<compile_context>
chip_gen: v7x
topology: tpu7x:2x2x1
jax: 0.10.0
libtpu: 0.0.40
codegen_flags: <defaults>
</compile_context>

<pallas_src>
import functools
import math

import jax
import jax.numpy as jnp
from jax import lax
from jax.experimental import pallas as pl
from jax.experimental.pallas import tpu as pltpu

BN_EPS = 1e-5


def _round_up(v, m):
    return (v + m - 1) // m * m


def _lcm(a, b):
    return a * b // math.gcd(a, b)


def _default_channel_tiles():
    """MXU-matched channel tiles: 256 on v6e/v7x, 128 on v5e/v5p (best effort)."""
    tco, tci = 256, 256
    try:
        kind = jax.devices()[0].device_kind.lower()
        if "v5" in kind:          # 128x128 MXU generation
            tco = 128
    except Exception:
        pass
    return tco, tci


# ---------------------------------------------------------------------------
# Pallas kernel: fused 3x3 conv (stride 1, pad 1, no bias) + folded BatchNorm
# (scale/bias) + ReLU (+ optional time-axis pooling), accumulated over
# input-channel tiles (last grid axis).
# ---------------------------------------------------------------------------
def _conv_bn_relu_kernel(x_ref, w_ref, scale_ref, bias_ref, o_ref, acc_ref, *,
                         th, W, Wp, n_ci, pool_h, pool_h_mode):
    """x_ref:   (1, L, tci)  bf16, flattened (row, padded-col) tile, L=(th+3)*Wp
       w_ref:   (9, tci, tco) bf16, taps in (dy, dx) row-major order
       scale_ref/bias_ref: (1, tco) f32, folded BatchNorm
       o_ref:   (1, th // pool_h, W, tco)
       acc_ref: (th*Wp, tco) f32 accumulator (dummy (8,128) when n_ci == 1)."""
    ci = pl.program_id(2)
    xt = x_ref[0]                                   # (L, tci) bf16
    L = xt.shape[0]
    n = th * Wp

    # Static 3x3 tap loops -> 9 big matmuls (M = L ~ thousands of rows).  The
    # tap shift in the flattened (row, col) space is s = dy*Wp + dx; it is
    # applied to the f32 result with a roll (XLU).  All 9 results are summed
    # locally so the VMEM accumulator sees one update per ci step.
    total = None
    for dy in range(3):
        for dx in range(3):
            y = jnp.dot(xt, w_ref[dy * 3 + dx],
                        preferred_element_type=jnp.float32)      # (L, tco) f32
            s = dy * Wp + dx
            if s:
                y = pltpu.roll(y, L - s, axis=0)                 # out[m] += y[m+s]
            y = y[:n]
            total = y if total is None else total + y

    def epilogue(acc):                               # acc: (n, tco) f32
        tco = acc.shape[-1]
        y = acc.reshape(th, Wp, tco)[:, :W, :]       # drop width padding
        y = jnp.maximum(y * scale_ref[...] + bias_ref[...], 0.0)  # BN + ReLU
        if pool_h > 1:                               # fused time-axis pooling
            y = y.reshape(th // pool_h, pool_h, W, tco)   # leading-dim split
            if pool_h_mode == "max":
                y = jnp.max(y, axis=1)
            else:                                    # "avg"
                y = jnp.sum(y, axis=1) * (1.0 / pool_h)
        o_ref[0] = y.astype(o_ref.dtype)             # one lane-dense store

    if n_ci == 1:
        epilogue(total)                              # no accumulator round-trip
    else:
        @pl.when(ci == 0)
        def _():
            acc_ref[...] = total

        @pl.when(ci > 0)
        def _():
            acc_ref[...] += total

        @pl.when(ci == n_ci - 1)
        def _():
            epilogue(acc_ref[...])


def conv3x3_bn_relu(x, w, bn_scale, bn_bias, *, out_dtype=jnp.float32,
                    pool_h=1, pool_h_mode=None,
                    tco=None, tci=None, th=None,
                    acc_budget_bytes=6 * 1024 * 1024):
    """Fused 3x3 conv (stride 1, pad 1, no bias) + folded BN + ReLU, with an
    optional fused avg/max pooling along H (the time axis, floor semantics).

    x: (B, H, W, Cin) ; w: (3, 3, Cin, Cout) -> (B, H//pool_h, W, Cout).
    Matmuls run in bf16 on the MXU with f32 accumulation.
    """
    assert pool_h == 1 or pool_h_mode in ("avg", "max")
    B, H, W, Cin = x.shape
    Cout = w.shape[-1]

    d_tco, d_tci = _default_channel_tiles()
    tco = d_tco if tco is None else tco
    tci = d_tci if tci is None else tci
    # Channel tiles must be the full channel dim or a 128-multiple dividing it.
    if Cout <= tco:
        tco = Cout
    else:
        assert Cout % tco == 0, f"Cout={Cout} must be a multiple of tco={tco}"
    if Cin <= tci:
        tci = Cin
    else:
        assert Cin % tci == 0, f"Cin={Cin} must be a multiple of tci={tci}"
    n_co, n_ci = Cout // tco, Cin // tci
    # TODO(synk): special-case very small Cin (e.g. the first PANN conv with
    # Cin=1) with an im2col-in-K formulation; the current path underfills the
    # MXU K dim there (negligible FLOPs, but avoidable instruction overhead).

    # Width (freq axis) is kept whole: conv halo (+1 each side) and rounded up
    # to a sublane multiple so the flattened row stride is tile-aligned.
    Wp = _round_up(W + 2, 8)

    # Time tile: multiple of lcm(8, pool_h), as large as possible while the
    # f32 accumulator stays a few MiB (headroom for v7x's smaller VMEM).
    m = _lcm(8, max(pool_h, 1))
    if th is None:
        th = acc_budget_bytes // (Wp * tco * 4)
        th = max(m, min(256, th // m * m))
    else:
        th = max(m, _round_up(th, m))
    th = min(th, _round_up(H, m))
    n_h = -(-H // th)
    Hc = n_h * th

    # Flattened, overlapped (1-row halo + alignment slack) time tiles.
    # TODO(synk): build the halo in-kernel (manual DMA on a pl.ANY input) to
    # avoid this wrapper-side repack of the activation.
    xb = x.astype(jnp.bfloat16)
    xb = jnp.pad(xb, ((0, 0), (1, Hc - H + 2), (1, Wp - W - 1), (0, 0)))
    tiles = [xb[:, i * th:i * th + th + 3] for i in range(n_h)]
    xt = jnp.stack(tiles, axis=1).reshape(B * n_h, (th + 3) * Wp, Cin)

    w9 = w.reshape(9, Cin, Cout).astype(jnp.bfloat16)
    scale2 = bn_scale.reshape(1, Cout).astype(jnp.float32)
    bias2 = bn_bias.reshape(1, Cout).astype(jnp.float32)

    L = (th + 3) * Wp
    G = B * n_h
    tho = th // pool_h
    kernel = functools.partial(_conv_bn_relu_kernel, th=th, W=W, Wp=Wp,
                               n_ci=n_ci, pool_h=pool_h,
                               pool_h_mode=pool_h_mode)
    acc_shape = (th * Wp, tco) if n_ci > 1 else (8, 128)   # dummy if unused

    out = pl.pallas_call(
        kernel,
        out_shape=jax.ShapeDtypeStruct((G, tho, W, Cout), out_dtype),
        grid_spec=pltpu.PrefetchScalarGridSpec(
            num_scalar_prefetch=0,
            grid=(G, n_co, n_ci),                       # reduction (ci) last
            in_specs=[
                pl.BlockSpec((1, L, tci), lambda g, co, ci: (g, 0, ci)),
                pl.BlockSpec((9, tci, tco), lambda g, co, ci: (0, ci, co)),
                pl.BlockSpec((1, tco), lambda g, co, ci: (0, co)),
                pl.BlockSpec((1, tco), lambda g, co, ci: (0, co)),
            ],
            out_specs=pl.BlockSpec((1, tho, W, tco),
                                   lambda g, co, ci: (g, 0, 0, co)),
            scratch_shapes=[pltpu.VMEM(acc_shape, jnp.float32)],
        ),
        compiler_params=pltpu.CompilerParams(
            dimension_semantics=("parallel", "parallel", "arbitrary"),
            vmem_limit_bytes=48 * 1024 * 1024),
    )(xt, w9, scale2, bias2)

    out = out.reshape(B, Hc // pool_h, W, Cout)
    Ho = H // pool_h
    return out[:, :Ho] if Hc // pool_h != Ho else out


# ---------------------------------------------------------------------------
# ConvBlock forward (glue: BN fold and the residual W-axis pooling are
# negligible-compute XLA ops).
# ---------------------------------------------------------------------------
def fold_bn(bn):
    scale = bn["gamma"] / jnp.sqrt(bn["var"] + BN_EPS)
    bias = bn["beta"] - bn["mean"] * scale
    return scale, bias


def _pool2d(x, pool_size, reduce_fn):
    ph, pw = pool_size
    if (ph, pw) == (1, 1):
        return x
    B, H, W, C = x.shape
    x = x[:, :H - H % ph, :W - W % pw]           # PyTorch floor behaviour
    x = x.reshape(B, H // ph, ph, W // pw, pw, C)
    return reduce_fn(x, axis=(2, 4))


def _pool_w(x, pw, pool_type):
    """Pool along W only (floor semantics)."""
    if pw == 1:
        return x
    B, H, W, C = x.shape
    Wk = (W // pw) * pw
    x = x[:, :, :Wk].reshape(B, H, Wk // pw, pw, C)
    return jnp.max(x, axis=3) if pool_type == "max" else jnp.mean(x, axis=3)


def conv_block_forward(params, x, pool_size=(2, 2), pool_type="avg"):
    """ConvBlock.forward (inference mode).  x: (B, Cin, H, W) NCHW like torch."""
    # TODO(synk): training-mode BatchNorm (batch statistics) not implemented;
    # BN uses running statistics folded into a per-channel scale/bias.
    if pool_type not in ("max", "avg", "avg+max"):
        raise Exception("Incorrect argument!")
    ph, pw = pool_size
    h = jnp.transpose(x, (0, 2, 3, 1))                           # NHWC
    s1, b1 = fold_bn(params["bn1"])
    s2, b2 = fold_bn(params["bn2"])
    h = conv3x3_bn_relu(h, params["w1"], s1, b1, out_dtype=jnp.bfloat16)
    if pool_type in ("avg", "max"):
        # Time(H)-axis half of the pooling is fused into the second conv's
        # epilogue; the width half is finished here (separable for avg/max).
        h = conv3x3_bn_relu(h, params["w2"], s2, b2, out_dtype=jnp.float32,
                            pool_h=ph, pool_h_mode=pool_type)
        h = _pool_w(h, pw, pool_type)
    else:                                                        # avg+max
        # TODO(synk): the avg+max variant would need two fused partial outputs
        # to keep the in-kernel pooling; pool fully outside the kernel instead.
        h = conv3x3_bn_relu(h, params["w2"], s2, b2, out_dtype=jnp.float32)
        h = _pool2d(h, pool_size, jnp.mean) + _pool2d(h, pool_size, jnp.max)
    return jnp.transpose(h, (0, 3, 1, 2))                        # back to NCHW


# ---------------------------------------------------------------------------
# Pure-XLA reference (mirrors the kernel's bf16 casts) and parameter init.
# ---------------------------------------------------------------------------
def conv_block_ref(params, x, pool_size=(2, 2), pool_type="avg"):
    def cbr(h, w, bn, out_dtype):
        hb = h.astype(jnp.bfloat16).astype(jnp.float32)
        wb = w.astype(jnp.bfloat16).astype(jnp.float32)
        y = lax.conv_general_dilated(
            hb, wb, window_strides=(1, 1), padding=((1, 1), (1, 1)),
            dimension_numbers=("NHWC", "HWIO", "NHWC"),
            precision=lax.Precision.HIGHEST)
        s, b = fold_bn(bn)
        return jnp.maximum(y * s + b, 0.0).astype(out_dtype)

    h = jnp.transpose(x, (0, 2, 3, 1))
    h = cbr(h, params["w1"], params["bn1"], jnp.bfloat16)
    h = cbr(h, params["w2"], params["bn2"], jnp.float32)
    if pool_type == "max":
        h = _pool2d(h, pool_size, jnp.max)
    elif pool_type == "avg":
        h = _pool2d(h, pool_size, jnp.mean)
    else:
        h = _pool2d(h, pool_size, jnp.mean) + _pool2d(h, pool_size, jnp.max)
    return jnp.transpose(h, (0, 3, 1, 2))


def xavier_uniform(key, shape, fan_in, fan_out):
    bound = math.sqrt(6.0 / (fan_in + fan_out))
    return jax.random.uniform(key, shape, jnp.float32, -bound, bound)


def make_conv_block_params(key, in_channels, out_channels):
    """Same init scheme as ConvBlock.__init__ (xavier convs, identity BN)."""
    k1, k2 = jax.random.split(key)

    def bn(c):
        return dict(gamma=jnp.ones((c,), jnp.float32),
                    beta=jnp.zeros((c,), jnp.float32),
                    mean=jnp.zeros((c,), jnp.float32),
                    var=jnp.ones((c,), jnp.float32))

    return dict(
        w1=xavier_uniform(k1, (3, 3, in_channels, out_channels),
                          in_channels * 9, out_channels * 9),
        w2=xavier_uniform(k2, (3, 3, out_channels, out_channels),
                          out_channels * 9, out_channels * 9),
        bn1=bn(out_channels), bn2=bn(out_channels))


if __name__ == "__main__":
    key = jax.random.PRNGKey(0)
    kp, kx = jax.random.split(key)

    B, Cin, Cout, H, W = 2, 4, 8, 16, 16
    params = make_conv_block_params(kp, Cin, Cout)
    x = jax.random.normal(kx, (B, Cin, H, W), jnp.float32)     # NCHW like torch

    fwd = jax.jit(conv_block_forward,
                  static_argnames=("pool_size", "pool_type"))

    for pool_type in ("avg", "max", "avg+max"):
        out = fwd(params, x, pool_size=(2, 2), pool_type=pool_type)
        jax.block_until_ready(out)
        assert out.shape == (B, Cout, H // 2, W // 2), (pool_type, out.shape)
        ref = conv_block_ref(params, x, (2, 2), pool_type)
        err = float(jnp.max(jnp.abs(out - ref)))
        assert err < 2e-2, f"{pool_type}: mismatch vs XLA reference: {err}"

    print("KERNEL_OK")
</pallas_src>

<mosaic_0001>
module attributes {stable_mosaic.version = 11 : i64} {
  func.func @_conv_bn_relu_kernel(%arg0: i32, %arg1: i32, %arg2: i32, %arg3: memref<1x456x4xbf16, #tpu.memory_space<vmem>>, %arg4: memref<9x4x8xbf16, #tpu.memory_space<vmem>>, %arg5: memref<1x8xf32, #tpu.memory_space<vmem>>, %arg6: memref<1x8xf32, #tpu.memory_space<vmem>>, %arg7: memref<1x16x16x8xbf16, #tpu.memory_space<vmem>>, %arg8: memref<8x128xf32, #tpu.memory_space<vmem>>) attributes {dimension_semantics = [#tpu.dimension_semantics<parallel>, #tpu.dimension_semantics<parallel>, #tpu.dimension_semantics<arbitrary>], iteration_bounds = array<i64: 2, 1, 1>, scalar_prefetch = 0 : i64, scratch_operands = 1 : i64, tpu.core_type = #tpu.core_type<tc>, window_params = [{transform_indices = @transform_0, window_bounds = array<i64: 1, 456, 4>}, {transform_indices = @transform_1, window_bounds = array<i64: 9, 4, 8>}, {transform_indices = @transform_2, window_bounds = array<i64: 1, 8>}, {transform_indices = @transform_3, window_bounds = array<i64: 1, 8>}, {transform_indices = @transform_4, window_bounds = array<i64: 1, 16, 16, 8>}]} {
    %c0 = arith.constant 0 : index
    %c0_0 = arith.constant 0 : index
    %c0_1 = arith.constant 0 : index
    %0 = vector.load %arg3[%c0, %c0_0, %c0_1] : memref<1x456x4xbf16, #tpu.memory_space<vmem>>, vector<1x456x4xbf16>
    %1 = vector.shape_cast %0 : vector<1x456x4xbf16> to vector<456x4xbf16>
    %c0_2 = arith.constant 0 : index
    %c0_3 = arith.constant 0 : index
    %c0_4 = arith.constant 0 : index
    %2 = vector.load %arg4[%c0_2, %c0_3, %c0_4] : memref<9x4x8xbf16, #tpu.memory_space<vmem>>, vector<1x4x8xbf16>
    %3 = vector.shape_cast %2 : vector<1x4x8xbf16> to vector<4x8xbf16>
    %cst = arith.constant dense<0.000000e+00> : vector<456x8xf32>
    %4 = tpu.matmul %1, %3, %cst {dimension_numbers = #tpu.dot_dimension_numbers<[1], [0], [0], [1], [0, 0, 1, 1], [], []>} : vector<456x4xbf16>, vector<4x8xbf16>, vector<456x8xf32> -> vector<456x8xf32>
    %5 = vector.extract_strided_slice %4 {offsets = [0, 0], sizes = [384, 8], strides = [1, 1]} : vector<456x8xf32> to vector<384x8xf32>
    %c1 = arith.constant 1 : index
    %c0_5 = arith.constant 0 : index
    %c0_6 = arith.constant 0 : index
    %6 = vector.load %arg4[%c1, %c0_5, %c0_6] : memref<9x4x8xbf16, #tpu.memory_space<vmem>>, vector<1x4x8xbf16>
    %7 = vector.shape_cast %6 : vector<1x4x8xbf16> to vector<4x8xbf16>
    %cst_7 = arith.constant dense<0.000000e+00> : vector<456x8xf32>
    %8 = tpu.matmul %1, %7, %cst_7 {dimension_numbers = #tpu.dot_dimension_numbers<[1], [0], [0], [1], [0, 0, 1, 1], [], []>} : vector<456x4xbf16>, vector<4x8xbf16>, vector<456x8xf32> -> vector<456x8xf32>
    %c455_i32 = arith.constant 455 : i32
    %9 = tpu.dynamic_rotate %8 by %c455_i32 dim 0 : vector<456x8xf32>, i32 -> vector<456x8xf32>
    %10 = vector.extract_strided_slice %9 {offsets = [0, 0], sizes = [384, 8], strides = [1, 1]} : vector<456x8xf32> to vector<384x8xf32>
    %11 = arith.addf %5, %10 : vector<384x8xf32>
    %c2 = arith.constant 2 : index
    %c0_8 = arith.constant 0 : index
    %c0_9 = arith.constant 0 : index
    %12 = vector.load %arg4[%c2, %c0_8, %c0_9] : memref<9x4x8xbf16, #tpu.memory_space<vmem>>, vector<1x4x8xbf16>
    %13 = vector.shape_cast %12 : vector<1x4x8xbf16> to vector<4x8xbf16>
    %cst_10 = arith.constant dense<0.000000e+00> : vector<456x8xf32>
    %14 = tpu.matmul %1, %13, %cst_10 {dimension_numbers = #tpu.dot_dimension_numbers<[1], [0], [0], [1], [0, 0, 1, 1], [], []>} : vector<456x4xbf16>, vector<4x8xbf16>, vector<456x8xf32> -> vector<456x8xf32>
    %c454_i32 = arith.constant 454 : i32
    %15 = tpu.dynamic_rotate %14 by %c454_i32 dim 0 : vector<456x8xf32>, i32 -> vector<456x8xf32>
    %16 = vector.extract_strided_slice %15 {offsets = [0, 0], sizes = [384, 8], strides = [1, 1]} : vector<456x8xf32> to vector<384x8xf32>
    %17 = arith.addf %11, %16 : vector<384x8xf32>
    %c3 = arith.constant 3 : index
    %c0_11 = arith.constant 0 : index
    %c0_12 = arith.constant 0 : index
    %18 = vector.load %arg4[%c3, %c0_11, %c0_12] : memref<9x4x8xbf16, #tpu.memory_space<vmem>>, vector<1x4x8xbf16>
    %19 = vector.shape_cast %18 : vector<1x4x8xbf16> to vector<4x8xbf16>
    %cst_13 = arith.constant dense<0.000000e+00> : vector<456x8xf32>
    %20 = tpu.matmul %1, %19, %cst_13 {dimension_numbers = #tpu.dot_dimension_numbers<[1], [0], [0], [1], [0, 0, 1, 1], [], []>} : vector<456x4xbf16>, vector<4x8xbf16>, vector<456x8xf32> -> vector<456x8xf32>
    %c432_i32 = arith.constant 432 : i32
    %21 = tpu.dynamic_rotate %20 by %c432_i32 dim 0 : vector<456x8xf32>, i32 -> vector<456x8xf32>
    %22 = vector.extract_strided_slice %21 {offsets = [0, 0], sizes = [384, 8], strides = [1, 1]} : vector<456x8xf32> to vector<384x8xf32>
    %23 = arith.addf %17, %22 : vector<384x8xf32>
    %c4 = arith.constant 4 : index
    %c0_14 = arith.constant 0 : index
    %c0_15 = arith.constant 0 : index
    %24 = vector.load %arg4[%c4, %c0_14, %c0_15] : memref<9x4x8xbf16, #tpu.memory_space<vmem>>, vector<1x4x8xbf16>
    %25 = vector.shape_cast %24 : vector<1x4x8xbf16> to vector<4x8xbf16>
    %cst_16 = arith.constant dense<0.000000e+00> : vector<456x8xf32>
    %26 = tpu.matmul %1, %25, %cst_16 {dimension_numbers = #tpu.dot_dimension_numbers<[1], [0], [0], [1], [0, 0, 1, 1], [], []>} : vector<456x4xbf16>, vector<4x8xbf16>, vector<456x8xf32> -> vector<456x8xf32>
    %c431_i32 = arith.constant 431 : i32
    %27 = tpu.dynamic_rotate %26 by %c431_i32 dim 0 : vector<456x8xf32>, i32 -> vector<456x8xf32>
    %28 = vector.extract_strided_slice %27 {offsets = [0, 0], sizes = [384, 8], strides = [1, 1]} : vector<456x8xf32> to vector<384x8xf32>
    %29 = arith.addf %23, %28 : vector<384x8xf32>
    %c5 = arith.constant 5 : index
    %c0_17 = arith.constant 0 : index
    %c0_18 = arith.constant 0 : index
    %30 = vector.load %arg4[%c5, %c0_17, %c0_18] : memref<9x4x8xbf16, #tpu.memory_space<vmem>>, vector<1x4x8xbf16>
    %31 = vector.shape_cast %30 : vector<1x4x8xbf16> to vector<4x8xbf16>
    %cst_19 = arith.constant dense<0.000000e+00> : vector<456x8xf32>
    %32 = tpu.matmul %1, %31, %cst_19 {dimension_numbers = #tpu.dot_dimension_numbers<[1], [0], [0], [1], [0, 0, 1, 1], [], []>} : vector<456x4xbf16>, vector<4x8xbf16>, vector<456x8xf32> -> vector<456x8xf32>
    %c430_i32 = arith.constant 430 : i32
    %33 = tpu.dynamic_rotate %32 by %c430_i32 dim 0 : vector<456x8xf32>, i32 -> vector<456x8xf32>
    %34 = vector.extract_strided_slice %33 {offsets = [0, 0], sizes = [384, 8], strides = [1, 1]} : vector<456x8xf32> to vector<384x8xf32>
    %35 = arith.addf %29, %34 : vector<384x8xf32>
    %c6 = arith.constant 6 : index
    %c0_20 = arith.constant 0 : index
    %c0_21 = arith.constant 0 : index
    %36 = vector.load %arg4[%c6, %c0_20, %c0_21] : memref<9x4x8xbf16, #tpu.memory_space<vmem>>, vector<1x4x8xbf16>
    %37 = vector.shape_cast %36 : vector<1x4x8xbf16> to vector<4x8xbf16>
    %cst_22 = arith.constant dense<0.000000e+00> : vector<456x8xf32>
    %38 = tpu.matmul %1, %37, %cst_22 {dimension_numbers = #tpu.dot_dimension_numbers<[1], [0], [0], [1], [0, 0, 1, 1], [], []>} : vector<456x4xbf16>, vector<4x8xbf16>, vector<456x8xf32> -> vector<456x8xf32>
    %c408_i32 = arith.constant 408 : i32
    %39 = tpu.dynamic_rotate %38 by %c408_i32 dim 0 : vector<456x8xf32>, i32 -> vector<456x8xf32>
    %40 = vector.extract_strided_slice %39 {offsets = [0, 0], sizes = [384, 8], strides = [1, 1]} : vector<456x8xf32> to vector<384x8xf32>
    %41 = arith.addf %35, %40 : vector<384x8xf32>
    %c7 = arith.constant 7 : index
    %c0_23 = arith.constant 0 : index
    %c0_24 = arith.constant 0 : index
    %42 = vector.load %arg4[%c7, %c0_23, %c0_24] : memref<9x4x8xbf16, #tpu.memory_space<vmem>>, vector<1x4x8xbf16>
    %43 = vector.shape_cast %42 : vector<1x4x8xbf16> to vector<4x8xbf16>
    %cst_25 = arith.constant dense<0.000000e+00> : vector<456x8xf32>
    %44 = tpu.matmul %1, %43, %cst_25 {dimension_numbers = #tpu.dot_dimension_numbers<[1], [0], [0], [1], [0, 0, 1, 1], [], []>} : vector<456x4xbf16>, vector<4x8xbf16>, vector<456x8xf32> -> vector<456x8xf32>
    %c407_i32 = arith.constant 407 : i32
    %45 = tpu.dynamic_rotate %44 by %c407_i32 dim 0 : vector<456x8xf32>, i32 -> vector<456x8xf32>
    %46 = vector.extract_strided_slice %45 {offsets = [0, 0], sizes = [384, 8], strides = [1, 1]} : vector<456x8xf32> to vector<384x8xf32>
    %47 = arith.addf %41, %46 : vector<384x8xf32>
    %c8 = arith.constant 8 : index
    %c0_26 = arith.constant 0 : index
    %c0_27 = arith.constant 0 : index
    %48 = vector.load %arg4[%c8, %c0_26, %c0_27] : memref<9x4x8xbf16, #tpu.memory_space<vmem>>, vector<1x4x8xbf16>
    %49 = vector.shape_cast %48 : vector<1x4x8xbf16> to vector<4x8xbf16>
    %cst_28 = arith.constant dense<0.000000e+00> : vector<456x8xf32>
    %50 = tpu.matmul %1, %49, %cst_28 {dimension_numbers = #tpu.dot_dimension_numbers<[1], [0], [0], [1], [0, 0, 1, 1], [], []>} : vector<456x4xbf16>, vector<4x8xbf16>, vector<456x8xf32> -> vector<456x8xf32>
    %c406_i32 = arith.constant 406 : i32
    %51 = tpu.dynamic_rotate %50 by %c406_i32 dim 0 : vector<456x8xf32>, i32 -> vector<456x8xf32>
    %52 = vector.extract_strided_slice %51 {offsets = [0, 0], sizes = [384, 8], strides = [1, 1]} : vector<456x8xf32> to vector<384x8xf32>
    %53 = arith.addf %47, %52 : vector<384x8xf32>
    %54 = vector.shape_cast %53 : vector<384x8xf32> to vector<16x24x8xf32>
    %55 = vector.extract_strided_slice %54 {offsets = [0, 0, 0], sizes = [16, 16, 8], strides = [1, 1, 1]} : vector<16x24x8xf32> to vector<16x16x8xf32>
    %c0_29 = arith.constant 0 : index
    %c0_30 = arith.constant 0 : index
    %56 = vector.load %arg5[%c0_29, %c0_30] : memref<1x8xf32, #tpu.memory_space<vmem>>, vector<1x8xf32>
    %57 = vector.shape_cast %56 : vector<1x8xf32> to vector<1x1x8xf32>
    %58 = vector.broadcast %57 : vector<1x1x8xf32> to vector<16x16x8xf32>
    %59 = arith.mulf %55, %58 : vector<16x16x8xf32>
    %c0_31 = arith.constant 0 : index
    %c0_32 = arith.constant 0 : index
    %60 = vector.load %arg6[%c0_31, %c0_32] : memref<1x8xf32, #tpu.memory_space<vmem>>, vector<1x8xf32>
    %61 = vector.shape_cast %60 : vector<1x8xf32> to vector<1x1x8xf32>
    %62 = vector.broadcast %61 : vector<1x1x8xf32> to vector<16x16x8xf32>
    %63 = arith.addf %59, %62 : vector<16x16x8xf32>
    %cst_33 = arith.constant 0.000000e+00 : f32
    %64 = vector.broadcast %cst_33 : f32 to vector<16x16x8xf32>
    %65 = arith.maximumf %63, %64 : vector<16x16x8xf32>
    %66 = arith.truncf %65 : vector<16x16x8xf32> to vector<16x16x8xbf16>
    %c0_34 = arith.constant 0 : index
    %c0_35 = arith.constant 0 : index
    %c0_36 = arith.constant 0 : index
    %c0_37 = arith.constant 0 : index
    %67 = vector.load %arg7[%c0_34, %c0_35, %c0_36, %c0_37] : memref<1x16x16x8xbf16, #tpu.memory_space<vmem>>, vector<1x16x16x8xbf16>
    %68 = vector.shape_cast %67 : vector<1x16x16x8xbf16> to vector<16x16x8xbf16>
    %69 = vector.shape_cast %66 : vector<16x16x8xbf16> to vector<1x16x16x8xbf16>
    tpu.vector_store %arg7[%c0_34, %c0_35, %c0_36, %c0_37], %69 {strides = array<i32>} : memref<1x16x16x8xbf16, #tpu.memory_space<vmem>>, vector<1x16x16x8xbf16>,
    return
  }
  func.func @transform_0(%arg0: i32, %arg1: i32, %arg2: i32) -> (i32, i32, i32) {
    %c0_i32 = arith.constant 0 : i32
    %c0_i32_0 = arith.constant 0 : i32
    return %arg0, %c0_i32, %arg2 : i32, i32, i32
  }
  func.func @transform_1(%arg0: i32, %arg1: i32, %arg2: i32) -> (i32, i32, i32) {
    %c0_i32 = arith.constant 0 : i32
    %c0_i32_0 = arith.constant 0 : i32
    return %c0_i32, %arg2, %arg1 : i32, i32, i32
  }
  func.func @transform_2(%arg0: i32, %arg1: i32, %arg2: i32) -> (i32, i32) {
    %c0_i32 = arith.constant 0 : i32
    %c0_i32_0 = arith.constant 0 : i32
    return %c0_i32, %arg1 : i32, i32
  }
  func.func @transform_3(%arg0: i32, %arg1: i32, %arg2: i32) -> (i32, i32) {
    %c0_i32 = arith.constant 0 : i32
    %c0_i32_0 = arith.constant 0 : i32
    return %c0_i32, %arg1 : i32, i32
  }
  func.func @transform_4(%arg0: i32, %arg1: i32, %arg2: i32) -> (i32, i32, i32, i32) {
    %c0_i32 = arith.constant 0 : i32
    %c0_i32_0 = arith.constant 0 : i32
    %c0_i32_1 = arith.constant 0 : i32
    return %arg0, %c0_i32, %c0_i32_0, %arg1 : i32, i32, i32, i32
  }
}

module attributes {stable_mosaic.version = 11 : i64} {
  func.func @_conv_bn_relu_kernel(%arg0: i32, %arg1: i32, %arg2: i32, %arg3: memref<1x456x8xbf16, #tpu.memory_space<vmem>>, %arg4: memref<9x8x8xbf16, #tpu.memory_space<vmem>>, %arg5: memref<1x8xf32, #tpu.memory_space<vmem>>, %arg6: memref<1x8xf32, #tpu.memory_space<vmem>>, %arg7: memref<1x8x16x8xf32, #tpu.memory_space<vmem>>, %arg8: memref<8x128xf32, #tpu.memory_space<vmem>>) attributes {dimension_semantics = [#tpu.dimension_semantics<parallel>, #tpu.dimension_semantics<parallel>, #tpu.dimension_semantics<arbitrary>], iteration_bounds = array<i64: 2, 1, 1>, scalar_prefetch = 0 : i64, scratch_operands = 1 : i64, tpu.core_type = #tpu.core_type<tc>, window_params = [{transform_indices = @transform_0, window_bounds = array<i64: 1, 456, 8>}, {transform_indices = @transform_1, window_bounds = array<i64: 9, 8, 8>}, {transform_indices = @transform_2, window_bounds = array<i64: 1, 8>}, {transform_indices = @transform_3, window_bounds = array<i64: 1, 8>}, {transform_indices = @transform_4, window_bounds = array<i64: 1, 8, 16, 8>}]} {
    %c0 = arith.constant 0 : index
    %c0_0 = arith.constant 0 : index
    %c0_1 = arith.constant 0 : index
    %0 = vector.load %arg3[%c0, %c0_0, %c0_1] : memref<1x456x8xbf16, #tpu.memory_space<vmem>>, vector<1x456x8xbf16>
    %1 = vector.shape_cast %0 : vector<1x456x8xbf16> to vector<456x8xbf16>
    %c0_2 = arith.constant 0 : index
    %c0_3 = arith.constant 0 : index
    %c0_4 = arith.constant 0 : index
    %2 = vector.load %arg4[%c0_2, %c0_3, %c0_4] : memref<9x8x8xbf16, #tpu.memory_space<vmem>>, vector<1x8x8xbf16>
    %3 = vector.shape_cast %2 : vector<1x8x8xbf16> to vector<8x8xbf16>
    %cst = arith.constant dense<0.000000e+00> : vector<456x8xf32>
    %4 = tpu.matmul %1, %3, %cst {dimension_numbers = #tpu.dot_dimension_numbers<[1], [0], [0], [1], [0, 0, 1, 1], [], []>} : vector<456x8xbf16>, vector<8x8xbf16>, vector<456x8xf32> -> vector<456x8xf32>
    %5 = vector.extract_strided_slice %4 {offsets = [0, 0], sizes = [384, 8], strides = [1, 1]} : vector<456x8xf32> to vector<384x8xf32>
    %c1 = arith.constant 1 : index
    %c0_5 = arith.constant 0 : index
    %c0_6 = arith.constant 0 : index
    %6 = vector.load %arg4[%c1, %c0_5, %c0_6] : memref<9x8x8xbf16, #tpu.memory_space<vmem>>, vector<1x8x8xbf16>
    %7 = vector.shape_cast %6 : vector<1x8x8xbf16> to vector<8x8xbf16>
    %cst_7 = arith.constant dense<0.000000e+00> : vector<456x8xf32>
    %8 = tpu.matmul %1, %7, %cst_7 {dimension_numbers = #tpu.dot_dimension_numbers<[1], [0], [0], [1], [0, 0, 1, 1], [], []>} : vector<456x8xbf16>, vector<8x8xbf16>, vector<456x8xf32> -> vector<456x8xf32>
    %c455_i32 = arith.constant 455 : i32
    %9 = tpu.dynamic_rotate %8 by %c455_i32 dim 0 : vector<456x8xf32>, i32 -> vector<456x8xf32>
    %10 = vector.extract_strided_slice %9 {offsets = [0, 0], sizes = [384, 8], strides = [1, 1]} : vector<456x8xf32> to vector<384x8xf32>
    %11 = arith.addf %5, %10 : vector<384x8xf32>
    %c2 = arith.constant 2 : index
    %c0_8 = arith.constant 0 : index
    %c0_9 = arith.constant 0 : index
    %12 = vector.load %arg4[%c2, %c0_8, %c0_9] : memref<9x8x8xbf16, #tpu.memory_space<vmem>>, vector<1x8x8xbf16>
    %13 = vector.shape_cast %12 : vector<1x8x8xbf16> to vector<8x8xbf16>
    %cst_10 = arith.constant dense<0.000000e+00> : vector<456x8xf32>
    %14 = tpu.matmul %1, %13, %cst_10 {dimension_numbers = #tpu.dot_dimension_numbers<[1], [0], [0], [1], [0, 0, 1, 1], [], []>} : vector<456x8xbf16>, vector<8x8xbf16>, vector<456x8xf32> -> vector<456x8xf32>
    %c454_i32 = arith.constant 454 : i32
    %15 = tpu.dynamic_rotate %14 by %c454_i32 dim 0 : vector<456x8xf32>, i32 -> vector<456x8xf32>
    %16 = vector.extract_strided_slice %15 {offsets = [0, 0], sizes = [384, 8], strides = [1, 1]} : vector<456x8xf32> to vector<384x8xf32>
    %17 = arith.addf %11, %16 : vector<384x8xf32>
    %c3 = arith.constant 3 : index
    %c0_11 = arith.constant 0 : index
    %c0_12 = arith.constant 0 : index
    %18 = vector.load %arg4[%c3, %c0_11, %c0_12] : memref<9x8x8xbf16, #tpu.memory_space<vmem>>, vector<1x8x8xbf16>
    %19 = vector.shape_cast %18 : vector<1x8x8xbf16> to vector<8x8xbf16>
    %cst_13 = arith.constant dense<0.000000e+00> : vector<456x8xf32>
    %20 = tpu.matmul %1, %19, %cst_13 {dimension_numbers = #tpu.dot_dimension_numbers<[1], [0], [0], [1], [0, 0, 1, 1], [], []>} : vector<456x8xbf16>, vector<8x8xbf16>, vector<456x8xf32> -> vector<456x8xf32>
    %c432_i32 = arith.constant 432 : i32
    %21 = tpu.dynamic_rotate %20 by %c432_i32 dim 0 : vector<456x8xf32>, i32 -> vector<456x8xf32>
    %22 = vector.extract_strided_slice %21 {offsets = [0, 0], sizes = [384, 8], strides = [1, 1]} : vector<456x8xf32> to vector<384x8xf32>
    %23 = arith.addf %17, %22 : vector<384x8xf32>
    %c4 = arith.constant 4 : index
    %c0_14 = arith.constant 0 : index
    %c0_15 = arith.constant 0 : index
    %24 = vector.load %arg4[%c4, %c0_14, %c0_15] : memref<9x8x8xbf16, #tpu.memory_space<vmem>>, vector<1x8x8xbf16>
    %25 = vector.shape_cast %24 : vector<1x8x8xbf16> to vector<8x8xbf16>
    %cst_16 = arith.constant dense<0.000000e+00> : vector<456x8xf32>
    %26 = tpu.matmul %1, %25, %cst_16 {dimension_numbers = #tpu.dot_dimension_numbers<[1], [0], [0], [1], [0, 0, 1, 1], [], []>} : vector<456x8xbf16>, vector<8x8xbf16>, vector<456x8xf32> -> vector<456x8xf32>
    %c431_i32 = arith.constant 431 : i32
    %27 = tpu.dynamic_rotate %26 by %c431_i32 dim 0 : vector<456x8xf32>, i32 -> vector<456x8xf32>
    %28 = vector.extract_strided_slice %27 {offsets = [0, 0], sizes = [384, 8], strides = [1, 1]} : vector<456x8xf32> to vector<384x8xf32>
    %29 = arith.addf %23, %28 : vector<384x8xf32>
    %c5 = arith.constant 5 : index
    %c0_17 = arith.constant 0 : index
    %c0_18 = arith.constant 0 : index
    %30 = vector.load %arg4[%c5, %c0_17, %c0_18] : memref<9x8x8xbf16, #tpu.memory_space<vmem>>, vector<1x8x8xbf16>
    %31 = vector.shape_cast %30 : vector<1x8x8xbf16> to vector<8x8xbf16>
    %cst_19 = arith.constant dense<0.000000e+00> : vector<456x8xf32>
    %32 = tpu.matmul %1, %31, %cst_19 {dimension_numbers = #tpu.dot_dimension_numbers<[1], [0], [0], [1], [0, 0, 1, 1], [], []>} : vector<456x8xbf16>, vector<8x8xbf16>, vector<456x8xf32> -> vector<456x8xf32>
    %c430_i32 = arith.constant 430 : i32
    %33 = tpu.dynamic_rotate %32 by %c430_i32 dim 0 : vector<456x8xf32>, i32 -> vector<456x8xf32>
    %34 = vector.extract_strided_slice %33 {offsets = [0, 0], sizes = [384, 8], strides = [1, 1]} : vector<456x8xf32> to vector<384x8xf32>
    %35 = arith.addf %29, %34 : vector<384x8xf32>
    %c6 = arith.constant 6 : index
    %c0_20 = arith.constant 0 : index
    %c0_21 = arith.constant 0 : index
    %36 = vector.load %arg4[%c6, %c0_20, %c0_21] : memref<9x8x8xbf16, #tpu.memory_space<vmem>>, vector<1x8x8xbf16>
    %37 = vector.shape_cast %36 : vector<1x8x8xbf16> to vector<8x8xbf16>
    %cst_22 = arith.constant dense<0.000000e+00> : vector<456x8xf32>
    %38 = tpu.matmul %1, %37, %cst_22 {dimension_numbers = #tpu.dot_dimension_numbers<[1], [0], [0], [1], [0, 0, 1, 1], [], []>} : vector<456x8xbf16>, vector<8x8xbf16>, vector<456x8xf32> -> vector<456x8xf32>
    %c408_i32 = arith.constant 408 : i32
    %39 = tpu.dynamic_rotate %38 by %c408_i32 dim 0 : vector<456x8xf32>, i32 -> vector<456x8xf32>
    %40 = vector.extract_strided_slice %39 {offsets = [0, 0], sizes = [384, 8], strides = [1, 1]} : vector<456x8xf32> to vector<384x8xf32>
    %41 = arith.addf %35, %40 : vector<384x8xf32>
    %c7 = arith.constant 7 : index
    %c0_23 = arith.constant 0 : index
    %c0_24 = arith.constant 0 : index
    %42 = vector.load %arg4[%c7, %c0_23, %c0_24] : memref<9x8x8xbf16, #tpu.memory_space<vmem>>, vector<1x8x8xbf16>
    %43 = vector.shape_cast %42 : vector<1x8x8xbf16> to vector<8x8xbf16>
    %cst_25 = arith.constant dense<0.000000e+00> : vector<456x8xf32>
    %44 = tpu.matmul %1, %43, %cst_25 {dimension_numbers = #tpu.dot_dimension_numbers<[1], [0], [0], [1], [0, 0, 1, 1], [], []>} : vector<456x8xbf16>, vector<8x8xbf16>, vector<456x8xf32> -> vector<456x8xf32>
    %c407_i32 = arith.constant 407 : i32
    %45 = tpu.dynamic_rotate %44 by %c407_i32 dim 0 : vector<456x8xf32>, i32 -> vector<456x8xf32>
    %46 = vector.extract_strided_slice %45 {offsets = [0, 0], sizes = [384, 8], strides = [1, 1]} : vector<456x8xf32> to vector<384x8xf32>
    %47 = arith.addf %41, %46 : vector<384x8xf32>
    %c8 = arith.constant 8 : index
    %c0_26 = arith.constant 0 : index
    %c0_27 = arith.constant 0 : index
    %48 = vector.load %arg4[%c8, %c0_26, %c0_27] : memref<9x8x8xbf16, #tpu.memory_space<vmem>>, vector<1x8x8xbf16>
    %49 = vector.shape_cast %48 : vector<1x8x8xbf16> to vector<8x8xbf16>
    %cst_28 = arith.constant dense<0.000000e+00> : vector<456x8xf32>
    %50 = tpu.matmul %1, %49, %cst_28 {dimension_numbers = #tpu.dot_dimension_numbers<[1], [0], [0], [1], [0, 0, 1, 1], [], []>} : vector<456x8xbf16>, vector<8x8xbf16>, vector<456x8xf32> -> vector<456x8xf32>
    %c406_i32 = arith.constant 406 : i32
    %51 = tpu.dynamic_rotate %50 by %c406_i32 dim 0 : vector<456x8xf32>, i32 -> vector<456x8xf32>
    %52 = vector.extract_strided_slice %51 {offsets = [0, 0], sizes = [384, 8], strides = [1, 1]} : vector<456x8xf32> to vector<384x8xf32>
    %53 = arith.addf %47, %52 : vector<384x8xf32>
    %54 = vector.shape_cast %53 : vector<384x8xf32> to vector<16x24x8xf32>
    %55 = vector.extract_strided_slice %54 {offsets = [0, 0, 0], sizes = [16, 16, 8], strides = [1, 1, 1]} : vector<16x24x8xf32> to vector<16x16x8xf32>
    %c0_29 = arith.constant 0 : index
    %c0_30 = arith.constant 0 : index
    %56 = vector.load %arg5[%c0_29, %c0_30] : memref<1x8xf32, #tpu.memory_space<vmem>>, vector<1x8xf32>
    %57 = vector.shape_cast %56 : vector<1x8xf32> to vector<1x1x8xf32>
    %58 = vector.broadcast %57 : vector<1x1x8xf32> to vector<16x16x8xf32>
    %59 = arith.mulf %55, %58 : vector<16x16x8xf32>
    %c0_31 = arith.constant 0 : index
    %c0_32 = arith.constant 0 : index
    %60 = vector.load %arg6[%c0_31, %c0_32] : memref<1x8xf32, #tpu.memory_space<vmem>>, vector<1x8xf32>
    %61 = vector.shape_cast %60 : vector<1x8xf32> to vector<1x1x8xf32>
    %62 = vector.broadcast %61 : vector<1x1x8xf32> to vector<16x16x8xf32>
    %63 = arith.addf %59, %62 : vector<16x16x8xf32>
    %cst_33 = arith.constant 0.000000e+00 : f32
    %64 = vector.broadcast %cst_33 : f32 to vector<16x16x8xf32>
    %65 = arith.maximumf %63, %64 : vector<16x16x8xf32>
    %66 = vector.shape_cast %65 : vector<16x16x8xf32> to vector<8x2x16x8xf32>
    %cst_34 = arith.constant dense<0.000000e+00> : vector<8x16x8xf32>
    %67 = vector.multi_reduction <add>, %66, %cst_34 [1] : vector<8x2x16x8xf32> to vector<8x16x8xf32>
    %cst_35 = arith.constant 5.000000e-01 : f32
    %68 = vector.broadcast %cst_35 : f32 to vector<8x16x8xf32>
    %69 = arith.mulf %67, %68 : vector<8x16x8xf32>
    %c0_36 = arith.constant 0 : index
    %c0_37 = arith.constant 0 : index
    %c0_38 = arith.constant 0 : index
    %c0_39 = arith.constant 0 : index
    %70 = vector.load %arg7[%c0_36, %c0_37, %c0_38, %c0_39] : memref<1x8x16x8xf32, #tpu.memory_space<vmem>>, vector<1x8x16x8xf32>
    %71 = vector.shape_cast %70 : vector<1x8x16x8xf32> to vector<8x16x8xf32>
    %72 = vector.shape_cast %69 : vector<8x16x8xf32> to vector<1x8x16x8xf32>
    tpu.vector_store %arg7[%c0_36, %c0_37, %c0_38, %c0_39], %72 {strides = array<i32>} : memref<1x8x16x8xf32, #tpu.memory_space<vmem>>, vector<1x8x16x8xf32>,
    return
  }
  func.func @transform_0(%arg0: i32, %arg1: i32, %arg2: i32) -> (i32, i32, i32) {
    %c0_i32 = arith.constant 0 : i32
    %c0_i32_0 = arith.constant 0 : i32
    return %arg0, %c0_i32, %arg2 : i32, i32, i32
  }
  func.func @transform_1(%arg0: i32, %arg1: i32, %arg2: i32) -> (i32, i32, i32) {
    %c0_i32 = arith.constant 0 : i32
    %c0_i32_0 = arith.constant 0 : i32
    return %c0_i32, %arg2, %arg1 : i32, i32, i32
  }
  func.func @transform_2(%arg0: i32, %arg1: i32, %arg2: i32) -> (i32, i32) {
    %c0_i32 = arith.constant 0 : i32
    %c0_i32_0 = arith.constant 0 : i32
    return %c0_i32, %arg1 : i32, i32
  }
  func.func @transform_3(%arg0: i32, %arg1: i32, %arg2: i32) -> (i32, i32) {
    %c0_i32 = arith.constant 0 : i32
    %c0_i32_0 = arith.constant 0 : i32
    return %c0_i32, %arg1 : i32, i32
  }
  func.func @transform_4(%arg0: i32, %arg1: i32, %arg2: i32) -> (i32, i32, i32, i32) {
    %c0_i32 = arith.constant 0 : i32
    %c0_i32_0 = arith.constant 0 : i32
    %c0_i32_1 = arith.constant 0 : i32
    return %arg0, %c0_i32, %c0_i32_0, %arg1 : i32, i32, i32, i32
  }
}

</mosaic_0001>

<bundles_post_ra>
// kernel: conv_block_forward.2
= control target key start
LH: loop header
LB: loop body
LE: loop exit
PB: predicated region body
PF: predicated region fallthrough
CT: control target
= control target key end

     0   :  { %s5885_s15 = smov 0   ;;  %s5887_s16 = smov 0   ;;  %s8103_s0 = inlined_call_operand.vmem [shape: bf16[2,456,4], index: 0, kind: input, shape index: {}]   ;;  %s8104_s1 = inlined_call_operand.vmem [shape: bf16[9,4,8], index: 1, kind: input, shape index: {}]   ;;  %s8105_s2 = inlined_call_operand.vmem [shape: f32[1,8], index: 2, kind: input, shape index: {}]   ;;  %s8106_s3 = inlined_call_operand.vmem [shape: f32[1,8], index: 3, kind: input, shape index: {}]   ;;  %s8107_s4 = inlined_call_operand.vmem [shape: bf16[2,16,16,8], index: 4, kind: output, shape index: {}]  }
   0x1   :  { %s5889_s17 = smov 0  }
   0x2 LB: > { %s33_s18 = sadd.s32 1, %s5852_s16  ;;  %p4020_p0 = scmp.ge.s32.totalorder %s5856_s17, 1  ;;  %s5856_s17 = sphi %s5889_s17, %s14_s17   ;;  %s5852_s16 = sphi %s5887_s16, %s8163_s16   ;;  %s5848_s15 = sphi %s5885_s15, %s8162_s15  }
   0x3   : > { %p35_p1 = scmp.ge.s32.totalorder %s33_s18, 2  ;;  %p218_p2 = scmp.lt.s32.totalorder %s5856_s17, 3 }
   0x5   : > { %s8165_s18 = smov (%p35_p1, %s33_s18), 0  ;;  %p219_p3 = pnand %p4020_p0, %p218_p2 }
   0x7   : > { %222 = sbr.rel (%p219_p3) target bundleno = 1276 (0x4fc), region = 36 }
   0xe   : > { %v350_v0 = vld [vmem:[%s8104_s1] sm:$0x3]  ;;  %vm582_vm0 = vcmask 1041408   ;;  %p263_p4 = scmp.lt.s32.totalorder %s5848_s15, 1  ;;  %v8108_v1 = vmov 0.0   ;;  %vm5859_vm1 = vmmov 0  }
   0xf   : > { %4661 = vmatprep.subr.bf16.mxu0 %v8108_v1  ;;  %5723 = vmatprep.subr.bf16.mxu1 %v8108_v1  ;;  %v584_v2 = vsel %vm582_vm0, %v350_v0, 0  ;;  %v4112_v3 = vld [vmem:[%s8104_s1 + $0x4] sm:$0x3]  ;;  %vm494_vm2 = vcmask 31744   ;;  %v4082_v4 = vld [vmem:[%s8104_s1 + $0x2] sm:$0x3] }
  0x10   : > { %4662 = vmatpush3.bf16.msra.mxu0 %v584_v2  ;;  %5724 = vmatpush3.bf16.msra.mxu1 %v584_v2  ;;  %s8167_s15 = smov (!%p263_p4, %s5848_s15), 1  ;;  %v1203_v6 = vsel %vm582_vm0, %v4112_v3, 0  ;;  %v828_v8 = vsel %vm582_vm0, %v4082_v4, 0  ;;  %v4142_v36 = vld [vmem:[%s8104_s1 + $0x6] sm:$0x3]  ;;  %vm3851_vm5 = vcmask 60416  }
  0x11   : > { %4663 = vmatprep.mubr.msk.bf16.mxu0 %vm5859_vm1, %v8108_v1  ;;  %4723 = vmatprep.mubr.msk.bf16.mxu1 %vm5859_vm1, %v8108_v1  ;;  %s5725_s21 = smul.u32 228, %s8167_s15  ;;  %v1576_v37 = vsel %vm582_vm0, %v4142_v36, 0  ;;  %v4172_v38 = vld [vmem:[%s8104_s1 + $0x8] sm:$0x3]  ;;  %s4358_s23 = sshll.u32 %s8167_s15, 7 }
  0x12   : > { %4897 = vmatprep.subr.bf16.mxu0 %v8108_v1  ;;  %4779 = vmatprep.subr.bf16.mxu1 %v8108_v1  ;;  %v1852_v39 = vsel %vm582_vm0, %v4172_v38, 0  ;;  %s7819_s15 = scalar_lea.vmem %s8107_s4, %s4358_s23 }
  0x13   : > { %s5924_s26 = scalar_lea.vmem %s8103_s0, %s5725_s21 }
  0x14   : > { %v5930_v5 = vld [vmem:[%s5924_s26] sm:$0xff]   ;;  %v5934_v7 = vld [vmem:[%s5924_s26 + $0x78] sm:$0xff]   ;;  %v5947_v9 = vld [vmem:[%s5924_s26 + $0x8] sm:$0xff]  }
  0x15   : > { %4664 = vmatmul.mubr.msk.bf16.vlgmr.msra.gmra.mrb[0].mxu0 %vm494_vm2, %v5930_v5  ;;  %4724 = vmatmul.mubr.msk.bf16.vlgmr.msra.gmra.mrb[0].mxu1 %vm494_vm2, %v5934_v7  ;;  %v5951_v10 = vld [vmem:[%s5924_s26 + $0x80] sm:$0xff]   ;;  %v5962_v11 = vld [vmem:[%s5924_s26 + $0x10] sm:$0xff]   ;;  %v5965_v12 = vld [vmem:[%s5924_s26 + $0x88] sm:$0xff]  }
  0x16   : > { %4898 = vmatpush3.bf16.msra.mxu0 %v1203_v6  ;;  %4667 = vmatprep.mubr.msk.bf16.mxu0 %vm5859_vm1, %v8108_v1  ;;  %v5976_v13 = vld [vmem:[%s5924_s26 + $0x18] sm:$0xff]   ;;  %v5979_v14 = vld [vmem:[%s5924_s26 + $0x90] sm:$0xff]   ;;  %v5990_v15 = vld [vmem:[%s5924_s26 + $0x20] sm:$0xff]  }
  0x17   : > { %4727 = vmatprep.mubr.msk.bf16.mxu1 %vm5859_vm1, %v8108_v1  ;;  %4780 = vmatpush3.bf16.msra.mxu1 %v828_v8  ;;  %v5993_v16 = vld [vmem:[%s5924_s26 + $0x98] sm:$0xff]   ;;  %v6004_v17 = vld [vmem:[%s5924_s26 + $0x28] sm:$0xff]   ;;  %v6007_v18 = vld [vmem:[%s5924_s26 + $0xa0] sm:$0xff]  }
  0x18   : > { %5133 = vmatprep.subr.bf16.mxu0 %v8108_v1  ;;  %5015 = vmatprep.subr.bf16.mxu1 %v8108_v1  ;;  %v6018_v19 = vld [vmem:[%s5924_s26 + $0x30] sm:$0xff]   ;;  %v6021_v20 = vld [vmem:[%s5924_s26 + $0xa8] sm:$0xff]   ;;  %v6032_v21 = vld [vmem:[%s5924_s26 + $0x38] sm:$0xff]  }
  0x19   : > { %v6035_v22 = vld [vmem:[%s5924_s26 + $0xb0] sm:$0xff]   ;;  %v6046_v23 = vld [vmem:[%s5924_s26 + $0x40] sm:$0xff]   ;;  %v6049_v24 = vld [vmem:[%s5924_s26 + $0xb8] sm:$0xff]  }
  0x1a   : > { %v6060_v25 = vld [vmem:[%s5924_s26 + $0x48] sm:$0xff]   ;;  %v6063_v26 = vld [vmem:[%s5924_s26 + $0xc0] sm:$0xff]   ;;  %v6074_v27 = vld [vmem:[%s5924_s26 + $0x50] sm:$0xff]  }
  0x1b   : > { %v6077_v28 = vld [vmem:[%s5924_s26 + $0xc8] sm:$0xff]   ;;  %v6088_v29 = vld [vmem:[%s5924_s26 + $0x58] sm:$0xff]   ;;  %v6091_v30 = vld [vmem:[%s5924_s26 + $0xd0] sm:$0xff]  }
  0x1c   : > { %v6102_v31 = vld [vmem:[%s5924_s26 + $0x60] sm:$0xff]   ;;  %v6105_v32 = vld [vmem:[%s5924_s26 + $0xd8] sm:$0xff]   ;;  %v6116_v33 = vld [vmem:[%s5924_s26 + $0x68] sm:$0xff]  }
  0x1d   : > { %4668 = vmatmul.mubr.msk.bf16.gmra.mrb[4].mxu0 %vm494_vm2, %v5947_v9  ;;  %4728 = vmatmul.mubr.msk.bf16.gmra.mrb[4].mxu1 %vm494_vm2, %v5951_v10  ;;  %v6119_v34 = vld [vmem:[%s5924_s26 + $0xe0] ss:$0 sps:$4 sm:$0xff]   ;;  %v6130_v35 = vld [vmem:[%s5924_s26 + $0x70] sm:$0xff]  }
  0x1e   : > { %4671 = vmatprep.mubr.msk.bf16.mxu0 %vm5859_vm1, %v8108_v1  ;;  %4731 = vmatprep.mubr.msk.bf16.mxu1 %vm5859_vm1, %v8108_v1 }
  0x25   : > { %4672 = vmatmul.mubr.msk.bf16.gmra.mrb[8].mxu0 %vm494_vm2, %v5962_v11  ;;  %4732 = vmatmul.mubr.msk.bf16.gmra.mrb[8].mxu1 %vm494_vm2, %v5965_v12 }
  0x26   : > { %4675 = vmatprep.mubr.msk.bf16.mxu0 %vm5859_vm1, %v8108_v1  ;;  %4735 = vmatprep.mubr.msk.bf16.mxu1 %vm5859_vm1, %v8108_v1 }
  0x2d   : > { %4676 = vmatmul.mubr.msk.bf16.gmra.mrb[12].mxu0 %vm494_vm2, %v5976_v13  ;;  %4736 = vmatmul.mubr.msk.bf16.gmra.mrb[12].mxu1 %vm494_vm2, %v5979_v14 }
  0x2e   : > { %4679 = vmatprep.mubr.msk.bf16.mxu0 %vm5859_vm1, %v8108_v1  ;;  %4739 = vmatprep.mubr.msk.bf16.mxu1 %vm5859_vm1, %v8108_v1 }
  0x35   : > { %4680 = vmatmul.mubr.msk.bf16.gmra.mrb[16].mxu0 %vm494_vm2, %v5990_v15  ;;  %4740 = vmatmul.mubr.msk.bf16.gmra.mrb[16].mxu1 %vm494_vm2, %v5993_v16 }
  0x36   : > { %4683 = vmatprep.mubr.msk.bf16.mxu0 %vm5859_vm1, %v8108_v1  ;;  %4743 = vmatprep.mubr.msk.bf16.mxu1 %vm5859_vm1, %v8108_v1 }
  0x3d   : > { %4684 = vmatmul.mubr.msk.bf16.gmra.mrb[20].mxu0 %vm494_vm2, %v6004_v17  ;;  %4744 = vmatmul.mubr.msk.bf16.gmra.mrb[20].mxu1 %vm494_vm2, %v6007_v18 }
  0x3e   : > { %4687 = vmatprep.mubr.msk.bf16.mxu0 %vm5859_vm1, %v8108_v1  ;;  %4747 = vmatprep.mubr.msk.bf16.mxu1 %vm5859_vm1, %v8108_v1 }
  0x45   : > { %4688 = vmatmul.mubr.msk.bf16.gmra.mrb[24].mxu0 %vm494_vm2, %v6018_v19  ;;  %4748 = vmatmul.mubr.msk.bf16.gmra.mrb[24].mxu1 %vm494_vm2, %v6021_v20 }
  0x46   : > { %4691 = vmatprep.mubr.msk.bf16.mxu0 %vm5859_vm1, %v8108_v1  ;;  %4751 = vmatprep.mubr.msk.bf16.mxu1 %vm5859_vm1, %v8108_v1 }
  0x4d   : > { %4692 = vmatmul.mubr.msk.bf16.gmra.mrb[28].mxu0 %vm494_vm2, %v6032_v21  ;;  %4752 = vmatmul.mubr.msk.bf16.gmra.mrb[28].mxu1 %vm494_vm2, %v6035_v22 }
  0x4e   : > { %4695 = vmatprep.mubr.msk.bf16.mxu0 %vm5859_vm1, %v8108_v1  ;;  %4755 = vmatprep.mubr.msk.bf16.mxu1 %vm5859_vm1, %v8108_v1 }
  0x55   : > { %4696 = vmatmul.mubr.msk.bf16.gmra.mrb[32].mxu0 %vm494_vm2, %v6046_v23  ;;  %4756 = vmatmul.mubr.msk.bf16.gmra.mrb[32].mxu1 %vm494_vm2, %v6049_v24 }
  0x56   : > { %4699 = vmatprep.mubr.msk.bf16.mxu0 %vm5859_vm1, %v8108_v1  ;;  %4759 = vmatprep.mubr.msk.bf16.mxu1 %vm5859_vm1, %v8108_v1 }
  0x5d   : > { %4700 = vmatmul.mubr.msk.bf16.gmra.mrb[36].mxu0 %vm494_vm2, %v6060_v25  ;;  %4760 = vmatmul.mubr.msk.bf16.gmra.mrb[36].mxu1 %vm494_vm2, %v6063_v26 }
  0x5e   : > { %4703 = vmatprep.mubr.msk.bf16.mxu0 %vm5859_vm1, %v8108_v1  ;;  %4763 = vmatprep.mubr.msk.bf16.mxu1 %vm5859_vm1, %v8108_v1 }
  0x65   : > { %4704 = vmatmul.mubr.msk.bf16.gmra.mrb[40].mxu0 %vm494_vm2, %v6074_v27  ;;  %4764 = vmatmul.mubr.msk.bf16.gmra.mrb[40].mxu1 %vm494_vm2, %v6077_v28 }
  0x66   : > { %4707 = vmatprep.mubr.msk.bf16.mxu0 %vm5859_vm1, %v8108_v1  ;;  %4767 = vmatprep.mubr.msk.bf16.mxu1 %vm5859_vm1, %v8108_v1 }
  0x6d   : > { %4708 = vmatmul.mubr.msk.bf16.gmra.mrb[44].mxu0 %vm494_vm2, %v6088_v29  ;;  %4768 = vmatmul.mubr.msk.bf16.gmra.mrb[44].mxu1 %vm494_vm2, %v6091_v30 }
  0x6e   : > { %4711 = vmatprep.mubr.msk.bf16.mxu0 %vm5859_vm1, %v8108_v1  ;;  %4771 = vmatprep.mubr.msk.bf16.mxu1 %vm5859_vm1, %v8108_v1 }
  0x75   : > { %4712 = vmatmul.mubr.msk.bf16.gmra.mrb[48].mxu0 %vm494_vm2, %v6102_v31  ;;  %4772 = vmatmul.mubr.msk.bf16.gmra.mrb[48].mxu1 %vm494_vm2, %v6105_v32 }
  0x76   : > { %4715 = vmatprep.mubr.msk.bf16.mxu0 %vm5859_vm1, %v8108_v1  ;;  %4775 = vmatprep.mubr.msk.bf16.mxu1 %vm5859_vm1, %v8108_v1 }
  0x7d   : > { %4716 = vmatmul.mubr.msk.bf16.gmra.mrb[52].mxu0 %vm494_vm2, %v6116_v33  ;;  %4776 = vmatmul.mubr.msk.bf16.gmra.mrb[52].mxu1 %vm494_vm2, %v6119_v34 }
  0x7e   : > { %4719 = vmatprep.mubr.msk.bf16.mxu0 %vm5859_vm1, %v8108_v1  ;;  %4781 = vmatprep.mubr.msk.bf16.mxu1 %vm5859_vm1, %v8108_v1 }
  0x85   : > { %4720 = vmatmul.mubr.msk.bf16.gmra.mrb[56].mxu0 %vm494_vm2, %v6130_v35  ;;  %4782 = vmatmul.mubr.msk.bf16.vlgmr.msra.gmra.mrb[56].mxu1 %vm494_vm2, %v5930_v5 }
  0x86   : > { %4899 = vmatprep.mubr.msk.bf16.mxu0 %vm5859_vm1, %v8108_v1  ;;  %4785 = vmatprep.mubr.msk.bf16.mxu1 %vm5859_vm1, %v8108_v1 }
  0x87   : > { %5016 = vmatpush3.bf16.msra.mxu1 %v1576_v37 }
  0x88   : > { %5251 = vmatprep.subr.bf16.mxu1 %v8108_v1 }
  0x8d   : > { %4900 = vmatmul.mubr.msk.bf16.vlgmr.msra.gmra.mrb[60].mxu0 %vm494_vm2, %v5930_v5  ;;  %4786 = vmatmul.mubr.msk.bf16.gmra.mrb[60].mxu1 %vm494_vm2, %v5947_v9 }
  0x8e   : > { %5134 = vmatpush3.bf16.msra.mxu0 %v1852_v39  ;;  %4789 = vmatprep.mubr.msk.bf16.mxu1 %vm5859_vm1, %v8108_v1 }
  0x8f   : > { %4903 = vmatprep.mubr.msk.bf16.mxu0 %vm5859_vm1, %v8108_v1  ;;  %5369 = vmatprep.subr.bf16.mxu0 %v8108_v1 }
  0x95   : > { %4904 = vmatmul.mubr.msk.bf16.gmra.mrb[64].mxu0 %vm494_vm2, %v5947_v9  ;;  %4790 = vmatmul.mubr.msk.bf16.gmra.mrb[64].mxu1 %vm494_vm2, %v5962_v11 }
  0x96   : > { %4907 = vmatprep.mubr.msk.bf16.mxu0 %vm5859_vm1, %v8108_v1  ;;  %4793 = vmatprep.mubr.msk.bf16.mxu1 %vm5859_vm1, %v8108_v1 }
  0x9d   : > { %4908 = vmatmul.mubr.msk.bf16.gmra.mrb[68].mxu0 %vm494_vm2, %v5962_v11  ;;  %4794 = vmatmul.mubr.msk.bf16.gmra.mrb[68].mxu1 %vm494_vm2, %v5976_v13 }
  0x9e   : > { %4911 = vmatprep.mubr.msk.bf16.mxu0 %vm5859_vm1, %v8108_v1  ;;  %4797 = vmatprep.mubr.msk.bf16.mxu1 %vm5859_vm1, %v8108_v1 }
  0xa5   : > { %4912 = vmatmul.mubr.msk.bf16.gmra.mrb[72].mxu0 %vm494_vm2, %v5976_v13  ;;  %4798 = vmatmul.mubr.msk.bf16.gmra.mrb[72].mxu1 %vm494_vm2, %v5990_v15 }
  0xa6   : > { %4915 = vmatprep.mubr.msk.bf16.mxu0 %vm5859_vm1, %v8108_v1  ;;  %4801 = vmatprep.mubr.msk.bf16.mxu1 %vm5859_vm1, %v8108_v1 }
  0xad   : > { %4916 = vmatmul.mubr.msk.bf16.gmra.mrb[76].mxu0 %vm494_vm2, %v5990_v15  ;;  %4802 = vmatmul.mubr.msk.bf16.gmra.mrb[76].mxu1 %vm494_vm2, %v6004_v17 }
  0xae   : > { %4919 = vmatprep.mubr.msk.bf16.mxu0 %vm5859_vm1, %v8108_v1  ;;  %4805 = vmatprep.mubr.msk.bf16.mxu1 %vm5859_vm1, %v8108_v1 }
  0xb5   : > { %4920 = vmatmul.mubr.msk.bf16.gmra.mrb[80].mxu0 %vm494_vm2, %v6004_v17  ;;  %4806 = vmatmul.mubr.msk.bf16.gmra.mrb[80].mxu1 %vm494_vm2, %v6018_v19 }
  0xb6   : > { %4923 = vmatprep.mubr.msk.bf16.mxu0 %vm5859_vm1, %v8108_v1  ;;  %4809 = vmatprep.mubr.msk.bf16.mxu1 %vm5859_vm1, %v8108_v1 }
  0xbd   : > { %4924 = vmatmul.mubr.msk.bf16.gmra.mrb[84].mxu0 %vm494_vm2, %v6018_v19  ;;  %4810 = vmatmul.mubr.msk.bf16.gmra.mrb[84].mxu1 %vm494_vm2, %v6032_v21 }
  0xbe   : > { %4927 = vmatprep.mubr.msk.bf16.mxu0 %vm5859_vm1, %v8108_v1  ;;  %4813 = vmatprep.mubr.msk.bf16.mxu1 %vm5859_vm1, %v8108_v1 }
  0xc5   : > { %4928 = vmatmul.mubr.msk.bf16.gmra.mrb[88].mxu0 %vm494_vm2, %v6032_v21  ;;  %4814 = vmatmul.mubr.msk.bf16.gmra.mrb[88].mxu1 %vm494_vm2, %v6046_v23 }
  0xc6   : > { %4931 = vmatprep.mubr.msk.bf16.mxu0 %vm5859_vm1, %v8108_v1  ;;  %4817 = vmatprep.mubr.msk.bf16.mxu1 %vm5859_vm1, %v8108_v1 }
  0xcd   : > { %4932 = vmatmul.mubr.msk.bf16.gmra.mrb[92].mxu0 %vm494_vm2, %v6046_v23  ;;  %4818 = vmatmul.mubr.msk.bf16.gmra.mrb[92].mxu1 %vm494_vm2, %v6060_v25 }
  0xce   : > { %4935 = vmatprep.mubr.msk.bf16.mxu0 %vm5859_vm1, %v8108_v1  ;;  %4821 = vmatprep.mubr.msk.bf16.mxu1 %vm5859_vm1, %v8108_v1 }
  0xd5   : > { %4936 = vmatmul.mubr.msk.bf16.gmra.mrb[96].mxu0 %vm494_vm2, %v6060_v25  ;;  %4822 = vmatmul.mubr.msk.bf16.gmra.mrb[96].mxu1 %vm494_vm2, %v6074_v27 }
  0xd6   : > { %4939 = vmatprep.mubr.msk.bf16.mxu0 %vm5859_vm1, %v8108_v1  ;;  %4825 = vmatprep.mubr.msk.bf16.mxu1 %vm5859_vm1, %v8108_v1 }
  0xdd   : > { %4940 = vmatmul.mubr.msk.bf16.gmra.mrb[100].mxu0 %vm494_vm2, %v6074_v27  ;;  %4826 = vmatmul.mubr.msk.bf16.gmra.mrb[100].mxu1 %vm494_vm2, %v6088_v29 }
  0xde   : > { %4943 = vmatprep.mubr.msk.bf16.mxu0 %vm5859_vm1, %v8108_v1  ;;  %4829 = vmatprep.mubr.msk.bf16.mxu1 %vm5859_vm1, %v8108_v1 }
  0xe5   : > { %4944 = vmatmul.mubr.msk.bf16.gmra.mrb[104].mxu0 %vm494_vm2, %v6088_v29  ;;  %4830 = vmatmul.mubr.msk.bf16.gmra.mrb[104].mxu1 %vm494_vm2, %v6102_v31 }
  0xe6   : > { %4947 = vmatprep.mubr.msk.bf16.mxu0 %vm5859_vm1, %v8108_v1  ;;  %4833 = vmatprep.mubr.msk.bf16.mxu1 %vm5859_vm1, %v8108_v1 }
  0xe8   : > { %v6246_v40 = vpop.f32.mrb[0].mxu0  ;;  %v6248_v42 = vpop.f32.mrb[0].mxu1 }
  0xe9   : > { %v4665_v41 = vpop.f32.mrb[1].mxu0  ;;  %v4725_v44 = vpop.f32.mrb[1].mxu1 }
  0xea   : > { %v6250_v43 = vpop.f32.mrb[2].mxu0  ;;  %v6252_v46 = vpop.f32.mrb[2].mxu1 }
  0xeb   : > { %v4666_v45 = vpop.f32.mrb[3].mxu0  ;;  %v4726_v47 = vpop.f32.mrb[3].mxu1 }
  0xed   : > { %4948 = vmatmul.mubr.msk.bf16.gmra.mrb[108].mxu0 %vm494_vm2, %v6102_v31  ;;  %4834 = vmatmul.mubr.msk.bf16.gmra.mrb[108].mxu1 %vm494_vm2, %v6116_v33 }
  0xee   : > { %4951 = vmatprep.mubr.msk.bf16.mxu0 %vm5859_vm1, %v8108_v1  ;;  %4837 = vmatprep.mubr.msk.bf16.mxu1 %vm5859_vm1, %v8108_v1 }
  0xf0   : > { %v628_v48 = vpop.f32.mrb[4].mxu0  ;;  %v738_v50 = vpop.f32.mrb[4].mxu1 }
  0xf1   : > { %v4669_v49 = vpop.f32.mrb[5].mxu0  ;;  %v4729_v52 = vpop.f32.mrb[5].mxu1 }
  0xf2   : > { %v6262_v51 = vpop.f32.mrb[6].mxu0  ;;  %v6264_v54 = vpop.f32.mrb[6].mxu1 }
  0xf3   : > { %v4670_v53 = vpop.f32.mrb[7].mxu0  ;;  %v4730_v55 = vpop.f32.mrb[7].mxu1 }
  0xf5   : > { %4952 = vmatmul.mubr.msk.bf16.gmra.mrb[112].mxu0 %vm494_vm2, %v6116_v33  ;;  %4838 = vmatmul.mubr.msk.bf16.gmra.mrb[112].mxu1 %vm494_vm2, %v6130_v35 }
  0xf6   : > { %4955 = vmatprep.mubr.msk.bf16.mxu0 %vm5859_vm1, %v8108_v1  ;;  %4841 = vmatprep.mubr.msk.bf16.mxu1 %vm5859_vm1, %v8108_v1 }
  0xf8   : > { %v6274_v56 = vpop.f32.mrb[8].mxu0  ;;  %v6276_v58 = vpop.f32.mrb[8].mxu1 }
  0xf9   : > { %v4673_v57 = vpop.f32.mrb[9].mxu0  ;;  %v4733_v60 = vpop.f32.mrb[9].mxu1 }
  0xfa   : > { %v638_v59 = vpop.f32.mrb[10].mxu0  ;;  %v748_v62 = vpop.f32.mrb[10].mxu1 }
  0xfb   : > { %v4674_v61 = vpop.f32.mrb[11].mxu0  ;;  %v4734_v63 = vpop.f32.mrb[11].mxu1 }
  0xfd   : > { %4956 = vmatmul.mubr.msk.bf16.gmra.mrb[116].mxu0 %vm494_vm2, %v6130_v35  ;;  %4842 = vmatmul.mubr.msk.bf16.gmra.mrb[116].mxu1 %vm494_vm2, %v5934_v7 }
  0xfe   : > { %4959 = vmatprep.mubr.msk.bf16.mxu0 %vm5859_vm1, %v8108_v1  ;;  %4845 = vmatprep.mubr.msk.bf16.mxu1 %vm5859_vm1, %v8108_v1 }
 0x100   : > { %v6286_v0 = vpop.f32.mrb[12].mxu0  ;;  %v6288_v3 = vpop.f32.mrb[12].mxu1 }
 0x101   : > { %v4677_v2 = vpop.f32.mrb[13].mxu0  ;;  %v4737_v6 = vpop.f32.mrb[13].mxu1 }
 0x102   : > { %v6290_v4 = vpop.f32.mrb[14].mxu0  ;;  %v6292_v25 = vpop.f32.mrb[14].mxu1 }
 0x103   : > { %v4678_v8 = vpop.f32.mrb[15].mxu0  ;;  %v4738_v27 = vpop.f32.mrb[15].mxu1 }
 0x105   : > { %4960 = vmatmul.mubr.msk.bf16.gmra.mrb[120].mxu0 %vm494_vm2, %v5934_v7  ;;  %4846 = vmatmul.mubr.msk.bf16.gmra.mrb[120].mxu1 %vm494_vm2, %v5951_v10 }
 0x106   : > { %4963 = vmatprep.mubr.msk.bf16.mxu0 %vm5859_vm1, %v8108_v1  ;;  %4849 = vmatprep.mubr.msk.bf16.mxu1 %vm5859_vm1, %v8108_v1 }
 0x108   : > { %v650_v29 = vpop.f32.mrb[16].mxu0  ;;  %v760_v33 = vpop.f32.mrb[16].mxu1 }
 0x109   : > { %v4681_v31 = vpop.f32.mrb[17].mxu0  ;;  %v4741_v36 = vpop.f32.mrb[17].mxu1 }
 0x10a   : > { %v6302_v35 = vpop.f32.mrb[18].mxu0  ;;  %v6304_v38 = vpop.f32.mrb[18].mxu1 }
 0x10b   : > { %v4682_v37 = vpop.f32.mrb[19].mxu0  ;;  %v4742_v39 = vpop.f32.mrb[19].mxu1 }
 0x10d   : > { %4964 = vmatmul.mubr.msk.bf16.gmra.mrb[124].mxu0 %vm494_vm2, %v5951_v10  ;;  %4850 = vmatmul.mubr.msk.bf16.gmra.mrb[124].mxu1 %vm494_vm2, %v5965_v12 }
 0x10e   : > { %4967 = vmatprep.mubr.msk.bf16.mxu0 %vm5859_vm1, %v8108_v1  ;;  %4853 = vmatprep.mubr.msk.bf16.mxu1 %vm5859_vm1, %v8108_v1 }
 0x110   : > { %v6314_v7 = vpop.f32.mrb[20].mxu0  ;;  %v6316_v44 = vpop.f32.mrb[20].mxu1 }
 0x111   : > { %v4685_v41 = vpop.f32.mrb[21].mxu0  ;;  %v4745_v47 = vpop.f32.mrb[21].mxu1 }
 0x112   : > { %v660_v45 = vpop.f32.mrb[22].mxu0  ;;  %v770_v49 = vpop.f32.mrb[22].mxu1 }
 0x113   : > { %v4686_v48 = vpop.f32.mrb[23].mxu0  ;;  %v4746_v50 = vpop.f32.mrb[23].mxu1 }
 0x115   : > { %4968 = vmatmul.mubr.msk.bf16.gmra.mrb[128].mxu0 %vm494_vm2, %v5965_v12  ;;  %4854 = vmatmul.mubr.msk.bf16.gmra.mrb[128].mxu1 %vm494_vm2, %v5979_v14 }
 0x116   : > { %4971 = vmatprep.mubr.msk.bf16.mxu0 %vm5859_vm1, %v8108_v1  ;;  %4857 = vmatprep.mubr.msk.bf16.mxu1 %vm5859_vm1, %v8108_v1 }
 0x118   : > { %v6326_v10 = vpop.f32.mrb[24].mxu0  ;;  %v6328_v53 = vpop.f32.mrb[24].mxu1 }
 0x119   : > { %v4689_v52 = vpop.f32.mrb[25].mxu0  ;;  %v4749_v57 = vpop.f32.mrb[25].mxu1 }
 0x11a   : > { %v6330_v55 = vpop.f32.mrb[26].mxu0  ;;  %v6332_v60 = vpop.f32.mrb[26].mxu1 }
 0x11b   : > { %v4690_v59 = vpop.f32.mrb[27].mxu0  ;;  %v4750_v12 = vpop.f32.mrb[27].mxu1 }
 0x11d   : > { %4972 = vmatmul.mubr.msk.bf16.gmra.mrb[132].mxu0 %vm494_vm2, %v5979_v14  ;;  %4858 = vmatmul.mubr.msk.bf16.gmra.mrb[132].mxu1 %vm494_vm2, %v5993_v16 }
 0x11e   : > { %4975 = vmatprep.mubr.msk.bf16.mxu0 %vm5859_vm1, %v8108_v1  ;;  %4861 = vmatprep.mubr.msk.bf16.mxu1 %vm5859_vm1, %v8108_v1 }
 0x120   : > { %v672_v61 = vpop.f32.mrb[28].mxu0  ;;  %v782_v63 = vpop.f32.mrb[28].mxu1 }
 0x121   : > { %v4693_v62 = vpop.f32.mrb[29].mxu0  ;;  %v4753_v6 = vpop.f32.mrb[29].mxu1 }
 0x122   : > { %v6342_v2 = vpop.f32.mrb[30].mxu0  ;;  %v6344_v27 = vpop.f32.mrb[30].mxu1 }
 0x123   : > { %v4694_v8 = vpop.f32.mrb[31].mxu0  ;;  %v4754_v29 = vpop.f32.mrb[31].mxu1 }
 0x125   : > { %4976 = vmatmul.mubr.msk.bf16.gmra.mrb[136].mxu0 %vm494_vm2, %v5993_v16  ;;  %4862 = vmatmul.mubr.msk.bf16.gmra.mrb[136].mxu1 %vm494_vm2, %v6007_v18 }
 0x126   : > { %4979 = vmatprep.mubr.msk.bf16.mxu0 %vm5859_vm1, %v8108_v1  ;;  %4865 = vmatprep.mubr.msk.bf16.mxu1 %vm5859_vm1, %v8108_v1 }
 0x128   : > { %v6354_v14 = vpop.f32.mrb[32].mxu0  ;;  %v6356_v33 = vpop.f32.mrb[32].mxu1 }
 0x129   : > { %v4697_v31 = vpop.f32.mrb[33].mxu0  ;;  %v4757_v37 = vpop.f32.mrb[33].mxu1 }
 0x12a   : > { %v682_v36 = vpop.f32.mrb[34].mxu0  ;;  %v792_v41 = vpop.f32.mrb[34].mxu1 }
 0x12b   : > { %v4698_v39 = vpop.f32.mrb[35].mxu0  ;;  %v4758_v45 = vpop.f32.mrb[35].mxu1 }
 0x12d   : > { %4980 = vmatmul.mubr.msk.bf16.gmra.mrb[140].mxu0 %vm494_vm2, %v6007_v18  ;;  %4866 = vmatmul.mubr.msk.bf16.gmra.mrb[140].mxu1 %vm494_vm2, %v6021_v20 }
 0x12e   : > { %4983 = vmatprep.mubr.msk.bf16.mxu0 %vm5859_vm1, %v8108_v1  ;;  %4869 = vmatprep.mubr.msk.bf16.mxu1 %vm5859_vm1, %v8108_v1 }
 0x130   : > { %v6366_v16 = vpop.f32.mrb[36].mxu0  ;;  %v796_v48 = vpop.f32.mrb[36].mxu1 }
 0x131   : > { %v4701_v47 = vpop.f32.mrb[37].mxu0  ;;  %v4761_v50 = vpop.f32.mrb[37].mxu1 }
 0x132   : > { %v6368_v49 = vpop.f32.mrb[38].mxu0  ;;  %v798_v57 = vpop.f32.mrb[38].mxu1 }
 0x133   : > { %v4702_v52 = vpop.f32.mrb[39].mxu0  ;;  %v4762_v59 = vpop.f32.mrb[39].mxu1 }
 0x135   : > { %4984 = vmatmul.mubr.msk.bf16.gmra.mrb[144].mxu0 %vm494_vm2, %v6021_v20  ;;  %4870 = vmatmul.mubr.msk.bf16.gmra.mrb[144].mxu1 %vm494_vm2, %v6035_v22 }
 0x136   : > { %4987 = vmatprep.mubr.msk.bf16.mxu0 %vm5859_vm1, %v8108_v1  ;;  %4873 = vmatprep.mubr.msk.bf16.mxu1 %vm5859_vm1, %v8108_v1 }
 0x138   : > { %v694_v18 = vpop.f32.mrb[40].mxu0  ;;  %v802_v61 = vpop.f32.mrb[40].mxu1 }
 0x139   : > { %v4705_v12 = vpop.f32.mrb[41].mxu0  ;;  %v4765_v63 = vpop.f32.mrb[41].mxu1 }
 0x13a   : > { %v6378_v62 = vpop.f32.mrb[42].mxu0  ;;  %v804_v8 = vpop.f32.mrb[42].mxu1 }
 0x13b   : > { %v4706_v6 = vpop.f32.mrb[43].mxu0  ;;  %v4766_v29 = vpop.f32.mrb[43].mxu1 }
 0x13d   : > { %4988 = vmatmul.mubr.msk.bf16.gmra.mrb[148].mxu0 %vm494_vm2, %v6035_v22  ;;  %4874 = vmatmul.mubr.msk.bf16.gmra.mrb[148].mxu1 %vm494_vm2, %v6049_v24 }
 0x13e   : > { %4991 = vmatprep.mubr.msk.bf16.mxu0 %vm5859_vm1, %v8108_v1  ;;  %4877 = vmatprep.mubr.msk.bf16.mxu1 %vm5859_vm1, %v8108_v1 }
 0x140   : > { %v6388_v20 = vpop.f32.mrb[44].mxu0  ;;  %v808_v36 = vpop.f32.mrb[44].mxu1 }
 0x141   : > { %v4709_v31 = vpop.f32.mrb[45].mxu0  ;;  %v4769_v39 = vpop.f32.mrb[45].mxu1  ;;  %v1133_v36 = vlaneseq }
 0x142   : > { %v704_v37 = vpop.f32.mrb[46].mxu0  ;;  %v810_v45 = vpop.f32.mrb[46].mxu1 }
 0x143   : > { %v4710_v41 = vpop.f32.mrb[47].mxu0  ;;  %v4770_v47 = vpop.f32.mrb[47].mxu1 }
 0x145   : > { %4992 = vmatmul.mubr.msk.bf16.gmra.mrb[152].mxu0 %vm494_vm2, %v6049_v24  ;;  %4878 = vmatmul.mubr.msk.bf16.gmra.mrb[152].mxu1 %vm494_vm2, %v6063_v26 }
 0x146   : > { %4995 = vmatprep.mubr.msk.bf16.mxu0 %vm5859_vm1, %v8108_v1  ;;  %4881 = vmatprep.mubr.msk.bf16.mxu1 %vm5859_vm1, %v8108_v1 }
 0x148   : > { %v6398_v22 = vpop.f32.mrb[48].mxu0  ;;  %v814_v50 = vpop.f32.mrb[48].mxu1 }
 0x149   : > { %v4713_v48 = vpop.f32.mrb[49].mxu0  ;;  %v4773_v57 = vpop.f32.mrb[49].mxu1 }
 0x14a   : > { %v6400_v52 = vpop.f32.mrb[50].mxu0  ;;  %v816_v18 = vpop.f32.mrb[50].mxu1 }
 0x14b   : > { %v4714_v59 = vpop.f32.mrb[51].mxu0  ;;  %v4774_v12 = vpop.f32.mrb[51].mxu1 }
 0x14d   : > { %4996 = vmatmul.mubr.msk.bf16.gmra.mrb[156].mxu0 %vm494_vm2, %v6063_v26  ;;  %4882 = vmatmul.mubr.msk.bf16.gmra.mrb[156].mxu1 %vm494_vm2, %v6077_v28  ;;  %v6418_v26 = vshrl.u32 %v1133_v36, 7 }
 0x14e   : > { %4999 = vmatprep.mubr.msk.bf16.mxu0 %vm5859_vm1, %v8108_v1  ;;  %4885 = vmatprep.mubr.msk.bf16.mxu1 %vm5859_vm1, %v8108_v1 }
 0x14f   : > { %vm1135_vm3 = vcmp.lt.s32.totalorder %v6418_v26, 7  ;;  %vm1508_vm4 = vcmp.lt.s32.totalorder %v6418_v26, 6 }
 0x150   : > { %v716_v24 = vpop.f32.mrb[52].mxu0  ;;  %v820_v63 = vpop.f32.mrb[52].mxu1 }
 0x151   : > { %v4717_v61 = vpop.f32.mrb[53].mxu0  ;;  %v4777_v8 = vpop.f32.mrb[53].mxu1 }
 0x152   : > { %v6410_v6 = vpop.f32.mrb[54].mxu0  ;;  %v822_v31 = vpop.f32.mrb[54].mxu1 }
 0x153   : > { %v4718_v29 = vpop.f32.mrb[55].mxu0  ;;  %v4778_v37 = vpop.f32.mrb[55].mxu1 }
 0x155   : > { %5000 = vmatmul.mubr.msk.bf16.gmra.mrb[160].mxu0 %vm494_vm2, %v6077_v28  ;;  %4886 = vmatmul.mubr.msk.bf16.gmra.mrb[160].mxu1 %vm494_vm2, %v6091_v30 }
 0x156   : > { %5003 = vmatprep.mubr.msk.bf16.mxu0 %vm5859_vm1, %v8108_v1  ;;  %4889 = vmatprep.mubr.msk.bf16.mxu1 %vm5859_vm1, %v8108_v1 }
 0x158   : > { %v6422_v39 = vpop.f32.mrb[56].mxu0  ;;  %v864_v41 = vpop.f32.mrb[56].mxu1 }
 0x159   : > { %v4721_v45 = vpop.f32.mrb[57].mxu0  ;;  %v1085_v47 = vrot.slane %v864_v41, 1  ;;  %v4783_v48 = vpop.f32.mrb[57].mxu1 }
 0x15a   : > { %v726_v50 = vpop.f32.mrb[58].mxu0  ;;  %v867_v57 = vpop.f32.mrb[58].mxu1 }
 0x15b   : > { %v4722_v28 = vpop.f32.mrb[59].mxu0  ;;  %v1086_v59 = vrot.slane %v867_v57, 1  ;;  %v4784_v18 = vpop.f32.mrb[59].mxu1 }
 0x15d   : > { %5004 = vmatmul.mubr.msk.bf16.gmra.mrb[164].mxu0 %vm494_vm2, %v6091_v30  ;;  %v1167_v12 = vsel %vm1135_vm3, %v1085_v47, %v1086_v59  ;;  %4890 = vmatmul.mubr.msk.bf16.gmra.mrb[164].mxu1 %vm494_vm2, %v6105_v32 }
 0x15e   : > { %5007 = vmatprep.mubr.msk.bf16.mxu0 %vm5859_vm1, %v8108_v1  ;;  %4893 = vmatprep.mubr.msk.bf16.mxu1 %vm5859_vm1, %v8108_v1  ;;  %v1168_v24 = vadd.f32 %v1167_v12, %v6246_v40 }
 0x160   : > { %v1239_v61 = vpop.f32.mrb[60].mxu0  ;;  %v872_v63 = vpop.f32.mrb[60].mxu1 }
 0x161   : > { %v4901_v8 = vpop.f32.mrb[61].mxu0  ;;  %v1087_v29 = vrot.slane %v872_v63, 1  ;;  %v4787_v30 = vpop.f32.mrb[61].mxu1  ;;  %v1460_v36 = vrot.slane %v1239_v61, 2 }
 0x162   : > { %v1242_v31 = vpop.f32.mrb[62].mxu0  ;;  %v875_v45 = vpop.f32.mrb[62].mxu1 }
 0x163   : > { %v1461_v37 = vrot.slane %v1242_v31, 2  ;;  %v4902_v41 = vpop.f32.mrb[63].mxu0  ;;  %v1166_v47 = vsel %vm1135_vm3, %v1086_v59, %v1087_v29  ;;  %v4788_v48 = vpop.f32.mrb[63].mxu1  ;;  %v1088_v28 = vrot.slane %v875_v45, 1 }
 0x164   : > { %v1169_v50 = vadd.f32 %v1166_v47, %v6250_v43  ;;  %v4202_v43 = vld [vmem:[%s8104_s1 + $0xa] sm:$0x3] }
 0x165   : > { %5008 = vmatmul.mubr.msk.bf16.gmra.mrb[168].mxu0 %vm494_vm2, %v6105_v32  ;;  %v1540_v40 = vsel %vm1508_vm4, %v1460_v36, %v1461_v37  ;;  %4894 = vmatmul.mubr.msk.bf16.gmra.mrb[168].mxu1 %vm494_vm2, %v6119_v34  ;;  %v2224_v45 = vsel %vm582_vm0, %v4202_v43, 0 }
 0x166   : > { %5011 = vmatprep.mubr.msk.bf16.mxu0 %vm5859_vm1, %v8108_v1  ;;  %v6448_v57 = vadd.f32 %v1540_v40, %v1168_v24  ;;  %5017 = vmatprep.mubr.msk.bf16.mxu1 %vm5859_vm1, %v8108_v1 }
 0x168   : > { %v1247_v59 = vpop.f32.mrb[64].mxu0  ;;  %v880_v18 = vpop.f32.mrb[64].mxu1 }
 0x169   : > { %v1462_v32 = vrot.slane %v1247_v59, 2  ;;  %v4905_v12 = vpop.f32.mrb[65].mxu0  ;;  %v1089_v61 = vrot.slane %v880_v18, 1  ;;  %v4791_v63 = vpop.f32.mrb[65].mxu1 }
 0x16a   : > { %v1250_v8 = vpop.f32.mrb[66].mxu0  ;;  %v883_v29 = vpop.f32.mrb[66].mxu1 }
 0x16b   : > { %v4906_v31 = vpop.f32.mrb[67].mxu0  ;;  %v1539_v24 = vsel %vm1508_vm4, %v1461_v37, %v1462_v32  ;;  %v1165_v30 = vsel %vm1135_vm3, %v1088_v28, %v1089_v61  ;;  %v1090_v36 = vrot.slane %v883_v29, 1  ;;  %v4792_v41 = vpop.f32.mrb[67].mxu1 }
 0x16c   : > { %v6460_v47 = vadd.f32 %v1539_v24, %v1169_v50  ;;  %v1170_v48 = vadd.f32 %v1165_v30, %v6262_v51  ;;  %v1463_v51 = vrot.slane %v1250_v8, 2 }
 0x16d   : > { %5012 = vmatmul.mubr.msk.bf16.gmra.mrb[172].mxu0 %vm494_vm2, %v6119_v34  ;;  %v1164_v40 = vsel %vm1135_vm3, %v1089_v61, %v1090_v36  ;;  %5018 = vmatmul.mubr.msk.bf16.vlgmr.msra.gmra.mrb[172].mxu1 %vm494_vm2, %v5930_v5  ;;  %v4232_v34 = vld [vmem:[%s8104_s1 + $0xc] sm:$0x3] }
 0x16e   : > { %5135 = vmatprep.mubr.msk.bf16.mxu0 %vm5859_vm1, %v8108_v1  ;;  %5021 = vmatprep.mubr.msk.bf16.mxu1 %vm5859_vm1, %v8108_v1  ;;  %v1171_v37 = vadd.f32 %v1164_v40, %v6274_v56  ;;  %v2596_v31 = vsel %vm582_vm0, %v4232_v34, 0 }
 0x16f   : > { %5252 = vmatpush3.bf16.msra.mxu1 %v2224_v45 }
 0x170   : > { %v1255_v50 = vpop.f32.mrb[68].mxu0  ;;  %5487 = vmatprep.subr.bf16.mxu1 %v8108_v1  ;;  %v888_v28 = vpop.f32.mrb[68].mxu1 }
 0x171   : > { %v1464_v59 = vrot.slane %v1255_v50, 2  ;;  %v4909_v18 = vpop.f32.mrb[69].mxu0  ;;  %v1091_v32 = vrot.slane %v888_v28, 1  ;;  %v4795_v12 = vpop.f32.mrb[69].mxu1 }
 0x172   : > { %v1258_v43 = vpop.f32.mrb[70].mxu0  ;;  %v891_v61 = vpop.f32.mrb[70].mxu1 }
 0x173   : > { %v1465_v63 = vrot.slane %v1258_v43, 2  ;;  %v4910_v29 = vpop.f32.mrb[71].mxu0  ;;  %v1538_v56 = vsel %vm1508_vm4, %v1463_v51, %v1464_v59  ;;  %v1092_v24 = vrot.slane %v891_v61, 1  ;;  %v4796_v30 = vpop.f32.mrb[71].mxu1 }
 0x174   : > { %v6481_v36 = vadd.f32 %v1538_v56, %v1170_v48 }
 0x175   : > { %5136 = vmatmul.mubr.msk.bf16.vlgmr.msra.gmra.mrb[176].mxu0 %vm494_vm2, %v5930_v5  ;;  %v1537_v8 = vsel %vm1508_vm4, %v1464_v59, %v1465_v63  ;;  %v1163_v41 = vsel %vm1135_vm3, %v1091_v32, %v1092_v24  ;;  %5022 = vmatmul.mubr.msk.bf16.gmra.mrb[176].mxu1 %vm494_vm2, %v5947_v9 }
 0x176   : > { %5370 = vmatpush3.bf16.msra.mxu0 %v2596_v31  ;;  %v6491_v45 = vadd.f32 %v1537_v8, %v1171_v37  ;;  %5025 = vmatprep.mubr.msk.bf16.mxu1 %vm5859_vm1, %v8108_v1  ;;  %v1172_v5 = vadd.f32 %v1163_v41, %v6286_v0 }
 0x177   : > { %5139 = vmatprep.mubr.msk.bf16.mxu0 %vm5859_vm1, %v8108_v1  ;;  %5605 = vmatprep.subr.bf16.mxu0 %v8108_v1 }
 0x178   : > { %v1263_v48 = vpop.f32.mrb[72].mxu0  ;;  %v896_v40 = vpop.f32.mrb[72].mxu1 }
 0x179   : > { %v4913_v50 = vpop.f32.mrb[73].mxu0  ;;  %v1093_v34 = vrot.slane %v896_v40, 1  ;;  %v4799_v28 = vpop.f32.mrb[73].mxu1  ;;  %v1466_v59 = vrot.slane %v1263_v48, 2 }
 0x17a   : > { %v1266_v51 = vpop.f32.mrb[74].mxu0  ;;  %v899_v32 = vpop.f32.mrb[74].mxu1 }
 0x17b   : > { %v1467_v18 = vrot.slane %v1266_v51, 2  ;;  %v4914_v37 = vpop.f32.mrb[75].mxu0  ;;  %v1162_v12 = vsel %vm1135_vm3, %v1092_v24, %v1093_v34  ;;  %v4800_v43 = vpop.f32.mrb[75].mxu1  ;;  %v1094_v29 = vrot.slane %v899_v32, 1 }
 0x17c   : > { %v1173_v61 = vadd.f32 %v1162_v12, %v6290_v4 }
 0x17d   : > { %5140 = vmatmul.mubr.msk.bf16.gmra.mrb[180].mxu0 %vm494_vm2, %v5947_v9  ;;  %v1536_v0 = vsel %vm1508_vm4, %v1466_v59, %v1467_v18  ;;  %5026 = vmatmul.mubr.msk.bf16.gmra.mrb[180].mxu1 %vm494_vm2, %v5962_v11 }
 0x17e   : > { %5143 = vmatprep.mubr.msk.bf16.mxu0 %vm5859_vm1, %v8108_v1  ;;  %v6510_v63 = vadd.f32 %v1536_v0, %v1172_v5  ;;  %5029 = vmatprep.mubr.msk.bf16.mxu1 %vm5859_vm1, %v8108_v1 }
 0x180   : > { %v1271_v31 = vpop.f32.mrb[76].mxu0  ;;  %v904_v56 = vpop.f32.mrb[76].mxu1 }
 0x181   : > { %v1468_v9 = vrot.slane %v1271_v31, 2  ;;  %v4917_v24 = vpop.f32.mrb[77].mxu0  ;;  %v1095_v30 = vrot.slane %v904_v56, 1  ;;  %v4803_v8 = vpop.f32.mrb[77].mxu1 }
 0x182   : > { %v1274_v41 = vpop.f32.mrb[78].mxu0  ;;  %v907_v4 = vpop.f32.mrb[78].mxu1 }
 0x183   : > { %v4918_v48 = vpop.f32.mrb[79].mxu0  ;;  %v1535_v40 = vsel %vm1508_vm4, %v1467_v18, %v1468_v9  ;;  %v1161_v5 = vsel %vm1135_vm3, %v1094_v29, %v1095_v30  ;;  %v1096_v50 = vrot.slane %v907_v4, 1  ;;  %v4804_v34 = vpop.f32.mrb[79].mxu1  ;;  %v1469_v32 = vrot.slane %v1274_v41, 2 }
 0x184   : > { %v6518_v51 = vadd.f32 %v1535_v40, %v1173_v61  ;;  %v1174_v28 = vadd.f32 %v1161_v5, %v6302_v35 }
 0x185   : > { %5144 = vmatmul.mubr.msk.bf16.gmra.mrb[184].mxu0 %vm494_vm2, %v5962_v11  ;;  %v1160_v59 = vsel %vm1135_vm3, %v1095_v30, %v1096_v50  ;;  %5030 = vmatmul.mubr.msk.bf16.gmra.mrb[184].mxu1 %vm494_vm2, %v5976_v13 }
 0x186   : > { %5147 = vmatprep.mubr.msk.bf16.mxu0 %vm5859_vm1, %v8108_v1  ;;  %5033 = vmatprep.mubr.msk.bf16.mxu1 %vm5859_vm1, %v8108_v1  ;;  %v1175_v18 = vadd.f32 %v1160_v59, %v6314_v7 }
 0x188   : > { %v1279_v37 = vpop.f32.mrb[80].mxu0  ;;  %v912_v12 = vpop.f32.mrb[80].mxu1 }
 0x189   : > { %v1470_v11 = vrot.slane %v1279_v37, 2  ;;  %v4921_v43 = vpop.f32.mrb[81].mxu0  ;;  %v1097_v35 = vrot.slane %v912_v12, 1  ;;  %v4807_v0 = vpop.f32.mrb[81].mxu1 }
 0x18a   : > { %v1282_v61 = vpop.f32.mrb[82].mxu0  ;;  %v915_v29 = vpop.f32.mrb[82].mxu1 }
 0x18b   : > { %v1471_v31 = vrot.slane %v1282_v61, 2  ;;  %v4922_v56 = vpop.f32.mrb[83].mxu0  ;;  %v1534_v9 = vsel %vm1508_vm4, %v1469_v32, %v1470_v11  ;;  %v1098_v24 = vrot.slane %v915_v29, 1  ;;  %v4808_v30 = vpop.f32.mrb[83].mxu1 }
 0x18c   : > { %v6534_v8 = vadd.f32 %v1534_v9, %v1174_v28 }
 0x18d   : > { %5148 = vmatmul.mubr.msk.bf16.gmra.mrb[188].mxu0 %vm494_vm2, %v5976_v13  ;;  %v1533_v7 = vsel %vm1508_vm4, %v1470_v11, %v1471_v31  ;;  %v1159_v41 = vsel %vm1135_vm3, %v1097_v35, %v1098_v24  ;;  %5034 = vmatmul.mubr.msk.bf16.gmra.mrb[188].mxu1 %vm494_vm2, %v5990_v15 }
 0x18e   : > { %5151 = vmatprep.mubr.msk.bf16.mxu0 %vm5859_vm1, %v8108_v1  ;;  %v6546_v4 = vadd.f32 %v1533_v7, %v1175_v18  ;;  %5037 = vmatprep.mubr.msk.bf16.mxu1 %vm5859_vm1, %v8108_v1  ;;  %v1176_v48 = vadd.f32 %v1159_v41, %v6326_v10 }
 0x190   : > { %v1287_v13 = vpop.f32.mrb[84].mxu0  ;;  %v920_v40 = vpop.f32.mrb[84].mxu1 }
 0x191   : > { %v4925_v5 = vpop.f32.mrb[85].mxu0  ;;  %v1099_v50 = vrot.slane %v920_v40, 1  ;;  %v4811_v28 = vpop.f32.mrb[85].mxu1  ;;  %v1472_v59 = vrot.slane %v1287_v13, 2 }
 0x192   : > { %v1290_v34 = vpop.f32.mrb[86].mxu0  ;;  %v923_v12 = vpop.f32.mrb[86].mxu1 }
 0x193   : > { %v1473_v37 = vrot.slane %v1290_v34, 2  ;;  %v4926_v32 = vpop.f32.mrb[87].mxu0  ;;  %v1158_v11 = vsel %vm1135_vm3, %v1098_v24, %v1099_v50  ;;  %v4812_v18 = vpop.f32.mrb[87].mxu1  ;;  %v1100_v0 = vrot.slane %v923_v12, 1 }
 0x194   : > { %v1177_v43 = vadd.f32 %v1158_v11, %v6330_v55 }
 0x195   : > { %5152 = vmatmul.mubr.msk.bf16.gmra.mrb[192].mxu0 %vm494_vm2, %v5990_v15  ;;  %v1532_v10 = vsel %vm1508_vm4, %v1472_v59, %v1473_v37  ;;  %5038 = vmatmul.mubr.msk.bf16.gmra.mrb[192].mxu1 %vm494_vm2, %v6004_v17 }
 0x196   : > { %5155 = vmatprep.mubr.msk.bf16.mxu0 %vm5859_vm1, %v8108_v1  ;;  %v6562_v35 = vadd.f32 %v1532_v10, %v1176_v48  ;;  %5041 = vmatprep.mubr.msk.bf16.mxu1 %vm5859_vm1, %v8108_v1 }
 0x198   : > { %v1295_v61 = vpop.f32.mrb[88].mxu0  ;;  %v928_v29 = vpop.f32.mrb[88].mxu1 }
 0x199   : > { %v1474_v15 = vrot.slane %v1295_v61, 2  ;;  %v4929_v31 = vpop.f32.mrb[89].mxu0  ;;  %v1101_v56 = vrot.slane %v928_v29, 1  ;;  %v4815_v9 = vpop.f32.mrb[89].mxu1 }
 0x19a   : > { %v1298_v24 = vpop.f32.mrb[90].mxu0  ;;  %v931_v55 = vpop.f32.mrb[90].mxu1 }
 0x19b   : > { %v4930_v30 = vpop.f32.mrb[91].mxu0  ;;  %v1531_v7 = vsel %vm1508_vm4, %v1473_v37, %v1474_v15  ;;  %v1157_v41 = vsel %vm1135_vm3, %v1100_v0, %v1101_v56  ;;  %v1102_v48 = vrot.slane %v931_v55, 1  ;;  %v4816_v13 = vpop.f32.mrb[91].mxu1  ;;  %v1475_v59 = vrot.slane %v1298_v24, 2 }
 0x19c   : > { %v6570_v40 = vadd.f32 %v1531_v7, %v1177_v43  ;;  %v1178_v5 = vadd.f32 %v1157_v41, %v6342_v2 }
 0x19d   : > { %5156 = vmatmul.mubr.msk.bf16.gmra.mrb[196].mxu0 %vm494_vm2, %v6004_v17  ;;  %v1156_v50 = vsel %vm1135_vm3, %v1101_v56, %v1102_v48  ;;  %5042 = vmatmul.mubr.msk.bf16.gmra.mrb[196].mxu1 %vm494_vm2, %v6018_v19 }
 0x19e   : > { %5159 = vmatprep.mubr.msk.bf16.mxu0 %vm5859_vm1, %v8108_v1  ;;  %5045 = vmatprep.mubr.msk.bf16.mxu1 %vm5859_vm1, %v8108_v1  ;;  %v1179_v34 = vadd.f32 %v1156_v50, %v6354_v14 }
 0x1a0   : > { %v1303_v28 = vpop.f32.mrb[92].mxu0  ;;  %v936_v37 = vpop.f32.mrb[92].mxu1 }
 0x1a1   : > { %v1476_v17 = vrot.slane %v1303_v28, 2  ;;  %v4933_v32 = vpop.f32.mrb[93].mxu0  ;;  %v1103_v2 = vrot.slane %v936_v37, 1  ;;  %v4819_v12 = vpop.f32.mrb[93].mxu1 }
 0x1a2   : > { %v1306_v11 = vpop.f32.mrb[94].mxu0  ;;  %v939_v18 = vpop.f32.mrb[94].mxu1 }
 0x1a3   : > { %v1477_v10 = vrot.slane %v1306_v11, 2  ;;  %v4934_v43 = vpop.f32.mrb[95].mxu0  ;;  %v1530_v0 = vsel %vm1508_vm4, %v1475_v59, %v1476_v17  ;;  %v1104_v61 = vrot.slane %v939_v18, 1  ;;  %v4820_v29 = vpop.f32.mrb[95].mxu1 }
 0x1a4   : > { %v6586_v15 = vadd.f32 %v1530_v0, %v1178_v5 }
 0x1a5   : > { %5160 = vmatmul.mubr.msk.bf16.gmra.mrb[200].mxu0 %vm494_vm2, %v6018_v19  ;;  %v1529_v14 = vsel %vm1508_vm4, %v1476_v17, %v1477_v10  ;;  %v1155_v31 = vsel %vm1135_vm3, %v1103_v2, %v1104_v61  ;;  %5046 = vmatmul.mubr.msk.bf16.gmra.mrb[200].mxu1 %vm494_vm2, %v6032_v21 }
 0x1a6   : > { %5163 = vmatprep.mubr.msk.bf16.mxu0 %vm5859_vm1, %v8108_v1  ;;  %v6598_v56 = vadd.f32 %v1529_v14, %v1179_v34  ;;  %5049 = vmatprep.mubr.msk.bf16.mxu1 %vm5859_vm1, %v8108_v1  ;;  %v1180_v9 = vadd.f32 %v1155_v31, %v6366_v16  ;;  %v5781_v31 = vld [vmem:[%s5924_s26 + $0x40] sm:$0xff]  }
 0x1a8   : > { %v1311_v19 = vpop.f32.mrb[96].mxu0  ;;  %v944_v24 = vpop.f32.mrb[96].mxu1 }
 0x1a9   : > { %v4937_v55 = vpop.f32.mrb[97].mxu0  ;;  %v1105_v30 = vrot.slane %v944_v24, 1  ;;  %v4823_v41 = vpop.f32.mrb[97].mxu1  ;;  %v1478_v48 = vrot.slane %v1311_v19, 2  ;;  %v5782_v24 = vld [vmem:[%s5924_s26 + $0x48] sm:$0xff]  }
 0x1aa   : > { %v1314_v7 = vpop.f32.mrb[98].mxu0  ;;  %v947_v50 = vpop.f32.mrb[98].mxu1 }
 0x1ab   : > { %v1479_v13 = vrot.slane %v1314_v7, 2  ;;  %v4938_v5 = vpop.f32.mrb[99].mxu0  ;;  %v1154_v28 = vsel %vm1135_vm3, %v1104_v61, %v1105_v30  ;;  %v4824_v34 = vpop.f32.mrb[99].mxu1  ;;  %v1106_v17 = vrot.slane %v947_v50, 1 }
 0x1ac   : > { %v1181_v59 = vadd.f32 %v1154_v28, %v6368_v49 }
 0x1ad   : > { %5164 = vmatmul.mubr.msk.bf16.gmra.mrb[204].mxu0 %vm494_vm2, %v6032_v21  ;;  %v1528_v16 = vsel %vm1508_vm4, %v1478_v48, %v1479_v13  ;;  %5050 = vmatmul.mubr.msk.bf16.gmra.mrb[204].mxu1 %vm494_vm2, %v6046_v23 }
 0x1ae   : > { %5167 = vmatprep.mubr.msk.bf16.mxu0 %vm5859_vm1, %v8108_v1  ;;  %v6614_v37 = vadd.f32 %v1528_v16, %v1180_v9  ;;  %5053 = vmatprep.mubr.msk.bf16.mxu1 %vm5859_vm1, %v8108_v1 }
 0x1b0   : > { %v1319_v32 = vpop.f32.mrb[100].mxu0  ;;  %v952_v21 = vpop.f32.mrb[100].mxu1 }
 0x1b1   : > { %v1480_v2 = vrot.slane %v1319_v32, 2  ;;  %v4941_v12 = vpop.f32.mrb[101].mxu0  ;;  %v1107_v11 = vrot.slane %v952_v21, 1  ;;  %v4827_v49 = vpop.f32.mrb[101].mxu1 }
 0x1b2   : > { %v1322_v18 = vpop.f32.mrb[102].mxu0  ;;  %v955_v10 = vpop.f32.mrb[102].mxu1  ;;  %v5783_v12 = vld [vmem:[%s5924_s26 + $0x50] sm:$0xff]  }
 0x1b3   : > { %v4942_v23 = vpop.f32.mrb[103].mxu0  ;;  %v1527_v43 = vsel %vm1508_vm4, %v1479_v13, %v1480_v2  ;;  %v1153_v0 = vsel %vm1135_vm3, %v1106_v17, %v1107_v11  ;;  %v1108_v61 = vrot.slane %v955_v10, 1  ;;  %v4828_v29 = vpop.f32.mrb[103].mxu1  ;;  %v1481_v7 = vrot.slane %v1322_v18, 2 }
 0x1b4   : > { %v6622_v14 = vadd.f32 %v1527_v43, %v1181_v59  ;;  %v1182_v9 = vadd.f32 %v1153_v0, %v6378_v62 }
 0x1b5   : > { %5168 = vmatmul.mubr.msk.bf16.gmra.mrb[208].mxu0 %vm494_vm2, %v5781_v31  ;;  %v1152_v19 = vsel %vm1135_vm3, %v1107_v11, %v1108_v61  ;;  %5054 = vmatmul.mubr.msk.bf16.gmra.mrb[208].mxu1 %vm494_vm2, %v5782_v24 }
 0x1b6   : > { %5171 = vmatprep.mubr.msk.bf16.mxu0 %vm5859_vm1, %v8108_v1  ;;  %5057 = vmatprep.mubr.msk.bf16.mxu1 %vm5859_vm1, %v8108_v1  ;;  %v1183_v55 = vadd.f32 %v1152_v19, %v6388_v20 }
 0x1b8   : > { %v1327_v30 = vpop.f32.mrb[104].mxu0  ;;  %v960_v41 = vpop.f32.mrb[104].mxu1 }
 0x1b9   : > { %v1482_v48 = vrot.slane %v1327_v30, 2  ;;  %v4945_v62 = vpop.f32.mrb[105].mxu0  ;;  %v1109_v13 = vrot.slane %v960_v41, 1  ;;  %v4831_v5 = vpop.f32.mrb[105].mxu1 }
 0x1ba   : > { %v1330_v50 = vpop.f32.mrb[106].mxu0  ;;  %v963_v28 = vpop.f32.mrb[106].mxu1 }
 0x1bb   : > { %v1483_v34 = vrot.slane %v1330_v50, 2  ;;  %v4946_v16 = vpop.f32.mrb[107].mxu0  ;;  %v1526_v59 = vsel %vm1508_vm4, %v1481_v7, %v1482_v48  ;;  %v1110_v17 = vrot.slane %v963_v28, 1  ;;  %v4832_v32 = vpop.f32.mrb[107].mxu1  ;;  %v5784_v7 = vld [vmem:[%s5924_s26 + $0x58] sm:$0xff]  }
 0x1bc   : > { %v6638_v21 = vadd.f32 %v1526_v59, %v1182_v9 }
 0x1bd   : > { %5172 = vmatmul.mubr.msk.bf16.gmra.mrb[212].mxu0 %vm494_vm2, %v5782_v24  ;;  %v1525_v20 = vsel %vm1508_vm4, %v1482_v48, %v1483_v34  ;;  %v1151_v2 = vsel %vm1135_vm3, %v1109_v13, %v1110_v17  ;;  %5058 = vmatmul.mubr.msk.bf16.gmra.mrb[212].mxu1 %vm494_vm2, %v5783_v12 }
 0x1be   : > { %5175 = vmatprep.mubr.msk.bf16.mxu0 %vm5859_vm1, %v8108_v1  ;;  %v6649_v11 = vadd.f32 %v1525_v20, %v1183_v55  ;;  %5061 = vmatprep.mubr.msk.bf16.mxu1 %vm5859_vm1, %v8108_v1  ;;  %v1184_v49 = vadd.f32 %v1151_v2, %v6398_v22 }
 0x1c0   : > { %v1335_v18 = vpop.f32.mrb[108].mxu0  ;;  %v968_v10 = vpop.f32.mrb[108].mxu1 }
 0x1c1   : > { %v4949_v23 = vpop.f32.mrb[109].mxu0  ;;  %v1111_v43 = vrot.slane %v968_v10, 1  ;;  %v4835_v61 = vpop.f32.mrb[109].mxu1  ;;  %v1484_v29 = vrot.slane %v1335_v18, 2  ;;  %v5785_v10 = vld [vmem:[%s5924_s26 + $0x60] sm:$0xff]  }
 0x1c2   : > { %v1338_v0 = vpop.f32.mrb[110].mxu0  ;;  %v971_v19 = vpop.f32.mrb[110].mxu1 }
 0x1c3   : > { %v1485_v31 = vrot.slane %v1338_v0, 2  ;;  %v4950_v9 = vpop.f32.mrb[111].mxu0  ;;  %v1150_v24 = vsel %vm1135_vm3, %v1110_v17, %v1111_v43  ;;  %v4836_v55 = vpop.f32.mrb[111].mxu1  ;;  %v1112_v48 = vrot.slane %v971_v19, 1 }
 0x1c4   : > { %v1185_v30 = vadd.f32 %v1150_v24, %v6400_v52 }
 0x1c5   : > { %5176 = vmatmul.mubr.msk.bf16.gmra.mrb[216].mxu0 %vm494_vm2, %v5783_v12  ;;  %v1524_v22 = vsel %vm1508_vm4, %v1484_v29, %v1485_v31  ;;  %5062 = vmatmul.mubr.msk.bf16.gmra.mrb[216].mxu1 %vm494_vm2, %v5784_v7 }
 0x1c6   : > { %5179 = vmatprep.mubr.msk.bf16.mxu0 %vm5859_vm1, %v8108_v1  ;;  %v6664_v41 = vadd.f32 %v1524_v22, %v1184_v49  ;;  %5065 = vmatprep.mubr.msk.bf16.mxu1 %vm5859_vm1, %v8108_v1 }
 0x1c8   : > { %v1343_v62 = vpop.f32.mrb[112].mxu0  ;;  %v976_v13 = vpop.f32.mrb[112].mxu1 }
 0x1c9   : > { %v1486_v5 = vrot.slane %v1343_v62, 2  ;;  %v4953_v50 = vpop.f32.mrb[113].mxu0  ;;  %v1113_v28 = vrot.slane %v976_v13, 1  ;;  %v4839_v34 = vpop.f32.mrb[113].mxu1 }
 0x1ca   : > { %v1346_v52 = vpop.f32.mrb[114].mxu0  ;;  %v979_v16 = vpop.f32.mrb[114].mxu1 }
 0x1cb   : > { %v4954_v59 = vpop.f32.mrb[115].mxu0  ;;  %v1523_v17 = vsel %vm1508_vm4, %v1485_v31, %v1486_v5  ;;  %v1149_v32 = vsel %vm1135_vm3, %v1112_v48, %v1113_v28  ;;  %v1114_v20 = vrot.slane %v979_v16, 1  ;;  %v4840_v2 = vpop.f32.mrb[115].mxu1  ;;  %v1487_v0 = vrot.slane %v1346_v52, 2  ;;  %v5786_v5 = vld [vmem:[%s5924_s26 + $0x68] sm:$0xff]  }
 0x1cc   : > { %v6672_v12 = vadd.f32 %v1523_v17, %v1185_v30  ;;  %v1186_v49 = vadd.f32 %v1149_v32, %v6410_v6 }
 0x1cd   : > { %5180 = vmatmul.mubr.msk.bf16.gmra.mrb[220].mxu0 %vm494_vm2, %v5784_v7  ;;  %v1148_v18 = vsel %vm1135_vm3, %v1113_v28, %v1114_v20  ;;  %5066 = vmatmul.mubr.msk.bf16.gmra.mrb[220].mxu1 %vm494_vm2, %v5785_v10 }
 0x1ce   : > { %5183 = vmatprep.mubr.msk.bf16.mxu0 %vm5859_vm1, %v8108_v1  ;;  %5069 = vmatprep.mubr.msk.bf16.mxu1 %vm5859_vm1, %v8108_v1  ;;  %v1187_v23 = vadd.f32 %v1148_v18, %v6422_v39 }
 0x1d0   : > { %v1351_v43 = vpop.f32.mrb[116].mxu0  ;;  %v984_v61 = vpop.f32.mrb[116].mxu1 }
 0x1d1   : > { %v1488_v29 = vrot.slane %v1351_v43, 2  ;;  %v4957_v6 = vpop.f32.mrb[117].mxu0  ;;  %v1115_v31 = vrot.slane %v984_v61, 1  ;;  %v4843_v9 = vpop.f32.mrb[117].mxu1 }
 0x1d2   : > { %v1354_v19 = vpop.f32.mrb[118].mxu0  ;;  %v987_v24 = vpop.f32.mrb[118].mxu1 }
 0x1d3   : > { %v1489_v55 = vrot.slane %v1354_v19, 2  ;;  %v4958_v22 = vpop.f32.mrb[119].mxu0  ;;  %v1522_v30 = vsel %vm1508_vm4, %v1487_v0, %v1488_v29  ;;  %v1116_v7 = vrot.slane %v987_v24, 1  ;;  %v4844_v48 = vpop.f32.mrb[119].mxu1  ;;  %v5787_v0 = vld [vmem:[%s5924_s26 + $0x70] sm:$0xff]  }
 0x1d4   : > { %v6687_v62 = vadd.f32 %v1522_v30, %v1186_v49 }
 0x1d5   : > { %5184 = vmatmul.mubr.msk.bf16.gmra.mrb[224].mxu0 %vm494_vm2, %v5785_v10  ;;  %v1521_v39 = vsel %vm1508_vm4, %v1488_v29, %v1489_v55  ;;  %v1147_v13 = vsel %vm1135_vm3, %v1115_v31, %v1116_v7  ;;  %5070 = vmatmul.mubr.msk.bf16.gmra.mrb[224].mxu1 %vm494_vm2, %v5786_v5 }
 0x1d6   : > { %5187 = vmatprep.mubr.msk.bf16.mxu0 %vm5859_vm1, %v8108_v1  ;;  %v6698_v50 = vadd.f32 %v1521_v39, %v1187_v23  ;;  %5073 = vmatprep.mubr.msk.bf16.mxu1 %vm5859_vm1, %v8108_v1  ;;  %v1188_v28 = vadd.f32 %v1147_v13, %v6248_v42 }
 0x1d8   : > { %v1359_v34 = vpop.f32.mrb[120].mxu0  ;;  %v992_v52 = vpop.f32.mrb[120].mxu1 }
 0x1d9   : > { %v4961_v16 = vpop.f32.mrb[121].mxu0  ;;  %v1117_v59 = vrot.slane %v992_v52, 1  ;;  %v4847_v32 = vpop.f32.mrb[121].mxu1  ;;  %v1490_v20 = vrot.slane %v1359_v34, 2  ;;  %v6728_v52 = vld [vmem:[%s5924_s26 + $0x78] sm:$0xff]  }
 0x1da   : > { %v1362_v17 = vpop.f32.mrb[122].mxu0  ;;  %v995_v18 = vpop.f32.mrb[122].mxu1 }
 0x1db   : > { %v1491_v2 = vrot.slane %v1362_v17, 2  ;;  %v4962_v49 = vpop.f32.mrb[123].mxu0  ;;  %v1146_v10 = vsel %vm1135_vm3, %v1116_v7, %v1117_v59  ;;  %v4848_v23 = vpop.f32.mrb[123].mxu1  ;;  %v1118_v29 = vrot.slane %v995_v18, 1 }
 0x1dc   : > { %v1189_v43 = vadd.f32 %v1146_v10, %v6252_v46 }
 0x1dd   : > { %5188 = vmatmul.mubr.msk.bf16.gmra.mrb[228].mxu0 %vm494_vm2, %v5786_v5  ;;  %v1520_v42 = vsel %vm1508_vm4, %v1490_v20, %v1491_v2  ;;  %5074 = vmatmul.mubr.msk.bf16.gmra.mrb[228].mxu1 %vm494_vm2, %v5787_v0 }
 0x1de   : > { %5191 = vmatprep.mubr.msk.bf16.mxu0 %vm5859_vm1, %v8108_v1  ;;  %v6713_v61 = vadd.f32 %v1520_v42, %v1188_v28  ;;  %5077 = vmatprep.mubr.msk.bf16.mxu1 %vm5859_vm1, %v8108_v1 }
 0x1e0   : > { %v1367_v6 = vpop.f32.mrb[124].mxu0  ;;  %v1000_v31 = vpop.f32.mrb[124].mxu1 }
 0x1e1   : > { %v1492_v9 = vrot.slane %v1367_v6, 2  ;;  %v4965_v19 = vpop.f32.mrb[125].mxu0  ;;  %v1119_v24 = vrot.slane %v1000_v31, 1  ;;  %v4851_v55 = vpop.f32.mrb[125].mxu1 }
 0x1e2   : > { %v1370_v46 = vpop.f32.mrb[126].mxu0  ;;  %v1003_v22 = vpop.f32.mrb[126].mxu1 }
 0x1e3   : > { %v4966_v30 = vpop.f32.mrb[127].mxu0  ;;  %v1519_v7 = vsel %vm1508_vm4, %v1491_v2, %v1492_v9  ;;  %v1145_v48 = vsel %vm1135_vm3, %v1118_v29, %v1119_v24  ;;  %v1120_v39 = vrot.slane %v1003_v22, 1  ;;  %v4852_v13 = vpop.f32.mrb[127].mxu1  ;;  %v1493_v17 = vrot.slane %v1370_v46, 2  ;;  %v6748_v9 = vld [vmem:[%s5924_s26 + $0x80] sm:$0xff]  }
 0x1e4   : > { %v6721_v5 = vadd.f32 %v1519_v7, %v1189_v43  ;;  %v1190_v28 = vadd.f32 %v1145_v48, %v6264_v54 }
 0x1e5   : > { %5192 = vmatmul.mubr.msk.bf16.gmra.mrb[232].mxu0 %vm494_vm2, %v5787_v0  ;;  %v1144_v34 = vsel %vm1135_vm3, %v1119_v24, %v1120_v39  ;;  %5078 = vmatmul.mubr.msk.bf16.gmra.mrb[232].mxu1 %vm494_vm2, %v6728_v52 }
 0x1e6   : > { %5195 = vmatprep.mubr.msk.bf16.mxu0 %vm5859_vm1, %v8108_v1  ;;  %5081 = vmatprep.mubr.msk.bf16.mxu1 %vm5859_vm1, %v8108_v1  ;;  %v1191_v16 = vadd.f32 %v1144_v34, %v6276_v58 }
 0x1e8   : > { %v1375_v59 = vpop.f32.mrb[128].mxu0  ;;  %v1008_v32 = vpop.f32.mrb[128].mxu1 }
 0x1e9   : > { %v1494_v54 = vrot.slane %v1375_v59, 2  ;;  %v4969_v20 = vpop.f32.mrb[129].mxu0  ;;  %v1121_v2 = vrot.slane %v1008_v32, 1  ;;  %v4855_v49 = vpop.f32.mrb[129].mxu1  ;;  %v6767_v32 = vld [vmem:[%s5924_s26 + $0x88] sm:$0xff]  }
 0x1ea   : > { %v1378_v18 = vpop.f32.mrb[130].mxu0  ;;  %v1011_v10 = vpop.f32.mrb[130].mxu1 }
 0x1eb   : > { %v1495_v23 = vrot.slane %v1378_v18, 2  ;;  %v4970_v42 = vpop.f32.mrb[131].mxu0  ;;  %v1518_v43 = vsel %vm1508_vm4, %v1493_v17, %v1494_v54  ;;  %v1122_v0 = vrot.slane %v1011_v10, 1  ;;  %v4856_v29 = vpop.f32.mrb[131].mxu1 }
 0x1ec   : > { %v6739_v6 = vadd.f32 %v1518_v43, %v1190_v28 }
 0x1ed   : > { %5196 = vmatmul.mubr.msk.bf16.gmra.mrb[236].mxu0 %vm494_vm2, %v6728_v52  ;;  %v1517_v58 = vsel %vm1508_vm4, %v1494_v54, %v1495_v23  ;;  %v1143_v31 = vsel %vm1135_vm3, %v1121_v2, %v1122_v0  ;;  %5082 = vmatmul.mubr.msk.bf16.gmra.mrb[236].mxu1 %vm494_vm2, %v6748_v9 }
 0x1ee   : > { %5199 = vmatprep.mubr.msk.bf16.mxu0 %vm5859_vm1, %v8108_v1  ;;  %v6754_v19 = vadd.f32 %v1517_v58, %v1191_v16  ;;  %5085 = vmatprep.mubr.msk.bf16.mxu1 %vm5859_vm1, %v8108_v1  ;;  %v1192_v24 = vadd.f32 %v1143_v31, %v6288_v3 }
 0x1f0   : > { %v1383_v55 = vpop.f32.mrb[132].mxu0  ;;  %v1016_v46 = vpop.f32.mrb[132].mxu1 }
 0x1f1   : > { %v4973_v22 = vpop.f32.mrb[133].mxu0  ;;  %v1123_v30 = vrot.slane %v1016_v46, 1  ;;  %v4859_v48 = vpop.f32.mrb[133].mxu1  ;;  %v1496_v39 = vrot.slane %v1383_v55, 2 }
 0x1f2   : > { %v1386_v7 = vpop.f32.mrb[134].mxu0  ;;  %v1019_v34 = vpop.f32.mrb[134].mxu1 }
 0x1f3   : > { %v1497_v13 = vrot.slane %v1386_v7, 2  ;;  %v4974_v28 = vpop.f32.mrb[135].mxu0  ;;  %v1142_v16 = vsel %vm1135_vm3, %v1122_v0, %v1123_v30  ;;  %v4860_v59 = vpop.f32.mrb[135].mxu1  ;;  %v1124_v20 = vrot.slane %v1019_v34, 1  ;;  %v6789_v30 = vld [vmem:[%s5924_s26 + $0x90] sm:$0xff]  }
 0x1f4   : > { %v1193_v17 = vadd.f32 %v1142_v16, %v6292_v25 }
 0x1f5   : > { %5200 = vmatmul.mubr.msk.bf16.gmra.mrb[240].mxu0 %vm494_vm2, %v6748_v9  ;;  %v1516_v3 = vsel %vm1508_vm4, %v1496_v39, %v1497_v13  ;;  %5086 = vmatmul.mubr.msk.bf16.gmra.mrb[240].mxu1 %vm494_vm2, %v6767_v32 }
 0x1f6   : > { %5203 = vmatprep.mubr.msk.bf16.mxu0 %vm5859_vm1, %v8108_v1  ;;  %v6773_v54 = vadd.f32 %v1516_v3, %v1192_v24  ;;  %5089 = vmatprep.mubr.msk.bf16.mxu1 %vm5859_vm1, %v8108_v1 }
 0x1f8   : > { %v1391_v2 = vpop.f32.mrb[136].mxu0  ;;  %v1024_v49 = vpop.f32.mrb[136].mxu1 }
 0x1f9   : > { %v1498_v18 = vrot.slane %v1391_v2, 2  ;;  %v4977_v10 = vpop.f32.mrb[137].mxu0  ;;  %v1125_v25 = vrot.slane %v1024_v49, 1  ;;  %v4863_v23 = vpop.f32.mrb[137].mxu1 }
 0x1fa   : > { %v1394_v42 = vpop.f32.mrb[138].mxu0  ;;  %v1027_v43 = vpop.f32.mrb[138].mxu1  ;;  %v6809_v23 = vld [vmem:[%s5924_s26 + $0x98] sm:$0xff]  }
 0x1fb   : > { %v4978_v0 = vpop.f32.mrb[139].mxu0  ;;  %v1515_v29 = vsel %vm1508_vm4, %v1497_v13, %v1498_v18  ;;  %v1141_v58 = vsel %vm1135_vm3, %v1124_v20, %v1125_v25  ;;  %v1126_v31 = vrot.slane %v1027_v43, 1  ;;  %v4864_v24 = vpop.f32.mrb[139].mxu1  ;;  %v1499_v39 = vrot.slane %v1394_v42, 2 }
 0x1fc   : > { %v6781_v55 = vadd.f32 %v1515_v29, %v1193_v17  ;;  %v1194_v46 = vadd.f32 %v1141_v58, %v6304_v38 }
 0x1fd   : > { %5204 = vmatmul.mubr.msk.bf16.gmra.mrb[244].mxu0 %vm494_vm2, %v6767_v32  ;;  %v1140_v22 = vsel %vm1135_vm3, %v1125_v25, %v1126_v31  ;;  %5090 = vmatmul.mubr.msk.bf16.gmra.mrb[244].mxu1 %vm494_vm2, %v6789_v30 }
 0x1fe   : > { %5207 = vmatprep.mubr.msk.bf16.mxu0 %vm5859_vm1, %v8108_v1  ;;  %5093 = vmatprep.mubr.msk.bf16.mxu1 %vm5859_vm1, %v8108_v1  ;;  %v1195_v7 = vadd.f32 %v1140_v22, %v6316_v44 }
 0x200   : > { %v1399_v48 = vpop.f32.mrb[140].mxu0  ;;  %v1032_v13 = vpop.f32.mrb[140].mxu1 }
 0x201   : > { %v1500_v38 = vrot.slane %v1399_v48, 2  ;;  %v4981_v28 = vpop.f32.mrb[141].mxu0  ;;  %v1127_v34 = vrot.slane %v1032_v13, 1  ;;  %v4867_v16 = vpop.f32.mrb[141].mxu1 }
 0x202   : > { %v1402_v59 = vpop.f32.mrb[142].mxu0  ;;  %v1035_v3 = vpop.f32.mrb[142].mxu1 }
 0x203   : > { %v1501_v17 = vrot.slane %v1402_v59, 2  ;;  %v4982_v20 = vpop.f32.mrb[143].mxu0  ;;  %v1514_v2 = vsel %vm1508_vm4, %v1499_v39, %v1500_v38  ;;  %v1128_v49 = vrot.slane %v1035_v3, 1  ;;  %v4868_v18 = vpop.f32.mrb[143].mxu1 }
 0x204   : > { %v6800_v10 = vadd.f32 %v1514_v2, %v1194_v46 }
 0x205   : > { %5208 = vmatmul.mubr.msk.bf16.gmra.mrb[248].mxu0 %vm494_vm2, %v6789_v30  ;;  %v1513_v44 = vsel %vm1508_vm4, %v1500_v38, %v1501_v17  ;;  %v1139_v25 = vsel %vm1135_vm3, %v1127_v34, %v1128_v49  ;;  %5094 = vmatmul.mubr.msk.bf16.gmra.mrb[248].mxu1 %vm494_vm2, %v6809_v23  ;;  %v6828_v34 = vld [vmem:[%s5924_s26 + $0xa0] sm:$0xff]  }
 0x206   : > { %5211 = vmatprep.mubr.msk.bf16.mxu0 %vm5859_vm1, %v8108_v1  ;;  %v6815_v42 = vadd.f32 %v1513_v44, %v1195_v7  ;;  %5097 = vmatprep.mubr.msk.bf16.mxu1 %vm5859_vm1, %v8108_v1  ;;  %v1196_v43 = vadd.f32 %v1139_v25, %v6328_v53 }
 0x208   : > { %v1407_v0 = vpop.f32.mrb[144].mxu0  ;;  %v1040_v29 = vpop.f32.mrb[144].mxu1 }
 0x209   : > { %v4985_v58 = vpop.f32.mrb[145].mxu0  ;;  %v1129_v31 = vrot.slane %v1040_v29, 1  ;;  %v4871_v46 = vpop.f32.mrb[145].mxu1  ;;  %v1502_v22 = vrot.slane %v1407_v0, 2 }
 0x20a   : > { %v1410_v24 = vpop.f32.mrb[146].mxu0  ;;  %v1043_v13 = vpop.f32.mrb[146].mxu1  ;;  %v6848_v46 = vld [vmem:[%s5924_s26 + $0xa8] sm:$0xff]  }
 0x20b   : > { %v1503_v48 = vrot.slane %v1410_v24, 2  ;;  %v4986_v39 = vpop.f32.mrb[147].mxu0  ;;  %v4872_v38 = vpop.f32.mrb[147].mxu1  ;;  %v1138_v7 = vsel %vm1135_vm3, %v1128_v49, %v1129_v31  ;;  %v1130_v59 = vrot.slane %v1043_v13, 1 }
 0x20c   : > { %v1197_v28 = vadd.f32 %v1138_v7, %v6332_v60 }
 0x20d   : > { %5212 = vmatmul.mubr.msk.bf16.gmra.mrb[252].mxu0 %vm494_vm2, %v6809_v23  ;;  %v1512_v53 = vsel %vm1508_vm4, %v1502_v22, %v1503_v48  ;;  %5098 = vmatmul.mubr.msk.bf16.gmra.mrb[252].mxu1 %vm494_vm2, %v6828_v34 }
 0x20e   : > { %5215 = vmatprep.mubr.msk.bf16.mxu0 %vm5859_vm1, %v8108_v1  ;;  %v6834_v16 = vadd.f32 %v1512_v53, %v1196_v43  ;;  %5101 = vmatprep.mubr.msk.bf16.mxu1 %vm5859_vm1, %v8108_v1 }
 0x210   : > { %v1415_v3 = vpop.f32.mrb[148].mxu0  ;;  %v1048_v17 = vpop.f32.mrb[148].mxu1 }
 0x211   : > { %v1504_v20 = vrot.slane %v1415_v3, 2  ;;  %v4989_v2 = vpop.f32.mrb[149].mxu0  ;;  %v1131_v60 = vrot.slane %v1048_v17, 1  ;;  %v4875_v49 = vpop.f32.mrb[149].mxu1 }
 0x212   : > { %v1418_v18 = vpop.f32.mrb[150].mxu0  ;;  %v1051_v44 = vpop.f32.mrb[150].mxu1  ;;  %v6868_v49 = vld [vmem:[%s5924_s26 + $0xb0] sm:$0xff]  }
 0x213   : > { %v4990_v25 = vpop.f32.mrb[151].mxu0  ;;  %v1511_v0 = vsel %vm1508_vm4, %v1503_v48, %v1504_v20  ;;  %v1132_v29 = vrot.slane %v1051_v44, 1  ;;  %v4876_v43 = vpop.f32.mrb[151].mxu1  ;;  %v1137_v31 = vsel %vm1135_vm3, %v1130_v59, %v1131_v60  ;;  %v1505_v13 = vrot.slane %v1418_v18, 2 }
 0x214   : > { %v6840_v58 = vadd.f32 %v1511_v0, %v1197_v28  ;;  %v1198_v24 = vadd.f32 %v1137_v31, %v6344_v27 }
 0x215   : > { %5216 = vmatmul.mubr.msk.bf16.gmra.mrb[0].mxu0 %vm494_vm2, %v6828_v34  ;;  %5102 = vmatmul.mubr.msk.bf16.gmra.mrb[0].mxu1 %vm494_vm2, %v6848_v46  ;;  %v1136_v22 = vsel %vm1135_vm3, %v1131_v60, %v1132_v29 }
 0x216   : > { %5219 = vmatprep.mubr.msk.bf16.mxu0 %vm5859_vm1, %v8108_v1  ;;  %5105 = vmatprep.mubr.msk.bf16.mxu1 %vm5859_vm1, %v8108_v1  ;;  %v1199_v48 = vadd.f32 %v1136_v22, %v6356_v33 }
 0x218   : > { %v1423_v39 = vpop.f32.mrb[152].mxu0  ;;  %v1056_v7 = vpop.f32.mrb[152].mxu1 }
 0x219   : > { %v1506_v27 = vrot.slane %v1423_v39, 2  ;;  %v4993_v38 = vpop.f32.mrb[153].mxu0  ;;  %v4879_v28 = vpop.f32.mrb[153].mxu1  ;;  %v6881_v39 = vld [vmem:[%s5924_s26 + $0xb8] sm:$0xff]  }
 0x21a   : > { %v1426_v53 = vpop.f32.mrb[154].mxu0  ;;  %v1058_v17 = vpop.f32.mrb[154].mxu1 }
 0x21b   : > { %v1507_v59 = vrot.slane %v1426_v53, 2  ;;  %v4994_v3 = vpop.f32.mrb[155].mxu0  ;;  %v1510_v20 = vsel %vm1508_vm4, %v1505_v13, %v1506_v27  ;;  %v4880_v2 = vpop.f32.mrb[155].mxu1 }
 0x21c   : > { %v6861_v60 = vadd.f32 %v1510_v20, %v1198_v24  ;;  %v6892_v3 = vld [vmem:[%s5924_s26 + $0xc0] sm:$0xff]  }
 0x21d   : > { %5220 = vmatmul.mubr.msk.bf16.gmra.mrb[4].mxu0 %vm494_vm2, %v6848_v46  ;;  %v1509_v33 = vsel %vm1508_vm4, %v1506_v27, %v1507_v59  ;;  %5106 = vmatmul.mubr.msk.bf16.gmra.mrb[4].mxu1 %vm494_vm2, %v6868_v49 }
 0x21e   : > { %5223 = vmatprep.mubr.msk.bf16.mxu0 %vm5859_vm1, %v8108_v1  ;;  %v6874_v18 = vadd.f32 %v1509_v33, %v1199_v48  ;;  %5109 = vmatprep.mubr.msk.bf16.mxu1 %vm5859_vm1, %v8108_v1 }
 0x220   : > { %v1431_v44 = vpop.f32.mrb[156].mxu0  ;;  %v1062_v0 = vpop.f32.mrb[156].mxu1 }
 0x221   : > { %v4997_v25 = vpop.f32.mrb[157].mxu0  ;;  %v4883_v43 = vpop.f32.mrb[157].mxu1 }
 0x222   : > { %v1433_v29 = vpop.f32.mrb[158].mxu0  ;;  %v1064_v24 = vpop.f32.mrb[158].mxu1  ;;  %v6903_v43 = vld [vmem:[%s5924_s26 + $0xc8] sm:$0xff]  }
 0x223   : > { %v4998_v31 = vpop.f32.mrb[159].mxu0  ;;  %v4884_v22 = vpop.f32.mrb[159].mxu1 }
 0x225   : > { %5224 = vmatmul.mubr.msk.bf16.gmra.mrb[8].mxu0 %vm494_vm2, %v6868_v49  ;;  %5110 = vmatmul.mubr.msk.bf16.gmra.mrb[8].mxu1 %vm494_vm2, %v6881_v39 }
 0x226   : > { %5227 = vmatprep.mubr.msk.bf16.mxu0 %vm5859_vm1, %v8108_v1  ;;  %5113 = vmatprep.mubr.msk.bf16.mxu1 %vm5859_vm1, %v8108_v1 }
 0x228   : > { %v1437_v48 = vpop.f32.mrb[160].mxu0  ;;  %v1068_v27 = vpop.f32.mrb[160].mxu1 }
 0x229   : > { %v5001_v13 = vpop.f32.mrb[161].mxu0  ;;  %v4887_v7 = vpop.f32.mrb[161].mxu1 }
 0x22a   : > { %v1439_v38 = vpop.f32.mrb[162].mxu0  ;;  %v1070_v28 = vpop.f32.mrb[162].mxu1 }
 0x22b   : > { %v5002_v53 = vpop.f32.mrb[163].mxu0  ;;  %v4888_v59 = vpop.f32.mrb[163].mxu1 }
 0x22c   : > { %v6914_v53 = vld [vmem:[%s5924_s26 + $0xd0] sm:$0xff]  }
 0x22d   : > { %5228 = vmatmul.mubr.msk.bf16.gmra.mrb[12].mxu0 %vm494_vm2, %v6881_v39  ;;  %5114 = vmatmul.mubr.msk.bf16.gmra.mrb[12].mxu1 %vm494_vm2, %v6892_v3 }
 0x22e   : > { %5231 = vmatprep.mubr.msk.bf16.mxu0 %vm5859_vm1, %v8108_v1  ;;  %5117 = vmatprep.mubr.msk.bf16.mxu1 %vm5859_vm1, %v8108_v1 }
 0x230   : > { %v1443_v17 = vpop.f32.mrb[164].mxu0  ;;  %v1074_v2 = vpop.f32.mrb[164].mxu1 }
 0x231   : > { %v5005_v20 = vpop.f32.mrb[165].mxu0  ;;  %v4891_v44 = vpop.f32.mrb[165].mxu1 }
 0x232   : > { %v1445_v33 = vpop.f32.mrb[166].mxu0  ;;  %v1076_v0 = vpop.f32.mrb[166].mxu1 }
 0x233   : > { %v5006_v25 = vpop.f32.mrb[167].mxu0  ;;  %v4892_v29 = vpop.f32.mrb[167].mxu1  ;;  %v6925_v0 = vld [vmem:[%s5924_s26 + $0xd8] sm:$0xff]  }
 0x235   : > { %5232 = vmatmul.mubr.msk.bf16.gmra.mrb[16].mxu0 %vm494_vm2, %v6892_v3  ;;  %5118 = vmatmul.mubr.msk.bf16.gmra.mrb[16].mxu1 %vm494_vm2, %v6903_v43 }
 0x236   : > { %5235 = vmatprep.mubr.msk.bf16.mxu0 %vm5859_vm1, %v8108_v1  ;;  %5121 = vmatprep.mubr.msk.bf16.mxu1 %vm5859_vm1, %v8108_v1 }
 0x238   : > { %v1449_v31 = vpop.f32.mrb[168].mxu0  ;;  %v1080_v22 = vpop.f32.mrb[168].mxu1 }
 0x239   : > { %v5009_v24 = vpop.f32.mrb[169].mxu0  ;;  %v4895_v13 = vpop.f32.mrb[169].mxu1 }
 0x23a   : > { %v1451_v48 = vpop.f32.mrb[170].mxu0  ;;  %v1082_v38 = vpop.f32.mrb[170].mxu1 }
 0x23b   : > { %v5010_v27 = vpop.f32.mrb[171].mxu0  ;;  %v4896_v7 = vpop.f32.mrb[171].mxu1 }
 0x23d   : > { %5236 = vmatmul.mubr.msk.bf16.gmra.mrb[20].mxu0 %vm494_vm2, %v6903_v43  ;;  %5122 = vmatmul.mubr.msk.bf16.gmra.mrb[20].mxu1 %vm494_vm2, %v6914_v53 }
 0x23e   : > { %5239 = vmatprep.mubr.msk.bf16.mxu0 %vm5859_vm1, %v8108_v1  ;;  %5125 = vmatprep.mubr.msk.bf16.mxu1 %vm5859_vm1, %v8108_v1 }
 0x240   : > { %v1455_v28 = vpop.f32.mrb[172].mxu0  ;;  %v1612_v17 = vpop.f32.mrb[172].mxu1 }
 0x241   : > { %v5013_v59 = vpop.f32.mrb[173].mxu0  ;;  %v5019_v2 = vpop.f32.mrb[173].mxu1  ;;  %v6937_v28 = vld [vmem:[%s5924_s26 + $0xe0] ss:$0 sps:$4 sm:$0xff]  }
 0x242   : > { %v1457_v20 = vpop.f32.mrb[174].mxu0  ;;  %v1614_v44 = vpop.f32.mrb[174].mxu1  ;;  %8131 = vst [vmem:[#allocation3_spill] sm:$0xff] %v6937_v28 }
 0x243   : > { %v5014_v33 = vpop.f32.mrb[175].mxu0  ;;  %v5020_v25 = vpop.f32.mrb[175].mxu1 }
 0x245   : > { %5240 = vmatmul.mubr.msk.bf16.gmra.mrb[24].mxu0 %vm494_vm2, %v6914_v53  ;;  %5126 = vmatmul.mubr.msk.bf16.gmra.mrb[24].mxu1 %vm494_vm2, %v6925_v0 }
 0x246   : > { %5243 = vmatprep.mubr.msk.bf16.mxu0 %vm5859_vm1, %v8108_v1  ;;  %5129 = vmatprep.mubr.msk.bf16.mxu1 %vm5859_vm1, %v8108_v1 }
 0x248   : > { %v1888_v29 = vpop.f32.mrb[176].mxu0  ;;  %v1618_v31 = vpop.f32.mrb[176].mxu1 }
 0x249   : > { %v5137_v24 = vpop.f32.mrb[177].mxu0  ;;  %v5023_v22 = vpop.f32.mrb[177].mxu1 }
 0x24a   : > { %v1890_v48 = vpop.f32.mrb[178].mxu0  ;;  %v1620_v13 = vpop.f32.mrb[178].mxu1  ;;  %v6953_v22 = vld [vmem:[%s5924_s26] sm:$0xff]  }
 0x24b   : > { %v5138_v27 = vpop.f32.mrb[179].mxu0  ;;  %v1817_v38 = vadd.f32 %v1620_v13, %v6448_v57  ;;  %v5024_v7 = vpop.f32.mrb[179].mxu1  ;;  %v4262_v57 = vld [vmem:[%s8104_s1 + $0xe] sm:$0x3]  ;;  %v4292_v48 = vld [vmem:[%s8104_s1 + $0x10] sm:$0x3] }
 0x24c   : > { %v2872_v24 = vsel %vm582_vm0, %v4262_v57, 0 }
 0x24d   : > { %5244 = vmatmul.mubr.msk.bf16.gmra.mrb[28].mxu0 %vm494_vm2, %v6925_v0  ;;  %5130 = vmatmul.mubr.msk.bf16.gmra.mrb[28].mxu1 %vm494_vm2, %v6937_v28 }
 0x24e   : > { %5247 = vmatprep.mubr.msk.bf16.mxu0 %vm5859_vm1, %v8108_v1  ;;  %5253 = vmatprep.mubr.msk.bf16.mxu1 %vm5859_vm1, %v8108_v1 }
 0x250   : > { %v1894_v59 = vpop.f32.mrb[180].mxu0  ;;  %v1625_v17 = vpop.f32.mrb[180].mxu1 }
 0x251   : > { %v5141_v20 = vpop.f32.mrb[181].mxu0  ;;  %v1818_v2 = vadd.f32 %v1625_v17, %v6460_v47  ;;  %v5027_v44 = vpop.f32.mrb[181].mxu1 }
 0x252   : > { %v1896_v33 = vpop.f32.mrb[182].mxu0  ;;  %v1628_v29 = vpop.f32.mrb[182].mxu1 }
 0x253   : > { %v5142_v25 = vpop.f32.mrb[183].mxu0  ;;  %v5028_v31 = vpop.f32.mrb[183].mxu1  ;;  %v2109_v13 = vrot.slane %v1896_v33, 1 }
 0x254   : > { %v3244_v31 = vsel %vm582_vm0, %v4292_v48, 0 }
 0x255   : > { %5248 = vmatmul.mubr.msk.bf16.gmra.mrb[32].mxu0 %vm494_vm2, %v6937_v28  ;;  %5254 = vmatmul.mubr.msk.bf16.vlgmr.msra.gmra.mrb[32].mxu1 %vm494_vm2, %v6953_v22 }
 0x256   : > { %5371 = vmatprep.mubr.msk.bf16.mxu0 %vm5859_vm1, %v8108_v1  ;;  %5257 = vmatprep.mubr.msk.bf16.mxu1 %vm5859_vm1, %v8108_v1 }
 0x257   : > { %5488 = vmatpush3.bf16.msra.mxu1 %v2872_v24 }
 0x258   : > { %v1901_v47 = vpop.f32.mrb[184].mxu0  ;;  %v1632_v27 = vpop.f32.mrb[184].mxu1 }
 0x259   : > { %v2110_v7 = vrot.slane %v1901_v47, 1  ;;  %v5145_v59 = vpop.f32.mrb[185].mxu0  ;;  %v1819_v17 = vadd.f32 %v1632_v27, %v6481_v36  ;;  %v5031_v20 = vpop.f32.mrb[185].mxu1  ;;  %v6976_v47 = vld [vmem:[%s5924_s26 + $0x8] sm:$0xff]  }
 0x25a   : > { %v1904_v57 = vpop.f32.mrb[186].mxu0  ;;  %v1635_v44 = vpop.f32.mrb[186].mxu1  ;;  %8132 = vst [vmem:[#allocation4_spill] sm:$0xff] %v6976_v47 }
 0x25b   : > { %v2111_v25 = vrot.slane %v1904_v57, 1  ;;  %v5146_v29 = vpop.f32.mrb[187].mxu0  ;;  %v2188_v24 = vsel %vm1135_vm3, %v2109_v13, %v2110_v7  ;;  %v1820_v1 = vadd.f32 %v1635_v44, %v6491_v45  ;;  %v5032_v28 = vpop.f32.mrb[187].mxu1  ;;  %v8133_v13 = vmov 0.0  }
 0x25c   : > { %v6969_v33 = vadd.f32 %v2188_v24, %v1817_v38 }
 0x25d   : > { %5372 = vmatmul.mubr.msk.bf16.vlgmr.msra.gmra.mrb[36].mxu0 %vm494_vm2, %v6953_v22  ;;  %v2187_v36 = vsel %vm1135_vm3, %v2110_v7, %v2111_v25  ;;  %5258 = vmatmul.mubr.msk.bf16.gmra.mrb[36].mxu1 %vm494_vm2, %v6976_v47 }
 0x25e   : > { %5606 = vmatpush3.bf16.msra.mxu0 %v3244_v31  ;;  %v6980_v48 = vadd.f32 %v2187_v36, %v1818_v2  ;;  %5261 = vmatprep.mubr.msk.bf16.mxu1 %vm5859_vm1, %v8133_v13  ;;  %v6992_v31 = vld [vmem:[%s5924_s26 + $0x10] sm:$0xff]  }
 0x25f   : > { %5375 = vmatprep.mubr.msk.bf16.mxu0 %vm5859_vm1, %v8133_v13  ;;  %8134 = vst [vmem:[#allocation5_spill] sm:$0xff] %v6992_v31 }
 0x260   : > { %v1909_v45 = vpop.f32.mrb[188].mxu0  ;;  %v1640_v38 = vpop.f32.mrb[188].mxu1 }
 0x261   : > { %v5149_v28 = vpop.f32.mrb[189].mxu0  ;;  %v5035_v27 = vpop.f32.mrb[189].mxu1  ;;  %v2112_v59 = vrot.slane %v1909_v45, 1 }
 0x262   : > { %v1912_v7 = vpop.f32.mrb[190].mxu0  ;;  %v1642_v20 = vpop.f32.mrb[190].mxu1 }
 0x263   : > { %v2113_v57 = vrot.slane %v1912_v7, 1  ;;  %v5150_v44 = vpop.f32.mrb[191].mxu0  ;;  %v1821_v25 = vadd.f32 %v1642_v20, %v6510_v63  ;;  %v5036_v2 = vpop.f32.mrb[191].mxu1 }
 0x265   : > { %5376 = vmatmul.mubr.msk.bf16.gmra.mrb[40].mxu0 %vm494_vm2, %v6976_v47  ;;  %v2186_v29 = vsel %vm1135_vm3, %v2112_v59, %v2113_v57  ;;  %5262 = vmatmul.mubr.msk.bf16.gmra.mrb[40].mxu1 %vm494_vm2, %v6992_v31 }
 0x266   : > { %5379 = vmatprep.mubr.msk.bf16.mxu0 %vm5859_vm1, %v8133_v13  ;;  %v6998_v24 = vadd.f32 %v2186_v29, %v1819_v17  ;;  %5265 = vmatprep.mubr.msk.bf16.mxu1 %vm5859_vm1, %v8133_v13  ;;  %v7010_v17 = vld [vmem:[%s5924_s26 + $0x18] sm:$0xff]  }
 0x268   : > { %v1917_v63 = vpop.f32.mrb[192].mxu0  ;;  %v1647_v36 = vpop.f32.mrb[192].mxu1 }
 0x269   : > { %v2114_v45 = vrot.slane %v1917_v63, 1  ;;  %v5153_v38 = vpop.f32.mrb[193].mxu0  ;;  %v1822_v28 = vadd.f32 %v1647_v36, %v6518_v51  ;;  %v5039_v7 = vpop.f32.mrb[193].mxu1 }
 0x26a   : > { %v1920_v27 = vpop.f32.mrb[194].mxu0  ;;  %v1650_v20 = vpop.f32.mrb[194].mxu1 }
 0x26b   : > { %v5154_v59 = vpop.f32.mrb[195].mxu0  ;;  %v2185_v44 = vsel %vm1135_vm3, %v2113_v57, %v2114_v45  ;;  %v5040_v2 = vpop.f32.mrb[195].mxu1  ;;  %v2115_v29 = vrot.slane %v1920_v27, 1 }
 0x26c   : > { %v7005_v47 = vadd.f32 %v2185_v44, %v1820_v1 }
 0x26d   : > { %5380 = vmatmul.mubr.msk.bf16.gmra.mrb[44].mxu0 %vm494_vm2, %v6992_v31  ;;  %5266 = vmatmul.mubr.msk.bf16.gmra.mrb[44].mxu1 %vm494_vm2, %v7010_v17 }
 0x26e   : > { %8135 = vst [vmem:[#allocation6_spill] sm:$0xff] %v7005_v47  ;;  %5383 = vmatprep.mubr.msk.bf16.mxu0 %vm5859_vm1, %v8133_v13  ;;  %5269 = vmatprep.mubr.msk.bf16.mxu1 %vm5859_vm1, %v8133_v13 }
 0x270   : > { %v1925_v51 = vpop.f32.mrb[196].mxu0  ;;  %v1654_v57 = vpop.f32.mrb[196].mxu1 }
 0x271   : > { %v2116_v1 = vrot.slane %v1925_v51, 1  ;;  %v5157_v63 = vpop.f32.mrb[197].mxu0  ;;  %v1823_v36 = vadd.f32 %v1654_v57, %v6534_v8  ;;  %v5043_v45 = vpop.f32.mrb[197].mxu1  ;;  %v7029_v8 = vld [vmem:[%s5924_s26 + $0x20] sm:$0xff]  }
 0x272   : > { %v1928_v38 = vpop.f32.mrb[198].mxu0  ;;  %v1657_v7 = vpop.f32.mrb[198].mxu1  ;;  %8136 = vst [vmem:[#allocation7_spill] sm:$0xff] %v7029_v8 }
 0x273   : > { %v2117_v59 = vrot.slane %v1928_v38, 1  ;;  %v5158_v20 = vpop.f32.mrb[199].mxu0  ;;  %v2184_v44 = vsel %vm1135_vm3, %v2115_v29, %v2116_v1  ;;  %v1824_v2 = vadd.f32 %v1657_v7, %v6546_v4  ;;  %v5044_v31 = vpop.f32.mrb[199].mxu1 }
 0x274   : > { %v7022_v47 = vadd.f32 %v2184_v44, %v1821_v25  ;;  %v7045_v20 = vld [vmem:[%s5924_s26 + $0x28] sm:$0xff]  }
 0x275   : > { %5384 = vmatmul.mubr.msk.bf16.gmra.mrb[48].mxu0 %vm494_vm2, %v7010_v17  ;;  %v2183_v27 = vsel %vm1135_vm3, %v2116_v1, %v2117_v59  ;;  %5270 = vmatmul.mubr.msk.bf16.gmra.mrb[48].mxu1 %vm494_vm2, %v7029_v8  ;;  %8137 = vst [vmem:[#allocation8_spill] sm:$0xff] %v7045_v20 }
 0x276   : > { %5387 = vmatprep.mubr.msk.bf16.mxu0 %vm5859_vm1, %v8133_v13  ;;  %v7035_v51 = vadd.f32 %v2183_v27, %v1822_v28  ;;  %5273 = vmatprep.mubr.msk.bf16.mxu1 %vm5859_vm1, %v8133_v13 }
 0x278   : > { %v1933_v4 = vpop.f32.mrb[200].mxu0  ;;  %v1662_v25 = vpop.f32.mrb[200].mxu1 }
 0x279   : > { %v5161_v31 = vpop.f32.mrb[201].mxu0  ;;  %v5047_v29 = vpop.f32.mrb[201].mxu1  ;;  %v2118_v1 = vrot.slane %v1933_v4, 1 }
 0x27a   : > { %v1936_v57 = vpop.f32.mrb[202].mxu0  ;;  %v1664_v63 = vpop.f32.mrb[202].mxu1 }
 0x27b   : > { %v2119_v45 = vrot.slane %v1936_v57, 1  ;;  %v5162_v38 = vpop.f32.mrb[203].mxu0  ;;  %v1825_v7 = vadd.f32 %v1664_v63, %v6562_v35  ;;  %v5048_v59 = vpop.f32.mrb[203].mxu1 }
 0x27d   : > { %5388 = vmatmul.mubr.msk.bf16.gmra.mrb[52].mxu0 %vm494_vm2, %v7029_v8  ;;  %v2182_v28 = vsel %vm1135_vm3, %v2118_v1, %v2119_v45  ;;  %5274 = vmatmul.mubr.msk.bf16.gmra.mrb[52].mxu1 %vm494_vm2, %v7045_v20 }
 0x27e   : > { %5391 = vmatprep.mubr.msk.bf16.mxu0 %vm5859_vm1, %v8133_v13  ;;  %v7051_v44 = vadd.f32 %v2182_v28, %v1823_v36  ;;  %5277 = vmatprep.mubr.msk.bf16.mxu1 %vm5859_vm1, %v8133_v13  ;;  %v7063_v36 = vld [vmem:[%s5924_s26 + $0x30] sm:$0xff]  }
 0x280   : > { %v1941_v35 = vpop.f32.mrb[204].mxu0  ;;  %v1669_v27 = vpop.f32.mrb[204].mxu1 }
 0x281   : > { %v2120_v4 = vrot.slane %v1941_v35, 1  ;;  %v5165_v25 = vpop.f32.mrb[205].mxu0  ;;  %v1826_v31 = vadd.f32 %v1669_v27, %v6570_v40  ;;  %v5051_v57 = vpop.f32.mrb[205].mxu1 }
 0x282   : > { %v1944_v29 = vpop.f32.mrb[206].mxu0  ;;  %v1672_v63 = vpop.f32.mrb[206].mxu1 }
 0x283   : > { %v5166_v1 = vpop.f32.mrb[207].mxu0  ;;  %v2181_v38 = vsel %vm1135_vm3, %v2119_v45, %v2120_v4  ;;  %v5052_v59 = vpop.f32.mrb[207].mxu1  ;;  %v2121_v28 = vrot.slane %v1944_v29, 1 }
 0x284   : > { %v7058_v8 = vadd.f32 %v2181_v38, %v1824_v2 }
 0x285   : > { %5392 = vmatmul.mubr.msk.bf16.gmra.mrb[56].mxu0 %vm494_vm2, %v7045_v20  ;;  %5278 = vmatmul.mubr.msk.bf16.gmra.mrb[56].mxu1 %vm494_vm2, %v7063_v36 }
 0x286   : > { %8138 = vst [vmem:[#allocation9_spill] sm:$0xff] %v7058_v8  ;;  %5395 = vmatprep.mubr.msk.bf16.mxu0 %vm5859_vm1, %v8133_v13  ;;  %5281 = vmatprep.mubr.msk.bf16.mxu1 %vm5859_vm1, %v8133_v13 }
 0x288   : > { %v1949_v40 = vpop.f32.mrb[208].mxu0  ;;  %v1676_v45 = vpop.f32.mrb[208].mxu1 }
 0x289   : > { %v2122_v2 = vrot.slane %v1949_v40, 1  ;;  %v5169_v35 = vpop.f32.mrb[209].mxu0  ;;  %v1827_v27 = vadd.f32 %v1676_v45, %v6586_v15  ;;  %v5055_v4 = vpop.f32.mrb[209].mxu1  ;;  %v7082_v15 = vld [vmem:[%s5924_s26 + $0x38] sm:$0xff]  }
 0x28a   : > { %v1952_v25 = vpop.f32.mrb[210].mxu0  ;;  %v1679_v57 = vpop.f32.mrb[210].mxu1  ;;  %8139 = vst [vmem:[#allocation10_spill] sm:$0xff] %v7082_v15 }
 0x28b   : > { %v2123_v1 = vrot.slane %v1952_v25, 1  ;;  %v5170_v63 = vpop.f32.mrb[211].mxu0  ;;  %v2180_v38 = vsel %vm1135_vm3, %v2121_v28, %v2122_v2  ;;  %v1828_v59 = vadd.f32 %v1679_v57, %v6598_v56  ;;  %v5056_v20 = vpop.f32.mrb[211].mxu1 }
 0x28c   : > { %v7075_v8 = vadd.f32 %v2180_v38, %v1825_v7  ;;  %v7098_v63 = vld [vmem:[%s5924_s26 + $0x40] sm:$0xff]  }
 0x28d   : > { %5396 = vmatmul.mubr.msk.bf16.gmra.mrb[60].mxu0 %vm494_vm2, %v7063_v36  ;;  %v2179_v29 = vsel %vm1135_vm3, %v2122_v2, %v2123_v1  ;;  %5282 = vmatmul.mubr.msk.bf16.gmra.mrb[60].mxu1 %vm494_vm2, %v7082_v15  ;;  %8140 = vst [vmem:[#allocation11_spill] sm:$0xff] %v7098_v63 }
 0x28e   : > { %5399 = vmatprep.mubr.msk.bf16.mxu0 %vm5859_vm1, %v8133_v13  ;;  %v7088_v40 = vadd.f32 %v2179_v29, %v1826_v31  ;;  %5285 = vmatprep.mubr.msk.bf16.mxu1 %vm5859_vm1, %v8133_v13 }
 0x290   : > { %v1957_v56 = vpop.f32.mrb[212].mxu0  ;;  %v1684_v7 = vpop.f32.mrb[212].mxu1 }
 0x291   : > { %v5173_v20 = vpop.f32.mrb[213].mxu0  ;;  %v5059_v28 = vpop.f32.mrb[213].mxu1  ;;  %v2124_v2 = vrot.slane %v1957_v56, 1 }
 0x292   : > { %v1960_v45 = vpop.f32.mrb[214].mxu0  ;;  %v1686_v35 = vpop.f32.mrb[214].mxu1 }
 0x293   : > { %v2125_v4 = vrot.slane %v1960_v45, 1  ;;  %v5174_v25 = vpop.f32.mrb[215].mxu0  ;;  %v1829_v57 = vadd.f32 %v1686_v35, %v6614_v37  ;;  %v5060_v1 = vpop.f32.mrb[215].mxu1 }
 0x295   : > { %5400 = vmatmul.mubr.msk.bf16.gmra.mrb[64].mxu0 %vm494_vm2, %v7082_v15  ;;  %v2178_v31 = vsel %vm1135_vm3, %v2124_v2, %v2125_v4  ;;  %5286 = vmatmul.mubr.msk.bf16.gmra.mrb[64].mxu1 %vm494_vm2, %v7098_v63 }
 0x296   : > { %5403 = vmatprep.mubr.msk.bf16.mxu0 %vm5859_vm1, %v8133_v13  ;;  %v7104_v38 = vadd.f32 %v2178_v31, %v1827_v27  ;;  %5289 = vmatprep.mubr.msk.bf16.mxu1 %vm5859_vm1, %v8133_v13  ;;  %v7116_v27 = vld [vmem:[%s5924_s26 + $0x48] sm:$0xff]  }
 0x298   : > { %v1965_v37 = vpop.f32.mrb[216].mxu0  ;;  %v1691_v29 = vpop.f32.mrb[216].mxu1 }
 0x299   : > { %v2126_v56 = vrot.slane %v1965_v37, 1  ;;  %v5177_v7 = vpop.f32.mrb[217].mxu0  ;;  %v1830_v20 = vadd.f32 %v1691_v29, %v6622_v14  ;;  %v5063_v45 = vpop.f32.mrb[217].mxu1 }
 0x29a   : > { %v1968_v28 = vpop.f32.mrb[218].mxu0  ;;  %v1694_v35 = vpop.f32.mrb[218].mxu1 }
 0x29b   : > { %v5178_v2 = vpop.f32.mrb[219].mxu0  ;;  %v2177_v25 = vsel %vm1135_vm3, %v2125_v4, %v2126_v56  ;;  %v5064_v1 = vpop.f32.mrb[219].mxu1  ;;  %v2127_v31 = vrot.slane %v1968_v28, 1 }
 0x29c   : > { %v7111_v15 = vadd.f32 %v2177_v25, %v1828_v59 }
 0x29d   : > { %5404 = vmatmul.mubr.msk.bf16.gmra.mrb[68].mxu0 %vm494_vm2, %v7098_v63  ;;  %5290 = vmatmul.mubr.msk.bf16.gmra.mrb[68].mxu1 %vm494_vm2, %v7116_v27 }
 0x29e   : > { %8141 = vst [vmem:[#allocation12_spill] sm:$0xff] %v7111_v15  ;;  %5407 = vmatprep.mubr.msk.bf16.mxu0 %vm5859_vm1, %v8133_v13  ;;  %5293 = vmatprep.mubr.msk.bf16.mxu1 %vm5859_vm1, %v8133_v13 }
 0x2a0   : > { %v1973_v14 = vpop.f32.mrb[220].mxu0  ;;  %v1698_v4 = vpop.f32.mrb[220].mxu1 }
 0x2a1   : > { %v2128_v59 = vrot.slane %v1973_v14, 1  ;;  %v5181_v37 = vpop.f32.mrb[221].mxu0  ;;  %v1831_v29 = vadd.f32 %v1698_v4, %v6638_v21  ;;  %v5067_v56 = vpop.f32.mrb[221].mxu1  ;;  %v7135_v21 = vld [vmem:[%s5924_s26 + $0x50] sm:$0xff]  }
 0x2a2   : > { %v1976_v7 = vpop.f32.mrb[222].mxu0  ;;  %v1701_v45 = vpop.f32.mrb[222].mxu1  ;;  %8142 = vst [vmem:[#allocation13_spill] sm:$0xff] %v7135_v21 }
 0x2a3   : > { %v2129_v2 = vrot.slane %v1976_v7, 1  ;;  %v5182_v35 = vpop.f32.mrb[223].mxu0  ;;  %v2176_v25 = vsel %vm1135_vm3, %v2127_v31, %v2128_v59  ;;  %v1832_v1 = vadd.f32 %v1701_v45, %v6649_v11  ;;  %v5068_v63 = vpop.f32.mrb[223].mxu1 }
 0x2a4   : > { %v7128_v15 = vadd.f32 %v2176_v25, %v1829_v57  ;;  %v7151_v35 = vld [vmem:[%s5924_s26 + $0x58] sm:$0xff]  }
 0x2a5   : > { %5408 = vmatmul.mubr.msk.bf16.gmra.mrb[72].mxu0 %vm494_vm2, %v7116_v27  ;;  %v2175_v28 = vsel %vm1135_vm3, %v2128_v59, %v2129_v2  ;;  %5294 = vmatmul.mubr.msk.bf16.gmra.mrb[72].mxu1 %vm494_vm2, %v7135_v21  ;;  %8143 = vst [vmem:[#allocation14_spill] sm:$0xff] %v7151_v35 }
 0x2a6   : > { %5411 = vmatprep.mubr.msk.bf16.mxu0 %vm5859_vm1, %v8133_v13  ;;  %v7141_v14 = vadd.f32 %v2175_v28, %v1830_v20  ;;  %5297 = vmatprep.mubr.msk.bf16.mxu1 %vm5859_vm1, %v8133_v13 }
 0x2a8   : > { %v1981_v11 = vpop.f32.mrb[224].mxu0  ;;  %v1706_v57 = vpop.f32.mrb[224].mxu1 }
 0x2a9   : > { %v5185_v63 = vpop.f32.mrb[225].mxu0  ;;  %v5071_v31 = vpop.f32.mrb[225].mxu1  ;;  %v2130_v59 = vrot.slane %v1981_v11, 1 }
 0x2aa   : > { %v1984_v4 = vpop.f32.mrb[226].mxu0  ;;  %v1708_v37 = vpop.f32.mrb[226].mxu1 }
 0x2ab   : > { %v2131_v56 = vrot.slane %v1984_v4, 1  ;;  %v5186_v7 = vpop.f32.mrb[227].mxu0  ;;  %v1833_v45 = vadd.f32 %v1708_v37, %v6664_v41  ;;  %v5072_v2 = vpop.f32.mrb[227].mxu1 }
 0x2ad   : > { %5412 = vmatmul.mubr.msk.bf16.gmra.mrb[76].mxu0 %vm494_vm2, %v7135_v21  ;;  %v2174_v20 = vsel %vm1135_vm3, %v2130_v59, %v2131_v56  ;;  %5298 = vmatmul.mubr.msk.bf16.gmra.mrb[76].mxu1 %vm494_vm2, %v7151_v35 }
 0x2ae   : > { %5415 = vmatprep.mubr.msk.bf16.mxu0 %vm5859_vm1, %v8133_v13  ;;  %v7157_v25 = vadd.f32 %v2174_v20, %v1831_v29  ;;  %5301 = vmatprep.mubr.msk.bf16.mxu1 %vm5859_vm1, %v8133_v13  ;;  %v7169_v29 = vld [vmem:[%s5924_s26 + $0x60] sm:$0xff]  }
 0x2b0   : > { %v1989_v41 = vpop.f32.mrb[228].mxu0  ;;  %v1713_v28 = vpop.f32.mrb[228].mxu1 }
 0x2b1   : > { %v2132_v11 = vrot.slane %v1989_v41, 1  ;;  %v5189_v57 = vpop.f32.mrb[229].mxu0  ;;  %v1834_v63 = vadd.f32 %v1713_v28, %v6672_v12  ;;  %v5075_v4 = vpop.f32.mrb[229].mxu1 }
 0x2b2   : > { %v1992_v31 = vpop.f32.mrb[230].mxu0  ;;  %v1716_v37 = vpop.f32.mrb[230].mxu1 }
 0x2b3   : > { %v5190_v59 = vpop.f32.mrb[231].mxu0  ;;  %v2173_v7 = vsel %vm1135_vm3, %v2131_v56, %v2132_v11  ;;  %v5076_v2 = vpop.f32.mrb[231].mxu1  ;;  %v2133_v20 = vrot.slane %v1992_v31, 1 }
 0x2b4   : > { %v7164_v21 = vadd.f32 %v2173_v7, %v1832_v1 }
 0x2b5   : > { %5416 = vmatmul.mubr.msk.bf16.gmra.mrb[80].mxu0 %vm494_vm2, %v7151_v35  ;;  %5302 = vmatmul.mubr.msk.bf16.gmra.mrb[80].mxu1 %vm494_vm2, %v7169_v29 }
 0x2b6   : > { %8144 = vst [vmem:[#allocation15_spill] sm:$0xff] %v7164_v21  ;;  %5419 = vmatprep.mubr.msk.bf16.mxu0 %vm5859_vm1, %v8133_v13  ;;  %5305 = vmatprep.mubr.msk.bf16.mxu1 %vm5859_vm1, %v8133_v13 }
 0x2b8   : > { %v1997_v12 = vpop.f32.mrb[232].mxu0  ;;  %v1720_v56 = vpop.f32.mrb[232].mxu1 }
 0x2b9   : > { %v2134_v1 = vrot.slane %v1997_v12, 1  ;;  %v5193_v41 = vpop.f32.mrb[233].mxu0  ;;  %v1835_v28 = vadd.f32 %v1720_v56, %v6687_v62  ;;  %v5079_v11 = vpop.f32.mrb[233].mxu1  ;;  %v7188_v62 = vld [vmem:[%s5924_s26 + $0x68] sm:$0xff]  }
 0x2ba   : > { %v2000_v57 = vpop.f32.mrb[234].mxu0  ;;  %v1723_v4 = vpop.f32.mrb[234].mxu1  ;;  %8145 = vst [vmem:[#allocation16_spill] sm:$0xff] %v7188_v62 }
 0x2bb   : > { %v2135_v59 = vrot.slane %v2000_v57, 1  ;;  %v5194_v37 = vpop.f32.mrb[235].mxu0  ;;  %v2172_v7 = vsel %vm1135_vm3, %v2133_v20, %v2134_v1  ;;  %v1836_v2 = vadd.f32 %v1723_v4, %v6698_v50  ;;  %v5080_v35 = vpop.f32.mrb[235].mxu1 }
 0x2bc   : > { %v7181_v21 = vadd.f32 %v2172_v7, %v1833_v45  ;;  %v7204_v37 = vld [vmem:[%s5924_s26 + $0x70] sm:$0xff]  }
 0x2bd   : > { %5420 = vmatmul.mubr.msk.bf16.gmra.mrb[84].mxu0 %vm494_vm2, %v7169_v29  ;;  %v2171_v31 = vsel %vm1135_vm3, %v2134_v1, %v2135_v59  ;;  %5306 = vmatmul.mubr.msk.bf16.gmra.mrb[84].mxu1 %vm494_vm2, %v7188_v62  ;;  %8146 = vst [vmem:[#allocation17_spill] sm:$0xff] %v7204_v37 }
 0x2be   : > { %5423 = vmatprep.mubr.msk.bf16.mxu0 %vm5859_vm1, %v8133_v13  ;;  %v7194_v12 = vadd.f32 %v2171_v31, %v1834_v63  ;;  %5309 = vmatprep.mubr.msk.bf16.mxu1 %vm5859_vm1, %v8133_v13 }
 0x2c0   : > { %v2005_v50 = vpop.f32.mrb[236].mxu0  ;;  %v1728_v45 = vpop.f32.mrb[236].mxu1 }
 0x2c1   : > { %v5197_v35 = vpop.f32.mrb[237].mxu0  ;;  %v5083_v20 = vpop.f32.mrb[237].mxu1  ;;  %v2136_v1 = vrot.slane %v2005_v50, 1 }
 0x2c2   : > { %v2008_v56 = vpop.f32.mrb[238].mxu0  ;;  %v1730_v41 = vpop.f32.mrb[238].mxu1 }
 0x2c3   : > { %v2137_v11 = vrot.slane %v2008_v56, 1  ;;  %v5198_v57 = vpop.f32.mrb[239].mxu0  ;;  %v1837_v4 = vadd.f32 %v1730_v41, %v6713_v61  ;;  %v5084_v59 = vpop.f32.mrb[239].mxu1 }
 0x2c5   : > { %5424 = vmatmul.mubr.msk.bf16.gmra.mrb[88].mxu0 %vm494_vm2, %v7188_v62  ;;  %v2170_v63 = vsel %vm1135_vm3, %v2136_v1, %v2137_v11  ;;  %5310 = vmatmul.mubr.msk.bf16.gmra.mrb[88].mxu1 %vm494_vm2, %v7204_v37 }
 0x2c6   : > { %5427 = vmatprep.mubr.msk.bf16.mxu0 %vm5859_vm1, %v8133_v13  ;;  %v7210_v7 = vadd.f32 %v2170_v63, %v1835_v28  ;;  %5313 = vmatprep.mubr.msk.bf16.mxu1 %vm5859_vm1, %v8133_v13 }
 0x2c8   : > { %v2013_v61 = vpop.f32.mrb[240].mxu0  ;;  %v1735_v31 = vpop.f32.mrb[240].mxu1 }
 0x2c9   : > { %v2138_v50 = vrot.slane %v2013_v61, 1  ;;  %v5201_v45 = vpop.f32.mrb[241].mxu0  ;;  %v1838_v35 = vadd.f32 %v1735_v31, %v6721_v5  ;;  %v5087_v56 = vpop.f32.mrb[241].mxu1 }
 0x2ca   : > { %v2016_v20 = vpop.f32.mrb[242].mxu0  ;;  %v1738_v41 = vpop.f32.mrb[242].mxu1 }
 0x2cb   : > { %v5202_v1 = vpop.f32.mrb[243].mxu0  ;;  %v2169_v57 = vsel %vm1135_vm3, %v2137_v11, %v2138_v50  ;;  %v5088_v59 = vpop.f32.mrb[243].mxu1  ;;  %v2139_v28 = vrot.slane %v2016_v20, 1 }
 0x2cc   : > { %v7217_v62 = vadd.f32 %v2169_v57, %v1836_v2 }
 0x2cd   : > { %5428 = vmatmul.mubr.msk.bf16.gmra.mrb[92].mxu0 %vm494_vm2, %v7204_v37  ;;  %5314 = vmatmul.mubr.msk.bf16.gmra.mrb[92].mxu1 %vm494_vm2, %v6728_v52  ;;  %v7234_v37 = vld [vmem:[%s5924_s26 + $0x78] sm:$0xff]  }
 0x2ce   : > { %5431 = vmatprep.mubr.msk.bf16.mxu0 %vm5859_vm1, %v8133_v13  ;;  %5317 = vmatprep.mubr.msk.bf16.mxu1 %vm5859_vm1, %v8133_v13 }
 0x2d0   : > { %v2021_v5 = vpop.f32.mrb[244].mxu0  ;;  %v1742_v63 = vpop.f32.mrb[244].mxu1 }
 0x2d1   : > { %v2140_v11 = vrot.slane %v2021_v5, 1  ;;  %v5205_v61 = vpop.f32.mrb[245].mxu0  ;;  %v1839_v2 = vadd.f32 %v1742_v63, %v6739_v6  ;;  %v5091_v31 = vpop.f32.mrb[245].mxu1 }
 0x2d2   : > { %v2024_v50 = vpop.f32.mrb[246].mxu0  ;;  %v1745_v45 = vpop.f32.mrb[246].mxu1 }
 0x2d3   : > { %v2141_v56 = vrot.slane %v2024_v50, 1  ;;  %v5206_v1 = vpop.f32.mrb[247].mxu0  ;;  %v2168_v52 = vsel %vm1135_vm3, %v2139_v28, %v2140_v11  ;;  %v1840_v41 = vadd.f32 %v1745_v45, %v6754_v19  ;;  %v5092_v57 = vpop.f32.mrb[247].mxu1 }
 0x2d4   : > { %v7231_v59 = vadd.f32 %v2168_v52, %v1837_v4 }
 0x2d5   : > { %5432 = vmatmul.mubr.msk.bf16.gmra.mrb[96].mxu0 %vm494_vm2, %v7234_v37  ;;  %v2167_v6 = vsel %vm1135_vm3, %v2140_v11, %v2141_v56  ;;  %5318 = vmatmul.mubr.msk.bf16.gmra.mrb[96].mxu1 %vm494_vm2, %v6748_v9  ;;  %v7250_v56 = vld [vmem:[%s5924_s26 + $0x80] sm:$0xff]  }
 0x2d6   : > { %5435 = vmatprep.mubr.msk.bf16.mxu0 %vm5859_vm1, %v8133_v13  ;;  %v7244_v20 = vadd.f32 %v2167_v6, %v1838_v35  ;;  %5321 = vmatprep.mubr.msk.bf16.mxu1 %vm5859_vm1, %v8133_v13 }
 0x2d8   : > { %v2029_v19 = vpop.f32.mrb[248].mxu0  ;;  %v1750_v4 = vpop.f32.mrb[248].mxu1 }
 0x2d9   : > { %v5209_v5 = vpop.f32.mrb[249].mxu0  ;;  %v5095_v28 = vpop.f32.mrb[249].mxu1  ;;  %v2142_v61 = vrot.slane %v2029_v19, 1 }
 0x2da   : > { %v2032_v63 = vpop.f32.mrb[250].mxu0  ;;  %v1752_v31 = vpop.f32.mrb[250].mxu1 }
 0x2db   : > { %v2143_v11 = vrot.slane %v2032_v63, 1  ;;  %v5210_v50 = vpop.f32.mrb[251].mxu0  ;;  %v1841_v45 = vadd.f32 %v1752_v31, %v6773_v54  ;;  %v5096_v9 = vpop.f32.mrb[251].mxu1 }
 0x2dd   : > { %5436 = vmatmul.mubr.msk.bf16.gmra.mrb[100].mxu0 %vm494_vm2, %v7250_v56  ;;  %v2166_v35 = vsel %vm1135_vm3, %v2142_v61, %v2143_v11  ;;  %5322 = vmatmul.mubr.msk.bf16.gmra.mrb[100].mxu1 %vm494_vm2, %v6767_v32 }
 0x2de   : > { %5439 = vmatprep.mubr.msk.bf16.mxu0 %vm5859_vm1, %v8133_v13  ;;  %v7260_v1 = vadd.f32 %v2166_v35, %v1839_v2  ;;  %5325 = vmatprep.mubr.msk.bf16.mxu1 %vm5859_vm1, %v8133_v13  ;;  %v7270_v2 = vld [vmem:[%s5924_s26 + $0x88] sm:$0xff]  }
 0x2e0   : > { %v2037_v54 = vpop.f32.mrb[252].mxu0  ;;  %v1757_v52 = vpop.f32.mrb[252].mxu1 }
 0x2e1   : > { %v2144_v57 = vrot.slane %v2037_v54, 1  ;;  %v5213_v6 = vpop.f32.mrb[253].mxu0  ;;  %v1842_v19 = vadd.f32 %v1757_v52, %v6781_v55  ;;  %v5099_v5 = vpop.f32.mrb[253].mxu1 }
 0x2e2   : > { %v2040_v4 = vpop.f32.mrb[254].mxu0  ;;  %v1760_v63 = vpop.f32.mrb[254].mxu1 }
 0x2e3   : > { %v5214_v28 = vpop.f32.mrb[255].mxu0  ;;  %v2165_v32 = vsel %vm1135_vm3, %v2143_v11, %v2144_v57  ;;  %v5100_v61 = vpop.f32.mrb[255].mxu1  ;;  %v2145_v11 = vrot.slane %v2040_v4, 1 }
 0x2e4   : > { %v7267_v31 = vadd.f32 %v2165_v32, %v1840_v41  ;;  %v7287_v61 = vld [vmem:[%s5924_s26 + $0x90] sm:$0xff]  }
 0x2e5   : > { %5440 = vmatmul.mubr.msk.bf16.gmra.mrb[104].mxu0 %vm494_vm2, %v7270_v2  ;;  %5326 = vmatmul.mubr.msk.bf16.gmra.mrb[104].mxu1 %vm494_vm2, %v6789_v30 }
 0x2e6   : > { %5443 = vmatprep.mubr.msk.bf16.mxu0 %vm5859_vm1, %v8133_v13  ;;  %5329 = vmatprep.mubr.msk.bf16.mxu1 %vm5859_vm1, %v8133_v13 }
 0x2e8   : > { %v2045_v55 = vpop.f32.mrb[0].mxu0  ;;  %v1764_v50 = vpop.f32.mrb[0].mxu1 }
 0x2e9   : > { %v2146_v41 = vrot.slane %v2045_v55, 1  ;;  %v5217_v9 = vpop.f32.mrb[1].mxu0  ;;  %v1843_v35 = vadd.f32 %v1764_v50, %v6800_v10  ;;  %v5103_v54 = vpop.f32.mrb[1].mxu1 }
 0x2ea   : > { %v2048_v52 = vpop.f32.mrb[2].mxu0  ;;  %v1767_v57 = vpop.f32.mrb[2].mxu1 }
 0x2eb   : > { %v2147_v6 = vrot.slane %v2048_v52, 1  ;;  %v5218_v5 = vpop.f32.mrb[3].mxu0  ;;  %v2164_v30 = vsel %vm1135_vm3, %v2145_v11, %v2146_v41  ;;  %v1844_v28 = vadd.f32 %v1767_v57, %v6815_v42  ;;  %v5104_v63 = vpop.f32.mrb[3].mxu1 }
 0x2ec   : > { %v7284_v32 = vadd.f32 %v2164_v30, %v1841_v45 }
 0x2ed   : > { %5444 = vmatmul.mubr.msk.bf16.gmra.mrb[108].mxu0 %vm494_vm2, %v7287_v61  ;;  %v2163_v10 = vsel %vm1135_vm3, %v2146_v41, %v2147_v6  ;;  %5330 = vmatmul.mubr.msk.bf16.gmra.mrb[108].mxu1 %vm494_vm2, %v6809_v23  ;;  %v7303_v6 = vld [vmem:[%s5924_s26 + $0x98] sm:$0xff]  }
 0x2ee   : > { %5447 = vmatprep.mubr.msk.bf16.mxu0 %vm5859_vm1, %v8133_v13  ;;  %v7297_v4 = vadd.f32 %v2163_v10, %v1842_v19  ;;  %5333 = vmatprep.mubr.msk.bf16.mxu1 %vm5859_vm1, %v8133_v13 }
 0x2f0   : > { %v2053_v42 = vpop.f32.mrb[4].mxu0  ;;  %v1772_v45 = vpop.f32.mrb[4].mxu1 }
 0x2f1   : > { %v5221_v55 = vpop.f32.mrb[5].mxu0  ;;  %v5107_v11 = vpop.f32.mrb[5].mxu1  ;;  %v2148_v9 = vrot.slane %v2053_v42, 1 }
 0x2f2   : > { %v2056_v50 = vpop.f32.mrb[6].mxu0  ;;  %v1774_v54 = vpop.f32.mrb[6].mxu1 }
 0x2f3   : > { %v2149_v41 = vrot.slane %v2056_v50, 1  ;;  %v5222_v52 = vpop.f32.mrb[7].mxu0  ;;  %v1845_v57 = vadd.f32 %v1774_v54, %v6834_v16  ;;  %v5108_v23 = vpop.f32.mrb[7].mxu1 }
 0x2f5   : > { %5448 = vmatmul.mubr.msk.bf16.gmra.mrb[112].mxu0 %vm494_vm2, %v7303_v6  ;;  %v2162_v19 = vsel %vm1135_vm3, %v2148_v9, %v2149_v41  ;;  %5334 = vmatmul.mubr.msk.bf16.gmra.mrb[112].mxu1 %vm494_vm2, %v6828_v34 }
 0x2f6   : > { %5451 = vmatprep.mubr.msk.bf16.mxu0 %vm5859_vm1, %v8133_v13  ;;  %v7313_v5 = vadd.f32 %v2162_v19, %v1843_v35  ;;  %5337 = vmatprep.mubr.msk.bf16.mxu1 %vm5859_vm1, %v8133_v13 }
 0x2f8   : > { %v2061_v16 = vpop.f32.mrb[8].mxu0  ;;  %v1779_v30 = vpop.f32.mrb[8].mxu1 }
 0x2f9   : > { %v2150_v63 = vrot.slane %v2061_v16, 1  ;;  %v5225_v10 = vpop.f32.mrb[9].mxu0  ;;  %v1846_v42 = vadd.f32 %v1779_v30, %v6840_v58  ;;  %v5111_v55 = vpop.f32.mrb[9].mxu1 }
 0x2fa   : > { %v2064_v45 = vpop.f32.mrb[10].mxu0  ;;  %v1782_v50 = vpop.f32.mrb[10].mxu1 }
 0x2fb   : > { %v5226_v11 = vpop.f32.mrb[11].mxu0  ;;  %v2161_v9 = vsel %vm1135_vm3, %v2149_v41, %v2150_v63  ;;  %v5112_v54 = vpop.f32.mrb[11].mxu1  ;;  %v2151_v35 = vrot.slane %v2064_v45, 1 }
 0x2fc   : > { %v7320_v52 = vadd.f32 %v2161_v9, %v1844_v28 }
 0x2fd   : > { %5452 = vmatmul.mubr.msk.bf16.gmra.mrb[116].mxu0 %vm494_vm2, %v6828_v34  ;;  %5338 = vmatmul.mubr.msk.bf16.gmra.mrb[116].mxu1 %vm494_vm2, %v6848_v46 }
 0x2fe   : > { %5455 = vmatprep.mubr.msk.bf16.mxu0 %vm5859_vm1, %v8133_v13  ;;  %5341 = vmatprep.mubr.msk.bf16.mxu1 %vm5859_vm1, %v8133_v13 }
 0x300   : > { %v2069_v58 = vpop.f32.mrb[12].mxu0  ;;  %v1786_v23 = vpop.f32.mrb[12].mxu1 }
 0x301   : > { %v2152_v19 = vrot.slane %v2069_v58, 1  ;;  %v5229_v41 = vpop.f32.mrb[13].mxu0  ;;  %v1847_v28 = vadd.f32 %v1786_v23, %v6861_v60  ;;  %v5115_v16 = vpop.f32.mrb[13].mxu1 }
 0x302   : > { %v2072_v30 = vpop.f32.mrb[14].mxu0  ;;  %v1789_v63 = vpop.f32.mrb[14].mxu1 }
 0x303   : > { %v2160_v34 = vsel %vm1135_vm3, %v2151_v35, %v2152_v19  ;;  %v2153_v10 = vrot.slane %v2072_v30, 1  ;;  %v5230_v55 = vpop.f32.mrb[15].mxu0  ;;  %v1848_v11 = vadd.f32 %v1789_v63, %v6874_v18  ;;  %v5116_v50 = vpop.f32.mrb[15].mxu1 }
 0x304   : > { %v7334_v9 = vadd.f32 %v2160_v34, %v1845_v57 }
 0x305   : > { %v2159_v45 = vsel %vm1135_vm3, %v2152_v19, %v2153_v10  ;;  %5456 = vmatmul.mubr.msk.bf16.gmra.mrb[120].mxu0 %vm494_vm2, %v6848_v46  ;;  %5342 = vmatmul.mubr.msk.bf16.gmra.mrb[120].mxu1 %vm494_vm2, %v6868_v49 }
 0x306   : > { %5459 = vmatprep.mubr.msk.bf16.mxu0 %vm5859_vm1, %v8133_v13  ;;  %v7344_v60 = vadd.f32 %v2159_v45, %v1846_v42  ;;  %5345 = vmatprep.mubr.msk.bf16.mxu1 %vm5859_vm1, %v8133_v13 }
 0x308   : > { %v2077_v18 = vpop.f32.mrb[16].mxu0  ;;  %v1794_v54 = vpop.f32.mrb[16].mxu1 }
 0x309   : > { %v5233_v57 = vpop.f32.mrb[17].mxu0  ;;  %v5119_v35 = vpop.f32.mrb[17].mxu1  ;;  %v2154_v23 = vrot.slane %v2077_v18, 1 }
 0x30a   : > { %v2080_v58 = vpop.f32.mrb[18].mxu0  ;;  %v1796_v46 = vpop.f32.mrb[18].mxu1 }
 0x30b   : > { %v2155_v19 = vrot.slane %v2080_v58, 1  ;;  %v5234_v41 = vpop.f32.mrb[19].mxu0  ;;  %v5120_v16 = vpop.f32.mrb[19].mxu1 }
 0x30d   : > { %v2158_v30 = vsel %vm1135_vm3, %v2154_v23, %v2155_v19  ;;  %5460 = vmatmul.mubr.msk.bf16.gmra.mrb[124].mxu0 %vm494_vm2, %v6868_v49  ;;  %5346 = vmatmul.mubr.msk.bf16.gmra.mrb[124].mxu1 %vm494_vm2, %v6881_v39 }
 0x30e   : > { %5463 = vmatprep.mubr.msk.bf16.mxu0 %vm5859_vm1, %v8133_v13  ;;  %v7356_v42 = vadd.f32 %v2158_v30, %v1847_v28  ;;  %5349 = vmatprep.mubr.msk.bf16.mxu1 %vm5859_vm1, %v8133_v13 }
 0x310   : > { %v2085_v34 = vpop.f32.mrb[20].mxu0  ;;  %v1800_v55 = vpop.f32.mrb[20].mxu1 }
 0x311   : > { %v2156_v63 = vrot.slane %v2085_v34, 1  ;;  %v5237_v10 = vpop.f32.mrb[21].mxu0  ;;  %v5123_v45 = vpop.f32.mrb[21].mxu1 }
 0x312   : > { %v2088_v50 = vpop.f32.mrb[22].mxu0  ;;  %v1802_v57 = vpop.f32.mrb[22].mxu1 }
 0x313   : > { %v2157_v49 = vsel %vm1135_vm3, %v2155_v19, %v2156_v63  ;;  %v5238_v18 = vpop.f32.mrb[23].mxu0  ;;  %v5124_v54 = vpop.f32.mrb[23].mxu1 }
 0x314   : > { %v7362_v58 = vadd.f32 %v2157_v49, %v1848_v11 }
 0x315   : > { %5464 = vmatmul.mubr.msk.bf16.gmra.mrb[128].mxu0 %vm494_vm2, %v6881_v39  ;;  %5350 = vmatmul.mubr.msk.bf16.gmra.mrb[128].mxu1 %vm494_vm2, %v6892_v3 }
 0x316   : > { %5467 = vmatprep.mubr.msk.bf16.mxu0 %vm5859_vm1, %v8133_v13  ;;  %5353 = vmatprep.mubr.msk.bf16.mxu1 %vm5859_vm1, %v8133_v13 }
 0x318   : > { %v2092_v28 = vpop.f32.mrb[24].mxu0  ;;  %v1806_v23 = vpop.f32.mrb[24].mxu1 }
 0x319   : > { %v5241_v35 = vpop.f32.mrb[25].mxu0  ;;  %v5127_v41 = vpop.f32.mrb[25].mxu1 }
 0x31a   : > { %v2094_v19 = vpop.f32.mrb[26].mxu0  ;;  %v1808_v11 = vpop.f32.mrb[26].mxu1 }
 0x31b   : > { %v5242_v46 = vpop.f32.mrb[27].mxu0  ;;  %v5128_v16 = vpop.f32.mrb[27].mxu1 }
 0x31d   : > { %5468 = vmatmul.mubr.msk.bf16.gmra.mrb[132].mxu0 %vm494_vm2, %v6892_v3  ;;  %5354 = vmatmul.mubr.msk.bf16.gmra.mrb[132].mxu1 %vm494_vm2, %v6903_v43 }
 0x31e   : > { %5471 = vmatprep.mubr.msk.bf16.mxu0 %vm5859_vm1, %v8133_v13  ;;  %5357 = vmatprep.mubr.msk.bf16.mxu1 %vm5859_vm1, %v8133_v13 }
 0x320   : > { %v2098_v39 = vpop.f32.mrb[28].mxu0  ;;  %v1812_v34 = vpop.f32.mrb[28].mxu1 }
 0x321   : > { %v5245_v30 = vpop.f32.mrb[29].mxu0  ;;  %v5131_v10 = vpop.f32.mrb[29].mxu1 }
 0x322   : > { %v2100_v63 = vpop.f32.mrb[30].mxu0  ;;  %v1814_v50 = vpop.f32.mrb[30].mxu1 }
 0x323   : > { %v5246_v55 = vpop.f32.mrb[31].mxu0  ;;  %v5132_v45 = vpop.f32.mrb[31].mxu1 }
 0x325   : > { %5472 = vmatmul.mubr.msk.bf16.gmra.mrb[136].mxu0 %vm494_vm2, %v6903_v43  ;;  %5358 = vmatmul.mubr.msk.bf16.gmra.mrb[136].mxu1 %vm494_vm2, %v6914_v53 }
 0x326   : > { %5475 = vmatprep.mubr.msk.bf16.mxu0 %vm5859_vm1, %v8133_v13  ;;  %5361 = vmatprep.mubr.msk.bf16.mxu1 %vm5859_vm1, %v8133_v13 }
 0x328   : > { %v2104_v3 = vpop.f32.mrb[32].mxu0  ;;  %v2260_v18 = vpop.f32.mrb[32].mxu1 }
 0x329   : > { %v5249_v49 = vpop.f32.mrb[33].mxu0  ;;  %v5255_v54 = vpop.f32.mrb[33].mxu1 }
 0x32a   : > { %v2106_v57 = vpop.f32.mrb[34].mxu0  ;;  %v2262_v35 = vpop.f32.mrb[34].mxu1 }
 0x32b   : > { %v5250_v28 = vpop.f32.mrb[35].mxu0  ;;  %v5256_v23 = vpop.f32.mrb[35].mxu1 }
 0x32c   : > { %v7407_v28 = vld [vmem:[%s5924_s26 + $0xe0] ss:$0 sps:$4 sm:$0xff]  }
 0x32d   : > { %5476 = vmatmul.mubr.msk.bf16.gmra.mrb[140].mxu0 %vm494_vm2, %v6914_v53  ;;  %5362 = vmatmul.mubr.msk.bf16.gmra.mrb[140].mxu1 %vm494_vm2, %v6925_v0  ;;  %v8147_v53 = vld [vmem:[#allocation3_spill] sm:$0xff] }
 0x32e   : > { %5479 = vmatprep.mubr.msk.bf16.mxu0 %vm5859_vm1, %v8133_v13  ;;  %5365 = vmatprep.mubr.msk.bf16.mxu1 %vm5859_vm1, %v8133_v13 }
 0x330   : > { %v2632_v43 = vpop.f32.mrb[36].mxu0  ;;  %v2266_v41 = vpop.f32.mrb[36].mxu1 }
 0x331   : > { %v5373_v19 = vpop.f32.mrb[37].mxu0  ;;  %v5259_v11 = vpop.f32.mrb[37].mxu1 }
 0x332   : > { %v2634_v46 = vpop.f32.mrb[38].mxu0  ;;  %v2268_v39 = vpop.f32.mrb[38].mxu1 }
 0x333   : > { %v5374_v16 = vpop.f32.mrb[39].mxu0  ;;  %v5260_v30 = vpop.f32.mrb[39].mxu1  ;;  %v2481_v34 = vrot.slane %v2268_v39, 2 }
 0x335   : > { %5480 = vmatmul.mubr.msk.bf16.gmra.mrb[144].mxu0 %vm494_vm2, %v6925_v0  ;;  %5366 = vmatmul.mubr.msk.bf16.gmra.mrb[144].mxu1 %vm494_vm2, %v8147_v53 }
 0x336   : > { %5483 = vmatprep.mubr.msk.bf16.mxu0 %vm5859_vm1, %v8133_v13  ;;  %5489 = vmatprep.mubr.msk.bf16.mxu1 %vm5859_vm1, %v8133_v13 }
 0x338   : > { %v2638_v63 = vpop.f32.mrb[40].mxu0  ;;  %v2273_v10 = vpop.f32.mrb[40].mxu1 }
 0x339   : > { %v5377_v55 = vpop.f32.mrb[41].mxu0  ;;  %v2482_v50 = vrot.slane %v2273_v10, 2  ;;  %v5263_v45 = vpop.f32.mrb[41].mxu1  ;;  %v8148_v63 = vld [vmem:[#allocation4_spill] sm:$0xff] }
 0x33a   : > { %v2640_v3 = vpop.f32.mrb[42].mxu0  ;;  %v2276_v49 = vpop.f32.mrb[42].mxu1 }
 0x33b   : > { %v5378_v18 = vpop.f32.mrb[43].mxu0  ;;  %v2483_v0 = vrot.slane %v2276_v49, 2  ;;  %v5264_v57 = vpop.f32.mrb[43].mxu1  ;;  %v2560_v54 = vsel %vm1508_vm4, %v2481_v34, %v2482_v50  ;;  %v5823_v34 = vld [vmem:[%s5924_s26] sm:$0xff]  }
 0x33c   : > { %v2561_v35 = vadd.f32 %v2560_v54, %v6969_v33 }
 0x33d   : > { %5484 = vmatmul.mubr.msk.bf16.gmra.mrb[148].mxu0 %vm494_vm2, %v7407_v28  ;;  %5490 = vmatmul.mubr.msk.bf16.vlgmr.msra.gmra.mrb[148].mxu1 %vm494_vm2, %v6953_v22  ;;  %v2559_v23 = vsel %vm1508_vm4, %v2482_v50, %v2483_v0 }
 0x33e   : > { %5607 = vmatprep.mubr.msk.bf16.mxu0 %vm5859_vm1, %v8133_v13  ;;  %5493 = vmatprep.mubr.msk.bf16.mxu1 %vm5859_vm1, %v8133_v13  ;;  %v2562_v43 = vadd.f32 %v2559_v23, %v6980_v48 }
 0x340   : > { %v2644_v19 = vpop.f32.mrb[44].mxu0  ;;  %v2281_v41 = vpop.f32.mrb[44].mxu1 }
 0x341   : > { %v5381_v46 = vpop.f32.mrb[45].mxu0  ;;  %v2484_v11 = vrot.slane %v2281_v41, 2  ;;  %v5267_v33 = vpop.f32.mrb[45].mxu1 }
 0x342   : > { %v2646_v16 = vpop.f32.mrb[46].mxu0  ;;  %v2284_v39 = vpop.f32.mrb[46].mxu1 }
 0x343   : > { %v5382_v30 = vpop.f32.mrb[47].mxu0  ;;  %v2485_v22 = vrot.slane %v2284_v39, 2  ;;  %v5268_v53 = vpop.f32.mrb[47].mxu1 }
 0x345   : > { %5608 = vmatmul.mubr.msk.bf16.vlgmr.msra.gmra.mrb[152].mxu0 %vm494_vm2, %v5823_v34  ;;  %5494 = vmatmul.mubr.msk.bf16.gmra.mrb[152].mxu1 %vm494_vm2, %v8148_v63  ;;  %v2558_v48 = vsel %vm1508_vm4, %v2484_v11, %v2485_v22  ;;  %v8150_v11 = vld [vmem:[#allocation5_spill] sm:$0xff] }
 0x346   : > { %5611 = vmatprep.mubr.msk.bf16.mxu0 %vm5859_vm1, %v8133_v13  ;;  %5497 = vmatprep.mubr.msk.bf16.mxu1 %vm5859_vm1, %v8133_v13  ;;  %v2563_v10 = vadd.f32 %v2558_v48, %v6998_v24  ;;  %v8149_v24 = vld [vmem:[#allocation6_spill] sm:$0xff] }
 0x348   : > { %v2650_v55 = vpop.f32.mrb[48].mxu0  ;;  %v2289_v50 = vpop.f32.mrb[48].mxu1 }
 0x349   : > { %v7432_v45 = vadd.f32 %v2650_v55, %v2561_v35  ;;  %v5385_v3 = vpop.f32.mrb[49].mxu0  ;;  %v2486_v49 = vrot.slane %v2289_v50, 2  ;;  %v5271_v0 = vpop.f32.mrb[49].mxu1 }
 0x34a   : > { %v2653_v18 = vpop.f32.mrb[50].mxu0  ;;  %v2292_v23 = vpop.f32.mrb[50].mxu1 }
 0x34b   : > { %v7434_v57 = vadd.f32 %v2653_v18, %v2562_v43  ;;  %v5386_v54 = vpop.f32.mrb[51].mxu0  ;;  %v5272_v19 = vpop.f32.mrb[51].mxu1  ;;  %v2557_v41 = vsel %vm1508_vm4, %v2485_v22, %v2486_v49  ;;  %v2487_v35 = vrot.slane %v2292_v23, 2 }
 0x34c   : > { %v2564_v46 = vadd.f32 %v2557_v41, %v8149_v24 }
 0x34d   : > { %5612 = vmatmul.mubr.msk.bf16.gmra.mrb[156].mxu0 %vm494_vm2, %v8148_v63  ;;  %5498 = vmatmul.mubr.msk.bf16.gmra.mrb[156].mxu1 %vm494_vm2, %v8150_v11 }
 0x34e   : > { %5615 = vmatprep.mubr.msk.bf16.mxu0 %vm5859_vm1, %v8133_v13  ;;  %5501 = vmatprep.mubr.msk.bf16.mxu1 %vm5859_vm1, %v8133_v13 }
 0x350   : > { %v2658_v43 = vpop.f32.mrb[52].mxu0  ;;  %v2297_v33 = vpop.f32.mrb[52].mxu1 }
 0x351   : > { %v5389_v16 = vpop.f32.mrb[53].mxu0  ;;  %v2488_v39 = vrot.slane %v2297_v33, 2  ;;  %v5275_v30 = vpop.f32.mrb[53].mxu1  ;;  %v8151_v33 = vld [vmem:[#allocation7_spill] sm:$0xff] }
 0x352   : > { %v2660_v22 = vpop.f32.mrb[54].mxu0  ;;  %v2300_v53 = vpop.f32.mrb[54].mxu1 }
 0x353   : > { %v7447_v34 = vadd.f32 %v2660_v22, %v2563_v10  ;;  %v5390_v63 = vpop.f32.mrb[55].mxu0  ;;  %v2489_v48 = vrot.slane %v2300_v53, 2  ;;  %v5276_v55 = vpop.f32.mrb[55].mxu1  ;;  %v2556_v50 = vsel %vm1508_vm4, %v2487_v35, %v2488_v39 }
 0x354   : > { %v2565_v3 = vadd.f32 %v2556_v50, %v7022_v47 }
 0x355   : > { %5616 = vmatmul.mubr.msk.bf16.gmra.mrb[160].mxu0 %vm494_vm2, %v8150_v11  ;;  %5502 = vmatmul.mubr.msk.bf16.gmra.mrb[160].mxu1 %vm494_vm2, %v7010_v17  ;;  %v2555_v10 = vsel %vm1508_vm4, %v2488_v39, %v2489_v48 }
 0x356   : > { %5619 = vmatprep.mubr.msk.bf16.mxu0 %vm5859_vm1, %v8133_v13  ;;  %5505 = vmatprep.mubr.msk.bf16.mxu1 %vm5859_vm1, %v8133_v13  ;;  %v2566_v49 = vadd.f32 %v2555_v10, %v7035_v51 }
 0x358   : > { %v2665_v18 = vpop.f32.mrb[56].mxu0  ;;  %v2305_v0 = vpop.f32.mrb[56].mxu1 }
 0x359   : > { %v7463_v54 = vadd.f32 %v2665_v18, %v2564_v46  ;;  %v5393_v23 = vpop.f32.mrb[57].mxu0  ;;  %v2490_v47 = vrot.slane %v2305_v0, 2  ;;  %v5279_v19 = vpop.f32.mrb[57].mxu1 }
 0x35a   : > { %v2668_v41 = vpop.f32.mrb[58].mxu0  ;;  %v2308_v24 = vpop.f32.mrb[58].mxu1  ;;  %v8153_v23 = vld [vmem:[#allocation8_spill] sm:$0xff] }
 0x35b   : > { %v5394_v11 = vpop.f32.mrb[59].mxu0  ;;  %v2491_v35 = vrot.slane %v2308_v24, 2  ;;  %v5280_v43 = vpop.f32.mrb[59].mxu1 }
 0x35d   : > { %5620 = vmatmul.mubr.msk.bf16.gmra.mrb[164].mxu0 %vm494_vm2, %v7010_v17  ;;  %5506 = vmatmul.mubr.msk.bf16.gmra.mrb[164].mxu1 %vm494_vm2, %v8151_v33  ;;  %v2554_v51 = vsel %vm1508_vm4, %v2490_v47, %v2491_v35 }
 0x35e   : > { %5623 = vmatprep.mubr.msk.bf16.mxu0 %vm5859_vm1, %v8133_v13  ;;  %5509 = vmatprep.mubr.msk.bf16.mxu1 %vm5859_vm1, %v8133_v13  ;;  %v2567_v46 = vadd.f32 %v2554_v51, %v7051_v44  ;;  %v8152_v44 = vld [vmem:[#allocation9_spill] sm:$0xff] }
 0x360   : > { %v2672_v16 = vpop.f32.mrb[60].mxu0  ;;  %v2313_v39 = vpop.f32.mrb[60].mxu1 }
 0x361   : > { %v7476_v30 = vadd.f32 %v2672_v16, %v2565_v3  ;;  %v5397_v22 = vpop.f32.mrb[61].mxu0  ;;  %v2492_v17 = vrot.slane %v2313_v39, 2  ;;  %v5283_v63 = vpop.f32.mrb[61].mxu1 }
 0x362   : > { %v2675_v53 = vpop.f32.mrb[62].mxu0  ;;  %v2316_v50 = vpop.f32.mrb[62].mxu1 }
 0x363   : > { %v7478_v48 = vadd.f32 %v2675_v53, %v2566_v49  ;;  %v5398_v55 = vpop.f32.mrb[63].mxu0  ;;  %v5284_v10 = vpop.f32.mrb[63].mxu1  ;;  %v2553_v18 = vsel %vm1508_vm4, %v2491_v35, %v2492_v17  ;;  %v2493_v3 = vrot.slane %v2316_v50, 2 }
 0x364   : > { %v2568_v0 = vadd.f32 %v2553_v18, %v8152_v44 }
 0x365   : > { %5624 = vmatmul.mubr.msk.bf16.gmra.mrb[168].mxu0 %vm494_vm2, %v8151_v33  ;;  %5510 = vmatmul.mubr.msk.bf16.gmra.mrb[168].mxu1 %vm494_vm2, %v8153_v23 }
 0x366   : > { %5627 = vmatprep.mubr.msk.bf16.mxu0 %vm5859_vm1, %v8133_v13  ;;  %5513 = vmatprep.mubr.msk.bf16.mxu1 %vm5859_vm1, %v8133_v13 }
 0x368   : > { %v2680_v49 = vpop.f32.mrb[64].mxu0  ;;  %v2321_v47 = vpop.f32.mrb[64].mxu1 }
 0x369   : > { %v5401_v19 = vpop.f32.mrb[65].mxu0  ;;  %v2494_v41 = vrot.slane %v2321_v47, 2  ;;  %v5287_v24 = vpop.f32.mrb[65].mxu1  ;;  %v8154_v47 = vld [vmem:[#allocation10_spill] sm:$0xff] }
 0x36a   : > { %v2682_v11 = vpop.f32.mrb[66].mxu0  ;;  %v2324_v35 = vpop.f32.mrb[66].mxu1 }
 0x36b   : > { %v7491_v43 = vadd.f32 %v2682_v11, %v2567_v46  ;;  %v5402_v33 = vpop.f32.mrb[67].mxu0  ;;  %v2495_v51 = vrot.slane %v2324_v35, 2  ;;  %v5288_v16 = vpop.f32.mrb[67].mxu1  ;;  %v2552_v39 = vsel %vm1508_vm4, %v2493_v3, %v2494_v41 }
 0x36c   : > { %v2569_v22 = vadd.f32 %v2552_v39, %v7075_v8 }
 0x36d   : > { %5628 = vmatmul.mubr.msk.bf16.gmra.mrb[172].mxu0 %vm494_vm2, %v8153_v23  ;;  %5514 = vmatmul.mubr.msk.bf16.gmra.mrb[172].mxu1 %vm494_vm2, %v7063_v36  ;;  %v2551_v46 = vsel %vm1508_vm4, %v2494_v41, %v2495_v51 }
 0x36e   : > { %5631 = vmatprep.mubr.msk.bf16.mxu0 %vm5859_vm1, %v8133_v13  ;;  %5517 = vmatprep.mubr.msk.bf16.mxu1 %vm5859_vm1, %v8133_v13  ;;  %v2570_v17 = vadd.f32 %v2551_v46, %v7088_v40 }
 0x370   : > { %v2687_v53 = vpop.f32.mrb[68].mxu0  ;;  %v2329_v63 = vpop.f32.mrb[68].mxu1 }
 0x371   : > { %v7507_v55 = vadd.f32 %v2687_v53, %v2568_v0  ;;  %v5405_v50 = vpop.f32.mrb[69].mxu0  ;;  %v2496_v8 = vrot.slane %v2329_v63, 2  ;;  %v5291_v10 = vpop.f32.mrb[69].mxu1 }
 0x372   : > { %v2690_v18 = vpop.f32.mrb[70].mxu0  ;;  %v2332_v44 = vpop.f32.mrb[70].mxu1  ;;  %v8156_v50 = vld [vmem:[#allocation11_spill] sm:$0xff] }
 0x373   : > { %v5406_v23 = vpop.f32.mrb[71].mxu0  ;;  %v2497_v3 = vrot.slane %v2332_v44, 2  ;;  %v5292_v49 = vpop.f32.mrb[71].mxu1 }
 0x375   : > { %5632 = vmatmul.mubr.msk.bf16.gmra.mrb[176].mxu0 %vm494_vm2, %v7063_v36  ;;  %5518 = vmatmul.mubr.msk.bf16.gmra.mrb[176].mxu1 %vm494_vm2, %v8154_v47  ;;  %v2550_v40 = vsel %vm1508_vm4, %v2496_v8, %v2497_v3 }
 0x376   : > { %5635 = vmatprep.mubr.msk.bf16.mxu0 %vm5859_vm1, %v8133_v13  ;;  %5521 = vmatprep.mubr.msk.bf16.mxu1 %vm5859_vm1, %v8133_v13  ;;  %v2571_v0 = vadd.f32 %v2550_v40, %v7104_v38  ;;  %v8155_v38 = vld [vmem:[#allocation12_spill] sm:$0xff] }
 0x378   : > { %v2694_v19 = vpop.f32.mrb[72].mxu0  ;;  %v2337_v41 = vpop.f32.mrb[72].mxu1 }
 0x379   : > { %v7520_v24 = vadd.f32 %v2694_v19, %v2569_v22  ;;  %v5409_v11 = vpop.f32.mrb[73].mxu0  ;;  %v2498_v36 = vrot.slane %v2337_v41, 2  ;;  %v5295_v33 = vpop.f32.mrb[73].mxu1 }
 0x37a   : > { %v2697_v35 = vpop.f32.mrb[74].mxu0  ;;  %v2340_v39 = vpop.f32.mrb[74].mxu1 }
 0x37b   : > { %v7522_v51 = vadd.f32 %v2697_v35, %v2570_v17  ;;  %v5410_v16 = vpop.f32.mrb[75].mxu0  ;;  %v5296_v46 = vpop.f32.mrb[75].mxu1  ;;  %v2549_v53 = vsel %vm1508_vm4, %v2497_v3, %v2498_v36  ;;  %v2499_v22 = vrot.slane %v2340_v39, 2 }
 0x37c   : > { %v2572_v63 = vadd.f32 %v2549_v53, %v8155_v38 }
 0x37d   : > { %5636 = vmatmul.mubr.msk.bf16.gmra.mrb[180].mxu0 %vm494_vm2, %v8154_v47  ;;  %5522 = vmatmul.mubr.msk.bf16.gmra.mrb[180].mxu1 %vm494_vm2, %v8156_v50 }
 0x37e   : > { %5639 = vmatprep.mubr.msk.bf16.mxu0 %vm5859_vm1, %v8133_v13  ;;  %5525 = vmatprep.mubr.msk.bf16.mxu1 %vm5859_vm1, %v8133_v13 }
 0x380   : > { %v2702_v17 = vpop.f32.mrb[76].mxu0  ;;  %v2345_v8 = vpop.f32.mrb[76].mxu1 }
 0x381   : > { %v5413_v10 = vpop.f32.mrb[77].mxu0  ;;  %v2500_v18 = vrot.slane %v2345_v8, 2  ;;  %v5299_v44 = vpop.f32.mrb[77].mxu1  ;;  %v8157_v8 = vld [vmem:[#allocation13_spill] sm:$0xff] }
 0x382   : > { %v2704_v23 = vpop.f32.mrb[78].mxu0  ;;  %v2348_v3 = vpop.f32.mrb[78].mxu1 }
 0x383   : > { %v7535_v49 = vadd.f32 %v2704_v23, %v2571_v0  ;;  %v5414_v47 = vpop.f32.mrb[79].mxu0  ;;  %v2501_v40 = vrot.slane %v2348_v3, 2  ;;  %v5300_v19 = vpop.f32.mrb[79].mxu1  ;;  %v2548_v41 = vsel %vm1508_vm4, %v2499_v22, %v2500_v18 }
 0x384   : > { %v2573_v11 = vadd.f32 %v2548_v41, %v7128_v15 }
 0x385   : > { %5640 = vmatmul.mubr.msk.bf16.gmra.mrb[184].mxu0 %vm494_vm2, %v8156_v50  ;;  %5526 = vmatmul.mubr.msk.bf16.gmra.mrb[184].mxu1 %vm494_vm2, %v7116_v27  ;;  %v2547_v0 = vsel %vm1508_vm4, %v2500_v18, %v2501_v40 }
 0x386   : > { %5643 = vmatprep.mubr.msk.bf16.mxu0 %vm5859_vm1, %v8133_v13  ;;  %5529 = vmatprep.mubr.msk.bf16.mxu1 %vm5859_vm1, %v8133_v13  ;;  %v2574_v36 = vadd.f32 %v2547_v0, %v7141_v14 }
 0x388   : > { %v2709_v35 = vpop.f32.mrb[80].mxu0  ;;  %v2353_v33 = vpop.f32.mrb[80].mxu1 }
 0x389   : > { %v7551_v16 = vadd.f32 %v2709_v35, %v2572_v63  ;;  %v5417_v39 = vpop.f32.mrb[81].mxu0  ;;  %v2502_v15 = vrot.slane %v2353_v33, 2  ;;  %v5303_v46 = vpop.f32.mrb[81].mxu1 }
 0x38a   : > { %v2712_v53 = vpop.f32.mrb[82].mxu0  ;;  %v2356_v38 = vpop.f32.mrb[82].mxu1  ;;  %v8159_v39 = vld [vmem:[#allocation14_spill] sm:$0xff] }
 0x38b   : > { %v5418_v50 = vpop.f32.mrb[83].mxu0  ;;  %v2503_v22 = vrot.slane %v2356_v38, 2  ;;  %v5304_v17 = vpop.f32.mrb[83].mxu1 }
 0x38d   : > { %5644 = vmatmul.mubr.msk.bf16.gmra.mrb[188].mxu0 %vm494_vm2, %v7116_v27  ;;  %5530 = vmatmul.mubr.msk.bf16.gmra.mrb[188].mxu1 %vm494_vm2, %v8157_v8  ;;  %v2546_v14 = vsel %vm1508_vm4, %v2502_v15, %v2503_v22 }
 0x38e   : > { %5647 = vmatprep.mubr.msk.bf16.mxu0 %vm5859_vm1, %v8133_v13  ;;  %5533 = vmatprep.mubr.msk.bf16.mxu1 %vm5859_vm1, %v8133_v13  ;;  %v2575_v63 = vadd.f32 %v2546_v14, %v7157_v25  ;;  %v8158_v25 = vld [vmem:[#allocation15_spill] sm:$0xff] }
 0x390   : > { %v2716_v10 = vpop.f32.mrb[84].mxu0  ;;  %v2361_v18 = vpop.f32.mrb[84].mxu1 }
 0x391   : > { %v7564_v44 = vadd.f32 %v2716_v10, %v2573_v11  ;;  %v5421_v23 = vpop.f32.mrb[85].mxu0  ;;  %v2504_v27 = vrot.slane %v2361_v18, 2  ;;  %v5307_v47 = vpop.f32.mrb[85].mxu1 }
 0x392   : > { %v2719_v3 = vpop.f32.mrb[86].mxu0  ;;  %v2364_v41 = vpop.f32.mrb[86].mxu1 }
 0x393   : > { %v7566_v40 = vadd.f32 %v2719_v3, %v2574_v36  ;;  %v5422_v19 = vpop.f32.mrb[87].mxu0  ;;  %v5308_v0 = vpop.f32.mrb[87].mxu1  ;;  %v2545_v35 = vsel %vm1508_vm4, %v2503_v22, %v2504_v27  ;;  %v2505_v11 = vrot.slane %v2364_v41, 2 }
 0x394   : > { %v2576_v33 = vadd.f32 %v2545_v35, %v8158_v25 }
 0x395   : > { %5648 = vmatmul.mubr.msk.bf16.gmra.mrb[192].mxu0 %vm494_vm2, %v8157_v8  ;;  %5534 = vmatmul.mubr.msk.bf16.gmra.mrb[192].mxu1 %vm494_vm2, %v8159_v39 }
 0x396   : > { %5651 = vmatprep.mubr.msk.bf16.mxu0 %vm5859_vm1, %v8133_v13  ;;  %5537 = vmatprep.mubr.msk.bf16.mxu1 %vm5859_vm1, %v8133_v13 }
 0x398   : > { %v2724_v36 = vpop.f32.mrb[88].mxu0  ;;  %v2369_v15 = vpop.f32.mrb[88].mxu1 }
 0x399   : > { %v5425_v46 = vpop.f32.mrb[89].mxu0  ;;  %v2506_v53 = vrot.slane %v2369_v15, 2  ;;  %v5311_v38 = vpop.f32.mrb[89].mxu1  ;;  %v8160_v15 = vld [vmem:[#allocation16_spill] sm:$0xff] }
 0x39a   : > { %v2726_v50 = vpop.f32.mrb[90].mxu0  ;;  %v2372_v22 = vpop.f32.mrb[90].mxu1 }
 0x39b   : > { %v7579_v17 = vadd.f32 %v2726_v50, %v2575_v63  ;;  %v5426_v8 = vpop.f32.mrb[91].mxu0  ;;  %v2507_v14 = vrot.slane %v2372_v22, 2  ;;  %v5312_v10 = vpop.f32.mrb[91].mxu1  ;;  %v2544_v18 = vsel %vm1508_vm4, %v2505_v11, %v2506_v53 }
 0x39c   : > { %v2577_v23 = vadd.f32 %v2544_v18, %v7181_v21 }
 0x39d   : > { %5652 = vmatmul.mubr.msk.bf16.gmra.mrb[196].mxu0 %vm494_vm2, %v8159_v39  ;;  %5538 = vmatmul.mubr.msk.bf16.gmra.mrb[196].mxu1 %vm494_vm2, %v7169_v29  ;;  %v2543_v63 = vsel %vm1508_vm4, %v2506_v53, %v2507_v14 }
 0x39e   : > { %5655 = vmatprep.mubr.msk.bf16.mxu0 %vm5859_vm1, %v8133_v13  ;;  %5541 = vmatprep.mubr.msk.bf16.mxu1 %vm5859_vm1, %v8133_v13  ;;  %v2578_v27 = vadd.f32 %v2543_v63, %v7194_v12 }
 0x3a0   : > { %v2731_v3 = vpop.f32.mrb[92].mxu0  ;;  %v2377_v47 = vpop.f32.mrb[92].mxu1 }
 0x3a1   : > { %v7595_v19 = vadd.f32 %v2731_v3, %v2576_v33  ;;  %v5429_v41 = vpop.f32.mrb[93].mxu0  ;;  %v2508_v21 = vrot.slane %v2377_v47, 2  ;;  %v5315_v0 = vpop.f32.mrb[93].mxu1  ;;  %v8161_v47 = vld [vmem:[#allocation17_spill] sm:$0xff] }
 0x3a2   : > { %v2734_v35 = vpop.f32.mrb[94].mxu0  ;;  %v2380_v25 = vpop.f32.mrb[94].mxu1 }
 0x3a3   : > { %v5430_v39 = vpop.f32.mrb[95].mxu0  ;;  %v2509_v11 = vrot.slane %v2380_v25, 2  ;;  %v5316_v36 = vpop.f32.mrb[95].mxu1 }
 0x3a5   : > { %5656 = vmatmul.mubr.msk.bf16.gmra.mrb[200].mxu0 %vm494_vm2, %v7169_v29  ;;  %5542 = vmatmul.mubr.msk.bf16.gmra.mrb[200].mxu1 %vm494_vm2, %v8160_v15  ;;  %v2542_v12 = vsel %vm1508_vm4, %v2508_v21, %v2509_v11 }
 0x3a6   : > { %5659 = vmatprep.mubr.msk.bf16.mxu0 %vm5859_vm1, %v8133_v13  ;;  %5545 = vmatprep.mubr.msk.bf16.mxu1 %vm5859_vm1, %v8133_v13  ;;  %v2579_v33 = vadd.f32 %v2542_v12, %v7210_v7 }
 0x3a8   : > { %v2738_v46 = vpop.f32.mrb[96].mxu0  ;;  %v2385_v53 = vpop.f32.mrb[96].mxu1 }
 0x3a9   : > { %v7608_v38 = vadd.f32 %v2738_v46, %v2577_v23  ;;  %v5433_v50 = vpop.f32.mrb[97].mxu0  ;;  %v2510_v29 = vrot.slane %v2385_v53, 2  ;;  %v5319_v8 = vpop.f32.mrb[97].mxu1 }
 0x3aa   : > { %v2741_v22 = vpop.f32.mrb[98].mxu0  ;;  %v2388_v18 = vpop.f32.mrb[98].mxu1 }
 0x3ab   : > { %v7610_v14 = vadd.f32 %v2741_v22, %v2578_v27  ;;  %v5434_v10 = vpop.f32.mrb[99].mxu0  ;;  %v5320_v63 = vpop.f32.mrb[99].mxu1  ;;  %v2541_v3 = vsel %vm1508_vm4, %v2509_v11, %v2510_v29  ;;  %v2511_v23 = vrot.slane %v2388_v18, 2 }
 0x3ac   : > { %v2580_v7 = vadd.f32 %v2541_v3, %v7217_v62 }
 0x3ad   : > { %5660 = vmatmul.mubr.msk.bf16.gmra.mrb[204].mxu0 %vm494_vm2, %v8160_v15  ;;  %5546 = vmatmul.mubr.msk.bf16.gmra.mrb[204].mxu1 %vm494_vm2, %v8161_v47 }
 0x3ae   : > { %5663 = vmatprep.mubr.msk.bf16.mxu0 %vm5859_vm1, %v8133_v13  ;;  %5549 = vmatprep.mubr.msk.bf16.mxu1 %vm5859_vm1, %v8133_v13 }
 0x3b0   : > { %v2746_v27 = vpop.f32.mrb[100].mxu0  ;;  %v2393_v41 = vpop.f32.mrb[100].mxu1 }
 0x3b1   : > { %v5437_v21 = vpop.f32.mrb[101].mxu0  ;;  %v2512_v0 = vrot.slane %v2393_v41, 2  ;;  %v5323_v35 = vpop.f32.mrb[101].mxu1 }
 0x3b2   : > { %v2748_v25 = vpop.f32.mrb[102].mxu0  ;;  %v2396_v39 = vpop.f32.mrb[102].mxu1 }
 0x3b3   : > { %v7623_v11 = vadd.f32 %v2748_v25, %v2579_v33  ;;  %v5438_v62 = vpop.f32.mrb[103].mxu0  ;;  %v2513_v36 = vrot.slane %v2396_v39, 2  ;;  %v5324_v15 = vpop.f32.mrb[103].mxu1  ;;  %v2540_v12 = vsel %vm1508_vm4, %v2511_v23, %v2512_v0 }
 0x3b4   : > { %v2581_v46 = vadd.f32 %v2540_v12, %v7231_v59 }
 0x3b5   : > { %5664 = vmatmul.mubr.msk.bf16.gmra.mrb[208].mxu0 %vm494_vm2, %v8161_v47  ;;  %5550 = vmatmul.mubr.msk.bf16.gmra.mrb[208].mxu1 %vm494_vm2, %v7234_v37  ;;  %v2539_v33 = vsel %vm1508_vm4, %v2512_v0, %v2513_v36 }
 0x3b6   : > { %5667 = vmatprep.mubr.msk.bf16.mxu0 %vm5859_vm1, %v8133_v13  ;;  %5553 = vmatprep.mubr.msk.bf16.mxu1 %vm5859_vm1, %v8133_v13  ;;  %v2582_v53 = vadd.f32 %v2539_v33, %v7244_v20 }
 0x3b8   : > { %v2753_v50 = vpop.f32.mrb[104].mxu0  ;;  %v2401_v29 = vpop.f32.mrb[104].mxu1 }
 0x3b9   : > { %v7639_v22 = vadd.f32 %v2753_v50, %v2580_v7  ;;  %v5441_v8 = vpop.f32.mrb[105].mxu0  ;;  %v2514_v59 = vrot.slane %v2401_v29, 2  ;;  %v5327_v10 = vpop.f32.mrb[105].mxu1 }
 0x3ba   : > { %v2756_v18 = vpop.f32.mrb[106].mxu0  ;;  %v2404_v63 = vpop.f32.mrb[106].mxu1 }
 0x3bb   : > { %v5442_v3 = vpop.f32.mrb[107].mxu0  ;;  %v2515_v47 = vrot.slane %v2404_v63, 2  ;;  %v5328_v23 = vpop.f32.mrb[107].mxu1 }
 0x3bd   : > { %5668 = vmatmul.mubr.msk.bf16.gmra.mrb[212].mxu0 %vm494_vm2, %v7234_v37  ;;  %5554 = vmatmul.mubr.msk.bf16.gmra.mrb[212].mxu1 %vm494_vm2, %v7250_v56  ;;  %v2538_v20 = vsel %vm1508_vm4, %v2514_v59, %v2515_v47 }
 0x3be   : > { %5671 = vmatprep.mubr.msk.bf16.mxu0 %vm5859_vm1, %v8133_v13  ;;  %5557 = vmatprep.mubr.msk.bf16.mxu1 %vm5859_vm1, %v8133_v13  ;;  %v2583_v7 = vadd.f32 %v2538_v20, %v7260_v1 }
 0x3c0   : > { %v2760_v27 = vpop.f32.mrb[108].mxu0  ;;  %v2409_v41 = vpop.f32.mrb[108].mxu1 }
 0x3c1   : > { %v7652_v21 = vadd.f32 %v2760_v27, %v2581_v46  ;;  %v5445_v0 = vpop.f32.mrb[109].mxu0  ;;  %v2516_v37 = vrot.slane %v2409_v41, 2  ;;  %v5331_v25 = vpop.f32.mrb[109].mxu1 }
 0x3c2   : > { %v2763_v35 = vpop.f32.mrb[110].mxu0  ;;  %v2412_v36 = vpop.f32.mrb[110].mxu1 }
 0x3c3   : > { %v7654_v39 = vadd.f32 %v2763_v35, %v2582_v53  ;;  %v5446_v62 = vpop.f32.mrb[111].mxu0  ;;  %v5332_v15 = vpop.f32.mrb[111].mxu1  ;;  %v2537_v12 = vsel %vm1508_vm4, %v2515_v47, %v2516_v37  ;;  %v2517_v46 = vrot.slane %v2412_v36, 2 }
 0x3c4   : > { %v2584_v1 = vadd.f32 %v2537_v12, %v7267_v31 }
 0x3c5   : > { %5672 = vmatmul.mubr.msk.bf16.gmra.mrb[216].mxu0 %vm494_vm2, %v7250_v56  ;;  %5558 = vmatmul.mubr.msk.bf16.gmra.mrb[216].mxu1 %vm494_vm2, %v7270_v2 }
 0x3c6   : > { %5675 = vmatprep.mubr.msk.bf16.mxu0 %vm5859_vm1, %v8133_v13  ;;  %5561 = vmatprep.mubr.msk.bf16.mxu1 %vm5859_vm1, %v8133_v13 }
 0x3c8   : > { %v2768_v33 = vpop.f32.mrb[112].mxu0  ;;  %v2417_v53 = vpop.f32.mrb[112].mxu1 }
 0x3c9   : > { %v5449_v50 = vpop.f32.mrb[113].mxu0  ;;  %v2518_v29 = vrot.slane %v2417_v53, 2  ;;  %v5335_v8 = vpop.f32.mrb[113].mxu1 }
 0x3ca   : > { %v2770_v59 = vpop.f32.mrb[114].mxu0  ;;  %v2420_v10 = vpop.f32.mrb[114].mxu1 }
 0x3cb   : > { %v7667_v56 = vadd.f32 %v2770_v59, %v2583_v7  ;;  %v5450_v31 = vpop.f32.mrb[115].mxu0  ;;  %v2519_v18 = vrot.slane %v2420_v10, 2  ;;  %v5336_v63 = vpop.f32.mrb[115].mxu1  ;;  %v2536_v3 = vsel %vm1508_vm4, %v2517_v46, %v2518_v29 }
 0x3cc   : > { %v2585_v47 = vadd.f32 %v2536_v3, %v7284_v32 }
 0x3cd   : > { %5676 = vmatmul.mubr.msk.bf16.gmra.mrb[220].mxu0 %vm494_vm2, %v7270_v2  ;;  %5562 = vmatmul.mubr.msk.bf16.gmra.mrb[220].mxu1 %vm494_vm2, %v7287_v61  ;;  %v2535_v23 = vsel %vm1508_vm4, %v2518_v29, %v2519_v18  ;;  %v5824_v18 = vld [vmem:[%s5924_s26 + $0xa0] sm:$0xff]  }
 0x3ce   : > { %5679 = vmatprep.mubr.msk.bf16.mxu0 %vm5859_vm1, %v8133_v13  ;;  %5565 = vmatprep.mubr.msk.bf16.mxu1 %vm5859_vm1, %v8133_v13  ;;  %v2586_v20 = vadd.f32 %v2535_v23, %v7297_v4 }
 0x3d0   : > { %v2775_v7 = vpop.f32.mrb[116].mxu0  ;;  %v2425_v27 = vpop.f32.mrb[116].mxu1 }
 0x3d1   : > { %v7683_v41 = vadd.f32 %v2775_v7, %v2584_v1  ;;  %v5453_v2 = vpop.f32.mrb[117].mxu0  ;;  %v2520_v32 = vrot.slane %v2425_v27, 2  ;;  %v5339_v0 = vpop.f32.mrb[117].mxu1 }
 0x3d2   : > { %v2778_v37 = vpop.f32.mrb[118].mxu0  ;;  %v2428_v35 = vpop.f32.mrb[118].mxu1 }
 0x3d3   : > { %v5454_v25 = vpop.f32.mrb[119].mxu0  ;;  %v2521_v62 = vrot.slane %v2428_v35, 2  ;;  %v5340_v36 = vpop.f32.mrb[119].mxu1 }
 0x3d4   : > { %v5825_v25 = vld [vmem:[%s5924_s26 + $0xa8] sm:$0xff]  }
 0x3d5   : > { %5680 = vmatmul.mubr.msk.bf16.gmra.mrb[224].mxu0 %vm494_vm2, %v7287_v61  ;;  %5566 = vmatmul.mubr.msk.bf16.gmra.mrb[224].mxu1 %vm494_vm2, %v7303_v6  ;;  %v2534_v4 = vsel %vm1508_vm4, %v2520_v32, %v2521_v62 }
 0x3d6   : > { %5683 = vmatprep.mubr.msk.bf16.mxu0 %vm5859_vm1, %v8133_v13  ;;  %5569 = vmatprep.mubr.msk.bf16.mxu1 %vm5859_vm1, %v8133_v13  ;;  %v2587_v15 = vadd.f32 %v2534_v4, %v7313_v5 }
 0x3d8   : > { %v2782_v12 = vpop.f32.mrb[120].mxu0  ;;  %v2433_v1 = vpop.f32.mrb[120].mxu1 }
 0x3d9   : > { %v7696_v46 = vadd.f32 %v2782_v12, %v2585_v47  ;;  %v5457_v61 = vpop.f32.mrb[121].mxu0  ;;  %v2522_v33 = vrot.slane %v2433_v1, 2  ;;  %v5343_v50 = vpop.f32.mrb[121].mxu1 }
 0x3da   : > { %v2785_v53 = vpop.f32.mrb[122].mxu0  ;;  %v2436_v59 = vpop.f32.mrb[122].mxu1 }
 0x3db   : > { %v7698_v29 = vadd.f32 %v2785_v53, %v2586_v20  ;;  %v5458_v8 = vpop.f32.mrb[123].mxu0  ;;  %v5344_v10 = vpop.f32.mrb[123].mxu1  ;;  %v2533_v31 = vsel %vm1508_vm4, %v2521_v62, %v2522_v33  ;;  %v2523_v63 = vrot.slane %v2436_v59, 2 }
 0x3dc   : > { %v2588_v5 = vadd.f32 %v2533_v31, %v7320_v52  ;;  %v5826_v10 = vld [vmem:[%s5924_s26 + $0xb0] sm:$0xff]  }
 0x3dd   : > { %5684 = vmatmul.mubr.msk.bf16.gmra.mrb[228].mxu0 %vm494_vm2, %v7303_v6  ;;  %5570 = vmatmul.mubr.msk.bf16.gmra.mrb[228].mxu1 %vm494_vm2, %v5824_v18 }
 0x3de   : > { %5687 = vmatprep.mubr.msk.bf16.mxu0 %vm5859_vm1, %v8133_v13  ;;  %5573 = vmatprep.mubr.msk.bf16.mxu1 %vm5859_vm1, %v8133_v13 }
 0x3e0   : > { %v2790_v3 = vpop.f32.mrb[124].mxu0  ;;  %v2441_v47 = vpop.f32.mrb[124].mxu1 }
 0x3e1   : > { %v5461_v23 = vpop.f32.mrb[125].mxu0  ;;  %v2524_v20 = vrot.slane %v2441_v47, 2  ;;  %v5347_v7 = vpop.f32.mrb[125].mxu1 }
 0x3e2   : > { %v2792_v27 = vpop.f32.mrb[126].mxu0  ;;  %v2444_v6 = vpop.f32.mrb[126].mxu1 }
 0x3e3   : > { %v7711_v2 = vadd.f32 %v2792_v27, %v2587_v15  ;;  %v5462_v52 = vpop.f32.mrb[127].mxu0  ;;  %v2525_v32 = vrot.slane %v2444_v6, 2  ;;  %v5348_v0 = vpop.f32.mrb[127].mxu1  ;;  %v2532_v37 = vsel %vm1508_vm4, %v2523_v63, %v2524_v20 }
 0x3e4   : > { %v2589_v35 = vadd.f32 %v2532_v37, %v7334_v9  ;;  %v5827_v0 = vld [vmem:[%s5924_s26 + $0xb8] sm:$0xff]  }
 0x3e5   : > { %5688 = vmatmul.mubr.msk.bf16.gmra.mrb[232].mxu0 %vm494_vm2, %v5824_v18  ;;  %5574 = vmatmul.mubr.msk.bf16.gmra.mrb[232].mxu1 %vm494_vm2, %v5825_v25  ;;  %v2531_v62 = vsel %vm1508_vm4, %v2524_v20, %v2525_v32 }
 0x3e6   : > { %5691 = vmatprep.mubr.msk.bf16.mxu0 %vm5859_vm1, %v8133_v13  ;;  %5577 = vmatprep.mubr.msk.bf16.mxu1 %vm5859_vm1, %v8133_v13  ;;  %v2590_v36 = vadd.f32 %v2531_v62, %v7344_v60 }
 0x3e8   : > { %v2797_v4 = vpop.f32.mrb[128].mxu0  ;;  %v2449_v15 = vpop.f32.mrb[128].mxu1 }
 0x3e9   : > { %v7726_v12 = vadd.f32 %v2797_v4, %v2588_v5  ;;  %v5465_v9 = vpop.f32.mrb[129].mxu0  ;;  %v2526_v1 = vrot.slane %v2449_v15, 2  ;;  %v5351_v61 = vpop.f32.mrb[129].mxu1 }
 0x3ea   : > { %v2800_v33 = vpop.f32.mrb[130].mxu0  ;;  %v2452_v53 = vpop.f32.mrb[130].mxu1 }
 0x3eb   : > { %v5466_v50 = vpop.f32.mrb[131].mxu0  ;;  %v2527_v8 = vrot.slane %v2452_v53, 2  ;;  %v5352_v59 = vpop.f32.mrb[131].mxu1 }
 0x3ed   : > { %5692 = vmatmul.mubr.msk.bf16.gmra.mrb[236].mxu0 %vm494_vm2, %v5825_v25  ;;  %5578 = vmatmul.mubr.msk.bf16.gmra.mrb[236].mxu1 %vm494_vm2, %v5826_v10  ;;  %v2530_v60 = vsel %vm1508_vm4, %v2526_v1, %v2527_v8 }
 0x3ee   : > { %5695 = vmatprep.mubr.msk.bf16.mxu0 %vm5859_vm1, %v8133_v13  ;;  %5581 = vmatprep.mubr.msk.bf16.mxu1 %vm5859_vm1, %v8133_v13  ;;  %v2591_v31 = vadd.f32 %v2530_v60, %v7356_v42 }
 0x3f0   : > { %v2804_v5 = vpop.f32.mrb[132].mxu0  ;;  %v2457_v18 = vpop.f32.mrb[132].mxu1 }
 0x3f1   : > { %v7738_v63 = vadd.f32 %v2804_v5, %v2589_v35  ;;  %v5469_v3 = vpop.f32.mrb[133].mxu0  ;;  %v2528_v47 = vrot.slane %v2457_v18, 2  ;;  %v5355_v20 = vpop.f32.mrb[133].mxu1  ;;  %v5829_v5 = vld [vmem:[%s5924_s26 + $0xc8] sm:$0xff]  }
 0x3f2   : > { %v2807_v23 = vpop.f32.mrb[134].mxu0  ;;  %v2460_v6 = vpop.f32.mrb[134].mxu1 }
 0x3f3   : > { %v7740_v7 = vadd.f32 %v2807_v23, %v2590_v36  ;;  %v5470_v27 = vpop.f32.mrb[135].mxu0  ;;  %v5356_v52 = vpop.f32.mrb[135].mxu1  ;;  %v2529_v32 = vsel %vm1508_vm4, %v2527_v8, %v2528_v47 }
 0x3f4   : > { %v2592_v42 = vadd.f32 %v2529_v32, %v7362_v58  ;;  %v5828_v58 = vld [vmem:[%s5924_s26 + $0xc0] sm:$0xff]   ;;  %v5830_v32 = vld [vmem:[%s5924_s26 + $0xd0] sm:$0xff]  }
 0x3f5   : > { %5696 = vmatmul.mubr.msk.bf16.gmra.mrb[240].mxu0 %vm494_vm2, %v5826_v10  ;;  %5582 = vmatmul.mubr.msk.bf16.gmra.mrb[240].mxu1 %vm494_vm2, %v5827_v0 }
 0x3f6   : > { %5699 = vmatprep.mubr.msk.bf16.mxu0 %vm5859_vm1, %v8133_v13  ;;  %5585 = vmatprep.mubr.msk.bf16.mxu1 %vm5859_vm1, %v8133_v13 }
 0x3f8   : > { %v2812_v37 = vpop.f32.mrb[136].mxu0  ;;  %v2464_v25 = vpop.f32.mrb[136].mxu1 }
 0x3f9   : > { %v5473_v35 = vpop.f32.mrb[137].mxu0  ;;  %v5359_v36 = vpop.f32.mrb[137].mxu1 }
 0x3fa   : > { %v2814_v62 = vpop.f32.mrb[138].mxu0  ;;  %v2466_v9 = vpop.f32.mrb[138].mxu1 }
 0x3fb   : > { %v7752_v4 = vadd.f32 %v2814_v62, %v2591_v31  ;;  %v5474_v15 = vpop.f32.mrb[139].mxu0  ;;  %v5360_v1 = vpop.f32.mrb[139].mxu1  ;;  %v5831_v9 = vld [vmem:[%s5924_s26 + $0xd8] sm:$0xff]  }
 0x3fd   : > { %5700 = vmatmul.mubr.msk.bf16.gmra.mrb[244].mxu0 %vm494_vm2, %v5827_v0  ;;  %5586 = vmatmul.mubr.msk.bf16.gmra.mrb[244].mxu1 %vm494_vm2, %v5828_v58 }
 0x3fe   : > { %5703 = vmatprep.mubr.msk.bf16.mxu0 %vm5859_vm1, %v8133_v13  ;;  %5589 = vmatprep.mubr.msk.bf16.mxu1 %vm5859_vm1, %v8133_v13 }
 0x400   : > { %v2819_v61 = vpop.f32.mrb[140].mxu0  ;;  %v2470_v50 = vpop.f32.mrb[140].mxu1 }
 0x401   : > { %v7761_v33 = vadd.f32 %v2819_v61, %v2592_v42  ;;  %v5477_v53 = vpop.f32.mrb[141].mxu0  ;;  %v5363_v59 = vpop.f32.mrb[141].mxu1 }
 0x402   : > { %v2822_v8 = vpop.f32.mrb[142].mxu0  ;;  %v2472_v60 = vpop.f32.mrb[142].mxu1 }
 0x403   : > { %v5478_v10 = vpop.f32.mrb[143].mxu0  ;;  %v5364_v31 = vpop.f32.mrb[143].mxu1 }
 0x405   : > { %5704 = vmatmul.mubr.msk.bf16.gmra.mrb[248].mxu0 %vm494_vm2, %v5828_v58  ;;  %5590 = vmatmul.mubr.msk.bf16.gmra.mrb[248].mxu1 %vm494_vm2, %v5829_v5 }
 0x406   : > { %5707 = vmatprep.mubr.msk.bf16.mxu0 %vm5859_vm1, %v8133_v13  ;;  %5593 = vmatprep.mubr.msk.bf16.mxu1 %vm5859_vm1, %v8133_v13 }
 0x408   : > { %v2826_v18 = vpop.f32.mrb[144].mxu0  ;;  %v2476_v47 = vpop.f32.mrb[144].mxu1 }
 0x409   : > { %v5481_v3 = vpop.f32.mrb[145].mxu0  ;;  %v5367_v20 = vpop.f32.mrb[145].mxu1 }
 0x40a   : > { %v2828_v23 = vpop.f32.mrb[146].mxu0  ;;  %v2478_v6 = vpop.f32.mrb[146].mxu1 }
 0x40b   : > { %v5482_v27 = vpop.f32.mrb[147].mxu0  ;;  %v5368_v52 = vpop.f32.mrb[147].mxu1 }
 0x40d   : > { %5708 = vmatmul.mubr.msk.bf16.gmra.mrb[252].mxu0 %vm494_vm2, %v5829_v5  ;;  %5594 = vmatmul.mubr.msk.bf16.gmra.mrb[252].mxu1 %vm494_vm2, %v5830_v32 }
 0x40e   : > { %5711 = vmatprep.mubr.msk.bf16.mxu0 %vm5859_vm1, %v8133_v13  ;;  %5597 = vmatprep.mubr.msk.bf16.mxu1 %vm5859_vm1, %v8133_v13 }
 0x410   : > { %v2832_v42 = vpop.f32.mrb[148].mxu0  ;;  %v2908_v37 = vpop.f32.mrb[148].mxu1 }
 0x411   : > { %v5485_v0 = vpop.f32.mrb[149].mxu0  ;;  %v5491_v25 = vpop.f32.mrb[149].mxu1 }
 0x412   : > { %v2834_v35 = vpop.f32.mrb[150].mxu0  ;;  %v2910_v36 = vpop.f32.mrb[150].mxu1 }
 0x413   : > { %v5486_v62 = vpop.f32.mrb[151].mxu0  ;;  %v5492_v15 = vpop.f32.mrb[151].mxu1 }
 0x415   : > { %5712 = vmatmul.mubr.msk.bf16.gmra.mrb[0].mxu0 %vm494_vm2, %v5830_v32  ;;  %5598 = vmatmul.mubr.msk.bf16.gmra.mrb[0].mxu1 %vm494_vm2, %v5831_v9 }
 0x416   : > { %5715 = vmatprep.mubr.msk.bf16.mxu0 %vm5859_vm1, %v8133_v13  ;;  %5601 = vmatprep.mubr.msk.bf16.mxu1 %vm5859_vm1, %v8133_v13 }
 0x418   : > { %v3280_v1 = vpop.f32.mrb[152].mxu0  ;;  %v2914_v61 = vpop.f32.mrb[152].mxu1 }
 0x419   : > { %v5609_v58 = vpop.f32.mrb[153].mxu0  ;;  %v5495_v50 = vpop.f32.mrb[153].mxu1 }
 0x41a   : > { %v3282_v53 = vpop.f32.mrb[154].mxu0  ;;  %v2916_v59 = vpop.f32.mrb[154].mxu1 }
 0x41b   : > { %v5610_v8 = vpop.f32.mrb[155].mxu0  ;;  %v5496_v10 = vpop.f32.mrb[155].mxu1 }
 0x41d   : > { %5716 = vmatmul.mubr.msk.bf16.gmra.mrb[4].mxu0 %vm494_vm2, %v5831_v9  ;;  %5602 = vmatmul.mubr.msk.bf16.gmra.mrb[4].mxu1 %vm494_vm2, %v7407_v28 }
 0x41e   : > { %5719 = vmatprep.mubr.msk.bf16.mxu0 %vm5859_vm1, %v8133_v13 }
 0x420   : > { %v3286_v60 = vpop.f32.mrb[156].mxu0  ;;  %v2920_v5 = vpop.f32.mrb[156].mxu1 }
 0x421   : > { %v5613_v31 = vpop.f32.mrb[157].mxu0  ;;  %v5499_v3 = vpop.f32.mrb[157].mxu1  ;;  %v7802_v5 = vld [vmem:[%s8105_s2] ss:$0 sm:$0xff] }
 0x422   : > { %v3288_v18 = vpop.f32.mrb[158].mxu0  ;;  %v2922_v23 = vpop.f32.mrb[158].mxu1  ;;  %v7807_v3 = vld [vmem:[%s8106_s3] ss:$0 sm:$0xff] }
 0x423   : > { %v5614_v47 = vpop.f32.mrb[159].mxu0  ;;  %v5500_v20 = vpop.f32.mrb[159].mxu1 }
 0x425   : > { %5720 = vmatmul.mubr.msk.bf16.gmra.mrb[8].mxu0 %vm494_vm2, %v7407_v28 }
 0x428   : > { %v3292_v27 = vpop.f32.mrb[160].mxu0  ;;  %v2926_v6 = vpop.f32.mrb[160].mxu1 }
 0x429   : > { %v5617_v52 = vpop.f32.mrb[161].mxu0  ;;  %v3129_v32 = vrot.slane %v2926_v6, 1  ;;  %v5503_v42 = vpop.f32.mrb[161].mxu1 }
 0x42a   : > { %v3294_v0 = vpop.f32.mrb[162].mxu0  ;;  %v2929_v37 = vpop.f32.mrb[162].mxu1 }
 0x42b   : > { %v5618_v35 = vpop.f32.mrb[163].mxu0  ;;  %v3130_v13 = vrot.slane %v2929_v37, 1  ;;  %v5504_v25 = vpop.f32.mrb[163].mxu1 }
 0x42d   : > { %v3208_v62 = vsel %vm1135_vm3, %v3129_v32, %v3130_v13 }
 0x42e   : > { %v3209_v36 = vadd.f32 %v3208_v62, %v7432_v45 }
 0x430   : > { %v3298_v15 = vpop.f32.mrb[164].mxu0  ;;  %v2934_v9 = vpop.f32.mrb[164].mxu1 }
 0x431   : > { %v5621_v1 = vpop.f32.mrb[165].mxu0  ;;  %v3131_v58 = vrot.slane %v2934_v9, 1  ;;  %v5507_v61 = vpop.f32.mrb[165].mxu1  ;;  %v3501_v53 = vrot.slane %v3298_v15, 2 }
 0x432   : > { %v3301_v28 = vpop.f32.mrb[166].mxu0  ;;  %v2937_v59 = vpop.f32.mrb[166].mxu1 }
 0x433   : > { %v3502_v50 = vrot.slane %v3301_v28, 2  ;;  %v5622_v8 = vpop.f32.mrb[167].mxu0  ;;  %v3207_v10 = vsel %vm1135_vm3, %v3130_v13, %v3131_v58  ;;  %v5508_v60 = vpop.f32.mrb[167].mxu1  ;;  %v3132_v23 = vrot.slane %v2937_v59, 1 }
 0x434   : > { %v3210_v31 = vadd.f32 %v3207_v10, %v7434_v57 }
 0x435   : > { %v3580_v45 = vsel %vm1508_vm4, %v3501_v53, %v3502_v50 }
 0x436   : > { %v3581_v18 = vadd.f32 %v3580_v45, %v3209_v36 }
 0x438   : > { %v3620_v47 = vmul.f32 %v7802_v5, %v3581_v18  ;;  %v3306_v20 = vpop.f32.mrb[168].mxu0  ;;  %v2942_v27 = vpop.f32.mrb[168].mxu1 }
 0x439   : > { %v3503_v57 = vrot.slane %v3306_v20, 2  ;;  %v5625_v6 = vpop.f32.mrb[169].mxu0  ;;  %v3133_v32 = vrot.slane %v2942_v27, 1  ;;  %v5511_v42 = vpop.f32.mrb[169].mxu1 }
 0x43a   : > { %v3659_v52 = vadd.f32 %v7807_v3, %v3620_v47  ;;  %v3309_v0 = vpop.f32.mrb[170].mxu0  ;;  %v2945_v35 = vpop.f32.mrb[170].mxu1 }
 0x43b   : > { %v3579_v37 = vsel %vm1508_vm4, %v3502_v50, %v3503_v57  ;;  %v5626_v13 = vpop.f32.mrb[171].mxu0  ;;  %v3206_v62 = vsel %vm1135_vm3, %v3132_v23, %v3133_v32  ;;  %v3134_v15 = vrot.slane %v2945_v35, 1  ;;  %v5512_v9 = vpop.f32.mrb[171].mxu1  ;;  %v3504_v59 = vrot.slane %v3309_v0, 2 }
 0x43c   : > { %v3691_v25 = vmax.f32 %v3659_v52, 0.0  ;;  %v3582_v36 = vadd.f32 %v3579_v37, %v3210_v31  ;;  %v3211_v1 = vadd.f32 %v3206_v62, %v7447_v34 }
 0x43d   : > { %v3205_v61 = vsel %vm1135_vm3, %v3133_v32, %v3134_v15 }
 0x43e   : > { %v4359_v58 = vpack.c.bf16 %v3691_v25, %v3691_v25  ;;  %v3621_v28 = vmul.f32 %v7802_v5, %v3582_v36  ;;  %v3212_v53 = vadd.f32 %v3205_v61, %v7463_v54 }
 0x440   : > { %3852 = vst.msk [vmem:[%s7819_s15] sm:$0xf] %vm3851_vm5, %v4359_v58  ;;  %v3660_v50 = vadd.f32 %v7807_v3, %v3621_v28  ;;  %v3314_v8 = vpop.f32.mrb[172].mxu0  ;;  %v2950_v10 = vpop.f32.mrb[172].mxu1 }
 0x441   : > { %v3505_v60 = vrot.slane %v3314_v8, 2  ;;  %v5629_v31 = vpop.f32.mrb[173].mxu0  ;;  %v3135_v34 = vrot.slane %v2950_v10, 1  ;;  %v5515_v18 = vpop.f32.mrb[173].mxu1 }
 0x442   : > { %v3692_v45 = vmax.f32 %v3660_v50, 0.0  ;;  %v3317_v47 = vpop.f32.mrb[174].mxu0  ;;  %v2953_v20 = vpop.f32.mrb[174].mxu1 }
 0x443   : > { %v3578_v23 = vsel %vm1508_vm4, %v3504_v59, %v3505_v60  ;;  %v3506_v27 = vrot.slane %v3317_v47, 2  ;;  %v5630_v54 = vpop.f32.mrb[175].mxu0  ;;  %v3136_v52 = vrot.slane %v2953_v20, 1  ;;  %v5516_v32 = vpop.f32.mrb[175].mxu1 }
 0x444   : > { %v4360_v57 = vpack.c.bf16 %v3692_v45, %v3692_v45  ;;  %v3583_v6 = vadd.f32 %v3578_v23, %v3211_v1 }
 0x445   : > { %v3577_v42 = vsel %vm1508_vm4, %v3505_v60, %v3506_v27  ;;  %v3204_v37 = vsel %vm1135_vm3, %v3135_v34, %v3136_v52 }
 0x446   : > { %3853 = vst.msk [vmem:[%s7819_s15 + $0x4] sm:$0xf] %vm3851_vm5, %v4360_v57  ;;  %v3622_v0 = vmul.f32 %v7802_v5, %v3583_v6  ;;  %v3584_v35 = vadd.f32 %v3577_v42, %v3212_v53  ;;  %v3213_v13 = vadd.f32 %v3204_v37, %v7476_v30 }
 0x448   : > { %v3661_v25 = vadd.f32 %v7807_v3, %v3622_v0  ;;  %v3623_v62 = vmul.f32 %v7802_v5, %v3584_v35  ;;  %v3322_v36 = vpop.f32.mrb[176].mxu0  ;;  %v2958_v15 = vpop.f32.mrb[176].mxu1 }
 0x449   : > { %v5633_v9 = vpop.f32.mrb[177].mxu0  ;;  %v3137_v28 = vrot.slane %v2958_v15, 1  ;;  %v5519_v50 = vpop.f32.mrb[177].mxu1  ;;  %v3507_v8 = vrot.slane %v3322_v36, 2 }
 0x44a   : > { %v3693_v1 = vmax.f32 %v3661_v25, 0.0  ;;  %v3662_v58 = vadd.f32 %v7807_v3, %v3623_v62  ;;  %v3325_v61 = vpop.f32.mrb[178].mxu0  ;;  %v2961_v10 = vpop.f32.mrb[178].mxu1 }
 0x44b   : > { %v3508_v59 = vrot.slane %v3325_v61, 2  ;;  %v5634_v53 = vpop.f32.mrb[179].mxu0  ;;  %v3203_v31 = vsel %vm1135_vm3, %v3136_v52, %v3137_v28  ;;  %v5520_v45 = vpop.f32.mrb[179].mxu1  ;;  %v3138_v27 = vrot.slane %v2961_v10, 1 }
 0x44c   : > { %v4361_v30 = vpack.c.bf16 %v3693_v1, %v3693_v1  ;;  %v3694_v60 = vmax.f32 %v3662_v58, 0.0  ;;  %v3214_v34 = vadd.f32 %v3203_v31, %v7478_v48 }
 0x44d   : > { %v3576_v18 = vsel %vm1508_vm4, %v3507_v8, %v3508_v59 }
 0x44e   : > { %3854 = vst.msk [vmem:[%s7819_s15 + $0x8] sm:$0xf] %vm3851_vm5, %v4361_v30  ;;  %v4362_v47 = vpack.c.bf16 %v3694_v60, %v3694_v60  ;;  %v3585_v23 = vadd.f32 %v3576_v18, %v3213_v13 }
 0x450   : > { %3855 = vst.msk [vmem:[%s7819_s15 + $0xc] sm:$0xf] %vm3851_vm5, %v4362_v47  ;;  %v3624_v20 = vmul.f32 %v7802_v5, %v3585_v23  ;;  %v3330_v54 = vpop.f32.mrb[180].mxu0  ;;  %v2966_v57 = vpop.f32.mrb[180].mxu1 }
 0x451   : > { %v3509_v6 = vrot.slane %v3330_v54, 2  ;;  %v5637_v32 = vpop.f32.mrb[181].mxu0  ;;  %v3139_v42 = vrot.slane %v2966_v57, 1  ;;  %v5523_v48 = vpop.f32.mrb[181].mxu1 }
 0x452   : > { %v3663_v52 = vadd.f32 %v7807_v3, %v3624_v20  ;;  %v3333_v0 = vpop.f32.mrb[182].mxu0  ;;  %v2969_v35 = vpop.f32.mrb[182].mxu1 }
 0x453   : > { %v3575_v37 = vsel %vm1508_vm4, %v3508_v59, %v3509_v6  ;;  %v5638_v13 = vpop.f32.mrb[183].mxu0  ;;  %v3202_v62 = vsel %vm1135_vm3, %v3138_v27, %v3139_v42  ;;  %v3140_v15 = vrot.slane %v2969_v35, 1  ;;  %v5524_v9 = vpop.f32.mrb[183].mxu1  ;;  %v3510_v53 = vrot.slane %v3333_v0, 2 }
 0x454   : > { %v3695_v25 = vmax.f32 %v3663_v52, 0.0  ;;  %v3586_v36 = vadd.f32 %v3575_v37, %v3214_v34  ;;  %v3215_v1 = vadd.f32 %v3202_v62, %v7491_v43 }
 0x455   : > { %v3201_v61 = vsel %vm1135_vm3, %v3139_v42, %v3140_v15 }
 0x456   : > { %v4363_v58 = vpack.c.bf16 %v3695_v25, %v3695_v25  ;;  %v3625_v28 = vmul.f32 %v7802_v5, %v3586_v36  ;;  %v3216_v50 = vadd.f32 %v3201_v61, %v7507_v55 }
 0x458   : > { %3856 = vst.msk [vmem:[%s7819_s15 + $0x10] sm:$0xf] %vm3851_vm5, %v4363_v58  ;;  %v3664_v8 = vadd.f32 %v7807_v3, %v3625_v28  ;;  %v3338_v59 = vpop.f32.mrb[184].mxu0  ;;  %v2974_v10 = vpop.f32.mrb[184].mxu1 }
 0x459   : > { %v3511_v30 = vrot.slane %v3338_v59, 2  ;;  %v5641_v60 = vpop.f32.mrb[185].mxu0  ;;  %v3141_v43 = vrot.slane %v2974_v10, 1  ;;  %v5527_v45 = vpop.f32.mrb[185].mxu1 }
 0x45a   : > { %v3696_v31 = vmax.f32 %v3664_v8, 0.0  ;;  %v3341_v34 = vpop.f32.mrb[186].mxu0  ;;  %v2977_v47 = vpop.f32.mrb[186].mxu1 }
 0x45b   : > { %v3574_v18 = vsel %vm1508_vm4, %v3510_v53, %v3511_v30  ;;  %v3512_v23 = vrot.slane %v3341_v34, 2  ;;  %v5642_v55 = vpop.f32.mrb[187].mxu0  ;;  %v3142_v54 = vrot.slane %v2977_v47, 1  ;;  %v5528_v57 = vpop.f32.mrb[187].mxu1 }
 0x45c   : > { %v4364_v20 = vpack.c.bf16 %v3696_v31, %v3696_v31  ;;  %v3587_v27 = vadd.f32 %v3574_v18, %v3215_v1 }
 0x45d   : > { %v3573_v6 = vsel %vm1508_vm4, %v3511_v30, %v3512_v23  ;;  %v3200_v52 = vsel %vm1135_vm3, %v3141_v43, %v3142_v54 }
 0x45e   : > { %3857 = vst.msk [vmem:[%s7819_s15 + $0x14] sm:$0xf] %vm3851_vm5, %v4364_v20  ;;  %v3626_v32 = vmul.f32 %v7802_v5, %v3587_v27  ;;  %v3588_v42 = vadd.f32 %v3573_v6, %v3216_v50  ;;  %v3217_v48 = vadd.f32 %v3200_v52, %v7520_v24 }
 0x460   : > { %v3665_v0 = vadd.f32 %v7807_v3, %v3626_v32  ;;  %v3627_v37 = vmul.f32 %v7802_v5, %v3588_v42  ;;  %v3346_v35 = vpop.f32.mrb[188].mxu0  ;;  %v2982_v13 = vpop.f32.mrb[188].mxu1 }
 0x461   : > { %v5645_v25 = vpop.f32.mrb[189].mxu0  ;;  %v3143_v15 = vrot.slane %v2982_v13, 1  ;;  %v5531_v1 = vpop.f32.mrb[189].mxu1  ;;  %v3513_v58 = vrot.slane %v3346_v35, 2 }
 0x462   : > { %v3697_v62 = vmax.f32 %v3665_v0, 0.0  ;;  %v3666_v36 = vadd.f32 %v7807_v3, %v3627_v37  ;;  %v3349_v9 = vpop.f32.mrb[190].mxu0  ;;  %v2985_v50 = vpop.f32.mrb[190].mxu1 }
 0x463   : > { %v3514_v28 = vrot.slane %v3349_v9, 2  ;;  %v5646_v61 = vpop.f32.mrb[191].mxu0  ;;  %v3199_v59 = vsel %vm1135_vm3, %v3142_v54, %v3143_v15  ;;  %v5532_v53 = vpop.f32.mrb[191].mxu1  ;;  %v3144_v45 = vrot.slane %v2985_v50, 1 }
 0x464   : > { %v4365_v24 = vpack.c.bf16 %v3697_v62, %v3697_v62  ;;  %v3698_v8 = vmax.f32 %v3666_v36, 0.0  ;;  %v3218_v10 = vadd.f32 %v3199_v59, %v7522_v51 }
 0x465   : > { %v3572_v30 = vsel %vm1508_vm4, %v3513_v58, %v3514_v28 }
 0x466   : > { %3858 = vst.msk [vmem:[%s7819_s15 + $0x18] sm:$0xf] %vm3851_vm5, %v4365_v24  ;;  %v4366_v60 = vpack.c.bf16 %v3698_v8, %v3698_v8  ;;  %v3589_v31 = vadd.f32 %v3572_v30, %v3217_v48 }
 0x468   : > { %3859 = vst.msk [vmem:[%s7819_s15 + $0x1c] sm:$0xf] %vm3851_vm5, %v4366_v60  ;;  %v3628_v43 = vmul.f32 %v7802_v5, %v3589_v31  ;;  %v3354_v34 = vpop.f32.mrb[192].mxu0  ;;  %v2990_v18 = vpop.f32.mrb[192].mxu1 }
 0x469   : > { %v3515_v47 = vrot.slane %v3354_v34, 2  ;;  %v5649_v23 = vpop.f32.mrb[193].mxu0  ;;  %v3145_v20 = vrot.slane %v2990_v18, 1  ;;  %v5535_v51 = vpop.f32.mrb[193].mxu1 }
 0x46a   : > { %v3667_v55 = vadd.f32 %v7807_v3, %v3628_v43  ;;  %v3357_v27 = vpop.f32.mrb[194].mxu0  ;;  %v2993_v57 = vpop.f32.mrb[194].mxu1 }
 0x46b   : > { %v3571_v54 = vsel %vm1508_vm4, %v3514_v28, %v3515_v47  ;;  %v5650_v6 = vpop.f32.mrb[195].mxu0  ;;  %v3198_v52 = vsel %vm1135_vm3, %v3144_v45, %v3145_v20  ;;  %v3146_v48 = vrot.slane %v2993_v57, 1  ;;  %v5536_v0 = vpop.f32.mrb[195].mxu1  ;;  %v3516_v9 = vrot.slane %v3357_v27, 2 }
 0x46c   : > { %v3699_v32 = vmax.f32 %v3667_v55, 0.0  ;;  %v3590_v42 = vadd.f32 %v3571_v54, %v3218_v10  ;;  %v3219_v37 = vadd.f32 %v3198_v52, %v7535_v49 }
 0x46d   : > { %v3197_v25 = vsel %vm1135_vm3, %v3145_v20, %v3146_v48 }
 0x46e   : > { %v4367_v35 = vpack.c.bf16 %v3699_v32, %v3699_v32  ;;  %v3629_v13 = vmul.f32 %v7802_v5, %v3590_v42  ;;  %v3220_v62 = vadd.f32 %v3197_v25, %v7551_v16 }
 0x470   : > { %3860 = vst.msk [vmem:[%s7819_s15 + $0x20] sm:$0xf] %vm3851_vm5, %v4367_v35  ;;  %v3668_v36 = vadd.f32 %v7807_v3, %v3629_v13  ;;  %v3362_v15 = vpop.f32.mrb[196].mxu0  ;;  %v2998_v1 = vpop.f32.mrb[196].mxu1 }
 0x471   : > { %v3517_v58 = vrot.slane %v3362_v15, 2  ;;  %v5653_v28 = vpop.f32.mrb[197].mxu0  ;;  %v3147_v49 = vrot.slane %v2998_v1, 1  ;;  %v5539_v50 = vpop.f32.mrb[197].mxu1 }
 0x472   : > { %v3700_v61 = vmax.f32 %v3668_v36, 0.0  ;;  %v3365_v24 = vpop.f32.mrb[198].mxu0  ;;  %v3001_v59 = vpop.f32.mrb[198].mxu1 }
 0x473   : > { %v3570_v8 = vsel %vm1508_vm4, %v3516_v9, %v3517_v58  ;;  %v3518_v53 = vrot.slane %v3365_v24, 2  ;;  %v5654_v16 = vpop.f32.mrb[199].mxu0  ;;  %v3148_v60 = vrot.slane %v3001_v59, 1  ;;  %v5540_v31 = vpop.f32.mrb[199].mxu1 }
 0x474   : > { %v4368_v10 = vpack.c.bf16 %v3700_v61, %v3700_v61  ;;  %v3591_v30 = vadd.f32 %v3570_v8, %v3219_v37 }
 0x475   : > { %v3569_v43 = vsel %vm1508_vm4, %v3517_v58, %v3518_v53  ;;  %v3196_v34 = vsel %vm1135_vm3, %v3147_v49, %v3148_v60 }
 0x476   : > { %3861 = vst.msk [vmem:[%s7819_s15 + $0x24] sm:$0xf] %vm3851_vm5, %v4368_v10  ;;  %v3630_v45 = vmul.f32 %v7802_v5, %v3591_v30  ;;  %v3592_v18 = vadd.f32 %v3569_v43, %v3220_v62  ;;  %v3221_v47 = vadd.f32 %v3196_v34, %v7564_v44 }
 0x478   : > { %v3669_v23 = vadd.f32 %v7807_v3, %v3630_v45  ;;  %v3631_v55 = vmul.f32 %v7802_v5, %v3592_v18  ;;  %v3370_v20 = vpop.f32.mrb[200].mxu0  ;;  %v3006_v51 = vpop.f32.mrb[200].mxu1 }
 0x479   : > { %v5657_v27 = vpop.f32.mrb[201].mxu0  ;;  %v3149_v6 = vrot.slane %v3006_v51, 1  ;;  %v5543_v52 = vpop.f32.mrb[201].mxu1  ;;  %v3519_v42 = vrot.slane %v3370_v20, 2 }
 0x47a   : > { %v3701_v54 = vmax.f32 %v3669_v23, 0.0  ;;  %v3670_v57 = vadd.f32 %v7807_v3, %v3631_v55  ;;  %v3373_v32 = vpop.f32.mrb[202].mxu0  ;;  %v3009_v37 = vpop.f32.mrb[202].mxu1 }
 0x47b   : > { %v3520_v48 = vrot.slane %v3373_v32, 2  ;;  %v5658_v0 = vpop.f32.mrb[203].mxu0  ;;  %v3195_v13 = vsel %vm1135_vm3, %v3148_v60, %v3149_v6  ;;  %v5544_v25 = vpop.f32.mrb[203].mxu1  ;;  %v3150_v58 = vrot.slane %v3009_v37, 1 }
 0x47c   : > { %v4369_v44 = vpack.c.bf16 %v3701_v54, %v3701_v54  ;;  %v3702_v35 = vmax.f32 %v3670_v57, 0.0  ;;  %v3222_v62 = vadd.f32 %v3195_v13, %v7566_v40 }
 0x47d   : > { %v3568_v36 = vsel %vm1508_vm4, %v3519_v42, %v3520_v48 }
 0x47e   : > { %3862 = vst.msk [vmem:[%s7819_s15 + $0x28] sm:$0xf] %vm3851_vm5, %v4369_v44  ;;  %v4370_v15 = vpack.c.bf16 %v3702_v35, %v3702_v35  ;;  %v3593_v9 = vadd.f32 %v3568_v36, %v3221_v47 }
 0x480   : > { %3863 = vst.msk [vmem:[%s7819_s15 + $0x2c] sm:$0xf] %vm3851_vm5, %v4370_v15  ;;  %v3632_v1 = vmul.f32 %v7802_v5, %v3593_v9  ;;  %v3378_v28 = vpop.f32.mrb[204].mxu0  ;;  %v3014_v61 = vpop.f32.mrb[204].mxu1 }
 0x481   : > { %v3521_v49 = vrot.slane %v3378_v28, 2  ;;  %v5661_v50 = vpop.f32.mrb[205].mxu0  ;;  %v3151_v8 = vrot.slane %v3014_v61, 1  ;;  %v5547_v40 = vpop.f32.mrb[205].mxu1 }
 0x482   : > { %v3671_v24 = vadd.f32 %v7807_v3, %v3632_v1  ;;  %v3381_v59 = vpop.f32.mrb[206].mxu0  ;;  %v3017_v16 = vpop.f32.mrb[206].mxu1 }
 0x483   : > { %v3567_v53 = vsel %vm1508_vm4, %v3520_v48, %v3521_v49  ;;  %v5662_v10 = vpop.f32.mrb[207].mxu0  ;;  %v3194_v60 = vsel %vm1135_vm3, %v3150_v58, %v3151_v8  ;;  %v3152_v43 = vrot.slane %v3017_v16, 1  ;;  %v5548_v45 = vpop.f32.mrb[207].mxu1  ;;  %v3522_v27 = vrot.slane %v3381_v59, 2 }
 0x484   : > { %v3703_v30 = vmax.f32 %v3671_v24, 0.0  ;;  %v3594_v31 = vadd.f32 %v3567_v53, %v3222_v62  ;;  %v3223_v34 = vadd.f32 %v3194_v60, %v7579_v17 }
 0x485   : > { %v3193_v23 = vsel %vm1135_vm3, %v3151_v8, %v3152_v43 }
 0x486   : > { %v4371_v18 = vpack.c.bf16 %v3703_v30, %v3703_v30  ;;  %v3633_v47 = vmul.f32 %v7802_v5, %v3594_v31  ;;  %v3224_v55 = vadd.f32 %v3193_v23, %v7595_v19 }
 0x488   : > { %3864 = vst.msk [vmem:[%s7819_s15 + $0x30] sm:$0xf] %vm3851_vm5, %v4371_v18  ;;  %v3672_v20 = vadd.f32 %v7807_v3, %v3633_v47  ;;  %v3386_v51 = vpop.f32.mrb[208].mxu0  ;;  %v3022_v54 = vpop.f32.mrb[208].mxu1 }
 0x489   : > { %v3523_v57 = vrot.slane %v3386_v51, 2  ;;  %v5665_v6 = vpop.f32.mrb[209].mxu0  ;;  %v3153_v17 = vrot.slane %v3022_v54, 1  ;;  %v5551_v52 = vpop.f32.mrb[209].mxu1 }
 0x48a   : > { %v3704_v32 = vmax.f32 %v3672_v20, 0.0  ;;  %v3389_v42 = vpop.f32.mrb[210].mxu0  ;;  %v3025_v0 = vpop.f32.mrb[210].mxu1 }
 0x48b   : > { %v3566_v48 = vsel %vm1508_vm4, %v3522_v27, %v3523_v57  ;;  %v3524_v37 = vrot.slane %v3389_v42, 2  ;;  %v5666_v19 = vpop.f32.mrb[211].mxu0  ;;  %v3154_v13 = vrot.slane %v3025_v0, 1  ;;  %v5552_v25 = vpop.f32.mrb[211].mxu1 }
 0x48c   : > { %v4372_v44 = vpack.c.bf16 %v3704_v32, %v3704_v32  ;;  %v3595_v35 = vadd.f32 %v3566_v48, %v3223_v34 }
 0x48d   : > { %v3565_v62 = vsel %vm1508_vm4, %v3523_v57, %v3524_v37  ;;  %v3192_v15 = vsel %vm1135_vm3, %v3153_v17, %v3154_v13 }
 0x48e   : > { %3865 = vst.msk [vmem:[%s7819_s15 + $0x34] sm:$0xf] %vm3851_vm5, %v4372_v44  ;;  %v3634_v36 = vmul.f32 %v7802_v5, %v3595_v35  ;;  %v3596_v9 = vadd.f32 %v3565_v62, %v3224_v55  ;;  %v3225_v1 = vadd.f32 %v3192_v15, %v7608_v38 }
 0x490   : > { %v3673_v58 = vadd.f32 %v7807_v3, %v3634_v36  ;;  %v3635_v28 = vmul.f32 %v7802_v5, %v3596_v9  ;;  %v3394_v61 = vpop.f32.mrb[212].mxu0  ;;  %v3030_v49 = vpop.f32.mrb[212].mxu1 }
 0x491   : > { %v5669_v50 = vpop.f32.mrb[213].mxu0  ;;  %v3155_v40 = vrot.slane %v3030_v49, 1  ;;  %v5555_v53 = vpop.f32.mrb[213].mxu1  ;;  %v3525_v16 = vrot.slane %v3394_v61, 2 }
 0x492   : > { %v3705_v24 = vmax.f32 %v3673_v58, 0.0  ;;  %v3674_v8 = vadd.f32 %v7807_v3, %v3635_v28  ;;  %v3397_v59 = vpop.f32.mrb[214].mxu0  ;;  %v3033_v60 = vpop.f32.mrb[214].mxu1 }
 0x493   : > { %v3526_v10 = vrot.slane %v3397_v59, 2  ;;  %v5670_v30 = vpop.f32.mrb[215].mxu0  ;;  %v3191_v43 = vsel %vm1135_vm3, %v3154_v13, %v3155_v40  ;;  %v5556_v45 = vpop.f32.mrb[215].mxu1  ;;  %v3156_v20 = vrot.slane %v3033_v60, 1 }
 0x494   : > { %v4373_v38 = vpack.c.bf16 %v3705_v24, %v3705_v24  ;;  %v3706_v31 = vmax.f32 %v3674_v8, 0.0  ;;  %v3226_v34 = vadd.f32 %v3191_v43, %v7610_v14 }
 0x495   : > { %v3564_v18 = vsel %vm1508_vm4, %v3525_v16, %v3526_v10 }
 0x496   : > { %3866 = vst.msk [vmem:[%s7819_s15 + $0x38] sm:$0xf] %vm3851_vm5, %v4373_v38  ;;  %v4374_v47 = vpack.c.bf16 %v3706_v31, %v3706_v31  ;;  %v3597_v23 = vadd.f32 %v3564_v18, %v3225_v1 }
 0x498   : > { %3867 = vst.msk [vmem:[%s7819_s15 + $0x3c] sm:$0xf] %vm3851_vm5, %v4374_v47  ;;  %v3636_v55 = vmul.f32 %v7802_v5, %v3597_v23  ;;  %v3402_v51 = vpop.f32.mrb[216].mxu0  ;;  %v3038_v27 = vpop.f32.mrb[216].mxu1 }
 0x499   : > { %v3527_v54 = vrot.slane %v3402_v51, 2  ;;  %v5673_v57 = vpop.f32.mrb[217].mxu0  ;;  %v3157_v32 = vrot.slane %v3038_v27, 1  ;;  %v5559_v14 = vpop.f32.mrb[217].mxu1 }
 0x49a   : > { %v3675_v6 = vadd.f32 %v7807_v3, %v3636_v55  ;;  %v3405_v17 = vpop.f32.mrb[218].mxu0  ;;  %v3041_v42 = vpop.f32.mrb[218].mxu1 }
 0x49b   : > { %v3563_v52 = vsel %vm1508_vm4, %v3526_v10, %v3527_v54  ;;  %v5674_v48 = vpop.f32.mrb[219].mxu0  ;;  %v3190_v37 = vsel %vm1135_vm3, %v3156_v20, %v3157_v32  ;;  %v3158_v44 = vrot.slane %v3041_v42, 1  ;;  %v5560_v35 = vpop.f32.mrb[219].mxu1  ;;  %v3528_v58 = vrot.slane %v3405_v17, 2 }
 0x49c   : > { %v3707_v0 = vmax.f32 %v3675_v6, 0.0  ;;  %v3598_v19 = vadd.f32 %v3563_v52, %v3226_v34  ;;  %v3227_v13 = vadd.f32 %v3190_v37, %v7623_v11 }
 0x49d   : > { %v3189_v36 = vsel %vm1135_vm3, %v3157_v32, %v3158_v44 }
 0x49e   : > { %v4375_v25 = vpack.c.bf16 %v3707_v0, %v3707_v0  ;;  %v3637_v62 = vmul.f32 %v7802_v5, %v3598_v19  ;;  %v3228_v15 = vadd.f32 %v3189_v36, %v7639_v22 }
 0x4a0   : > { %3868 = vst.msk [vmem:[%s7819_s15 + $0x40] sm:$0xf] %vm3851_vm5, %v4375_v25  ;;  %v3676_v9 = vadd.f32 %v7807_v3, %v3637_v62  ;;  %v3410_v1 = vpop.f32.mrb[220].mxu0  ;;  %v3046_v28 = vpop.f32.mrb[220].mxu1 }
 0x4a1   : > { %v3529_v61 = vrot.slane %v3410_v1, 2  ;;  %v5677_v49 = vpop.f32.mrb[221].mxu0  ;;  %v3159_v11 = vrot.slane %v3046_v28, 1  ;;  %v5563_v24 = vpop.f32.mrb[221].mxu1 }
 0x4a2   : > { %v3708_v50 = vmax.f32 %v3676_v9, 0.0  ;;  %v3413_v8 = vpop.f32.mrb[222].mxu0  ;;  %v3049_v59 = vpop.f32.mrb[222].mxu1 }
 0x4a3   : > { %v3562_v40 = vsel %vm1508_vm4, %v3528_v58, %v3529_v61  ;;  %v3530_v53 = vrot.slane %v3413_v8, 2  ;;  %v5678_v22 = vpop.f32.mrb[223].mxu0  ;;  %v3160_v30 = vrot.slane %v3049_v59, 1  ;;  %v5564_v60 = vpop.f32.mrb[223].mxu1 }
 0x4a4   : > { %v4376_v16 = vpack.c.bf16 %v3708_v50, %v3708_v50  ;;  %v3599_v10 = vadd.f32 %v3562_v40, %v3227_v13 }
 0x4a5   : > { %v3561_v38 = vsel %vm1508_vm4, %v3529_v61, %v3530_v53  ;;  %v3188_v43 = vsel %vm1135_vm3, %v3159_v11, %v3160_v30 }
 0x4a6   : > { %3869 = vst.msk [vmem:[%s7819_s15 + $0x44] sm:$0xf] %vm3851_vm5, %v4376_v16  ;;  %v3638_v31 = vmul.f32 %v7802_v5, %v3599_v10  ;;  %v3600_v45 = vadd.f32 %v3561_v38, %v3228_v15  ;;  %v3229_v34 = vadd.f32 %v3188_v43, %v7652_v21 }
 0x4a8   : > { %v3677_v18 = vadd.f32 %v7807_v3, %v3638_v31  ;;  %v3639_v47 = vmul.f32 %v7802_v5, %v3600_v45  ;;  %v3418_v23 = vpop.f32.mrb[224].mxu0  ;;  %v3054_v55 = vpop.f32.mrb[224].mxu1 }
 0x4a9   : > { %v5681_v20 = vpop.f32.mrb[225].mxu0  ;;  %v3161_v54 = vrot.slane %v3054_v55, 1  ;;  %v5567_v6 = vpop.f32.mrb[225].mxu1  ;;  %v3531_v32 = vrot.slane %v3418_v23, 2 }
 0x4aa   : > { %v3709_v51 = vmax.f32 %v3677_v18, 0.0  ;;  %v3678_v27 = vadd.f32 %v7807_v3, %v3639_v47  ;;  %v3421_v57 = vpop.f32.mrb[226].mxu0  ;;  %v3057_v52 = vpop.f32.mrb[226].mxu1 }
 0x4ab   : > { %v3532_v14 = vrot.slane %v3421_v57, 2  ;;  %v5682_v17 = vpop.f32.mrb[227].mxu0  ;;  %v3187_v48 = vsel %vm1135_vm3, %v3160_v30, %v3161_v54  ;;  %v5568_v0 = vpop.f32.mrb[227].mxu1  ;;  %v3162_v25 = vrot.slane %v3057_v52, 1 }
 0x4ac   : > { %v4377_v21 = vpack.c.bf16 %v3709_v51, %v3709_v51  ;;  %v3710_v42 = vmax.f32 %v3678_v27, 0.0  ;;  %v3230_v37 = vadd.f32 %v3187_v48, %v7654_v39 }
 0x4ad   : > { %v3560_v19 = vsel %vm1508_vm4, %v3531_v32, %v3532_v14 }
 0x4ae   : > { %3870 = vst.msk [vmem:[%s7819_s15 + $0x48] sm:$0xf] %vm3851_vm5, %v4377_v21  ;;  %v4378_v44 = vpack.c.bf16 %v3710_v42, %v3710_v42  ;;  %v3601_v35 = vadd.f32 %v3560_v19, %v3229_v34 }
 0x4b0   : > { %3871 = vst.msk [vmem:[%s7819_s15 + $0x4c] sm:$0xf] %vm3851_vm5, %v4378_v44  ;;  %v3640_v13 = vmul.f32 %v7802_v5, %v3601_v35  ;;  %v3426_v62 = vpop.f32.mrb[228].mxu0  ;;  %v3062_v36 = vpop.f32.mrb[228].mxu1 }
 0x4b1   : > { %v3533_v15 = vrot.slane %v3426_v62, 2  ;;  %v5685_v9 = vpop.f32.mrb[229].mxu0  ;;  %v3163_v58 = vrot.slane %v3062_v36, 1  ;;  %v5571_v39 = vpop.f32.mrb[229].mxu1 }
 0x4b2   : > { %v3679_v1 = vadd.f32 %v7807_v3, %v3640_v13  ;;  %v3429_v28 = vpop.f32.mrb[230].mxu0  ;;  %v3065_v49 = vpop.f32.mrb[230].mxu1 }
 0x4b3   : > { %v3559_v61 = vsel %vm1508_vm4, %v3532_v14, %v3533_v15  ;;  %v5686_v50 = vpop.f32.mrb[231].mxu0  ;;  %v3186_v24 = vsel %vm1135_vm3, %v3162_v25, %v3163_v58  ;;  %v3164_v40 = vrot.slane %v3065_v49, 1  ;;  %v5572_v59 = vpop.f32.mrb[231].mxu1  ;;  %v3534_v31 = vrot.slane %v3429_v28, 2 }
 0x4b4   : > { %v3711_v11 = vmax.f32 %v3679_v1, 0.0  ;;  %v3602_v8 = vadd.f32 %v3559_v61, %v3230_v37  ;;  %v3231_v53 = vadd.f32 %v3186_v24, %v7667_v56 }
 0x4b5   : > { %v3185_v10 = vsel %vm1135_vm3, %v3163_v58, %v3164_v40 }
 0x4b6   : > { %v4379_v22 = vpack.c.bf16 %v3711_v11, %v3711_v11  ;;  %v3641_v16 = vmul.f32 %v7802_v5, %v3602_v8  ;;  %v3232_v30 = vadd.f32 %v3185_v10, %v7683_v41 }
 0x4b8   : > { %3872 = vst.msk [vmem:[%s7819_s15 + $0x50] sm:$0xf] %vm3851_vm5, %v4379_v22  ;;  %v3680_v60 = vadd.f32 %v7807_v3, %v3641_v16  ;;  %v3434_v38 = vpop.f32.mrb[232].mxu0  ;;  %v3070_v43 = vpop.f32.mrb[232].mxu1 }
 0x4b9   : > { %v3535_v45 = vrot.slane %v3434_v38, 2  ;;  %v5689_v34 = vpop.f32.mrb[233].mxu0  ;;  %v3165_v56 = vrot.slane %v3070_v43, 1  ;;  %v5575_v47 = vpop.f32.mrb[233].mxu1 }
 0x4ba   : > { %v3712_v18 = vmax.f32 %v3680_v60, 0.0  ;;  %v3437_v23 = vpop.f32.mrb[234].mxu0  ;;  %v3073_v20 = vpop.f32.mrb[234].mxu1 }
 0x4bb   : > { %v3558_v55 = vsel %vm1508_vm4, %v3534_v31, %v3535_v45  ;;  %v3536_v51 = vrot.slane %v3437_v23, 2  ;;  %v5690_v41 = vpop.f32.mrb[235].mxu0  ;;  %v3166_v57 = vrot.slane %v3073_v20, 1  ;;  %v5576_v6 = vpop.f32.mrb[235].mxu1 }
 0x4bc   : > { %v4380_v27 = vpack.c.bf16 %v3712_v18, %v3712_v18  ;;  %v3603_v54 = vadd.f32 %v3558_v55, %v3231_v53 }
 0x4bd   : > { %v3557_v32 = vsel %vm1508_vm4, %v3535_v45, %v3536_v51  ;;  %v3184_v17 = vsel %vm1135_vm3, %v3165_v56, %v3166_v57 }
 0x4be   : > { %3873 = vst.msk [vmem:[%s7819_s15 + $0x54] sm:$0xf] %vm3851_vm5, %v4380_v27  ;;  %v3642_v14 = vmul.f32 %v7802_v5, %v3603_v54  ;;  %v3604_v52 = vadd.f32 %v3557_v32, %v3232_v30  ;;  %v3233_v21 = vadd.f32 %v3184_v17, %v7696_v46 }
 0x4c0   : > { %v3681_v42 = vadd.f32 %v7807_v3, %v3642_v14  ;;  %v3643_v48 = vmul.f32 %v7802_v5, %v3604_v52  ;;  %v3442_v0 = vpop.f32.mrb[236].mxu0  ;;  %v3078_v37 = vpop.f32.mrb[236].mxu1 }
 0x4c1   : > { %v5693_v19 = vpop.f32.mrb[237].mxu0  ;;  %v3167_v13 = vrot.slane %v3078_v37, 1  ;;  %v5579_v62 = vpop.f32.mrb[237].mxu1  ;;  %v3537_v36 = vrot.slane %v3442_v0, 2 }
 0x4c2   : > { %v3713_v44 = vmax.f32 %v3681_v42, 0.0  ;;  %v3682_v35 = vadd.f32 %v7807_v3, %v3643_v48  ;;  %v3445_v25 = vpop.f32.mrb[238].mxu0  ;;  %v3081_v1 = vpop.f32.mrb[238].mxu1 }
 0x4c3   : > { %v3538_v15 = vrot.slane %v3445_v25, 2  ;;  %v5694_v9 = vpop.f32.mrb[239].mxu0  ;;  %v3183_v39 = vsel %vm1135_vm3, %v3166_v57, %v3167_v13  ;;  %v5580_v28 = vpop.f32.mrb[239].mxu1  ;;  %v3168_v8 = vrot.slane %v3081_v1, 1 }
 0x4c4   : > { %v4381_v46 = vpack.c.bf16 %v3713_v44, %v3713_v44  ;;  %v3714_v58 = vmax.f32 %v3682_v35, 0.0  ;;  %v3234_v61 = vadd.f32 %v3183_v39, %v7698_v29 }
 0x4c5   : > { %v3556_v49 = vsel %vm1508_vm4, %v3537_v36, %v3538_v15 }
 0x4c6   : > { %3874 = vst.msk [vmem:[%s7819_s15 + $0x58] sm:$0xf] %vm3851_vm5, %v4381_v46  ;;  %v4382_v50 = vpack.c.bf16 %v3714_v58, %v3714_v58  ;;  %v3605_v11 = vadd.f32 %v3556_v49, %v3233_v21 }
 0x4c8   : > { %3875 = vst.msk [vmem:[%s7819_s15 + $0x5c] sm:$0xf] %vm3851_vm5, %v4382_v50  ;;  %v3644_v24 = vmul.f32 %v7802_v5, %v3605_v11  ;;  %v3450_v40 = vpop.f32.mrb[240].mxu0  ;;  %v3086_v59 = vpop.f32.mrb[240].mxu1 }
 0x4c9   : > { %v3539_v53 = vrot.slane %v3450_v40, 2  ;;  %v5697_v22 = vpop.f32.mrb[241].mxu0  ;;  %v3169_v10 = vrot.slane %v3086_v59, 1  ;;  %v5583_v29 = vpop.f32.mrb[241].mxu1 }
 0x4ca   : > { %v3683_v16 = vadd.f32 %v7807_v3, %v3644_v24  ;;  %v3453_v30 = vpop.f32.mrb[242].mxu0  ;;  %v3089_v38 = vpop.f32.mrb[242].mxu1 }
 0x4cb   : > { %v3555_v60 = vsel %vm1508_vm4, %v3538_v15, %v3539_v53  ;;  %v5698_v31 = vpop.f32.mrb[243].mxu0  ;;  %v3182_v45 = vsel %vm1135_vm3, %v3168_v8, %v3169_v10  ;;  %v3170_v18 = vrot.slane %v3089_v38, 1  ;;  %v5584_v56 = vpop.f32.mrb[243].mxu1  ;;  %v3540_v54 = vrot.slane %v3453_v30, 2 }
 0x4cc   : > { %v3715_v43 = vmax.f32 %v3683_v16, 0.0  ;;  %v3606_v34 = vadd.f32 %v3555_v60, %v3234_v61  ;;  %v3235_v47 = vadd.f32 %v3182_v45, %v7711_v2 }
 0x4cd   : > { %v3181_v20 = vsel %vm1135_vm3, %v3169_v10, %v3170_v18 }
 0x4ce   : > { %v4383_v23 = vpack.c.bf16 %v3715_v43, %v3715_v43  ;;  %v3645_v55 = vmul.f32 %v7802_v5, %v3606_v34  ;;  %v3236_v51 = vadd.f32 %v3181_v20, %v7726_v12 }
 0x4d0   : > { %3876 = vst.msk [vmem:[%s7819_s15 + $0x60] sm:$0xf] %vm3851_vm5, %v4383_v23  ;;  %v3684_v41 = vadd.f32 %v7807_v3, %v3645_v55  ;;  %v3458_v27 = vpop.f32.mrb[244].mxu0  ;;  %v3094_v57 = vpop.f32.mrb[244].mxu1 }
 0x4d1   : > { %v3541_v6 = vrot.slane %v3458_v27, 2  ;;  %v5701_v32 = vpop.f32.mrb[245].mxu0  ;;  %v3171_v2 = vrot.slane %v3094_v57, 1  ;;  %v5587_v17 = vpop.f32.mrb[245].mxu1 }
 0x4d2   : > { %v3716_v14 = vmax.f32 %v3684_v41, 0.0  ;;  %v3461_v52 = vpop.f32.mrb[246].mxu0  ;;  %v3097_v42 = vpop.f32.mrb[246].mxu1  ;;  %v5833_v32 = vld [vmem:[%s8105_s2] ss:$0 sm:$0xff] }
 0x4d3   : > { %v3554_v21 = vsel %vm1508_vm4, %v3540_v54, %v3541_v6  ;;  %v3542_v48 = vrot.slane %v3461_v52, 2  ;;  %v5702_v12 = vpop.f32.mrb[247].mxu0  ;;  %v3172_v19 = vrot.slane %v3097_v42, 1  ;;  %v5588_v44 = vpop.f32.mrb[247].mxu1 }
 0x4d4   : > { %v4384_v0 = vpack.c.bf16 %v3716_v14, %v3716_v14  ;;  %v3607_v37 = vadd.f32 %v3554_v21, %v3235_v47 }
 0x4d5   : > { %v3553_v35 = vsel %vm1508_vm4, %v3541_v6, %v3542_v48  ;;  %v3180_v25 = vsel %vm1135_vm3, %v3171_v2, %v3172_v19 }
 0x4d6   : > { %3877 = vst.msk [vmem:[%s7819_s15 + $0x64] sm:$0xf] %vm3851_vm5, %v4384_v0  ;;  %v3646_v13 = vmul.f32 %v7802_v5, %v3607_v37  ;;  %v3608_v62 = vadd.f32 %v3553_v35, %v3236_v51  ;;  %v3237_v36 = vadd.f32 %v3180_v25, %v7738_v63 }
 0x4d8   : > { %v3685_v15 = vadd.f32 %v7807_v3, %v3646_v13  ;;  %v3647_v9 = vmul.f32 %v7802_v5, %v3608_v62  ;;  %v3466_v1 = vpop.f32.mrb[248].mxu0  ;;  %v3102_v46 = vpop.f32.mrb[248].mxu1 }
 0x4d9   : > { %v5705_v58 = vpop.f32.mrb[249].mxu0  ;;  %v3173_v61 = vrot.slane %v3102_v46, 1  ;;  %v5591_v50 = vpop.f32.mrb[249].mxu1  ;;  %v3543_v11 = vrot.slane %v3466_v1, 2 }
 0x4da   : > { %v3717_v39 = vmax.f32 %v3685_v15, 0.0  ;;  %v3686_v28 = vadd.f32 %v7807_v3, %v3647_v9  ;;  %v3469_v49 = vpop.f32.mrb[250].mxu0  ;;  %v3105_v40 = vpop.f32.mrb[250].mxu1 }
 0x4db   : > { %v3544_v24 = vrot.slane %v3469_v49, 2  ;;  %v5706_v8 = vpop.f32.mrb[251].mxu0  ;;  %v3179_v53 = vsel %vm1135_vm3, %v3172_v19, %v3173_v61  ;;  %v5592_v22 = vpop.f32.mrb[251].mxu1  ;;  %v3174_v60 = vrot.slane %v3105_v40, 1 }
 0x4dc   : > { %v4385_v63 = vpack.c.bf16 %v3717_v39, %v3717_v39  ;;  %v3718_v59 = vmax.f32 %v3686_v28, 0.0  ;;  %v3238_v16 = vadd.f32 %v3179_v53, %v7740_v7  ;;  %v5832_v7 = vld [vmem:[%s8106_s3] ss:$0 sm:$0xff] }
 0x4dd   : > { %v3552_v10 = vsel %vm1508_vm4, %v3543_v11, %v3544_v24 }
 0x4de   : > { %3878 = vst.msk [vmem:[%s7819_s15 + $0x68] sm:$0xf] %vm3851_vm5, %v4385_v63  ;;  %v4386_v3 = vpack.c.bf16 %v3718_v59, %v3718_v59  ;;  %v3609_v29 = vadd.f32 %v3552_v10, %v3237_v36 }
 0x4e0   : > { %3879 = vst.msk [vmem:[%s7819_s15 + $0x6c] sm:$0xf] %vm3851_vm5, %v4386_v3  ;;  %v3648_v30 = vmul.f32 %v7802_v5, %v3609_v29  ;;  %v3474_v38 = vpop.f32.mrb[252].mxu0  ;;  %v3110_v31 = vpop.f32.mrb[252].mxu1 }
 0x4e1   : > { %v3545_v43 = vrot.slane %v3474_v38, 2  ;;  %v5709_v45 = vpop.f32.mrb[253].mxu0  ;;  %v3175_v18 = vrot.slane %v3110_v31, 1  ;;  %v5595_v56 = vpop.f32.mrb[253].mxu1 }
 0x4e2   : > { %v3687_v34 = vadd.f32 %v5832_v7, %v3648_v30  ;;  %v3477_v47 = vpop.f32.mrb[254].mxu0  ;;  %v3113_v55 = vpop.f32.mrb[254].mxu1 }
 0x4e3   : > { %v3551_v23 = vsel %vm1508_vm4, %v3544_v24, %v3545_v43  ;;  %v5710_v20 = vpop.f32.mrb[255].mxu0  ;;  %v3178_v51 = vsel %vm1135_vm3, %v3174_v60, %v3175_v18  ;;  %v3176_v27 = vrot.slane %v3113_v55, 1  ;;  %v5596_v54 = vpop.f32.mrb[255].mxu1  ;;  %v3546_v42 = vrot.slane %v3477_v47, 2 }
 0x4e4   : > { %v3719_v5 = vmax.f32 %v3687_v34, 0.0  ;;  %v3610_v41 = vadd.f32 %v3551_v23, %v3238_v16  ;;  %v3239_v57 = vadd.f32 %v3178_v51, %v7752_v4 }
 0x4e5   : > { %v3177_v2 = vsel %vm1135_vm3, %v3175_v18, %v3176_v27 }
 0x4e6   : > { %v4387_v6 = vpack.c.bf16 %v3719_v5, %v3719_v5  ;;  %v3649_v14 = vmul.f32 %v5833_v32, %v3610_v41  ;;  %v3240_v17 = vadd.f32 %v3177_v2, %v7761_v33 }
 0x4e8   : > { %3880 = vst.msk [vmem:[%s7819_s15 + $0x70] sm:$0xf] %vm3851_vm5, %v4387_v6  ;;  %v3688_v52 = vadd.f32 %v5832_v7, %v3649_v14  ;;  %v3482_v21 = vpop.f32.mrb[0].mxu0  ;;  %v3118_v4 = vpop.f32.mrb[0].mxu1 }
 0x4e9   : > { %v3547_v48 = vrot.slane %v3482_v21, 2  ;;  %v5713_v12 = vpop.f32.mrb[1].mxu0  ;;  %v5599_v19 = vpop.f32.mrb[1].mxu1 }
 0x4ea   : > { %v3720_v0 = vmax.f32 %v3688_v52, 0.0  ;;  %v3485_v37 = vpop.f32.mrb[2].mxu0  ;;  %v3120_v25 = vpop.f32.mrb[2].mxu1 }
 0x4eb   : > { %v3550_v44 = vsel %vm1508_vm4, %v3546_v42, %v3547_v48  ;;  %v3548_v35 = vrot.slane %v3485_v37, 2  ;;  %v5714_v13 = vpop.f32.mrb[3].mxu0  ;;  %v5600_v36 = vpop.f32.mrb[3].mxu1 }
 0x4ec   : > { %v4388_v62 = vpack.c.bf16 %v3720_v0, %v3720_v0  ;;  %v3611_v33 = vadd.f32 %v3550_v44, %v3239_v57 }
 0x4ed   : > { %v3549_v15 = vsel %vm1508_vm4, %v3547_v48, %v3548_v35 }
 0x4ee   : > { %3881 = vst.msk [vmem:[%s7819_s15 + $0x74] sm:$0xf] %vm3851_vm5, %v4388_v62  ;;  %v3650_v9 = vmul.f32 %v5833_v32, %v3611_v33  ;;  %v3612_v1 = vadd.f32 %v3549_v15, %v3240_v17 }
 0x4f0   : > { %v3689_v46 = vadd.f32 %v5832_v7, %v3650_v9  ;;  %v3651_v58 = vmul.f32 %v5833_v32, %v3612_v1  ;;  %v3490_v39 = vpop.f32.mrb[4].mxu0  ;;  %v3124_v61 = vpop.f32.mrb[4].mxu1 }
 0x4f1   : > { %v5717_v28 = vpop.f32.mrb[5].mxu0  ;;  %v5603_v24 = vpop.f32.mrb[5].mxu1 }
 0x4f2   : > { %v3721_v49 = vmax.f32 %v3689_v46, 0.0  ;;  %v3690_v50 = vadd.f32 %v5832_v7, %v3651_v58  ;;  %v3492_v11 = vpop.f32.mrb[6].mxu0  ;;  %v3126_v40 = vpop.f32.mrb[6].mxu1 }
 0x4f3   : > { %v5718_v8 = vpop.f32.mrb[7].mxu0  ;;  %v5604_v59 = vpop.f32.mrb[7].mxu1 }
 0x4f4   : > { %v4389_v63 = vpack.c.bf16 %v3721_v49, %v3721_v49  ;;  %v3722_v26 = vmax.f32 %v3690_v50, 0.0 }
 0x4f6   : > { %3882 = vst.msk [vmem:[%s7819_s15 + $0x78] sm:$0xf] %vm3851_vm5, %v4389_v63  ;;  %v4390_v53 = vpack.c.bf16 %v3722_v26, %v3722_v26 }
 0x4f8   : > { %3883 = vst.msk [vmem:[%s7819_s15 + $0x7c] sm:$0xf] %vm3851_vm5, %v4390_v53  ;;  %v3496_v22 = vpop.f32.mrb[8].mxu0 }
 0x4f9   : > { %v5721_v16 = vpop.f32.mrb[9].mxu0 }
 0x4fa   : > { %v3498_v10 = vpop.f32.mrb[10].mxu0 }
 0x4fb   : > { %v5722_v3 = vpop.f32.mrb[11].mxu0 }
 0x4fc PF: > { %s14_s17 = sadd.s32 1, %s5856_s17   ;;  %s8162_s15 = smov %s5852_s16 }
 0x4fd   : > { %p11_p5 = scmp.ge.s32.totalorder %s14_s17, 4   ;;  %s8163_s16 = smov %s8165_s18 }
 0x4ff   :  { %13 = sbr.rel (!%p11_p5) target bundleno = 2 (0x2), region = 83 }

// kernel: conv_block_forward.3
= control target key start
LH: loop header
LB: loop body
LE: loop exit
PB: predicated region body
PF: predicated region fallthrough
CT: control target
= control target key end

     0   :  { %s5740_s15 = smov 0   ;;  %s5742_s16 = smov 0   ;;  %s7957_s0 = inlined_call_operand.vmem [shape: bf16[2,456,8], index: 0, kind: input, shape index: {}]   ;;  %s7958_s1 = inlined_call_operand.vmem [shape: bf16[9,8,8], index: 1, kind: input, shape index: {}]   ;;  %s7959_s2 = inlined_call_operand.vmem [shape: f32[1,8], index: 2, kind: input, shape index: {}]   ;;  %s7960_s3 = inlined_call_operand.vmem [shape: f32[1,8], index: 3, kind: input, shape index: {}]   ;;  %s7961_s4 = inlined_call_operand.vmem [shape: f32[2,8,16,8], index: 4, kind: output, shape index: {}]  }
   0x1   :  { %s5744_s17 = smov 0  }
   0x2 LB: > { %s33_s18 = sadd.s32 1, %s5707_s16  ;;  %p3939_p0 = scmp.ge.s32.totalorder %s5711_s17, 1  ;;  %s5711_s17 = sphi %s5744_s17, %s14_s17   ;;  %s5707_s16 = sphi %s5742_s16, %s8017_s16   ;;  %s5703_s15 = sphi %s5740_s15, %s8016_s15  }
   0x3   : > { %p35_p1 = scmp.ge.s32.totalorder %s33_s18, 2  ;;  %p218_p2 = scmp.lt.s32.totalorder %s5711_s17, 3 }
   0x5   : > { %s8019_s18 = smov (%p35_p1, %s33_s18), 0  ;;  %p219_p3 = pnand %p3939_p0, %p218_p2 }
   0x7   : > { %222 = sbr.rel (%p219_p3) target bundleno = 1276 (0x4fc), region = 36 }
   0xe   : > { %v350_v0 = vld [vmem:[%s7958_s1] sm:$0xf]  ;;  %vm582_vm0 = vcmask 1043456   ;;  %p263_p4 = scmp.lt.s32.totalorder %s5703_s15, 1  ;;  %v7962_v1 = vmov 0.0   ;;  %vm5714_vm1 = vmmov 0  }
   0xf   : > { %4516 = vmatprep.subr.bf16.mxu0 %v7962_v1  ;;  %5578 = vmatprep.subr.bf16.mxu1 %v7962_v1  ;;  %v584_v2 = vsel %vm582_vm0, %v350_v0, 0  ;;  %v4031_v3 = vld [vmem:[%s7958_s1 + $0x8] sm:$0xf]  ;;  %v4001_v4 = vld [vmem:[%s7958_s1 + $0x4] sm:$0xf]  ;;  %vm494_vm2 = vcmask 64512  }
  0x10   : > { %4517 = vmatpush3.bf16.msra.mxu0 %v584_v2  ;;  %5579 = vmatpush3.bf16.msra.mxu1 %v584_v2  ;;  %s8021_s15 = smov (!%p263_p4, %s5703_s15), 1  ;;  %v1203_v6 = vsel %vm582_vm0, %v4031_v3, 0  ;;  %v828_v8 = vsel %vm582_vm0, %v4001_v4, 0  ;;  %v4061_v36 = vld [vmem:[%s7958_s1 + $0xc] sm:$0xf] }
  0x11   : > { %4518 = vmatprep.mubr.msk.bf16.mxu0 %vm5714_vm1, %v7962_v1  ;;  %4578 = vmatprep.mubr.msk.bf16.mxu1 %vm5714_vm1, %v7962_v1  ;;  %s5580_s21 = smul.u32 228, %s8021_s15  ;;  %v1576_v37 = vsel %vm582_vm0, %v4061_v36, 0  ;;  %v4091_v38 = vld [vmem:[%s7958_s1 + $0x10] sm:$0xf]  ;;  %s4245_s23 = sshll.u32 %s8021_s15, 7 }
  0x12   : > { %4752 = vmatprep.subr.bf16.mxu0 %v7962_v1  ;;  %4634 = vmatprep.subr.bf16.mxu1 %v7962_v1  ;;  %v1852_v39 = vsel %vm582_vm0, %v4091_v38, 0  ;;  %s7699_s25 = scalar_lea.vmem %s7961_s4, %s4245_s23 }
  0x13   : > { %s5782_s28 = scalar_lea.vmem %s7957_s0, %s5580_s21 }
  0x14   : > { %v5785_v5 = vld [vmem:[%s5782_s28] sm:$0xff]   ;;  %v5789_v7 = vld [vmem:[%s5782_s28 + $0x78] sm:$0xff]   ;;  %v5802_v9 = vld [vmem:[%s5782_s28 + $0x8] sm:$0xff]  }
  0x15   : > { %4519 = vmatmul.mubr.msk.bf16.vlgmr.msra.gmra.mrb[0].mxu0 %vm494_vm2, %v5785_v5  ;;  %4579 = vmatmul.mubr.msk.bf16.vlgmr.msra.gmra.mrb[0].mxu1 %vm494_vm2, %v5789_v7  ;;  %v5806_v10 = vld [vmem:[%s5782_s28 + $0x80] sm:$0xff]   ;;  %v5817_v11 = vld [vmem:[%s5782_s28 + $0x10] sm:$0xff]   ;;  %v5820_v12 = vld [vmem:[%s5782_s28 + $0x88] sm:$0xff]  }
  0x16   : > { %4753 = vmatpush3.bf16.msra.mxu0 %v1203_v6  ;;  %4635 = vmatpush3.bf16.msra.mxu1 %v828_v8  ;;  %v5831_v13 = vld [vmem:[%s5782_s28 + $0x18] sm:$0xff]   ;;  %v5834_v14 = vld [vmem:[%s5782_s28 + $0x90] sm:$0xff]   ;;  %v5845_v15 = vld [vmem:[%s5782_s28 + $0x20] sm:$0xff]  }
  0x17   : > { %4522 = vmatprep.mubr.msk.bf16.mxu0 %vm5714_vm1, %v7962_v1  ;;  %4582 = vmatprep.mubr.msk.bf16.mxu1 %vm5714_vm1, %v7962_v1  ;;  %v5848_v16 = vld [vmem:[%s5782_s28 + $0x98] sm:$0xff]   ;;  %v5859_v17 = vld [vmem:[%s5782_s28 + $0x28] sm:$0xff]   ;;  %v5862_v18 = vld [vmem:[%s5782_s28 + $0xa0] sm:$0xff]  }
  0x18   : > { %4870 = vmatprep.subr.bf16.mxu1 %v7962_v1  ;;  %4988 = vmatprep.subr.bf16.mxu0 %v7962_v1  ;;  %v5873_v19 = vld [vmem:[%s5782_s28 + $0x30] sm:$0xff]   ;;  %v5876_v20 = vld [vmem:[%s5782_s28 + $0xa8] sm:$0xff]   ;;  %v5887_v21 = vld [vmem:[%s5782_s28 + $0x38] sm:$0xff]  }
  0x19   : > { %v5890_v22 = vld [vmem:[%s5782_s28 + $0xb0] sm:$0xff]   ;;  %v5901_v23 = vld [vmem:[%s5782_s28 + $0x40] sm:$0xff]   ;;  %v5904_v24 = vld [vmem:[%s5782_s28 + $0xb8] sm:$0xff]  }
  0x1a   : > { %v5915_v25 = vld [vmem:[%s5782_s28 + $0x48] sm:$0xff]   ;;  %v5918_v26 = vld [vmem:[%s5782_s28 + $0xc0] sm:$0xff]   ;;  %v5929_v27 = vld [vmem:[%s5782_s28 + $0x50] sm:$0xff]  }
  0x1b   : > { %v5932_v28 = vld [vmem:[%s5782_s28 + $0xc8] sm:$0xff]   ;;  %v5943_v29 = vld [vmem:[%s5782_s28 + $0x58] sm:$0xff]   ;;  %v5946_v30 = vld [vmem:[%s5782_s28 + $0xd0] sm:$0xff]  }
  0x1c   : > { %v5957_v31 = vld [vmem:[%s5782_s28 + $0x60] sm:$0xff]   ;;  %v5960_v32 = vld [vmem:[%s5782_s28 + $0xd8] sm:$0xff]   ;;  %v5971_v33 = vld [vmem:[%s5782_s28 + $0x68] sm:$0xff]  }
  0x1d   : > { %4523 = vmatmul.mubr.msk.bf16.gmra.mrb[4].mxu0 %vm494_vm2, %v5802_v9  ;;  %4583 = vmatmul.mubr.msk.bf16.gmra.mrb[4].mxu1 %vm494_vm2, %v5806_v10  ;;  %v5974_v34 = vld [vmem:[%s5782_s28 + $0xe0] ss:$0 sps:$4 sm:$0xff]   ;;  %v5985_v35 = vld [vmem:[%s5782_s28 + $0x70] sm:$0xff]  }
  0x1e   : > { %4526 = vmatprep.mubr.msk.bf16.mxu0 %vm5714_vm1, %v7962_v1  ;;  %4586 = vmatprep.mubr.msk.bf16.mxu1 %vm5714_vm1, %v7962_v1 }
  0x25   : > { %4527 = vmatmul.mubr.msk.bf16.gmra.mrb[8].mxu0 %vm494_vm2, %v5817_v11  ;;  %4587 = vmatmul.mubr.msk.bf16.gmra.mrb[8].mxu1 %vm494_vm2, %v5820_v12 }
  0x26   : > { %4530 = vmatprep.mubr.msk.bf16.mxu0 %vm5714_vm1, %v7962_v1  ;;  %4590 = vmatprep.mubr.msk.bf16.mxu1 %vm5714_vm1, %v7962_v1 }
  0x2d   : > { %4531 = vmatmul.mubr.msk.bf16.gmra.mrb[12].mxu0 %vm494_vm2, %v5831_v13  ;;  %4591 = vmatmul.mubr.msk.bf16.gmra.mrb[12].mxu1 %vm494_vm2, %v5834_v14 }
  0x2e   : > { %4534 = vmatprep.mubr.msk.bf16.mxu0 %vm5714_vm1, %v7962_v1  ;;  %4594 = vmatprep.mubr.msk.bf16.mxu1 %vm5714_vm1, %v7962_v1 }
  0x35   : > { %4535 = vmatmul.mubr.msk.bf16.gmra.mrb[16].mxu0 %vm494_vm2, %v5845_v15  ;;  %4595 = vmatmul.mubr.msk.bf16.gmra.mrb[16].mxu1 %vm494_vm2, %v5848_v16 }
  0x36   : > { %4538 = vmatprep.mubr.msk.bf16.mxu0 %vm5714_vm1, %v7962_v1  ;;  %4598 = vmatprep.mubr.msk.bf16.mxu1 %vm5714_vm1, %v7962_v1 }
  0x3d   : > { %4539 = vmatmul.mubr.msk.bf16.gmra.mrb[20].mxu0 %vm494_vm2, %v5859_v17  ;;  %4599 = vmatmul.mubr.msk.bf16.gmra.mrb[20].mxu1 %vm494_vm2, %v5862_v18 }
  0x3e   : > { %4542 = vmatprep.mubr.msk.bf16.mxu0 %vm5714_vm1, %v7962_v1  ;;  %4602 = vmatprep.mubr.msk.bf16.mxu1 %vm5714_vm1, %v7962_v1 }
  0x45   : > { %4543 = vmatmul.mubr.msk.bf16.gmra.mrb[24].mxu0 %vm494_vm2, %v5873_v19  ;;  %4603 = vmatmul.mubr.msk.bf16.gmra.mrb[24].mxu1 %vm494_vm2, %v5876_v20 }
  0x46   : > { %4546 = vmatprep.mubr.msk.bf16.mxu0 %vm5714_vm1, %v7962_v1  ;;  %4606 = vmatprep.mubr.msk.bf16.mxu1 %vm5714_vm1, %v7962_v1 }
  0x4d   : > { %4547 = vmatmul.mubr.msk.bf16.gmra.mrb[28].mxu0 %vm494_vm2, %v5887_v21  ;;  %4607 = vmatmul.mubr.msk.bf16.gmra.mrb[28].mxu1 %vm494_vm2, %v5890_v22 }
  0x4e   : > { %4550 = vmatprep.mubr.msk.bf16.mxu0 %vm5714_vm1, %v7962_v1  ;;  %4610 = vmatprep.mubr.msk.bf16.mxu1 %vm5714_vm1, %v7962_v1 }
  0x55   : > { %4551 = vmatmul.mubr.msk.bf16.gmra.mrb[32].mxu0 %vm494_vm2, %v5901_v23  ;;  %4611 = vmatmul.mubr.msk.bf16.gmra.mrb[32].mxu1 %vm494_vm2, %v5904_v24 }
  0x56   : > { %4554 = vmatprep.mubr.msk.bf16.mxu0 %vm5714_vm1, %v7962_v1  ;;  %4614 = vmatprep.mubr.msk.bf16.mxu1 %vm5714_vm1, %v7962_v1 }
  0x5d   : > { %4555 = vmatmul.mubr.msk.bf16.gmra.mrb[36].mxu0 %vm494_vm2, %v5915_v25  ;;  %4615 = vmatmul.mubr.msk.bf16.gmra.mrb[36].mxu1 %vm494_vm2, %v5918_v26 }
  0x5e   : > { %4558 = vmatprep.mubr.msk.bf16.mxu0 %vm5714_vm1, %v7962_v1  ;;  %4618 = vmatprep.mubr.msk.bf16.mxu1 %vm5714_vm1, %v7962_v1 }
  0x65   : > { %4559 = vmatmul.mubr.msk.bf16.gmra.mrb[40].mxu0 %vm494_vm2, %v5929_v27  ;;  %4619 = vmatmul.mubr.msk.bf16.gmra.mrb[40].mxu1 %vm494_vm2, %v5932_v28 }
  0x66   : > { %4562 = vmatprep.mubr.msk.bf16.mxu0 %vm5714_vm1, %v7962_v1  ;;  %4622 = vmatprep.mubr.msk.bf16.mxu1 %vm5714_vm1, %v7962_v1 }
  0x6d   : > { %4563 = vmatmul.mubr.msk.bf16.gmra.mrb[44].mxu0 %vm494_vm2, %v5943_v29  ;;  %4623 = vmatmul.mubr.msk.bf16.gmra.mrb[44].mxu1 %vm494_vm2, %v5946_v30 }
  0x6e   : > { %4566 = vmatprep.mubr.msk.bf16.mxu0 %vm5714_vm1, %v7962_v1  ;;  %4626 = vmatprep.mubr.msk.bf16.mxu1 %vm5714_vm1, %v7962_v1 }
  0x75   : > { %4567 = vmatmul.mubr.msk.bf16.gmra.mrb[48].mxu0 %vm494_vm2, %v5957_v31  ;;  %4627 = vmatmul.mubr.msk.bf16.gmra.mrb[48].mxu1 %vm494_vm2, %v5960_v32 }
  0x76   : > { %4570 = vmatprep.mubr.msk.bf16.mxu0 %vm5714_vm1, %v7962_v1  ;;  %4630 = vmatprep.mubr.msk.bf16.mxu1 %vm5714_vm1, %v7962_v1 }
  0x7d   : > { %4571 = vmatmul.mubr.msk.bf16.gmra.mrb[52].mxu0 %vm494_vm2, %v5971_v33  ;;  %4631 = vmatmul.mubr.msk.bf16.gmra.mrb[52].mxu1 %vm494_vm2, %v5974_v34 }
  0x7e   : > { %4574 = vmatprep.mubr.msk.bf16.mxu0 %vm5714_vm1, %v7962_v1  ;;  %4636 = vmatprep.mubr.msk.bf16.mxu1 %vm5714_vm1, %v7962_v1 }
  0x85   : > { %4575 = vmatmul.mubr.msk.bf16.gmra.mrb[56].mxu0 %vm494_vm2, %v5985_v35  ;;  %4637 = vmatmul.mubr.msk.bf16.vlgmr.msra.gmra.mrb[56].mxu1 %vm494_vm2, %v5785_v5 }
  0x86   : > { %4754 = vmatprep.mubr.msk.bf16.mxu0 %vm5714_vm1, %v7962_v1  ;;  %4871 = vmatpush3.bf16.msra.mxu1 %v1576_v37 }
  0x87   : > { %4640 = vmatprep.mubr.msk.bf16.mxu1 %vm5714_vm1, %v7962_v1  ;;  %5106 = vmatprep.subr.bf16.mxu1 %v7962_v1 }
  0x8d   : > { %4755 = vmatmul.mubr.msk.bf16.vlgmr.msra.gmra.mrb[60].mxu0 %vm494_vm2, %v5785_v5  ;;  %4641 = vmatmul.mubr.msk.bf16.gmra.mrb[60].mxu1 %vm494_vm2, %v5802_v9 }
  0x8e   : > { %4989 = vmatpush3.bf16.msra.mxu0 %v1852_v39  ;;  %4644 = vmatprep.mubr.msk.bf16.mxu1 %vm5714_vm1, %v7962_v1 }
  0x8f   : > { %4758 = vmatprep.mubr.msk.bf16.mxu0 %vm5714_vm1, %v7962_v1  ;;  %5224 = vmatprep.subr.bf16.mxu0 %v7962_v1 }
  0x95   : > { %4759 = vmatmul.mubr.msk.bf16.gmra.mrb[64].mxu0 %vm494_vm2, %v5802_v9  ;;  %4645 = vmatmul.mubr.msk.bf16.gmra.mrb[64].mxu1 %vm494_vm2, %v5817_v11 }
  0x96   : > { %4762 = vmatprep.mubr.msk.bf16.mxu0 %vm5714_vm1, %v7962_v1  ;;  %4648 = vmatprep.mubr.msk.bf16.mxu1 %vm5714_vm1, %v7962_v1 }
  0x9d   : > { %4763 = vmatmul.mubr.msk.bf16.gmra.mrb[68].mxu0 %vm494_vm2, %v5817_v11  ;;  %4649 = vmatmul.mubr.msk.bf16.gmra.mrb[68].mxu1 %vm494_vm2, %v5831_v13 }
  0x9e   : > { %4766 = vmatprep.mubr.msk.bf16.mxu0 %vm5714_vm1, %v7962_v1  ;;  %4652 = vmatprep.mubr.msk.bf16.mxu1 %vm5714_vm1, %v7962_v1 }
  0xa5   : > { %4767 = vmatmul.mubr.msk.bf16.gmra.mrb[72].mxu0 %vm494_vm2, %v5831_v13  ;;  %4653 = vmatmul.mubr.msk.bf16.gmra.mrb[72].mxu1 %vm494_vm2, %v5845_v15 }
  0xa6   : > { %4770 = vmatprep.mubr.msk.bf16.mxu0 %vm5714_vm1, %v7962_v1  ;;  %4656 = vmatprep.mubr.msk.bf16.mxu1 %vm5714_vm1, %v7962_v1 }
  0xad   : > { %4771 = vmatmul.mubr.msk.bf16.gmra.mrb[76].mxu0 %vm494_vm2, %v5845_v15  ;;  %4657 = vmatmul.mubr.msk.bf16.gmra.mrb[76].mxu1 %vm494_vm2, %v5859_v17 }
  0xae   : > { %4774 = vmatprep.mubr.msk.bf16.mxu0 %vm5714_vm1, %v7962_v1  ;;  %4660 = vmatprep.mubr.msk.bf16.mxu1 %vm5714_vm1, %v7962_v1 }
  0xb5   : > { %4775 = vmatmul.mubr.msk.bf16.gmra.mrb[80].mxu0 %vm494_vm2, %v5859_v17  ;;  %4661 = vmatmul.mubr.msk.bf16.gmra.mrb[80].mxu1 %vm494_vm2, %v5873_v19 }
  0xb6   : > { %4778 = vmatprep.mubr.msk.bf16.mxu0 %vm5714_vm1, %v7962_v1  ;;  %4664 = vmatprep.mubr.msk.bf16.mxu1 %vm5714_vm1, %v7962_v1 }
  0xbd   : > { %4779 = vmatmul.mubr.msk.bf16.gmra.mrb[84].mxu0 %vm494_vm2, %v5873_v19  ;;  %4665 = vmatmul.mubr.msk.bf16.gmra.mrb[84].mxu1 %vm494_vm2, %v5887_v21 }
  0xbe   : > { %4782 = vmatprep.mubr.msk.bf16.mxu0 %vm5714_vm1, %v7962_v1  ;;  %4668 = vmatprep.mubr.msk.bf16.mxu1 %vm5714_vm1, %v7962_v1 }
  0xc5   : > { %4783 = vmatmul.mubr.msk.bf16.gmra.mrb[88].mxu0 %vm494_vm2, %v5887_v21  ;;  %4669 = vmatmul.mubr.msk.bf16.gmra.mrb[88].mxu1 %vm494_vm2, %v5901_v23 }
  0xc6   : > { %4786 = vmatprep.mubr.msk.bf16.mxu0 %vm5714_vm1, %v7962_v1  ;;  %4672 = vmatprep.mubr.msk.bf16.mxu1 %vm5714_vm1, %v7962_v1 }
  0xcd   : > { %4787 = vmatmul.mubr.msk.bf16.gmra.mrb[92].mxu0 %vm494_vm2, %v5901_v23  ;;  %4673 = vmatmul.mubr.msk.bf16.gmra.mrb[92].mxu1 %vm494_vm2, %v5915_v25 }
  0xce   : > { %4790 = vmatprep.mubr.msk.bf16.mxu0 %vm5714_vm1, %v7962_v1  ;;  %4676 = vmatprep.mubr.msk.bf16.mxu1 %vm5714_vm1, %v7962_v1 }
  0xd5   : > { %4791 = vmatmul.mubr.msk.bf16.gmra.mrb[96].mxu0 %vm494_vm2, %v5915_v25  ;;  %4677 = vmatmul.mubr.msk.bf16.gmra.mrb[96].mxu1 %vm494_vm2, %v5929_v27 }
  0xd6   : > { %4794 = vmatprep.mubr.msk.bf16.mxu0 %vm5714_vm1, %v7962_v1  ;;  %4680 = vmatprep.mubr.msk.bf16.mxu1 %vm5714_vm1, %v7962_v1 }
  0xdd   : > { %4795 = vmatmul.mubr.msk.bf16.gmra.mrb[100].mxu0 %vm494_vm2, %v5929_v27  ;;  %4681 = vmatmul.mubr.msk.bf16.gmra.mrb[100].mxu1 %vm494_vm2, %v5943_v29 }
  0xde   : > { %4798 = vmatprep.mubr.msk.bf16.mxu0 %vm5714_vm1, %v7962_v1  ;;  %4684 = vmatprep.mubr.msk.bf16.mxu1 %vm5714_vm1, %v7962_v1 }
  0xe5   : > { %4799 = vmatmul.mubr.msk.bf16.gmra.mrb[104].mxu0 %vm494_vm2, %v5943_v29  ;;  %4685 = vmatmul.mubr.msk.bf16.gmra.mrb[104].mxu1 %vm494_vm2, %v5957_v31 }
  0xe6   : > { %4802 = vmatprep.mubr.msk.bf16.mxu0 %vm5714_vm1, %v7962_v1  ;;  %4688 = vmatprep.mubr.msk.bf16.mxu1 %vm5714_vm1, %v7962_v1 }
  0xe8   : > { %v6101_v40 = vpop.f32.mrb[0].mxu0  ;;  %v6103_v42 = vpop.f32.mrb[0].mxu1 }
  0xe9   : > { %v4520_v41 = vpop.f32.mrb[1].mxu0  ;;  %v4580_v44 = vpop.f32.mrb[1].mxu1 }
  0xea   : > { %v6105_v43 = vpop.f32.mrb[2].mxu0  ;;  %v6107_v46 = vpop.f32.mrb[2].mxu1 }
  0xeb   : > { %v4521_v45 = vpop.f32.mrb[3].mxu0  ;;  %v4581_v47 = vpop.f32.mrb[3].mxu1 }
  0xed   : > { %4803 = vmatmul.mubr.msk.bf16.gmra.mrb[108].mxu0 %vm494_vm2, %v5957_v31  ;;  %4689 = vmatmul.mubr.msk.bf16.gmra.mrb[108].mxu1 %vm494_vm2, %v5971_v33 }
  0xee   : > { %4806 = vmatprep.mubr.msk.bf16.mxu0 %vm5714_vm1, %v7962_v1  ;;  %4692 = vmatprep.mubr.msk.bf16.mxu1 %vm5714_vm1, %v7962_v1 }
  0xf0   : > { %v628_v48 = vpop.f32.mrb[4].mxu0  ;;  %v738_v50 = vpop.f32.mrb[4].mxu1 }
  0xf1   : > { %v4524_v49 = vpop.f32.mrb[5].mxu0  ;;  %v4584_v52 = vpop.f32.mrb[5].mxu1 }
  0xf2   : > { %v6117_v51 = vpop.f32.mrb[6].mxu0  ;;  %v6119_v54 = vpop.f32.mrb[6].mxu1 }
  0xf3   : > { %v4525_v53 = vpop.f32.mrb[7].mxu0  ;;  %v4585_v55 = vpop.f32.mrb[7].mxu1 }
  0xf5   : > { %4807 = vmatmul.mubr.msk.bf16.gmra.mrb[112].mxu0 %vm494_vm2, %v5971_v33  ;;  %4693 = vmatmul.mubr.msk.bf16.gmra.mrb[112].mxu1 %vm494_vm2, %v5985_v35 }
  0xf6   : > { %4810 = vmatprep.mubr.msk.bf16.mxu0 %vm5714_vm1, %v7962_v1  ;;  %4696 = vmatprep.mubr.msk.bf16.mxu1 %vm5714_vm1, %v7962_v1 }
  0xf8   : > { %v6129_v56 = vpop.f32.mrb[8].mxu0  ;;  %v6131_v58 = vpop.f32.mrb[8].mxu1 }
  0xf9   : > { %v4528_v57 = vpop.f32.mrb[9].mxu0  ;;  %v4588_v60 = vpop.f32.mrb[9].mxu1 }
  0xfa   : > { %v638_v59 = vpop.f32.mrb[10].mxu0  ;;  %v748_v62 = vpop.f32.mrb[10].mxu1 }
  0xfb   : > { %v4529_v61 = vpop.f32.mrb[11].mxu0  ;;  %v4589_v63 = vpop.f32.mrb[11].mxu1 }
  0xfd   : > { %4811 = vmatmul.mubr.msk.bf16.gmra.mrb[116].mxu0 %vm494_vm2, %v5985_v35  ;;  %4697 = vmatmul.mubr.msk.bf16.gmra.mrb[116].mxu1 %vm494_vm2, %v5789_v7 }
  0xfe   : > { %4814 = vmatprep.mubr.msk.bf16.mxu0 %vm5714_vm1, %v7962_v1  ;;  %4700 = vmatprep.mubr.msk.bf16.mxu1 %vm5714_vm1, %v7962_v1 }
 0x100   : > { %v6141_v0 = vpop.f32.mrb[12].mxu0  ;;  %v6143_v3 = vpop.f32.mrb[12].mxu1 }
 0x101   : > { %v4532_v2 = vpop.f32.mrb[13].mxu0  ;;  %v4592_v6 = vpop.f32.mrb[13].mxu1 }
 0x102   : > { %v6145_v4 = vpop.f32.mrb[14].mxu0  ;;  %v6147_v25 = vpop.f32.mrb[14].mxu1 }
 0x103   : > { %v4533_v8 = vpop.f32.mrb[15].mxu0  ;;  %v4593_v27 = vpop.f32.mrb[15].mxu1 }
 0x105   : > { %4815 = vmatmul.mubr.msk.bf16.gmra.mrb[120].mxu0 %vm494_vm2, %v5789_v7  ;;  %4701 = vmatmul.mubr.msk.bf16.gmra.mrb[120].mxu1 %vm494_vm2, %v5806_v10 }
 0x106   : > { %4818 = vmatprep.mubr.msk.bf16.mxu0 %vm5714_vm1, %v7962_v1  ;;  %4704 = vmatprep.mubr.msk.bf16.mxu1 %vm5714_vm1, %v7962_v1 }
 0x108   : > { %v650_v29 = vpop.f32.mrb[16].mxu0  ;;  %v760_v33 = vpop.f32.mrb[16].mxu1 }
 0x109   : > { %v4536_v31 = vpop.f32.mrb[17].mxu0  ;;  %v4596_v36 = vpop.f32.mrb[17].mxu1 }
 0x10a   : > { %v6157_v35 = vpop.f32.mrb[18].mxu0  ;;  %v6159_v38 = vpop.f32.mrb[18].mxu1 }
 0x10b   : > { %v4537_v37 = vpop.f32.mrb[19].mxu0  ;;  %v4597_v39 = vpop.f32.mrb[19].mxu1 }
 0x10d   : > { %4819 = vmatmul.mubr.msk.bf16.gmra.mrb[124].mxu0 %vm494_vm2, %v5806_v10  ;;  %4705 = vmatmul.mubr.msk.bf16.gmra.mrb[124].mxu1 %vm494_vm2, %v5820_v12 }
 0x10e   : > { %4822 = vmatprep.mubr.msk.bf16.mxu0 %vm5714_vm1, %v7962_v1  ;;  %4708 = vmatprep.mubr.msk.bf16.mxu1 %vm5714_vm1, %v7962_v1 }
 0x110   : > { %v6169_v7 = vpop.f32.mrb[20].mxu0  ;;  %v6171_v44 = vpop.f32.mrb[20].mxu1 }
 0x111   : > { %v4540_v41 = vpop.f32.mrb[21].mxu0  ;;  %v4600_v47 = vpop.f32.mrb[21].mxu1 }
 0x112   : > { %v660_v45 = vpop.f32.mrb[22].mxu0  ;;  %v770_v49 = vpop.f32.mrb[22].mxu1 }
 0x113   : > { %v4541_v48 = vpop.f32.mrb[23].mxu0  ;;  %v4601_v50 = vpop.f32.mrb[23].mxu1 }
 0x115   : > { %4823 = vmatmul.mubr.msk.bf16.gmra.mrb[128].mxu0 %vm494_vm2, %v5820_v12  ;;  %4709 = vmatmul.mubr.msk.bf16.gmra.mrb[128].mxu1 %vm494_vm2, %v5834_v14 }
 0x116   : > { %4826 = vmatprep.mubr.msk.bf16.mxu0 %vm5714_vm1, %v7962_v1  ;;  %4712 = vmatprep.mubr.msk.bf16.mxu1 %vm5714_vm1, %v7962_v1 }
 0x118   : > { %v6181_v10 = vpop.f32.mrb[24].mxu0  ;;  %v6183_v53 = vpop.f32.mrb[24].mxu1 }
 0x119   : > { %v4544_v52 = vpop.f32.mrb[25].mxu0  ;;  %v4604_v57 = vpop.f32.mrb[25].mxu1 }
 0x11a   : > { %v6185_v55 = vpop.f32.mrb[26].mxu0  ;;  %v6187_v60 = vpop.f32.mrb[26].mxu1 }
 0x11b   : > { %v4545_v59 = vpop.f32.mrb[27].mxu0  ;;  %v4605_v12 = vpop.f32.mrb[27].mxu1 }
 0x11d   : > { %4827 = vmatmul.mubr.msk.bf16.gmra.mrb[132].mxu0 %vm494_vm2, %v5834_v14  ;;  %4713 = vmatmul.mubr.msk.bf16.gmra.mrb[132].mxu1 %vm494_vm2, %v5848_v16 }
 0x11e   : > { %4830 = vmatprep.mubr.msk.bf16.mxu0 %vm5714_vm1, %v7962_v1  ;;  %4716 = vmatprep.mubr.msk.bf16.mxu1 %vm5714_vm1, %v7962_v1 }
 0x120   : > { %v672_v61 = vpop.f32.mrb[28].mxu0  ;;  %v782_v63 = vpop.f32.mrb[28].mxu1 }
 0x121   : > { %v4548_v62 = vpop.f32.mrb[29].mxu0  ;;  %v4608_v6 = vpop.f32.mrb[29].mxu1 }
 0x122   : > { %v6197_v2 = vpop.f32.mrb[30].mxu0  ;;  %v6199_v27 = vpop.f32.mrb[30].mxu1 }
 0x123   : > { %v4549_v8 = vpop.f32.mrb[31].mxu0  ;;  %v4609_v29 = vpop.f32.mrb[31].mxu1 }
 0x125   : > { %4831 = vmatmul.mubr.msk.bf16.gmra.mrb[136].mxu0 %vm494_vm2, %v5848_v16  ;;  %4717 = vmatmul.mubr.msk.bf16.gmra.mrb[136].mxu1 %vm494_vm2, %v5862_v18 }
 0x126   : > { %4834 = vmatprep.mubr.msk.bf16.mxu0 %vm5714_vm1, %v7962_v1  ;;  %4720 = vmatprep.mubr.msk.bf16.mxu1 %vm5714_vm1, %v7962_v1 }
 0x128   : > { %v6209_v14 = vpop.f32.mrb[32].mxu0  ;;  %v6211_v33 = vpop.f32.mrb[32].mxu1 }
 0x129   : > { %v4552_v31 = vpop.f32.mrb[33].mxu0  ;;  %v4612_v37 = vpop.f32.mrb[33].mxu1 }
 0x12a   : > { %v682_v36 = vpop.f32.mrb[34].mxu0  ;;  %v792_v41 = vpop.f32.mrb[34].mxu1 }
 0x12b   : > { %v4553_v39 = vpop.f32.mrb[35].mxu0  ;;  %v4613_v45 = vpop.f32.mrb[35].mxu1 }
 0x12d   : > { %4835 = vmatmul.mubr.msk.bf16.gmra.mrb[140].mxu0 %vm494_vm2, %v5862_v18  ;;  %4721 = vmatmul.mubr.msk.bf16.gmra.mrb[140].mxu1 %vm494_vm2, %v5876_v20 }
 0x12e   : > { %4838 = vmatprep.mubr.msk.bf16.mxu0 %vm5714_vm1, %v7962_v1  ;;  %4724 = vmatprep.mubr.msk.bf16.mxu1 %vm5714_vm1, %v7962_v1 }
 0x130   : > { %v6221_v16 = vpop.f32.mrb[36].mxu0  ;;  %v796_v48 = vpop.f32.mrb[36].mxu1 }
 0x131   : > { %v4556_v47 = vpop.f32.mrb[37].mxu0  ;;  %v4616_v50 = vpop.f32.mrb[37].mxu1 }
 0x132   : > { %v6223_v49 = vpop.f32.mrb[38].mxu0  ;;  %v798_v57 = vpop.f32.mrb[38].mxu1 }
 0x133   : > { %v4557_v52 = vpop.f32.mrb[39].mxu0  ;;  %v4617_v59 = vpop.f32.mrb[39].mxu1 }
 0x135   : > { %4839 = vmatmul.mubr.msk.bf16.gmra.mrb[144].mxu0 %vm494_vm2, %v5876_v20  ;;  %4725 = vmatmul.mubr.msk.bf16.gmra.mrb[144].mxu1 %vm494_vm2, %v5890_v22 }
 0x136   : > { %4842 = vmatprep.mubr.msk.bf16.mxu0 %vm5714_vm1, %v7962_v1  ;;  %4728 = vmatprep.mubr.msk.bf16.mxu1 %vm5714_vm1, %v7962_v1 }
 0x138   : > { %v694_v18 = vpop.f32.mrb[40].mxu0  ;;  %v802_v61 = vpop.f32.mrb[40].mxu1 }
 0x139   : > { %v4560_v12 = vpop.f32.mrb[41].mxu0  ;;  %v4620_v63 = vpop.f32.mrb[41].mxu1 }
 0x13a   : > { %v6233_v62 = vpop.f32.mrb[42].mxu0  ;;  %v804_v8 = vpop.f32.mrb[42].mxu1 }
 0x13b   : > { %v4561_v6 = vpop.f32.mrb[43].mxu0  ;;  %v4621_v29 = vpop.f32.mrb[43].mxu1 }
 0x13d   : > { %4843 = vmatmul.mubr.msk.bf16.gmra.mrb[148].mxu0 %vm494_vm2, %v5890_v22  ;;  %4729 = vmatmul.mubr.msk.bf16.gmra.mrb[148].mxu1 %vm494_vm2, %v5904_v24 }
 0x13e   : > { %4846 = vmatprep.mubr.msk.bf16.mxu0 %vm5714_vm1, %v7962_v1  ;;  %4732 = vmatprep.mubr.msk.bf16.mxu1 %vm5714_vm1, %v7962_v1 }
 0x140   : > { %v6243_v20 = vpop.f32.mrb[44].mxu0  ;;  %v808_v36 = vpop.f32.mrb[44].mxu1 }
 0x141   : > { %v4564_v31 = vpop.f32.mrb[45].mxu0  ;;  %v4624_v39 = vpop.f32.mrb[45].mxu1  ;;  %v1133_v36 = vlaneseq }
 0x142   : > { %v704_v37 = vpop.f32.mrb[46].mxu0  ;;  %v810_v45 = vpop.f32.mrb[46].mxu1 }
 0x143   : > { %v4565_v41 = vpop.f32.mrb[47].mxu0  ;;  %v4625_v47 = vpop.f32.mrb[47].mxu1 }
 0x145   : > { %4847 = vmatmul.mubr.msk.bf16.gmra.mrb[152].mxu0 %vm494_vm2, %v5904_v24  ;;  %4733 = vmatmul.mubr.msk.bf16.gmra.mrb[152].mxu1 %vm494_vm2, %v5918_v26 }
 0x146   : > { %4850 = vmatprep.mubr.msk.bf16.mxu0 %vm5714_vm1, %v7962_v1  ;;  %4736 = vmatprep.mubr.msk.bf16.mxu1 %vm5714_vm1, %v7962_v1 }
 0x148   : > { %v6253_v22 = vpop.f32.mrb[48].mxu0  ;;  %v814_v50 = vpop.f32.mrb[48].mxu1 }
 0x149   : > { %v4568_v48 = vpop.f32.mrb[49].mxu0  ;;  %v4628_v57 = vpop.f32.mrb[49].mxu1 }
 0x14a   : > { %v6255_v52 = vpop.f32.mrb[50].mxu0  ;;  %v816_v18 = vpop.f32.mrb[50].mxu1 }
 0x14b   : > { %v4569_v59 = vpop.f32.mrb[51].mxu0  ;;  %v4629_v12 = vpop.f32.mrb[51].mxu1 }
 0x14d   : > { %4851 = vmatmul.mubr.msk.bf16.gmra.mrb[156].mxu0 %vm494_vm2, %v5918_v26  ;;  %4737 = vmatmul.mubr.msk.bf16.gmra.mrb[156].mxu1 %vm494_vm2, %v5932_v28  ;;  %v6273_v26 = vshrl.u32 %v1133_v36, 7 }
 0x14e   : > { %4854 = vmatprep.mubr.msk.bf16.mxu0 %vm5714_vm1, %v7962_v1  ;;  %4740 = vmatprep.mubr.msk.bf16.mxu1 %vm5714_vm1, %v7962_v1 }
 0x14f   : > { %vm1135_vm3 = vcmp.lt.s32.totalorder %v6273_v26, 7  ;;  %vm1508_vm4 = vcmp.lt.s32.totalorder %v6273_v26, 6 }
 0x150   : > { %v716_v24 = vpop.f32.mrb[52].mxu0  ;;  %v820_v63 = vpop.f32.mrb[52].mxu1 }
 0x151   : > { %v4572_v61 = vpop.f32.mrb[53].mxu0  ;;  %v4632_v8 = vpop.f32.mrb[53].mxu1 }
 0x152   : > { %v6265_v6 = vpop.f32.mrb[54].mxu0  ;;  %v822_v31 = vpop.f32.mrb[54].mxu1 }
 0x153   : > { %v4573_v29 = vpop.f32.mrb[55].mxu0  ;;  %v4633_v37 = vpop.f32.mrb[55].mxu1 }
 0x155   : > { %4855 = vmatmul.mubr.msk.bf16.gmra.mrb[160].mxu0 %vm494_vm2, %v5932_v28  ;;  %4741 = vmatmul.mubr.msk.bf16.gmra.mrb[160].mxu1 %vm494_vm2, %v5946_v30 }
 0x156   : > { %4858 = vmatprep.mubr.msk.bf16.mxu0 %vm5714_vm1, %v7962_v1  ;;  %4744 = vmatprep.mubr.msk.bf16.mxu1 %vm5714_vm1, %v7962_v1 }
 0x158   : > { %v6277_v39 = vpop.f32.mrb[56].mxu0  ;;  %v864_v41 = vpop.f32.mrb[56].mxu1 }
 0x159   : > { %v4576_v45 = vpop.f32.mrb[57].mxu0  ;;  %v1085_v47 = vrot.slane %v864_v41, 1  ;;  %v4638_v48 = vpop.f32.mrb[57].mxu1 }
 0x15a   : > { %v726_v50 = vpop.f32.mrb[58].mxu0  ;;  %v867_v57 = vpop.f32.mrb[58].mxu1 }
 0x15b   : > { %v4577_v28 = vpop.f32.mrb[59].mxu0  ;;  %v1086_v59 = vrot.slane %v867_v57, 1  ;;  %v4639_v18 = vpop.f32.mrb[59].mxu1 }
 0x15d   : > { %4859 = vmatmul.mubr.msk.bf16.gmra.mrb[164].mxu0 %vm494_vm2, %v5946_v30  ;;  %v1167_v12 = vsel %vm1135_vm3, %v1085_v47, %v1086_v59  ;;  %4745 = vmatmul.mubr.msk.bf16.gmra.mrb[164].mxu1 %vm494_vm2, %v5960_v32 }
 0x15e   : > { %4862 = vmatprep.mubr.msk.bf16.mxu0 %vm5714_vm1, %v7962_v1  ;;  %4748 = vmatprep.mubr.msk.bf16.mxu1 %vm5714_vm1, %v7962_v1  ;;  %v1168_v24 = vadd.f32 %v1167_v12, %v6101_v40  ;;  %v4121_v12 = vld [vmem:[%s7958_s1 + $0x14] sm:$0xf] }
 0x160   : > { %v1239_v61 = vpop.f32.mrb[60].mxu0  ;;  %v872_v63 = vpop.f32.mrb[60].mxu1 }
 0x161   : > { %v4756_v8 = vpop.f32.mrb[61].mxu0  ;;  %v1087_v29 = vrot.slane %v872_v63, 1  ;;  %v4642_v30 = vpop.f32.mrb[61].mxu1  ;;  %v1460_v36 = vrot.slane %v1239_v61, 2 }
 0x162   : > { %v1242_v31 = vpop.f32.mrb[62].mxu0  ;;  %v875_v45 = vpop.f32.mrb[62].mxu1 }
 0x163   : > { %v1461_v37 = vrot.slane %v1242_v31, 2  ;;  %v4757_v41 = vpop.f32.mrb[63].mxu0  ;;  %v1166_v47 = vsel %vm1135_vm3, %v1086_v59, %v1087_v29  ;;  %v4643_v48 = vpop.f32.mrb[63].mxu1 }
 0x164   : > { %v1169_v50 = vadd.f32 %v1166_v47, %v6105_v43  ;;  %v1088_v43 = vrot.slane %v875_v45, 1  ;;  %v2224_v47 = vsel %vm582_vm0, %v4121_v12, 0 }
 0x165   : > { %4863 = vmatmul.mubr.msk.bf16.gmra.mrb[168].mxu0 %vm494_vm2, %v5960_v32  ;;  %v1540_v40 = vsel %vm1508_vm4, %v1460_v36, %v1461_v37  ;;  %4749 = vmatmul.mubr.msk.bf16.gmra.mrb[168].mxu1 %vm494_vm2, %v5974_v34 }
 0x166   : > { %4866 = vmatprep.mubr.msk.bf16.mxu0 %vm5714_vm1, %v7962_v1  ;;  %v6303_v57 = vadd.f32 %v1540_v40, %v1168_v24  ;;  %4872 = vmatprep.mubr.msk.bf16.mxu1 %vm5714_vm1, %v7962_v1 }
 0x168   : > { %v1247_v28 = vpop.f32.mrb[64].mxu0  ;;  %v880_v59 = vpop.f32.mrb[64].mxu1 }
 0x169   : > { %v1462_v18 = vrot.slane %v1247_v28, 2  ;;  %v4760_v32 = vpop.f32.mrb[65].mxu0  ;;  %v1089_v61 = vrot.slane %v880_v59, 1  ;;  %v4646_v63 = vpop.f32.mrb[65].mxu1 }
 0x16a   : > { %v1250_v8 = vpop.f32.mrb[66].mxu0  ;;  %v883_v29 = vpop.f32.mrb[66].mxu1 }
 0x16b   : > { %v4761_v31 = vpop.f32.mrb[67].mxu0  ;;  %v1539_v24 = vsel %vm1508_vm4, %v1461_v37, %v1462_v18  ;;  %v1165_v30 = vsel %vm1135_vm3, %v1088_v43, %v1089_v61  ;;  %v1090_v36 = vrot.slane %v883_v29, 1  ;;  %v4647_v41 = vpop.f32.mrb[67].mxu1 }
 0x16c   : > { %v6315_v48 = vadd.f32 %v1539_v24, %v1169_v50  ;;  %v1170_v45 = vadd.f32 %v1165_v30, %v6117_v51  ;;  %v1463_v51 = vrot.slane %v1250_v8, 2 }
 0x16d   : > { %4867 = vmatmul.mubr.msk.bf16.gmra.mrb[172].mxu0 %vm494_vm2, %v5974_v34  ;;  %v1164_v40 = vsel %vm1135_vm3, %v1089_v61, %v1090_v36  ;;  %4873 = vmatmul.mubr.msk.bf16.vlgmr.msra.gmra.mrb[172].mxu1 %vm494_vm2, %v5785_v5  ;;  %v4151_v34 = vld [vmem:[%s7958_s1 + $0x18] sm:$0xf] }
 0x16e   : > { %4990 = vmatprep.mubr.msk.bf16.mxu0 %vm5714_vm1, %v7962_v1  ;;  %5107 = vmatpush3.bf16.msra.mxu1 %v2224_v47  ;;  %v1171_v37 = vadd.f32 %v1164_v40, %v6129_v56  ;;  %v2596_v31 = vsel %vm582_vm0, %v4151_v34, 0 }
 0x16f   : > { %4876 = vmatprep.mubr.msk.bf16.mxu1 %vm5714_vm1, %v7962_v1  ;;  %5342 = vmatprep.subr.bf16.mxu1 %v7962_v1 }
 0x170   : > { %v1255_v50 = vpop.f32.mrb[68].mxu0  ;;  %v888_v28 = vpop.f32.mrb[68].mxu1 }
 0x171   : > { %v1464_v59 = vrot.slane %v1255_v50, 2  ;;  %v4764_v18 = vpop.f32.mrb[69].mxu0  ;;  %v1091_v32 = vrot.slane %v888_v28, 1  ;;  %v4650_v12 = vpop.f32.mrb[69].mxu1 }
 0x172   : > { %v1258_v43 = vpop.f32.mrb[70].mxu0  ;;  %v891_v61 = vpop.f32.mrb[70].mxu1 }
 0x173   : > { %v1465_v63 = vrot.slane %v1258_v43, 2  ;;  %v4765_v29 = vpop.f32.mrb[71].mxu0  ;;  %v1538_v56 = vsel %vm1508_vm4, %v1463_v51, %v1464_v59  ;;  %v1092_v24 = vrot.slane %v891_v61, 1  ;;  %v4651_v30 = vpop.f32.mrb[71].mxu1 }
 0x174   : > { %v6336_v36 = vadd.f32 %v1538_v56, %v1170_v45 }
 0x175   : > { %4991 = vmatmul.mubr.msk.bf16.vlgmr.msra.gmra.mrb[176].mxu0 %vm494_vm2, %v5785_v5  ;;  %v1537_v8 = vsel %vm1508_vm4, %v1464_v59, %v1465_v63  ;;  %v1163_v41 = vsel %vm1135_vm3, %v1091_v32, %v1092_v24  ;;  %4877 = vmatmul.mubr.msk.bf16.gmra.mrb[176].mxu1 %vm494_vm2, %v5802_v9 }
 0x176   : > { %5225 = vmatpush3.bf16.msra.mxu0 %v2596_v31  ;;  %v6346_v47 = vadd.f32 %v1537_v8, %v1171_v37  ;;  %4880 = vmatprep.mubr.msk.bf16.mxu1 %vm5714_vm1, %v7962_v1  ;;  %v1172_v5 = vadd.f32 %v1163_v41, %v6141_v0 }
 0x177   : > { %4994 = vmatprep.mubr.msk.bf16.mxu0 %vm5714_vm1, %v7962_v1  ;;  %5460 = vmatprep.subr.bf16.mxu0 %v7962_v1 }
 0x178   : > { %v1263_v45 = vpop.f32.mrb[72].mxu0  ;;  %v896_v40 = vpop.f32.mrb[72].mxu1 }
 0x179   : > { %v4768_v50 = vpop.f32.mrb[73].mxu0  ;;  %v1093_v34 = vrot.slane %v896_v40, 1  ;;  %v4654_v28 = vpop.f32.mrb[73].mxu1  ;;  %v1466_v59 = vrot.slane %v1263_v45, 2 }
 0x17a   : > { %v1266_v51 = vpop.f32.mrb[74].mxu0  ;;  %v899_v32 = vpop.f32.mrb[74].mxu1 }
 0x17b   : > { %v1467_v18 = vrot.slane %v1266_v51, 2  ;;  %v4769_v37 = vpop.f32.mrb[75].mxu0  ;;  %v1162_v12 = vsel %vm1135_vm3, %v1092_v24, %v1093_v34  ;;  %v4655_v43 = vpop.f32.mrb[75].mxu1  ;;  %v1094_v24 = vrot.slane %v899_v32, 1 }
 0x17c   : > { %v1173_v61 = vadd.f32 %v1162_v12, %v6145_v4 }
 0x17d   : > { %4995 = vmatmul.mubr.msk.bf16.gmra.mrb[180].mxu0 %vm494_vm2, %v5802_v9  ;;  %v1536_v0 = vsel %vm1508_vm4, %v1466_v59, %v1467_v18  ;;  %4881 = vmatmul.mubr.msk.bf16.gmra.mrb[180].mxu1 %vm494_vm2, %v5817_v11 }
 0x17e   : > { %4998 = vmatprep.mubr.msk.bf16.mxu0 %vm5714_vm1, %v7962_v1  ;;  %v6365_v63 = vadd.f32 %v1536_v0, %v1172_v5  ;;  %4884 = vmatprep.mubr.msk.bf16.mxu1 %vm5714_vm1, %v7962_v1 }
 0x180   : > { %v1271_v29 = vpop.f32.mrb[76].mxu0  ;;  %v904_v31 = vpop.f32.mrb[76].mxu1 }
 0x181   : > { %v1468_v56 = vrot.slane %v1271_v29, 2  ;;  %v4772_v9 = vpop.f32.mrb[77].mxu0  ;;  %v1095_v30 = vrot.slane %v904_v31, 1  ;;  %v4658_v8 = vpop.f32.mrb[77].mxu1 }
 0x182   : > { %v1274_v41 = vpop.f32.mrb[78].mxu0  ;;  %v907_v4 = vpop.f32.mrb[78].mxu1 }
 0x183   : > { %v4773_v45 = vpop.f32.mrb[79].mxu0  ;;  %v1535_v40 = vsel %vm1508_vm4, %v1467_v18, %v1468_v56  ;;  %v1161_v5 = vsel %vm1135_vm3, %v1094_v24, %v1095_v30  ;;  %v1096_v50 = vrot.slane %v907_v4, 1  ;;  %v4659_v34 = vpop.f32.mrb[79].mxu1  ;;  %v1469_v32 = vrot.slane %v1274_v41, 2 }
 0x184   : > { %v6373_v51 = vadd.f32 %v1535_v40, %v1173_v61  ;;  %v1174_v28 = vadd.f32 %v1161_v5, %v6157_v35 }
 0x185   : > { %4999 = vmatmul.mubr.msk.bf16.gmra.mrb[184].mxu0 %vm494_vm2, %v5817_v11  ;;  %v1160_v59 = vsel %vm1135_vm3, %v1095_v30, %v1096_v50  ;;  %4885 = vmatmul.mubr.msk.bf16.gmra.mrb[184].mxu1 %vm494_vm2, %v5831_v13 }
 0x186   : > { %5002 = vmatprep.mubr.msk.bf16.mxu0 %vm5714_vm1, %v7962_v1  ;;  %4888 = vmatprep.mubr.msk.bf16.mxu1 %vm5714_vm1, %v7962_v1  ;;  %v1175_v18 = vadd.f32 %v1160_v59, %v6169_v7 }
 0x188   : > { %v1279_v37 = vpop.f32.mrb[80].mxu0  ;;  %v912_v12 = vpop.f32.mrb[80].mxu1 }
 0x189   : > { %v1470_v11 = vrot.slane %v1279_v37, 2  ;;  %v4776_v43 = vpop.f32.mrb[81].mxu0  ;;  %v1097_v35 = vrot.slane %v912_v12, 1  ;;  %v4662_v0 = vpop.f32.mrb[81].mxu1 }
 0x18a   : > { %v1282_v61 = vpop.f32.mrb[82].mxu0  ;;  %v915_v29 = vpop.f32.mrb[82].mxu1 }
 0x18b   : > { %v1471_v31 = vrot.slane %v1282_v61, 2  ;;  %v4777_v56 = vpop.f32.mrb[83].mxu0  ;;  %v1534_v9 = vsel %vm1508_vm4, %v1469_v32, %v1470_v11  ;;  %v1098_v24 = vrot.slane %v915_v29, 1  ;;  %v4663_v30 = vpop.f32.mrb[83].mxu1 }
 0x18c   : > { %v6389_v8 = vadd.f32 %v1534_v9, %v1174_v28 }
 0x18d   : > { %5003 = vmatmul.mubr.msk.bf16.gmra.mrb[188].mxu0 %vm494_vm2, %v5831_v13  ;;  %v1533_v7 = vsel %vm1508_vm4, %v1470_v11, %v1471_v31  ;;  %v1159_v41 = vsel %vm1135_vm3, %v1097_v35, %v1098_v24  ;;  %4889 = vmatmul.mubr.msk.bf16.gmra.mrb[188].mxu1 %vm494_vm2, %v5845_v15 }
 0x18e   : > { %5006 = vmatprep.mubr.msk.bf16.mxu0 %vm5714_vm1, %v7962_v1  ;;  %v6401_v4 = vadd.f32 %v1533_v7, %v1175_v18  ;;  %4892 = vmatprep.mubr.msk.bf16.mxu1 %vm5714_vm1, %v7962_v1  ;;  %v1176_v45 = vadd.f32 %v1159_v41, %v6181_v10 }
 0x190   : > { %v1287_v13 = vpop.f32.mrb[84].mxu0  ;;  %v920_v40 = vpop.f32.mrb[84].mxu1 }
 0x191   : > { %v4780_v5 = vpop.f32.mrb[85].mxu0  ;;  %v1099_v50 = vrot.slane %v920_v40, 1  ;;  %v4666_v28 = vpop.f32.mrb[85].mxu1  ;;  %v1472_v59 = vrot.slane %v1287_v13, 2 }
 0x192   : > { %v1290_v34 = vpop.f32.mrb[86].mxu0  ;;  %v923_v12 = vpop.f32.mrb[86].mxu1 }
 0x193   : > { %v1473_v37 = vrot.slane %v1290_v34, 2  ;;  %v4781_v32 = vpop.f32.mrb[87].mxu0  ;;  %v1158_v11 = vsel %vm1135_vm3, %v1098_v24, %v1099_v50  ;;  %v4667_v18 = vpop.f32.mrb[87].mxu1  ;;  %v1100_v31 = vrot.slane %v923_v12, 1 }
 0x194   : > { %v1177_v43 = vadd.f32 %v1158_v11, %v6185_v55 }
 0x195   : > { %5007 = vmatmul.mubr.msk.bf16.gmra.mrb[192].mxu0 %vm494_vm2, %v5845_v15  ;;  %v1532_v10 = vsel %vm1508_vm4, %v1472_v59, %v1473_v37  ;;  %4893 = vmatmul.mubr.msk.bf16.gmra.mrb[192].mxu1 %vm494_vm2, %v5859_v17 }
 0x196   : > { %5010 = vmatprep.mubr.msk.bf16.mxu0 %vm5714_vm1, %v7962_v1  ;;  %v6417_v35 = vadd.f32 %v1532_v10, %v1176_v45  ;;  %4896 = vmatprep.mubr.msk.bf16.mxu1 %vm5714_vm1, %v7962_v1 }
 0x198   : > { %v1295_v0 = vpop.f32.mrb[88].mxu0  ;;  %v928_v61 = vpop.f32.mrb[88].mxu1 }
 0x199   : > { %v1474_v29 = vrot.slane %v1295_v0, 2  ;;  %v4784_v15 = vpop.f32.mrb[89].mxu0  ;;  %v1101_v56 = vrot.slane %v928_v61, 1  ;;  %v4670_v9 = vpop.f32.mrb[89].mxu1 }
 0x19a   : > { %v1298_v24 = vpop.f32.mrb[90].mxu0  ;;  %v931_v55 = vpop.f32.mrb[90].mxu1 }
 0x19b   : > { %v4785_v30 = vpop.f32.mrb[91].mxu0  ;;  %v1531_v7 = vsel %vm1508_vm4, %v1473_v37, %v1474_v29  ;;  %v1157_v41 = vsel %vm1135_vm3, %v1100_v31, %v1101_v56  ;;  %v1102_v45 = vrot.slane %v931_v55, 1  ;;  %v4671_v13 = vpop.f32.mrb[91].mxu1  ;;  %v1475_v59 = vrot.slane %v1298_v24, 2 }
 0x19c   : > { %v6425_v40 = vadd.f32 %v1531_v7, %v1177_v43  ;;  %v1178_v5 = vadd.f32 %v1157_v41, %v6197_v2 }
 0x19d   : > { %5011 = vmatmul.mubr.msk.bf16.gmra.mrb[196].mxu0 %vm494_vm2, %v5859_v17  ;;  %v1156_v50 = vsel %vm1135_vm3, %v1101_v56, %v1102_v45  ;;  %4897 = vmatmul.mubr.msk.bf16.gmra.mrb[196].mxu1 %vm494_vm2, %v5873_v19 }
 0x19e   : > { %5014 = vmatprep.mubr.msk.bf16.mxu0 %vm5714_vm1, %v7962_v1  ;;  %4900 = vmatprep.mubr.msk.bf16.mxu1 %vm5714_vm1, %v7962_v1  ;;  %v1179_v34 = vadd.f32 %v1156_v50, %v6209_v14 }
 0x1a0   : > { %v1303_v28 = vpop.f32.mrb[92].mxu0  ;;  %v936_v37 = vpop.f32.mrb[92].mxu1 }
 0x1a1   : > { %v1476_v17 = vrot.slane %v1303_v28, 2  ;;  %v4788_v32 = vpop.f32.mrb[93].mxu0  ;;  %v1103_v2 = vrot.slane %v936_v37, 1  ;;  %v4674_v12 = vpop.f32.mrb[93].mxu1 }
 0x1a2   : > { %v1306_v11 = vpop.f32.mrb[94].mxu0  ;;  %v939_v18 = vpop.f32.mrb[94].mxu1 }
 0x1a3   : > { %v1477_v10 = vrot.slane %v1306_v11, 2  ;;  %v4789_v43 = vpop.f32.mrb[95].mxu0  ;;  %v1530_v0 = vsel %vm1508_vm4, %v1475_v59, %v1476_v17  ;;  %v1104_v61 = vrot.slane %v939_v18, 1  ;;  %v4675_v29 = vpop.f32.mrb[95].mxu1 }
 0x1a4   : > { %v6441_v15 = vadd.f32 %v1530_v0, %v1178_v5 }
 0x1a5   : > { %5015 = vmatmul.mubr.msk.bf16.gmra.mrb[200].mxu0 %vm494_vm2, %v5873_v19  ;;  %v1529_v14 = vsel %vm1508_vm4, %v1476_v17, %v1477_v10  ;;  %v1155_v31 = vsel %vm1135_vm3, %v1103_v2, %v1104_v61  ;;  %4901 = vmatmul.mubr.msk.bf16.gmra.mrb[200].mxu1 %vm494_vm2, %v5887_v21 }
 0x1a6   : > { %5018 = vmatprep.mubr.msk.bf16.mxu0 %vm5714_vm1, %v7962_v1  ;;  %v6453_v56 = vadd.f32 %v1529_v14, %v1179_v34  ;;  %4904 = vmatprep.mubr.msk.bf16.mxu1 %vm5714_vm1, %v7962_v1  ;;  %v1180_v9 = vadd.f32 %v1155_v31, %v6221_v16  ;;  %v5636_v31 = vld [vmem:[%s5782_s28 + $0x40] sm:$0xff]  }
 0x1a8   : > { %v1311_v19 = vpop.f32.mrb[96].mxu0  ;;  %v944_v24 = vpop.f32.mrb[96].mxu1 }
 0x1a9   : > { %v4792_v55 = vpop.f32.mrb[97].mxu0  ;;  %v1105_v30 = vrot.slane %v944_v24, 1  ;;  %v4678_v41 = vpop.f32.mrb[97].mxu1  ;;  %v1478_v45 = vrot.slane %v1311_v19, 2  ;;  %v5637_v24 = vld [vmem:[%s5782_s28 + $0x48] sm:$0xff]  }
 0x1aa   : > { %v1314_v7 = vpop.f32.mrb[98].mxu0  ;;  %v947_v50 = vpop.f32.mrb[98].mxu1 }
 0x1ab   : > { %v1479_v13 = vrot.slane %v1314_v7, 2  ;;  %v4793_v5 = vpop.f32.mrb[99].mxu0  ;;  %v1154_v28 = vsel %vm1135_vm3, %v1104_v61, %v1105_v30  ;;  %v4679_v34 = vpop.f32.mrb[99].mxu1  ;;  %v1106_v12 = vrot.slane %v947_v50, 1 }
 0x1ac   : > { %v1181_v59 = vadd.f32 %v1154_v28, %v6223_v49 }
 0x1ad   : > { %5019 = vmatmul.mubr.msk.bf16.gmra.mrb[204].mxu0 %vm494_vm2, %v5887_v21  ;;  %v1528_v16 = vsel %vm1508_vm4, %v1478_v45, %v1479_v13  ;;  %4905 = vmatmul.mubr.msk.bf16.gmra.mrb[204].mxu1 %vm494_vm2, %v5901_v23 }
 0x1ae   : > { %5022 = vmatprep.mubr.msk.bf16.mxu0 %vm5714_vm1, %v7962_v1  ;;  %v6469_v37 = vadd.f32 %v1528_v16, %v1180_v9  ;;  %4908 = vmatprep.mubr.msk.bf16.mxu1 %vm5714_vm1, %v7962_v1 }
 0x1b0   : > { %v1319_v17 = vpop.f32.mrb[100].mxu0  ;;  %v952_v32 = vpop.f32.mrb[100].mxu1 }
 0x1b1   : > { %v1480_v21 = vrot.slane %v1319_v17, 2  ;;  %v4796_v2 = vpop.f32.mrb[101].mxu0  ;;  %v1107_v11 = vrot.slane %v952_v32, 1  ;;  %v4682_v49 = vpop.f32.mrb[101].mxu1 }
 0x1b2   : > { %v1322_v18 = vpop.f32.mrb[102].mxu0  ;;  %v955_v10 = vpop.f32.mrb[102].mxu1 }
 0x1b3   : > { %v4797_v23 = vpop.f32.mrb[103].mxu0  ;;  %v1527_v43 = vsel %vm1508_vm4, %v1479_v13, %v1480_v21  ;;  %v1153_v0 = vsel %vm1135_vm3, %v1106_v12, %v1107_v11  ;;  %v1108_v61 = vrot.slane %v955_v10, 1  ;;  %v4683_v29 = vpop.f32.mrb[103].mxu1  ;;  %v1481_v7 = vrot.slane %v1322_v18, 2  ;;  %v5638_v12 = vld [vmem:[%s5782_s28 + $0x50] sm:$0xff]  }
 0x1b4   : > { %v6477_v14 = vadd.f32 %v1527_v43, %v1181_v59  ;;  %v1182_v9 = vadd.f32 %v1153_v0, %v6233_v62 }
 0x1b5   : > { %5023 = vmatmul.mubr.msk.bf16.gmra.mrb[208].mxu0 %vm494_vm2, %v5636_v31  ;;  %v1152_v19 = vsel %vm1135_vm3, %v1107_v11, %v1108_v61  ;;  %4909 = vmatmul.mubr.msk.bf16.gmra.mrb[208].mxu1 %vm494_vm2, %v5637_v24 }
 0x1b6   : > { %5026 = vmatprep.mubr.msk.bf16.mxu0 %vm5714_vm1, %v7962_v1  ;;  %4912 = vmatprep.mubr.msk.bf16.mxu1 %vm5714_vm1, %v7962_v1  ;;  %v1183_v55 = vadd.f32 %v1152_v19, %v6243_v20 }
 0x1b8   : > { %v1327_v30 = vpop.f32.mrb[104].mxu0  ;;  %v960_v41 = vpop.f32.mrb[104].mxu1 }
 0x1b9   : > { %v1482_v45 = vrot.slane %v1327_v30, 2  ;;  %v4800_v62 = vpop.f32.mrb[105].mxu0  ;;  %v1109_v13 = vrot.slane %v960_v41, 1  ;;  %v4686_v5 = vpop.f32.mrb[105].mxu1 }
 0x1ba   : > { %v1330_v50 = vpop.f32.mrb[106].mxu0  ;;  %v963_v28 = vpop.f32.mrb[106].mxu1 }
 0x1bb   : > { %v1483_v34 = vrot.slane %v1330_v50, 2  ;;  %v4801_v16 = vpop.f32.mrb[107].mxu0  ;;  %v1526_v59 = vsel %vm1508_vm4, %v1481_v7, %v1482_v45  ;;  %v1110_v17 = vrot.slane %v963_v28, 1  ;;  %v4687_v32 = vpop.f32.mrb[107].mxu1  ;;  %v5639_v7 = vld [vmem:[%s5782_s28 + $0x58] sm:$0xff]  }
 0x1bc   : > { %v6493_v21 = vadd.f32 %v1526_v59, %v1182_v9 }
 0x1bd   : > { %5027 = vmatmul.mubr.msk.bf16.gmra.mrb[212].mxu0 %vm494_vm2, %v5637_v24  ;;  %v1525_v20 = vsel %vm1508_vm4, %v1482_v45, %v1483_v34  ;;  %v1151_v2 = vsel %vm1135_vm3, %v1109_v13, %v1110_v17  ;;  %4913 = vmatmul.mubr.msk.bf16.gmra.mrb[212].mxu1 %vm494_vm2, %v5638_v12 }
 0x1be   : > { %5030 = vmatprep.mubr.msk.bf16.mxu0 %vm5714_vm1, %v7962_v1  ;;  %v6504_v11 = vadd.f32 %v1525_v20, %v1183_v55  ;;  %4916 = vmatprep.mubr.msk.bf16.mxu1 %vm5714_vm1, %v7962_v1  ;;  %v1184_v49 = vadd.f32 %v1151_v2, %v6253_v22 }
 0x1c0   : > { %v1335_v18 = vpop.f32.mrb[108].mxu0  ;;  %v968_v10 = vpop.f32.mrb[108].mxu1 }
 0x1c1   : > { %v4804_v23 = vpop.f32.mrb[109].mxu0  ;;  %v1111_v43 = vrot.slane %v968_v10, 1  ;;  %v4690_v61 = vpop.f32.mrb[109].mxu1  ;;  %v1484_v29 = vrot.slane %v1335_v18, 2  ;;  %v5640_v10 = vld [vmem:[%s5782_s28 + $0x60] sm:$0xff]  }
 0x1c2   : > { %v1338_v0 = vpop.f32.mrb[110].mxu0  ;;  %v971_v19 = vpop.f32.mrb[110].mxu1 }
 0x1c3   : > { %v1485_v31 = vrot.slane %v1338_v0, 2  ;;  %v4805_v9 = vpop.f32.mrb[111].mxu0  ;;  %v1150_v24 = vsel %vm1135_vm3, %v1110_v17, %v1111_v43  ;;  %v4691_v55 = vpop.f32.mrb[111].mxu1  ;;  %v1112_v50 = vrot.slane %v971_v19, 1 }
 0x1c4   : > { %v1185_v30 = vadd.f32 %v1150_v24, %v6255_v52 }
 0x1c5   : > { %5031 = vmatmul.mubr.msk.bf16.gmra.mrb[216].mxu0 %vm494_vm2, %v5638_v12  ;;  %v1524_v22 = vsel %vm1508_vm4, %v1484_v29, %v1485_v31  ;;  %4917 = vmatmul.mubr.msk.bf16.gmra.mrb[216].mxu1 %vm494_vm2, %v5639_v7 }
 0x1c6   : > { %5034 = vmatprep.mubr.msk.bf16.mxu0 %vm5714_vm1, %v7962_v1  ;;  %v6519_v41 = vadd.f32 %v1524_v22, %v1184_v49  ;;  %4920 = vmatprep.mubr.msk.bf16.mxu1 %vm5714_vm1, %v7962_v1 }
 0x1c8   : > { %v1343_v45 = vpop.f32.mrb[112].mxu0  ;;  %v976_v62 = vpop.f32.mrb[112].mxu1 }
 0x1c9   : > { %v1486_v13 = vrot.slane %v1343_v45, 2  ;;  %v4808_v5 = vpop.f32.mrb[113].mxu0  ;;  %v1113_v28 = vrot.slane %v976_v62, 1  ;;  %v4694_v34 = vpop.f32.mrb[113].mxu1 }
 0x1ca   : > { %v1346_v52 = vpop.f32.mrb[114].mxu0  ;;  %v979_v16 = vpop.f32.mrb[114].mxu1  ;;  %v5641_v5 = vld [vmem:[%s5782_s28 + $0x68] sm:$0xff]  }
 0x1cb   : > { %v4809_v59 = vpop.f32.mrb[115].mxu0  ;;  %v1523_v17 = vsel %vm1508_vm4, %v1485_v31, %v1486_v13  ;;  %v1149_v32 = vsel %vm1135_vm3, %v1112_v50, %v1113_v28  ;;  %v1114_v20 = vrot.slane %v979_v16, 1  ;;  %v4695_v2 = vpop.f32.mrb[115].mxu1  ;;  %v1487_v0 = vrot.slane %v1346_v52, 2 }
 0x1cc   : > { %v6527_v12 = vadd.f32 %v1523_v17, %v1185_v30  ;;  %v1186_v49 = vadd.f32 %v1149_v32, %v6265_v6 }
 0x1cd   : > { %5035 = vmatmul.mubr.msk.bf16.gmra.mrb[220].mxu0 %vm494_vm2, %v5639_v7  ;;  %v1148_v18 = vsel %vm1135_vm3, %v1113_v28, %v1114_v20  ;;  %4921 = vmatmul.mubr.msk.bf16.gmra.mrb[220].mxu1 %vm494_vm2, %v5640_v10 }
 0x1ce   : > { %5038 = vmatprep.mubr.msk.bf16.mxu0 %vm5714_vm1, %v7962_v1  ;;  %4924 = vmatprep.mubr.msk.bf16.mxu1 %vm5714_vm1, %v7962_v1  ;;  %v1187_v23 = vadd.f32 %v1148_v18, %v6277_v39 }
 0x1d0   : > { %v1351_v43 = vpop.f32.mrb[116].mxu0  ;;  %v984_v61 = vpop.f32.mrb[116].mxu1 }
 0x1d1   : > { %v1488_v29 = vrot.slane %v1351_v43, 2  ;;  %v4812_v6 = vpop.f32.mrb[117].mxu0  ;;  %v1115_v31 = vrot.slane %v984_v61, 1  ;;  %v4698_v9 = vpop.f32.mrb[117].mxu1 }
 0x1d2   : > { %v1354_v19 = vpop.f32.mrb[118].mxu0  ;;  %v987_v24 = vpop.f32.mrb[118].mxu1 }
 0x1d3   : > { %v1489_v55 = vrot.slane %v1354_v19, 2  ;;  %v4813_v22 = vpop.f32.mrb[119].mxu0  ;;  %v1522_v30 = vsel %vm1508_vm4, %v1487_v0, %v1488_v29  ;;  %v1116_v7 = vrot.slane %v987_v24, 1  ;;  %v4699_v45 = vpop.f32.mrb[119].mxu1  ;;  %v5642_v0 = vld [vmem:[%s5782_s28 + $0x70] sm:$0xff]  }
 0x1d4   : > { %v6542_v62 = vadd.f32 %v1522_v30, %v1186_v49 }
 0x1d5   : > { %5039 = vmatmul.mubr.msk.bf16.gmra.mrb[224].mxu0 %vm494_vm2, %v5640_v10  ;;  %v1521_v39 = vsel %vm1508_vm4, %v1488_v29, %v1489_v55  ;;  %v1147_v13 = vsel %vm1135_vm3, %v1115_v31, %v1116_v7  ;;  %4925 = vmatmul.mubr.msk.bf16.gmra.mrb[224].mxu1 %vm494_vm2, %v5641_v5 }
 0x1d6   : > { %5042 = vmatprep.mubr.msk.bf16.mxu0 %vm5714_vm1, %v7962_v1  ;;  %v6553_v50 = vadd.f32 %v1521_v39, %v1187_v23  ;;  %4928 = vmatprep.mubr.msk.bf16.mxu1 %vm5714_vm1, %v7962_v1  ;;  %v1188_v28 = vadd.f32 %v1147_v13, %v6103_v42 }
 0x1d8   : > { %v1359_v34 = vpop.f32.mrb[120].mxu0  ;;  %v992_v52 = vpop.f32.mrb[120].mxu1 }
 0x1d9   : > { %v4816_v16 = vpop.f32.mrb[121].mxu0  ;;  %v1117_v59 = vrot.slane %v992_v52, 1  ;;  %v4702_v32 = vpop.f32.mrb[121].mxu1  ;;  %v1490_v20 = vrot.slane %v1359_v34, 2  ;;  %v6583_v52 = vld [vmem:[%s5782_s28 + $0x78] sm:$0xff]  }
 0x1da   : > { %v1362_v17 = vpop.f32.mrb[122].mxu0  ;;  %v995_v18 = vpop.f32.mrb[122].mxu1 }
 0x1db   : > { %v1491_v2 = vrot.slane %v1362_v17, 2  ;;  %v4817_v49 = vpop.f32.mrb[123].mxu0  ;;  %v1146_v10 = vsel %vm1135_vm3, %v1116_v7, %v1117_v59  ;;  %v4703_v23 = vpop.f32.mrb[123].mxu1  ;;  %v1118_v19 = vrot.slane %v995_v18, 1 }
 0x1dc   : > { %v1189_v43 = vadd.f32 %v1146_v10, %v6107_v46 }
 0x1dd   : > { %5043 = vmatmul.mubr.msk.bf16.gmra.mrb[228].mxu0 %vm494_vm2, %v5641_v5  ;;  %v1520_v42 = vsel %vm1508_vm4, %v1490_v20, %v1491_v2  ;;  %4929 = vmatmul.mubr.msk.bf16.gmra.mrb[228].mxu1 %vm494_vm2, %v5642_v0 }
 0x1de   : > { %5046 = vmatprep.mubr.msk.bf16.mxu0 %vm5714_vm1, %v7962_v1  ;;  %v6568_v61 = vadd.f32 %v1520_v42, %v1188_v28  ;;  %4932 = vmatprep.mubr.msk.bf16.mxu1 %vm5714_vm1, %v7962_v1 }
 0x1e0   : > { %v1367_v29 = vpop.f32.mrb[124].mxu0  ;;  %v1000_v6 = vpop.f32.mrb[124].mxu1 }
 0x1e1   : > { %v1492_v31 = vrot.slane %v1367_v29, 2  ;;  %v4820_v9 = vpop.f32.mrb[125].mxu0  ;;  %v1119_v24 = vrot.slane %v1000_v6, 1  ;;  %v4706_v55 = vpop.f32.mrb[125].mxu1 }
 0x1e2   : > { %v1370_v46 = vpop.f32.mrb[126].mxu0  ;;  %v1003_v22 = vpop.f32.mrb[126].mxu1  ;;  %v6603_v9 = vld [vmem:[%s5782_s28 + $0x80] sm:$0xff]  }
 0x1e3   : > { %v4821_v30 = vpop.f32.mrb[127].mxu0  ;;  %v1519_v7 = vsel %vm1508_vm4, %v1491_v2, %v1492_v31  ;;  %v1145_v45 = vsel %vm1135_vm3, %v1118_v19, %v1119_v24  ;;  %v1120_v39 = vrot.slane %v1003_v22, 1  ;;  %v4707_v13 = vpop.f32.mrb[127].mxu1  ;;  %v1493_v17 = vrot.slane %v1370_v46, 2 }
 0x1e4   : > { %v6576_v5 = vadd.f32 %v1519_v7, %v1189_v43  ;;  %v1190_v28 = vadd.f32 %v1145_v45, %v6119_v54 }
 0x1e5   : > { %5047 = vmatmul.mubr.msk.bf16.gmra.mrb[232].mxu0 %vm494_vm2, %v5642_v0  ;;  %v1144_v34 = vsel %vm1135_vm3, %v1119_v24, %v1120_v39  ;;  %4933 = vmatmul.mubr.msk.bf16.gmra.mrb[232].mxu1 %vm494_vm2, %v6583_v52 }
 0x1e6   : > { %5050 = vmatprep.mubr.msk.bf16.mxu0 %vm5714_vm1, %v7962_v1  ;;  %4936 = vmatprep.mubr.msk.bf16.mxu1 %vm5714_vm1, %v7962_v1  ;;  %v1191_v16 = vadd.f32 %v1144_v34, %v6131_v58 }
 0x1e8   : > { %v1375_v59 = vpop.f32.mrb[128].mxu0  ;;  %v1008_v32 = vpop.f32.mrb[128].mxu1 }
 0x1e9   : > { %v1494_v54 = vrot.slane %v1375_v59, 2  ;;  %v4824_v20 = vpop.f32.mrb[129].mxu0  ;;  %v1121_v2 = vrot.slane %v1008_v32, 1  ;;  %v4710_v49 = vpop.f32.mrb[129].mxu1  ;;  %v6622_v32 = vld [vmem:[%s5782_s28 + $0x88] sm:$0xff]  }
 0x1ea   : > { %v1378_v18 = vpop.f32.mrb[130].mxu0  ;;  %v1011_v10 = vpop.f32.mrb[130].mxu1 }
 0x1eb   : > { %v1495_v23 = vrot.slane %v1378_v18, 2  ;;  %v4825_v42 = vpop.f32.mrb[131].mxu0  ;;  %v1518_v43 = vsel %vm1508_vm4, %v1493_v17, %v1494_v54  ;;  %v1122_v0 = vrot.slane %v1011_v10, 1  ;;  %v4711_v29 = vpop.f32.mrb[131].mxu1 }
 0x1ec   : > { %v6594_v6 = vadd.f32 %v1518_v43, %v1190_v28 }
 0x1ed   : > { %5051 = vmatmul.mubr.msk.bf16.gmra.mrb[236].mxu0 %vm494_vm2, %v6583_v52  ;;  %v1517_v58 = vsel %vm1508_vm4, %v1494_v54, %v1495_v23  ;;  %v1143_v31 = vsel %vm1135_vm3, %v1121_v2, %v1122_v0  ;;  %4937 = vmatmul.mubr.msk.bf16.gmra.mrb[236].mxu1 %vm494_vm2, %v6603_v9 }
 0x1ee   : > { %5054 = vmatprep.mubr.msk.bf16.mxu0 %vm5714_vm1, %v7962_v1  ;;  %v6609_v19 = vadd.f32 %v1517_v58, %v1191_v16  ;;  %4940 = vmatprep.mubr.msk.bf16.mxu1 %vm5714_vm1, %v7962_v1  ;;  %v1192_v24 = vadd.f32 %v1143_v31, %v6143_v3 }
 0x1f0   : > { %v1383_v55 = vpop.f32.mrb[132].mxu0  ;;  %v1016_v46 = vpop.f32.mrb[132].mxu1 }
 0x1f1   : > { %v4828_v22 = vpop.f32.mrb[133].mxu0  ;;  %v1123_v30 = vrot.slane %v1016_v46, 1  ;;  %v4714_v45 = vpop.f32.mrb[133].mxu1  ;;  %v1496_v39 = vrot.slane %v1383_v55, 2 }
 0x1f2   : > { %v1386_v7 = vpop.f32.mrb[134].mxu0  ;;  %v1019_v34 = vpop.f32.mrb[134].mxu1 }
 0x1f3   : > { %v1497_v13 = vrot.slane %v1386_v7, 2  ;;  %v4829_v28 = vpop.f32.mrb[135].mxu0  ;;  %v1142_v16 = vsel %vm1135_vm3, %v1122_v0, %v1123_v30  ;;  %v4715_v59 = vpop.f32.mrb[135].mxu1  ;;  %v1124_v10 = vrot.slane %v1019_v34, 1  ;;  %v6644_v30 = vld [vmem:[%s5782_s28 + $0x90] sm:$0xff]  }
 0x1f4   : > { %v1193_v17 = vadd.f32 %v1142_v16, %v6147_v25 }
 0x1f5   : > { %5055 = vmatmul.mubr.msk.bf16.gmra.mrb[240].mxu0 %vm494_vm2, %v6603_v9  ;;  %v1516_v3 = vsel %vm1508_vm4, %v1496_v39, %v1497_v13  ;;  %4941 = vmatmul.mubr.msk.bf16.gmra.mrb[240].mxu1 %vm494_vm2, %v6622_v32 }
 0x1f6   : > { %5058 = vmatprep.mubr.msk.bf16.mxu0 %vm5714_vm1, %v7962_v1  ;;  %v6628_v54 = vadd.f32 %v1516_v3, %v1192_v24  ;;  %4944 = vmatprep.mubr.msk.bf16.mxu1 %vm5714_vm1, %v7962_v1 }
 0x1f8   : > { %v1391_v20 = vpop.f32.mrb[136].mxu0  ;;  %v1024_v2 = vpop.f32.mrb[136].mxu1 }
 0x1f9   : > { %v1498_v49 = vrot.slane %v1391_v20, 2  ;;  %v4832_v18 = vpop.f32.mrb[137].mxu0  ;;  %v1125_v25 = vrot.slane %v1024_v2, 1  ;;  %v4718_v23 = vpop.f32.mrb[137].mxu1 }
 0x1fa   : > { %v1394_v42 = vpop.f32.mrb[138].mxu0  ;;  %v1027_v43 = vpop.f32.mrb[138].mxu1  ;;  %v6664_v23 = vld [vmem:[%s5782_s28 + $0x98] sm:$0xff]  }
 0x1fb   : > { %v4833_v0 = vpop.f32.mrb[139].mxu0  ;;  %v1515_v29 = vsel %vm1508_vm4, %v1497_v13, %v1498_v49  ;;  %v1141_v58 = vsel %vm1135_vm3, %v1124_v10, %v1125_v25  ;;  %v1126_v31 = vrot.slane %v1027_v43, 1  ;;  %v4719_v24 = vpop.f32.mrb[139].mxu1  ;;  %v1499_v39 = vrot.slane %v1394_v42, 2 }
 0x1fc   : > { %v6636_v55 = vadd.f32 %v1515_v29, %v1193_v17  ;;  %v1194_v46 = vadd.f32 %v1141_v58, %v6159_v38 }
 0x1fd   : > { %5059 = vmatmul.mubr.msk.bf16.gmra.mrb[244].mxu0 %vm494_vm2, %v6622_v32  ;;  %v1140_v22 = vsel %vm1135_vm3, %v1125_v25, %v1126_v31  ;;  %4945 = vmatmul.mubr.msk.bf16.gmra.mrb[244].mxu1 %vm494_vm2, %v6644_v30 }
 0x1fe   : > { %5062 = vmatprep.mubr.msk.bf16.mxu0 %vm5714_vm1, %v7962_v1  ;;  %4948 = vmatprep.mubr.msk.bf16.mxu1 %vm5714_vm1, %v7962_v1  ;;  %v1195_v7 = vadd.f32 %v1140_v22, %v6171_v44 }
 0x200   : > { %v1399_v45 = vpop.f32.mrb[140].mxu0  ;;  %v1032_v13 = vpop.f32.mrb[140].mxu1 }
 0x201   : > { %v1500_v38 = vrot.slane %v1399_v45, 2  ;;  %v4836_v28 = vpop.f32.mrb[141].mxu0  ;;  %v1127_v34 = vrot.slane %v1032_v13, 1  ;;  %v4722_v16 = vpop.f32.mrb[141].mxu1 }
 0x202   : > { %v1402_v59 = vpop.f32.mrb[142].mxu0  ;;  %v1035_v3 = vpop.f32.mrb[142].mxu1 }
 0x203   : > { %v1501_v17 = vrot.slane %v1402_v59, 2  ;;  %v4837_v20 = vpop.f32.mrb[143].mxu0  ;;  %v1514_v2 = vsel %vm1508_vm4, %v1499_v39, %v1500_v38  ;;  %v1128_v49 = vrot.slane %v1035_v3, 1  ;;  %v4723_v18 = vpop.f32.mrb[143].mxu1 }
 0x204   : > { %v6655_v10 = vadd.f32 %v1514_v2, %v1194_v46 }
 0x205   : > { %5063 = vmatmul.mubr.msk.bf16.gmra.mrb[248].mxu0 %vm494_vm2, %v6644_v30  ;;  %v1513_v44 = vsel %vm1508_vm4, %v1500_v38, %v1501_v17  ;;  %v1139_v25 = vsel %vm1135_vm3, %v1127_v34, %v1128_v49  ;;  %4949 = vmatmul.mubr.msk.bf16.gmra.mrb[248].mxu1 %vm494_vm2, %v6664_v23  ;;  %v6683_v34 = vld [vmem:[%s5782_s28 + $0xa0] sm:$0xff]  }
 0x206   : > { %5066 = vmatprep.mubr.msk.bf16.mxu0 %vm5714_vm1, %v7962_v1  ;;  %v6670_v42 = vadd.f32 %v1513_v44, %v1195_v7  ;;  %4952 = vmatprep.mubr.msk.bf16.mxu1 %vm5714_vm1, %v7962_v1  ;;  %v1196_v43 = vadd.f32 %v1139_v25, %v6183_v53 }
 0x208   : > { %v1407_v0 = vpop.f32.mrb[144].mxu0  ;;  %v1040_v29 = vpop.f32.mrb[144].mxu1 }
 0x209   : > { %v4840_v58 = vpop.f32.mrb[145].mxu0  ;;  %v1129_v31 = vrot.slane %v1040_v29, 1  ;;  %v4726_v46 = vpop.f32.mrb[145].mxu1  ;;  %v1502_v22 = vrot.slane %v1407_v0, 2 }
 0x20a   : > { %v1410_v24 = vpop.f32.mrb[146].mxu0  ;;  %v1043_v13 = vpop.f32.mrb[146].mxu1  ;;  %v6703_v46 = vld [vmem:[%s5782_s28 + $0xa8] sm:$0xff]  }
 0x20b   : > { %v1503_v45 = vrot.slane %v1410_v24, 2  ;;  %v4841_v39 = vpop.f32.mrb[147].mxu0  ;;  %v4727_v38 = vpop.f32.mrb[147].mxu1  ;;  %v1138_v7 = vsel %vm1135_vm3, %v1128_v49, %v1129_v31  ;;  %v1130_v2 = vrot.slane %v1043_v13, 1 }
 0x20c   : > { %v1197_v28 = vadd.f32 %v1138_v7, %v6187_v60 }
 0x20d   : > { %5067 = vmatmul.mubr.msk.bf16.gmra.mrb[252].mxu0 %vm494_vm2, %v6664_v23  ;;  %v1512_v53 = vsel %vm1508_vm4, %v1502_v22, %v1503_v45  ;;  %4953 = vmatmul.mubr.msk.bf16.gmra.mrb[252].mxu1 %vm494_vm2, %v6683_v34 }
 0x20e   : > { %5070 = vmatprep.mubr.msk.bf16.mxu0 %vm5714_vm1, %v7962_v1  ;;  %v6689_v16 = vadd.f32 %v1512_v53, %v1196_v43  ;;  %4956 = vmatprep.mubr.msk.bf16.mxu1 %vm5714_vm1, %v7962_v1 }
 0x210   : > { %v1415_v59 = vpop.f32.mrb[148].mxu0  ;;  %v1048_v3 = vpop.f32.mrb[148].mxu1 }
 0x211   : > { %v1504_v17 = vrot.slane %v1415_v59, 2  ;;  %v4844_v20 = vpop.f32.mrb[149].mxu0  ;;  %v1131_v60 = vrot.slane %v1048_v3, 1  ;;  %v4730_v49 = vpop.f32.mrb[149].mxu1 }
 0x212   : > { %v1418_v18 = vpop.f32.mrb[150].mxu0  ;;  %v1051_v44 = vpop.f32.mrb[150].mxu1  ;;  %v6723_v49 = vld [vmem:[%s5782_s28 + $0xb0] sm:$0xff]  }
 0x213   : > { %v4845_v25 = vpop.f32.mrb[151].mxu0  ;;  %v1511_v0 = vsel %vm1508_vm4, %v1503_v45, %v1504_v17  ;;  %v1132_v29 = vrot.slane %v1051_v44, 1  ;;  %v4731_v43 = vpop.f32.mrb[151].mxu1  ;;  %v1137_v31 = vsel %vm1135_vm3, %v1130_v2, %v1131_v60  ;;  %v1505_v13 = vrot.slane %v1418_v18, 2 }
 0x214   : > { %v6695_v58 = vadd.f32 %v1511_v0, %v1197_v28  ;;  %v1198_v24 = vadd.f32 %v1137_v31, %v6199_v27 }
 0x215   : > { %5071 = vmatmul.mubr.msk.bf16.gmra.mrb[0].mxu0 %vm494_vm2, %v6683_v34  ;;  %4957 = vmatmul.mubr.msk.bf16.gmra.mrb[0].mxu1 %vm494_vm2, %v6703_v46  ;;  %v1136_v22 = vsel %vm1135_vm3, %v1131_v60, %v1132_v29 }
 0x216   : > { %5074 = vmatprep.mubr.msk.bf16.mxu0 %vm5714_vm1, %v7962_v1  ;;  %4960 = vmatprep.mubr.msk.bf16.mxu1 %vm5714_vm1, %v7962_v1  ;;  %v1199_v45 = vadd.f32 %v1136_v22, %v6211_v33 }
 0x218   : > { %v1423_v39 = vpop.f32.mrb[152].mxu0  ;;  %v1056_v7 = vpop.f32.mrb[152].mxu1 }
 0x219   : > { %v1506_v27 = vrot.slane %v1423_v39, 2  ;;  %v4848_v38 = vpop.f32.mrb[153].mxu0  ;;  %v4734_v28 = vpop.f32.mrb[153].mxu1  ;;  %v6736_v39 = vld [vmem:[%s5782_s28 + $0xb8] sm:$0xff]  }
 0x21a   : > { %v1426_v53 = vpop.f32.mrb[154].mxu0  ;;  %v1058_v17 = vpop.f32.mrb[154].mxu1 }
 0x21b   : > { %v1507_v59 = vrot.slane %v1426_v53, 2  ;;  %v4849_v3 = vpop.f32.mrb[155].mxu0  ;;  %v1510_v20 = vsel %vm1508_vm4, %v1505_v13, %v1506_v27  ;;  %v4735_v2 = vpop.f32.mrb[155].mxu1 }
 0x21c   : > { %v6716_v60 = vadd.f32 %v1510_v20, %v1198_v24  ;;  %v6747_v3 = vld [vmem:[%s5782_s28 + $0xc0] sm:$0xff]  }
 0x21d   : > { %5075 = vmatmul.mubr.msk.bf16.gmra.mrb[4].mxu0 %vm494_vm2, %v6703_v46  ;;  %v1509_v33 = vsel %vm1508_vm4, %v1506_v27, %v1507_v59  ;;  %4961 = vmatmul.mubr.msk.bf16.gmra.mrb[4].mxu1 %vm494_vm2, %v6723_v49 }
 0x21e   : > { %5078 = vmatprep.mubr.msk.bf16.mxu0 %vm5714_vm1, %v7962_v1  ;;  %v6729_v18 = vadd.f32 %v1509_v33, %v1199_v45  ;;  %4964 = vmatprep.mubr.msk.bf16.mxu1 %vm5714_vm1, %v7962_v1 }
 0x220   : > { %v1431_v44 = vpop.f32.mrb[156].mxu0  ;;  %v1062_v0 = vpop.f32.mrb[156].mxu1 }
 0x221   : > { %v4852_v25 = vpop.f32.mrb[157].mxu0  ;;  %v4738_v43 = vpop.f32.mrb[157].mxu1 }
 0x222   : > { %v1433_v29 = vpop.f32.mrb[158].mxu0  ;;  %v1064_v24 = vpop.f32.mrb[158].mxu1  ;;  %v6758_v43 = vld [vmem:[%s5782_s28 + $0xc8] sm:$0xff]  }
 0x223   : > { %v4853_v31 = vpop.f32.mrb[159].mxu0  ;;  %v4739_v22 = vpop.f32.mrb[159].mxu1 }
 0x225   : > { %5079 = vmatmul.mubr.msk.bf16.gmra.mrb[8].mxu0 %vm494_vm2, %v6723_v49  ;;  %4965 = vmatmul.mubr.msk.bf16.gmra.mrb[8].mxu1 %vm494_vm2, %v6736_v39 }
 0x226   : > { %5082 = vmatprep.mubr.msk.bf16.mxu0 %vm5714_vm1, %v7962_v1  ;;  %4968 = vmatprep.mubr.msk.bf16.mxu1 %vm5714_vm1, %v7962_v1 }
 0x228   : > { %v1437_v45 = vpop.f32.mrb[160].mxu0  ;;  %v1068_v27 = vpop.f32.mrb[160].mxu1 }
 0x229   : > { %v4856_v13 = vpop.f32.mrb[161].mxu0  ;;  %v4742_v7 = vpop.f32.mrb[161].mxu1 }
 0x22a   : > { %v1439_v38 = vpop.f32.mrb[162].mxu0  ;;  %v1070_v28 = vpop.f32.mrb[162].mxu1 }
 0x22b   : > { %v4857_v53 = vpop.f32.mrb[163].mxu0  ;;  %v4743_v59 = vpop.f32.mrb[163].mxu1 }
 0x22c   : > { %v6769_v53 = vld [vmem:[%s5782_s28 + $0xd0] sm:$0xff]  }
 0x22d   : > { %5083 = vmatmul.mubr.msk.bf16.gmra.mrb[12].mxu0 %vm494_vm2, %v6736_v39  ;;  %4969 = vmatmul.mubr.msk.bf16.gmra.mrb[12].mxu1 %vm494_vm2, %v6747_v3 }
 0x22e   : > { %5086 = vmatprep.mubr.msk.bf16.mxu0 %vm5714_vm1, %v7962_v1  ;;  %4972 = vmatprep.mubr.msk.bf16.mxu1 %vm5714_vm1, %v7962_v1 }
 0x230   : > { %v1443_v17 = vpop.f32.mrb[164].mxu0  ;;  %v1074_v2 = vpop.f32.mrb[164].mxu1 }
 0x231   : > { %v4860_v20 = vpop.f32.mrb[165].mxu0  ;;  %v4746_v44 = vpop.f32.mrb[165].mxu1 }
 0x232   : > { %v1445_v33 = vpop.f32.mrb[166].mxu0  ;;  %v1076_v0 = vpop.f32.mrb[166].mxu1 }
 0x233   : > { %v4861_v25 = vpop.f32.mrb[167].mxu0  ;;  %v4747_v29 = vpop.f32.mrb[167].mxu1  ;;  %v6780_v0 = vld [vmem:[%s5782_s28 + $0xd8] sm:$0xff]  }
 0x235   : > { %5087 = vmatmul.mubr.msk.bf16.gmra.mrb[16].mxu0 %vm494_vm2, %v6747_v3  ;;  %4973 = vmatmul.mubr.msk.bf16.gmra.mrb[16].mxu1 %vm494_vm2, %v6758_v43 }
 0x236   : > { %5090 = vmatprep.mubr.msk.bf16.mxu0 %vm5714_vm1, %v7962_v1  ;;  %4976 = vmatprep.mubr.msk.bf16.mxu1 %vm5714_vm1, %v7962_v1 }
 0x238   : > { %v1449_v31 = vpop.f32.mrb[168].mxu0  ;;  %v1080_v22 = vpop.f32.mrb[168].mxu1 }
 0x239   : > { %v4864_v24 = vpop.f32.mrb[169].mxu0  ;;  %v4750_v13 = vpop.f32.mrb[169].mxu1 }
 0x23a   : > { %v1451_v45 = vpop.f32.mrb[170].mxu0  ;;  %v1082_v38 = vpop.f32.mrb[170].mxu1 }
 0x23b   : > { %v4865_v27 = vpop.f32.mrb[171].mxu0  ;;  %v4751_v7 = vpop.f32.mrb[171].mxu1 }
 0x23d   : > { %5091 = vmatmul.mubr.msk.bf16.gmra.mrb[20].mxu0 %vm494_vm2, %v6758_v43  ;;  %4977 = vmatmul.mubr.msk.bf16.gmra.mrb[20].mxu1 %vm494_vm2, %v6769_v53 }
 0x23e   : > { %5094 = vmatprep.mubr.msk.bf16.mxu0 %vm5714_vm1, %v7962_v1  ;;  %4980 = vmatprep.mubr.msk.bf16.mxu1 %vm5714_vm1, %v7962_v1 }
 0x240   : > { %v1455_v28 = vpop.f32.mrb[172].mxu0  ;;  %v1612_v17 = vpop.f32.mrb[172].mxu1 }
 0x241   : > { %v4868_v59 = vpop.f32.mrb[173].mxu0  ;;  %v4874_v2 = vpop.f32.mrb[173].mxu1  ;;  %v6792_v28 = vld [vmem:[%s5782_s28 + $0xe0] ss:$0 sps:$4 sm:$0xff]  }
 0x242   : > { %v1457_v20 = vpop.f32.mrb[174].mxu0  ;;  %v1614_v44 = vpop.f32.mrb[174].mxu1  ;;  %7985 = vst [vmem:[#allocation3_spill] sm:$0xff] %v6792_v28 }
 0x243   : > { %v4869_v33 = vpop.f32.mrb[175].mxu0  ;;  %v4875_v25 = vpop.f32.mrb[175].mxu1 }
 0x245   : > { %5095 = vmatmul.mubr.msk.bf16.gmra.mrb[24].mxu0 %vm494_vm2, %v6769_v53  ;;  %4981 = vmatmul.mubr.msk.bf16.gmra.mrb[24].mxu1 %vm494_vm2, %v6780_v0 }
 0x246   : > { %5098 = vmatprep.mubr.msk.bf16.mxu0 %vm5714_vm1, %v7962_v1  ;;  %4984 = vmatprep.mubr.msk.bf16.mxu1 %vm5714_vm1, %v7962_v1 }
 0x248   : > { %v1888_v29 = vpop.f32.mrb[176].mxu0  ;;  %v1618_v31 = vpop.f32.mrb[176].mxu1 }
 0x249   : > { %v4992_v24 = vpop.f32.mrb[177].mxu0  ;;  %v4878_v22 = vpop.f32.mrb[177].mxu1 }
 0x24a   : > { %v1890_v45 = vpop.f32.mrb[178].mxu0  ;;  %v1620_v13 = vpop.f32.mrb[178].mxu1  ;;  %v6808_v22 = vld [vmem:[%s5782_s28] sm:$0xff]  }
 0x24b   : > { %v4993_v27 = vpop.f32.mrb[179].mxu0  ;;  %v1817_v38 = vadd.f32 %v1620_v13, %v6303_v57  ;;  %v4879_v7 = vpop.f32.mrb[179].mxu1  ;;  %v4181_v57 = vld [vmem:[%s7958_s1 + $0x1c] sm:$0xf]  ;;  %v4211_v45 = vld [vmem:[%s7958_s1 + $0x20] sm:$0xf] }
 0x24c   : > { %v2872_v24 = vsel %vm582_vm0, %v4181_v57, 0 }
 0x24d   : > { %5099 = vmatmul.mubr.msk.bf16.gmra.mrb[28].mxu0 %vm494_vm2, %v6780_v0  ;;  %4985 = vmatmul.mubr.msk.bf16.gmra.mrb[28].mxu1 %vm494_vm2, %v6792_v28 }
 0x24e   : > { %5102 = vmatprep.mubr.msk.bf16.mxu0 %vm5714_vm1, %v7962_v1  ;;  %5108 = vmatprep.mubr.msk.bf16.mxu1 %vm5714_vm1, %v7962_v1 }
 0x250   : > { %v1894_v59 = vpop.f32.mrb[180].mxu0  ;;  %v1625_v17 = vpop.f32.mrb[180].mxu1 }
 0x251   : > { %v4996_v20 = vpop.f32.mrb[181].mxu0  ;;  %v1818_v2 = vadd.f32 %v1625_v17, %v6315_v48  ;;  %v4882_v44 = vpop.f32.mrb[181].mxu1 }
 0x252   : > { %v1896_v33 = vpop.f32.mrb[182].mxu0  ;;  %v1628_v29 = vpop.f32.mrb[182].mxu1 }
 0x253   : > { %v4997_v25 = vpop.f32.mrb[183].mxu0  ;;  %v4883_v31 = vpop.f32.mrb[183].mxu1  ;;  %v2109_v13 = vrot.slane %v1896_v33, 1 }
 0x254   : > { %v3244_v31 = vsel %vm582_vm0, %v4211_v45, 0 }
 0x255   : > { %5103 = vmatmul.mubr.msk.bf16.gmra.mrb[32].mxu0 %vm494_vm2, %v6792_v28  ;;  %5109 = vmatmul.mubr.msk.bf16.vlgmr.msra.gmra.mrb[32].mxu1 %vm494_vm2, %v6808_v22 }
 0x256   : > { %5226 = vmatprep.mubr.msk.bf16.mxu0 %vm5714_vm1, %v7962_v1  ;;  %5343 = vmatpush3.bf16.msra.mxu1 %v2872_v24 }
 0x257   : > { %5112 = vmatprep.mubr.msk.bf16.mxu1 %vm5714_vm1, %v7962_v1 }
 0x258   : > { %v1901_v48 = vpop.f32.mrb[184].mxu0  ;;  %v1632_v27 = vpop.f32.mrb[184].mxu1 }
 0x259   : > { %v2110_v7 = vrot.slane %v1901_v48, 1  ;;  %v5000_v59 = vpop.f32.mrb[185].mxu0  ;;  %v1819_v17 = vadd.f32 %v1632_v27, %v6336_v36  ;;  %v4886_v20 = vpop.f32.mrb[185].mxu1  ;;  %v6831_v48 = vld [vmem:[%s5782_s28 + $0x8] sm:$0xff]  }
 0x25a   : > { %v1904_v57 = vpop.f32.mrb[186].mxu0  ;;  %v1635_v44 = vpop.f32.mrb[186].mxu1  ;;  %7986 = vst [vmem:[#allocation4_spill] sm:$0xff] %v6831_v48 }
 0x25b   : > { %v2111_v25 = vrot.slane %v1904_v57, 1  ;;  %v5001_v29 = vpop.f32.mrb[187].mxu0  ;;  %v2188_v24 = vsel %vm1135_vm3, %v2109_v13, %v2110_v7  ;;  %v1820_v1 = vadd.f32 %v1635_v44, %v6346_v47  ;;  %v4887_v28 = vpop.f32.mrb[187].mxu1  ;;  %v7987_v13 = vmov 0.0  }
 0x25c   : > { %v6824_v33 = vadd.f32 %v2188_v24, %v1817_v38 }
 0x25d   : > { %5227 = vmatmul.mubr.msk.bf16.vlgmr.msra.gmra.mrb[36].mxu0 %vm494_vm2, %v6808_v22  ;;  %v2187_v36 = vsel %vm1135_vm3, %v2110_v7, %v2111_v25  ;;  %5113 = vmatmul.mubr.msk.bf16.gmra.mrb[36].mxu1 %vm494_vm2, %v6831_v48 }
 0x25e   : > { %5461 = vmatpush3.bf16.msra.mxu0 %v3244_v31  ;;  %v6835_v45 = vadd.f32 %v2187_v36, %v1818_v2  ;;  %5116 = vmatprep.mubr.msk.bf16.mxu1 %vm5714_vm1, %v7987_v13  ;;  %v6847_v31 = vld [vmem:[%s5782_s28 + $0x10] sm:$0xff]  }
 0x25f   : > { %5230 = vmatprep.mubr.msk.bf16.mxu0 %vm5714_vm1, %v7987_v13  ;;  %7988 = vst [vmem:[#allocation5_spill] sm:$0xff] %v6847_v31 }
 0x260   : > { %v1909_v47 = vpop.f32.mrb[188].mxu0  ;;  %v1640_v38 = vpop.f32.mrb[188].mxu1 }
 0x261   : > { %v5004_v28 = vpop.f32.mrb[189].mxu0  ;;  %v4890_v27 = vpop.f32.mrb[189].mxu1  ;;  %v2112_v59 = vrot.slane %v1909_v47, 1 }
 0x262   : > { %v1912_v7 = vpop.f32.mrb[190].mxu0  ;;  %v1642_v20 = vpop.f32.mrb[190].mxu1 }
 0x263   : > { %v2113_v57 = vrot.slane %v1912_v7, 1  ;;  %v5005_v44 = vpop.f32.mrb[191].mxu0  ;;  %v1821_v25 = vadd.f32 %v1642_v20, %v6365_v63  ;;  %v4891_v2 = vpop.f32.mrb[191].mxu1 }
 0x265   : > { %5231 = vmatmul.mubr.msk.bf16.gmra.mrb[40].mxu0 %vm494_vm2, %v6831_v48  ;;  %v2186_v29 = vsel %vm1135_vm3, %v2112_v59, %v2113_v57  ;;  %5117 = vmatmul.mubr.msk.bf16.gmra.mrb[40].mxu1 %vm494_vm2, %v6847_v31 }
 0x266   : > { %5234 = vmatprep.mubr.msk.bf16.mxu0 %vm5714_vm1, %v7987_v13  ;;  %v6853_v24 = vadd.f32 %v2186_v29, %v1819_v17  ;;  %5120 = vmatprep.mubr.msk.bf16.mxu1 %vm5714_vm1, %v7987_v13  ;;  %v6865_v17 = vld [vmem:[%s5782_s28 + $0x18] sm:$0xff]  }
 0x268   : > { %v1917_v63 = vpop.f32.mrb[192].mxu0  ;;  %v1647_v36 = vpop.f32.mrb[192].mxu1 }
 0x269   : > { %v2114_v47 = vrot.slane %v1917_v63, 1  ;;  %v5008_v38 = vpop.f32.mrb[193].mxu0  ;;  %v1822_v28 = vadd.f32 %v1647_v36, %v6373_v51  ;;  %v4894_v7 = vpop.f32.mrb[193].mxu1 }
 0x26a   : > { %v1920_v27 = vpop.f32.mrb[194].mxu0  ;;  %v1650_v20 = vpop.f32.mrb[194].mxu1 }
 0x26b   : > { %v5009_v59 = vpop.f32.mrb[195].mxu0  ;;  %v2185_v44 = vsel %vm1135_vm3, %v2113_v57, %v2114_v47  ;;  %v4895_v2 = vpop.f32.mrb[195].mxu1  ;;  %v2115_v29 = vrot.slane %v1920_v27, 1 }
 0x26c   : > { %v6860_v48 = vadd.f32 %v2185_v44, %v1820_v1 }
 0x26d   : > { %5235 = vmatmul.mubr.msk.bf16.gmra.mrb[44].mxu0 %vm494_vm2, %v6847_v31  ;;  %5121 = vmatmul.mubr.msk.bf16.gmra.mrb[44].mxu1 %vm494_vm2, %v6865_v17 }
 0x26e   : > { %7989 = vst [vmem:[#allocation6_spill] sm:$0xff] %v6860_v48  ;;  %5238 = vmatprep.mubr.msk.bf16.mxu0 %vm5714_vm1, %v7987_v13  ;;  %5124 = vmatprep.mubr.msk.bf16.mxu1 %vm5714_vm1, %v7987_v13 }
 0x270   : > { %v1925_v51 = vpop.f32.mrb[196].mxu0  ;;  %v1654_v57 = vpop.f32.mrb[196].mxu1 }
 0x271   : > { %v2116_v1 = vrot.slane %v1925_v51, 1  ;;  %v5012_v63 = vpop.f32.mrb[197].mxu0  ;;  %v1823_v36 = vadd.f32 %v1654_v57, %v6389_v8  ;;  %v4898_v47 = vpop.f32.mrb[197].mxu1  ;;  %v6884_v8 = vld [vmem:[%s5782_s28 + $0x20] sm:$0xff]  }
 0x272   : > { %v1928_v38 = vpop.f32.mrb[198].mxu0  ;;  %v1657_v7 = vpop.f32.mrb[198].mxu1  ;;  %7990 = vst [vmem:[#allocation7_spill] sm:$0xff] %v6884_v8 }
 0x273   : > { %v2117_v59 = vrot.slane %v1928_v38, 1  ;;  %v5013_v20 = vpop.f32.mrb[199].mxu0  ;;  %v2184_v44 = vsel %vm1135_vm3, %v2115_v29, %v2116_v1  ;;  %v1824_v2 = vadd.f32 %v1657_v7, %v6401_v4  ;;  %v4899_v31 = vpop.f32.mrb[199].mxu1 }
 0x274   : > { %v6877_v48 = vadd.f32 %v2184_v44, %v1821_v25  ;;  %v6900_v20 = vld [vmem:[%s5782_s28 + $0x28] sm:$0xff]  }
 0x275   : > { %5239 = vmatmul.mubr.msk.bf16.gmra.mrb[48].mxu0 %vm494_vm2, %v6865_v17  ;;  %v2183_v27 = vsel %vm1135_vm3, %v2116_v1, %v2117_v59  ;;  %5125 = vmatmul.mubr.msk.bf16.gmra.mrb[48].mxu1 %vm494_vm2, %v6884_v8  ;;  %7991 = vst [vmem:[#allocation8_spill] sm:$0xff] %v6900_v20 }
 0x276   : > { %5242 = vmatprep.mubr.msk.bf16.mxu0 %vm5714_vm1, %v7987_v13  ;;  %v6890_v51 = vadd.f32 %v2183_v27, %v1822_v28  ;;  %5128 = vmatprep.mubr.msk.bf16.mxu1 %vm5714_vm1, %v7987_v13 }
 0x278   : > { %v1933_v4 = vpop.f32.mrb[200].mxu0  ;;  %v1662_v25 = vpop.f32.mrb[200].mxu1 }
 0x279   : > { %v5016_v31 = vpop.f32.mrb[201].mxu0  ;;  %v4902_v29 = vpop.f32.mrb[201].mxu1  ;;  %v2118_v1 = vrot.slane %v1933_v4, 1 }
 0x27a   : > { %v1936_v57 = vpop.f32.mrb[202].mxu0  ;;  %v1664_v63 = vpop.f32.mrb[202].mxu1 }
 0x27b   : > { %v2119_v47 = vrot.slane %v1936_v57, 1  ;;  %v5017_v38 = vpop.f32.mrb[203].mxu0  ;;  %v1825_v7 = vadd.f32 %v1664_v63, %v6417_v35  ;;  %v4903_v59 = vpop.f32.mrb[203].mxu1 }
 0x27d   : > { %5243 = vmatmul.mubr.msk.bf16.gmra.mrb[52].mxu0 %vm494_vm2, %v6884_v8  ;;  %v2182_v28 = vsel %vm1135_vm3, %v2118_v1, %v2119_v47  ;;  %5129 = vmatmul.mubr.msk.bf16.gmra.mrb[52].mxu1 %vm494_vm2, %v6900_v20 }
 0x27e   : > { %5246 = vmatprep.mubr.msk.bf16.mxu0 %vm5714_vm1, %v7987_v13  ;;  %v6906_v44 = vadd.f32 %v2182_v28, %v1823_v36  ;;  %5132 = vmatprep.mubr.msk.bf16.mxu1 %vm5714_vm1, %v7987_v13  ;;  %v6918_v36 = vld [vmem:[%s5782_s28 + $0x30] sm:$0xff]  }
 0x280   : > { %v1941_v35 = vpop.f32.mrb[204].mxu0  ;;  %v1669_v27 = vpop.f32.mrb[204].mxu1 }
 0x281   : > { %v2120_v4 = vrot.slane %v1941_v35, 1  ;;  %v5020_v25 = vpop.f32.mrb[205].mxu0  ;;  %v1826_v31 = vadd.f32 %v1669_v27, %v6425_v40  ;;  %v4906_v57 = vpop.f32.mrb[205].mxu1 }
 0x282   : > { %v1944_v29 = vpop.f32.mrb[206].mxu0  ;;  %v1672_v63 = vpop.f32.mrb[206].mxu1 }
 0x283   : > { %v5021_v1 = vpop.f32.mrb[207].mxu0  ;;  %v2181_v38 = vsel %vm1135_vm3, %v2119_v47, %v2120_v4  ;;  %v4907_v59 = vpop.f32.mrb[207].mxu1  ;;  %v2121_v28 = vrot.slane %v1944_v29, 1 }
 0x284   : > { %v6913_v8 = vadd.f32 %v2181_v38, %v1824_v2 }
 0x285   : > { %5247 = vmatmul.mubr.msk.bf16.gmra.mrb[56].mxu0 %vm494_vm2, %v6900_v20  ;;  %5133 = vmatmul.mubr.msk.bf16.gmra.mrb[56].mxu1 %vm494_vm2, %v6918_v36 }
 0x286   : > { %7992 = vst [vmem:[#allocation9_spill] sm:$0xff] %v6913_v8  ;;  %5250 = vmatprep.mubr.msk.bf16.mxu0 %vm5714_vm1, %v7987_v13  ;;  %5136 = vmatprep.mubr.msk.bf16.mxu1 %vm5714_vm1, %v7987_v13 }
 0x288   : > { %v1949_v40 = vpop.f32.mrb[208].mxu0  ;;  %v1676_v47 = vpop.f32.mrb[208].mxu1 }
 0x289   : > { %v2122_v2 = vrot.slane %v1949_v40, 1  ;;  %v5024_v35 = vpop.f32.mrb[209].mxu0  ;;  %v1827_v27 = vadd.f32 %v1676_v47, %v6441_v15  ;;  %v4910_v4 = vpop.f32.mrb[209].mxu1  ;;  %v6937_v15 = vld [vmem:[%s5782_s28 + $0x38] sm:$0xff]  }
 0x28a   : > { %v1952_v25 = vpop.f32.mrb[210].mxu0  ;;  %v1679_v57 = vpop.f32.mrb[210].mxu1  ;;  %7993 = vst [vmem:[#allocation10_spill] sm:$0xff] %v6937_v15 }
 0x28b   : > { %v2123_v1 = vrot.slane %v1952_v25, 1  ;;  %v5025_v63 = vpop.f32.mrb[211].mxu0  ;;  %v2180_v38 = vsel %vm1135_vm3, %v2121_v28, %v2122_v2  ;;  %v1828_v59 = vadd.f32 %v1679_v57, %v6453_v56  ;;  %v4911_v20 = vpop.f32.mrb[211].mxu1 }
 0x28c   : > { %v6930_v8 = vadd.f32 %v2180_v38, %v1825_v7  ;;  %v6953_v63 = vld [vmem:[%s5782_s28 + $0x40] sm:$0xff]  }
 0x28d   : > { %5251 = vmatmul.mubr.msk.bf16.gmra.mrb[60].mxu0 %vm494_vm2, %v6918_v36  ;;  %v2179_v29 = vsel %vm1135_vm3, %v2122_v2, %v2123_v1  ;;  %5137 = vmatmul.mubr.msk.bf16.gmra.mrb[60].mxu1 %vm494_vm2, %v6937_v15  ;;  %7994 = vst [vmem:[#allocation11_spill] sm:$0xff] %v6953_v63 }
 0x28e   : > { %5254 = vmatprep.mubr.msk.bf16.mxu0 %vm5714_vm1, %v7987_v13  ;;  %v6943_v40 = vadd.f32 %v2179_v29, %v1826_v31  ;;  %5140 = vmatprep.mubr.msk.bf16.mxu1 %vm5714_vm1, %v7987_v13 }
 0x290   : > { %v1957_v56 = vpop.f32.mrb[212].mxu0  ;;  %v1684_v7 = vpop.f32.mrb[212].mxu1 }
 0x291   : > { %v5028_v20 = vpop.f32.mrb[213].mxu0  ;;  %v4914_v28 = vpop.f32.mrb[213].mxu1  ;;  %v2124_v2 = vrot.slane %v1957_v56, 1 }
 0x292   : > { %v1960_v47 = vpop.f32.mrb[214].mxu0  ;;  %v1686_v35 = vpop.f32.mrb[214].mxu1 }
 0x293   : > { %v2125_v4 = vrot.slane %v1960_v47, 1  ;;  %v5029_v25 = vpop.f32.mrb[215].mxu0  ;;  %v1829_v57 = vadd.f32 %v1686_v35, %v6469_v37  ;;  %v4915_v1 = vpop.f32.mrb[215].mxu1 }
 0x295   : > { %5255 = vmatmul.mubr.msk.bf16.gmra.mrb[64].mxu0 %vm494_vm2, %v6937_v15  ;;  %v2178_v31 = vsel %vm1135_vm3, %v2124_v2, %v2125_v4  ;;  %5141 = vmatmul.mubr.msk.bf16.gmra.mrb[64].mxu1 %vm494_vm2, %v6953_v63 }
 0x296   : > { %5258 = vmatprep.mubr.msk.bf16.mxu0 %vm5714_vm1, %v7987_v13  ;;  %v6959_v38 = vadd.f32 %v2178_v31, %v1827_v27  ;;  %5144 = vmatprep.mubr.msk.bf16.mxu1 %vm5714_vm1, %v7987_v13  ;;  %v6971_v27 = vld [vmem:[%s5782_s28 + $0x48] sm:$0xff]  }
 0x298   : > { %v1965_v37 = vpop.f32.mrb[216].mxu0  ;;  %v1691_v29 = vpop.f32.mrb[216].mxu1 }
 0x299   : > { %v2126_v56 = vrot.slane %v1965_v37, 1  ;;  %v5032_v7 = vpop.f32.mrb[217].mxu0  ;;  %v1830_v20 = vadd.f32 %v1691_v29, %v6477_v14  ;;  %v4918_v47 = vpop.f32.mrb[217].mxu1 }
 0x29a   : > { %v1968_v28 = vpop.f32.mrb[218].mxu0  ;;  %v1694_v35 = vpop.f32.mrb[218].mxu1 }
 0x29b   : > { %v5033_v2 = vpop.f32.mrb[219].mxu0  ;;  %v2177_v25 = vsel %vm1135_vm3, %v2125_v4, %v2126_v56  ;;  %v4919_v1 = vpop.f32.mrb[219].mxu1  ;;  %v2127_v31 = vrot.slane %v1968_v28, 1 }
 0x29c   : > { %v6966_v15 = vadd.f32 %v2177_v25, %v1828_v59 }
 0x29d   : > { %5259 = vmatmul.mubr.msk.bf16.gmra.mrb[68].mxu0 %vm494_vm2, %v6953_v63  ;;  %5145 = vmatmul.mubr.msk.bf16.gmra.mrb[68].mxu1 %vm494_vm2, %v6971_v27 }
 0x29e   : > { %7995 = vst [vmem:[#allocation12_spill] sm:$0xff] %v6966_v15  ;;  %5262 = vmatprep.mubr.msk.bf16.mxu0 %vm5714_vm1, %v7987_v13  ;;  %5148 = vmatprep.mubr.msk.bf16.mxu1 %vm5714_vm1, %v7987_v13 }
 0x2a0   : > { %v1973_v14 = vpop.f32.mrb[220].mxu0  ;;  %v1698_v4 = vpop.f32.mrb[220].mxu1 }
 0x2a1   : > { %v2128_v59 = vrot.slane %v1973_v14, 1  ;;  %v5036_v37 = vpop.f32.mrb[221].mxu0  ;;  %v1831_v29 = vadd.f32 %v1698_v4, %v6493_v21  ;;  %v4922_v56 = vpop.f32.mrb[221].mxu1  ;;  %v6990_v21 = vld [vmem:[%s5782_s28 + $0x50] sm:$0xff]  }
 0x2a2   : > { %v1976_v7 = vpop.f32.mrb[222].mxu0  ;;  %v1701_v47 = vpop.f32.mrb[222].mxu1  ;;  %7996 = vst [vmem:[#allocation13_spill] sm:$0xff] %v6990_v21 }
 0x2a3   : > { %v2129_v2 = vrot.slane %v1976_v7, 1  ;;  %v5037_v35 = vpop.f32.mrb[223].mxu0  ;;  %v2176_v25 = vsel %vm1135_vm3, %v2127_v31, %v2128_v59  ;;  %v1832_v1 = vadd.f32 %v1701_v47, %v6504_v11  ;;  %v4923_v63 = vpop.f32.mrb[223].mxu1 }
 0x2a4   : > { %v6983_v15 = vadd.f32 %v2176_v25, %v1829_v57  ;;  %v7006_v35 = vld [vmem:[%s5782_s28 + $0x58] sm:$0xff]  }
 0x2a5   : > { %5263 = vmatmul.mubr.msk.bf16.gmra.mrb[72].mxu0 %vm494_vm2, %v6971_v27  ;;  %v2175_v28 = vsel %vm1135_vm3, %v2128_v59, %v2129_v2  ;;  %5149 = vmatmul.mubr.msk.bf16.gmra.mrb[72].mxu1 %vm494_vm2, %v6990_v21  ;;  %7997 = vst [vmem:[#allocation14_spill] sm:$0xff] %v7006_v35 }
 0x2a6   : > { %5266 = vmatprep.mubr.msk.bf16.mxu0 %vm5714_vm1, %v7987_v13  ;;  %v6996_v14 = vadd.f32 %v2175_v28, %v1830_v20  ;;  %5152 = vmatprep.mubr.msk.bf16.mxu1 %vm5714_vm1, %v7987_v13 }
 0x2a8   : > { %v1981_v11 = vpop.f32.mrb[224].mxu0  ;;  %v1706_v57 = vpop.f32.mrb[224].mxu1 }
 0x2a9   : > { %v5040_v63 = vpop.f32.mrb[225].mxu0  ;;  %v4926_v31 = vpop.f32.mrb[225].mxu1  ;;  %v2130_v59 = vrot.slane %v1981_v11, 1 }
 0x2aa   : > { %v1984_v4 = vpop.f32.mrb[226].mxu0  ;;  %v1708_v37 = vpop.f32.mrb[226].mxu1 }
 0x2ab   : > { %v2131_v56 = vrot.slane %v1984_v4, 1  ;;  %v5041_v7 = vpop.f32.mrb[227].mxu0  ;;  %v1833_v47 = vadd.f32 %v1708_v37, %v6519_v41  ;;  %v4927_v2 = vpop.f32.mrb[227].mxu1 }
 0x2ad   : > { %5267 = vmatmul.mubr.msk.bf16.gmra.mrb[76].mxu0 %vm494_vm2, %v6990_v21  ;;  %v2174_v20 = vsel %vm1135_vm3, %v2130_v59, %v2131_v56  ;;  %5153 = vmatmul.mubr.msk.bf16.gmra.mrb[76].mxu1 %vm494_vm2, %v7006_v35 }
 0x2ae   : > { %5270 = vmatprep.mubr.msk.bf16.mxu0 %vm5714_vm1, %v7987_v13  ;;  %v7012_v25 = vadd.f32 %v2174_v20, %v1831_v29  ;;  %5156 = vmatprep.mubr.msk.bf16.mxu1 %vm5714_vm1, %v7987_v13  ;;  %v7024_v29 = vld [vmem:[%s5782_s28 + $0x60] sm:$0xff]  }
 0x2b0   : > { %v1989_v41 = vpop.f32.mrb[228].mxu0  ;;  %v1713_v28 = vpop.f32.mrb[228].mxu1 }
 0x2b1   : > { %v2132_v11 = vrot.slane %v1989_v41, 1  ;;  %v5044_v57 = vpop.f32.mrb[229].mxu0  ;;  %v1834_v63 = vadd.f32 %v1713_v28, %v6527_v12  ;;  %v4930_v4 = vpop.f32.mrb[229].mxu1 }
 0x2b2   : > { %v1992_v31 = vpop.f32.mrb[230].mxu0  ;;  %v1716_v37 = vpop.f32.mrb[230].mxu1 }
 0x2b3   : > { %v5045_v59 = vpop.f32.mrb[231].mxu0  ;;  %v2173_v7 = vsel %vm1135_vm3, %v2131_v56, %v2132_v11  ;;  %v4931_v2 = vpop.f32.mrb[231].mxu1  ;;  %v2133_v20 = vrot.slane %v1992_v31, 1 }
 0x2b4   : > { %v7019_v21 = vadd.f32 %v2173_v7, %v1832_v1 }
 0x2b5   : > { %5271 = vmatmul.mubr.msk.bf16.gmra.mrb[80].mxu0 %vm494_vm2, %v7006_v35  ;;  %5157 = vmatmul.mubr.msk.bf16.gmra.mrb[80].mxu1 %vm494_vm2, %v7024_v29 }
 0x2b6   : > { %7998 = vst [vmem:[#allocation15_spill] sm:$0xff] %v7019_v21  ;;  %5274 = vmatprep.mubr.msk.bf16.mxu0 %vm5714_vm1, %v7987_v13  ;;  %5160 = vmatprep.mubr.msk.bf16.mxu1 %vm5714_vm1, %v7987_v13 }
 0x2b8   : > { %v1997_v12 = vpop.f32.mrb[232].mxu0  ;;  %v1720_v56 = vpop.f32.mrb[232].mxu1 }
 0x2b9   : > { %v2134_v1 = vrot.slane %v1997_v12, 1  ;;  %v5048_v41 = vpop.f32.mrb[233].mxu0  ;;  %v1835_v28 = vadd.f32 %v1720_v56, %v6542_v62  ;;  %v4934_v11 = vpop.f32.mrb[233].mxu1  ;;  %v7043_v62 = vld [vmem:[%s5782_s28 + $0x68] sm:$0xff]  }
 0x2ba   : > { %v2000_v57 = vpop.f32.mrb[234].mxu0  ;;  %v1723_v4 = vpop.f32.mrb[234].mxu1  ;;  %7999 = vst [vmem:[#allocation16_spill] sm:$0xff] %v7043_v62 }
 0x2bb   : > { %v2135_v59 = vrot.slane %v2000_v57, 1  ;;  %v5049_v37 = vpop.f32.mrb[235].mxu0  ;;  %v2172_v7 = vsel %vm1135_vm3, %v2133_v20, %v2134_v1  ;;  %v1836_v2 = vadd.f32 %v1723_v4, %v6553_v50  ;;  %v4935_v35 = vpop.f32.mrb[235].mxu1 }
 0x2bc   : > { %v7036_v21 = vadd.f32 %v2172_v7, %v1833_v47  ;;  %v7059_v37 = vld [vmem:[%s5782_s28 + $0x70] sm:$0xff]  }
 0x2bd   : > { %5275 = vmatmul.mubr.msk.bf16.gmra.mrb[84].mxu0 %vm494_vm2, %v7024_v29  ;;  %v2171_v31 = vsel %vm1135_vm3, %v2134_v1, %v2135_v59  ;;  %5161 = vmatmul.mubr.msk.bf16.gmra.mrb[84].mxu1 %vm494_vm2, %v7043_v62  ;;  %8000 = vst [vmem:[#allocation17_spill] sm:$0xff] %v7059_v37 }
 0x2be   : > { %5278 = vmatprep.mubr.msk.bf16.mxu0 %vm5714_vm1, %v7987_v13  ;;  %v7049_v12 = vadd.f32 %v2171_v31, %v1834_v63  ;;  %5164 = vmatprep.mubr.msk.bf16.mxu1 %vm5714_vm1, %v7987_v13 }
 0x2c0   : > { %v2005_v50 = vpop.f32.mrb[236].mxu0  ;;  %v1728_v47 = vpop.f32.mrb[236].mxu1 }
 0x2c1   : > { %v5052_v35 = vpop.f32.mrb[237].mxu0  ;;  %v4938_v20 = vpop.f32.mrb[237].mxu1  ;;  %v2136_v1 = vrot.slane %v2005_v50, 1 }
 0x2c2   : > { %v2008_v56 = vpop.f32.mrb[238].mxu0  ;;  %v1730_v41 = vpop.f32.mrb[238].mxu1 }
 0x2c3   : > { %v2137_v11 = vrot.slane %v2008_v56, 1  ;;  %v5053_v57 = vpop.f32.mrb[239].mxu0  ;;  %v1837_v4 = vadd.f32 %v1730_v41, %v6568_v61  ;;  %v4939_v59 = vpop.f32.mrb[239].mxu1 }
 0x2c5   : > { %5279 = vmatmul.mubr.msk.bf16.gmra.mrb[88].mxu0 %vm494_vm2, %v7043_v62  ;;  %v2170_v63 = vsel %vm1135_vm3, %v2136_v1, %v2137_v11  ;;  %5165 = vmatmul.mubr.msk.bf16.gmra.mrb[88].mxu1 %vm494_vm2, %v7059_v37 }
 0x2c6   : > { %5282 = vmatprep.mubr.msk.bf16.mxu0 %vm5714_vm1, %v7987_v13  ;;  %v7065_v7 = vadd.f32 %v2170_v63, %v1835_v28  ;;  %5168 = vmatprep.mubr.msk.bf16.mxu1 %vm5714_vm1, %v7987_v13 }
 0x2c8   : > { %v2013_v61 = vpop.f32.mrb[240].mxu0  ;;  %v1735_v31 = vpop.f32.mrb[240].mxu1 }
 0x2c9   : > { %v2138_v50 = vrot.slane %v2013_v61, 1  ;;  %v5056_v47 = vpop.f32.mrb[241].mxu0  ;;  %v1838_v35 = vadd.f32 %v1735_v31, %v6576_v5  ;;  %v4942_v56 = vpop.f32.mrb[241].mxu1 }
 0x2ca   : > { %v2016_v20 = vpop.f32.mrb[242].mxu0  ;;  %v1738_v41 = vpop.f32.mrb[242].mxu1 }
 0x2cb   : > { %v5057_v1 = vpop.f32.mrb[243].mxu0  ;;  %v2169_v57 = vsel %vm1135_vm3, %v2137_v11, %v2138_v50  ;;  %v4943_v59 = vpop.f32.mrb[243].mxu1  ;;  %v2139_v28 = vrot.slane %v2016_v20, 1 }
 0x2cc   : > { %v7072_v62 = vadd.f32 %v2169_v57, %v1836_v2 }
 0x2cd   : > { %5283 = vmatmul.mubr.msk.bf16.gmra.mrb[92].mxu0 %vm494_vm2, %v7059_v37  ;;  %5169 = vmatmul.mubr.msk.bf16.gmra.mrb[92].mxu1 %vm494_vm2, %v6583_v52  ;;  %v7089_v37 = vld [vmem:[%s5782_s28 + $0x78] sm:$0xff]  }
 0x2ce   : > { %5286 = vmatprep.mubr.msk.bf16.mxu0 %vm5714_vm1, %v7987_v13  ;;  %5172 = vmatprep.mubr.msk.bf16.mxu1 %vm5714_vm1, %v7987_v13 }
 0x2d0   : > { %v2021_v5 = vpop.f32.mrb[244].mxu0  ;;  %v1742_v63 = vpop.f32.mrb[244].mxu1 }
 0x2d1   : > { %v2140_v11 = vrot.slane %v2021_v5, 1  ;;  %v5060_v61 = vpop.f32.mrb[245].mxu0  ;;  %v1839_v2 = vadd.f32 %v1742_v63, %v6594_v6  ;;  %v4946_v31 = vpop.f32.mrb[245].mxu1 }
 0x2d2   : > { %v2024_v50 = vpop.f32.mrb[246].mxu0  ;;  %v1745_v47 = vpop.f32.mrb[246].mxu1 }
 0x2d3   : > { %v2141_v56 = vrot.slane %v2024_v50, 1  ;;  %v5061_v1 = vpop.f32.mrb[247].mxu0  ;;  %v2168_v52 = vsel %vm1135_vm3, %v2139_v28, %v2140_v11  ;;  %v1840_v41 = vadd.f32 %v1745_v47, %v6609_v19  ;;  %v4947_v57 = vpop.f32.mrb[247].mxu1 }
 0x2d4   : > { %v7086_v59 = vadd.f32 %v2168_v52, %v1837_v4 }
 0x2d5   : > { %5287 = vmatmul.mubr.msk.bf16.gmra.mrb[96].mxu0 %vm494_vm2, %v7089_v37  ;;  %v2167_v6 = vsel %vm1135_vm3, %v2140_v11, %v2141_v56  ;;  %5173 = vmatmul.mubr.msk.bf16.gmra.mrb[96].mxu1 %vm494_vm2, %v6603_v9  ;;  %v7105_v56 = vld [vmem:[%s5782_s28 + $0x80] sm:$0xff]  }
 0x2d6   : > { %5290 = vmatprep.mubr.msk.bf16.mxu0 %vm5714_vm1, %v7987_v13  ;;  %v7099_v20 = vadd.f32 %v2167_v6, %v1838_v35  ;;  %5176 = vmatprep.mubr.msk.bf16.mxu1 %vm5714_vm1, %v7987_v13 }
 0x2d8   : > { %v2029_v19 = vpop.f32.mrb[248].mxu0  ;;  %v1750_v4 = vpop.f32.mrb[248].mxu1 }
 0x2d9   : > { %v5064_v5 = vpop.f32.mrb[249].mxu0  ;;  %v4950_v28 = vpop.f32.mrb[249].mxu1  ;;  %v2142_v61 = vrot.slane %v2029_v19, 1 }
 0x2da   : > { %v2032_v63 = vpop.f32.mrb[250].mxu0  ;;  %v1752_v31 = vpop.f32.mrb[250].mxu1 }
 0x2db   : > { %v2143_v11 = vrot.slane %v2032_v63, 1  ;;  %v5065_v50 = vpop.f32.mrb[251].mxu0  ;;  %v1841_v47 = vadd.f32 %v1752_v31, %v6628_v54  ;;  %v4951_v9 = vpop.f32.mrb[251].mxu1 }
 0x2dd   : > { %5291 = vmatmul.mubr.msk.bf16.gmra.mrb[100].mxu0 %vm494_vm2, %v7105_v56  ;;  %v2166_v35 = vsel %vm1135_vm3, %v2142_v61, %v2143_v11  ;;  %5177 = vmatmul.mubr.msk.bf16.gmra.mrb[100].mxu1 %vm494_vm2, %v6622_v32 }
 0x2de   : > { %5294 = vmatprep.mubr.msk.bf16.mxu0 %vm5714_vm1, %v7987_v13  ;;  %v7115_v1 = vadd.f32 %v2166_v35, %v1839_v2  ;;  %5180 = vmatprep.mubr.msk.bf16.mxu1 %vm5714_vm1, %v7987_v13  ;;  %v7125_v2 = vld [vmem:[%s5782_s28 + $0x88] sm:$0xff]  }
 0x2e0   : > { %v2037_v54 = vpop.f32.mrb[252].mxu0  ;;  %v1757_v52 = vpop.f32.mrb[252].mxu1 }
 0x2e1   : > { %v2144_v57 = vrot.slane %v2037_v54, 1  ;;  %v5068_v6 = vpop.f32.mrb[253].mxu0  ;;  %v1842_v19 = vadd.f32 %v1757_v52, %v6636_v55  ;;  %v4954_v5 = vpop.f32.mrb[253].mxu1 }
 0x2e2   : > { %v2040_v4 = vpop.f32.mrb[254].mxu0  ;;  %v1760_v63 = vpop.f32.mrb[254].mxu1 }
 0x2e3   : > { %v5069_v28 = vpop.f32.mrb[255].mxu0  ;;  %v2165_v32 = vsel %vm1135_vm3, %v2143_v11, %v2144_v57  ;;  %v4955_v61 = vpop.f32.mrb[255].mxu1  ;;  %v2145_v11 = vrot.slane %v2040_v4, 1 }
 0x2e4   : > { %v7122_v31 = vadd.f32 %v2165_v32, %v1840_v41  ;;  %v7142_v61 = vld [vmem:[%s5782_s28 + $0x90] sm:$0xff]  }
 0x2e5   : > { %5295 = vmatmul.mubr.msk.bf16.gmra.mrb[104].mxu0 %vm494_vm2, %v7125_v2  ;;  %5181 = vmatmul.mubr.msk.bf16.gmra.mrb[104].mxu1 %vm494_vm2, %v6644_v30 }
 0x2e6   : > { %5298 = vmatprep.mubr.msk.bf16.mxu0 %vm5714_vm1, %v7987_v13  ;;  %5184 = vmatprep.mubr.msk.bf16.mxu1 %vm5714_vm1, %v7987_v13 }
 0x2e8   : > { %v2045_v55 = vpop.f32.mrb[0].mxu0  ;;  %v1764_v50 = vpop.f32.mrb[0].mxu1 }
 0x2e9   : > { %v2146_v41 = vrot.slane %v2045_v55, 1  ;;  %v5072_v9 = vpop.f32.mrb[1].mxu0  ;;  %v1843_v35 = vadd.f32 %v1764_v50, %v6655_v10  ;;  %v4958_v54 = vpop.f32.mrb[1].mxu1 }
 0x2ea   : > { %v2048_v52 = vpop.f32.mrb[2].mxu0  ;;  %v1767_v57 = vpop.f32.mrb[2].mxu1 }
 0x2eb   : > { %v2147_v6 = vrot.slane %v2048_v52, 1  ;;  %v5073_v5 = vpop.f32.mrb[3].mxu0  ;;  %v2164_v30 = vsel %vm1135_vm3, %v2145_v11, %v2146_v41  ;;  %v1844_v28 = vadd.f32 %v1767_v57, %v6670_v42  ;;  %v4959_v63 = vpop.f32.mrb[3].mxu1 }
 0x2ec   : > { %v7139_v32 = vadd.f32 %v2164_v30, %v1841_v47 }
 0x2ed   : > { %5299 = vmatmul.mubr.msk.bf16.gmra.mrb[108].mxu0 %vm494_vm2, %v7142_v61  ;;  %v2163_v10 = vsel %vm1135_vm3, %v2146_v41, %v2147_v6  ;;  %5185 = vmatmul.mubr.msk.bf16.gmra.mrb[108].mxu1 %vm494_vm2, %v6664_v23  ;;  %v7158_v6 = vld [vmem:[%s5782_s28 + $0x98] sm:$0xff]  }
 0x2ee   : > { %5302 = vmatprep.mubr.msk.bf16.mxu0 %vm5714_vm1, %v7987_v13  ;;  %v7152_v4 = vadd.f32 %v2163_v10, %v1842_v19  ;;  %5188 = vmatprep.mubr.msk.bf16.mxu1 %vm5714_vm1, %v7987_v13 }
 0x2f0   : > { %v2053_v42 = vpop.f32.mrb[4].mxu0  ;;  %v1772_v47 = vpop.f32.mrb[4].mxu1 }
 0x2f1   : > { %v5076_v55 = vpop.f32.mrb[5].mxu0  ;;  %v4962_v11 = vpop.f32.mrb[5].mxu1  ;;  %v2148_v9 = vrot.slane %v2053_v42, 1 }
 0x2f2   : > { %v2056_v50 = vpop.f32.mrb[6].mxu0  ;;  %v1774_v54 = vpop.f32.mrb[6].mxu1 }
 0x2f3   : > { %v2149_v41 = vrot.slane %v2056_v50, 1  ;;  %v5077_v52 = vpop.f32.mrb[7].mxu0  ;;  %v1845_v57 = vadd.f32 %v1774_v54, %v6689_v16  ;;  %v4963_v23 = vpop.f32.mrb[7].mxu1 }
 0x2f5   : > { %5303 = vmatmul.mubr.msk.bf16.gmra.mrb[112].mxu0 %vm494_vm2, %v7158_v6  ;;  %v2162_v19 = vsel %vm1135_vm3, %v2148_v9, %v2149_v41  ;;  %5189 = vmatmul.mubr.msk.bf16.gmra.mrb[112].mxu1 %vm494_vm2, %v6683_v34 }
 0x2f6   : > { %5306 = vmatprep.mubr.msk.bf16.mxu0 %vm5714_vm1, %v7987_v13  ;;  %v7168_v5 = vadd.f32 %v2162_v19, %v1843_v35  ;;  %5192 = vmatprep.mubr.msk.bf16.mxu1 %vm5714_vm1, %v7987_v13 }
 0x2f8   : > { %v2061_v16 = vpop.f32.mrb[8].mxu0  ;;  %v1779_v30 = vpop.f32.mrb[8].mxu1 }
 0x2f9   : > { %v2150_v63 = vrot.slane %v2061_v16, 1  ;;  %v5080_v10 = vpop.f32.mrb[9].mxu0  ;;  %v1846_v42 = vadd.f32 %v1779_v30, %v6695_v58  ;;  %v4966_v55 = vpop.f32.mrb[9].mxu1 }
 0x2fa   : > { %v2064_v47 = vpop.f32.mrb[10].mxu0  ;;  %v1782_v50 = vpop.f32.mrb[10].mxu1 }
 0x2fb   : > { %v5081_v11 = vpop.f32.mrb[11].mxu0  ;;  %v2161_v9 = vsel %vm1135_vm3, %v2149_v41, %v2150_v63  ;;  %v4967_v54 = vpop.f32.mrb[11].mxu1  ;;  %v2151_v35 = vrot.slane %v2064_v47, 1 }
 0x2fc   : > { %v7175_v52 = vadd.f32 %v2161_v9, %v1844_v28 }
 0x2fd   : > { %5307 = vmatmul.mubr.msk.bf16.gmra.mrb[116].mxu0 %vm494_vm2, %v6683_v34  ;;  %5193 = vmatmul.mubr.msk.bf16.gmra.mrb[116].mxu1 %vm494_vm2, %v6703_v46 }
 0x2fe   : > { %5310 = vmatprep.mubr.msk.bf16.mxu0 %vm5714_vm1, %v7987_v13  ;;  %5196 = vmatprep.mubr.msk.bf16.mxu1 %vm5714_vm1, %v7987_v13 }
 0x300   : > { %v2069_v58 = vpop.f32.mrb[12].mxu0  ;;  %v1786_v23 = vpop.f32.mrb[12].mxu1 }
 0x301   : > { %v2152_v19 = vrot.slane %v2069_v58, 1  ;;  %v5084_v41 = vpop.f32.mrb[13].mxu0  ;;  %v1847_v28 = vadd.f32 %v1786_v23, %v6716_v60  ;;  %v4970_v16 = vpop.f32.mrb[13].mxu1 }
 0x302   : > { %v2072_v30 = vpop.f32.mrb[14].mxu0  ;;  %v1789_v63 = vpop.f32.mrb[14].mxu1 }
 0x303   : > { %v2160_v34 = vsel %vm1135_vm3, %v2151_v35, %v2152_v19  ;;  %v2153_v10 = vrot.slane %v2072_v30, 1  ;;  %v5085_v55 = vpop.f32.mrb[15].mxu0  ;;  %v1848_v11 = vadd.f32 %v1789_v63, %v6729_v18  ;;  %v4971_v50 = vpop.f32.mrb[15].mxu1 }
 0x304   : > { %v7189_v9 = vadd.f32 %v2160_v34, %v1845_v57 }
 0x305   : > { %v2159_v47 = vsel %vm1135_vm3, %v2152_v19, %v2153_v10  ;;  %5311 = vmatmul.mubr.msk.bf16.gmra.mrb[120].mxu0 %vm494_vm2, %v6703_v46  ;;  %5197 = vmatmul.mubr.msk.bf16.gmra.mrb[120].mxu1 %vm494_vm2, %v6723_v49 }
 0x306   : > { %5314 = vmatprep.mubr.msk.bf16.mxu0 %vm5714_vm1, %v7987_v13  ;;  %v7199_v60 = vadd.f32 %v2159_v47, %v1846_v42  ;;  %5200 = vmatprep.mubr.msk.bf16.mxu1 %vm5714_vm1, %v7987_v13 }
 0x308   : > { %v2077_v18 = vpop.f32.mrb[16].mxu0  ;;  %v1794_v54 = vpop.f32.mrb[16].mxu1 }
 0x309   : > { %v5088_v57 = vpop.f32.mrb[17].mxu0  ;;  %v4974_v35 = vpop.f32.mrb[17].mxu1  ;;  %v2154_v23 = vrot.slane %v2077_v18, 1 }
 0x30a   : > { %v2080_v58 = vpop.f32.mrb[18].mxu0  ;;  %v1796_v46 = vpop.f32.mrb[18].mxu1 }
 0x30b   : > { %v2155_v19 = vrot.slane %v2080_v58, 1  ;;  %v5089_v41 = vpop.f32.mrb[19].mxu0  ;;  %v4975_v16 = vpop.f32.mrb[19].mxu1 }
 0x30d   : > { %v2158_v30 = vsel %vm1135_vm3, %v2154_v23, %v2155_v19  ;;  %5315 = vmatmul.mubr.msk.bf16.gmra.mrb[124].mxu0 %vm494_vm2, %v6723_v49  ;;  %5201 = vmatmul.mubr.msk.bf16.gmra.mrb[124].mxu1 %vm494_vm2, %v6736_v39 }
 0x30e   : > { %5318 = vmatprep.mubr.msk.bf16.mxu0 %vm5714_vm1, %v7987_v13  ;;  %v7211_v42 = vadd.f32 %v2158_v30, %v1847_v28  ;;  %5204 = vmatprep.mubr.msk.bf16.mxu1 %vm5714_vm1, %v7987_v13 }
 0x310   : > { %v2085_v34 = vpop.f32.mrb[20].mxu0  ;;  %v1800_v55 = vpop.f32.mrb[20].mxu1 }
 0x311   : > { %v2156_v63 = vrot.slane %v2085_v34, 1  ;;  %v5092_v10 = vpop.f32.mrb[21].mxu0  ;;  %v4978_v47 = vpop.f32.mrb[21].mxu1 }
 0x312   : > { %v2088_v50 = vpop.f32.mrb[22].mxu0  ;;  %v1802_v57 = vpop.f32.mrb[22].mxu1 }
 0x313   : > { %v2157_v49 = vsel %vm1135_vm3, %v2155_v19, %v2156_v63  ;;  %v5093_v18 = vpop.f32.mrb[23].mxu0  ;;  %v4979_v54 = vpop.f32.mrb[23].mxu1 }
 0x314   : > { %v7217_v58 = vadd.f32 %v2157_v49, %v1848_v11 }
 0x315   : > { %5319 = vmatmul.mubr.msk.bf16.gmra.mrb[128].mxu0 %vm494_vm2, %v6736_v39  ;;  %5205 = vmatmul.mubr.msk.bf16.gmra.mrb[128].mxu1 %vm494_vm2, %v6747_v3 }
 0x316   : > { %5322 = vmatprep.mubr.msk.bf16.mxu0 %vm5714_vm1, %v7987_v13  ;;  %5208 = vmatprep.mubr.msk.bf16.mxu1 %vm5714_vm1, %v7987_v13 }
 0x318   : > { %v2092_v28 = vpop.f32.mrb[24].mxu0  ;;  %v1806_v23 = vpop.f32.mrb[24].mxu1 }
 0x319   : > { %v5096_v35 = vpop.f32.mrb[25].mxu0  ;;  %v4982_v41 = vpop.f32.mrb[25].mxu1 }
 0x31a   : > { %v2094_v19 = vpop.f32.mrb[26].mxu0  ;;  %v1808_v11 = vpop.f32.mrb[26].mxu1 }
 0x31b   : > { %v5097_v46 = vpop.f32.mrb[27].mxu0  ;;  %v4983_v16 = vpop.f32.mrb[27].mxu1 }
 0x31d   : > { %5323 = vmatmul.mubr.msk.bf16.gmra.mrb[132].mxu0 %vm494_vm2, %v6747_v3  ;;  %5209 = vmatmul.mubr.msk.bf16.gmra.mrb[132].mxu1 %vm494_vm2, %v6758_v43 }
 0x31e   : > { %5326 = vmatprep.mubr.msk.bf16.mxu0 %vm5714_vm1, %v7987_v13  ;;  %5212 = vmatprep.mubr.msk.bf16.mxu1 %vm5714_vm1, %v7987_v13 }
 0x320   : > { %v2098_v39 = vpop.f32.mrb[28].mxu0  ;;  %v1812_v34 = vpop.f32.mrb[28].mxu1 }
 0x321   : > { %v5100_v30 = vpop.f32.mrb[29].mxu0  ;;  %v4986_v10 = vpop.f32.mrb[29].mxu1 }
 0x322   : > { %v2100_v63 = vpop.f32.mrb[30].mxu0  ;;  %v1814_v50 = vpop.f32.mrb[30].mxu1 }
 0x323   : > { %v5101_v55 = vpop.f32.mrb[31].mxu0  ;;  %v4987_v47 = vpop.f32.mrb[31].mxu1 }
 0x325   : > { %5327 = vmatmul.mubr.msk.bf16.gmra.mrb[136].mxu0 %vm494_vm2, %v6758_v43  ;;  %5213 = vmatmul.mubr.msk.bf16.gmra.mrb[136].mxu1 %vm494_vm2, %v6769_v53 }
 0x326   : > { %5330 = vmatprep.mubr.msk.bf16.mxu0 %vm5714_vm1, %v7987_v13  ;;  %5216 = vmatprep.mubr.msk.bf16.mxu1 %vm5714_vm1, %v7987_v13 }
 0x328   : > { %v2104_v3 = vpop.f32.mrb[32].mxu0  ;;  %v2260_v18 = vpop.f32.mrb[32].mxu1 }
 0x329   : > { %v5104_v49 = vpop.f32.mrb[33].mxu0  ;;  %v5110_v54 = vpop.f32.mrb[33].mxu1 }
 0x32a   : > { %v2106_v57 = vpop.f32.mrb[34].mxu0  ;;  %v2262_v35 = vpop.f32.mrb[34].mxu1 }
 0x32b   : > { %v5105_v28 = vpop.f32.mrb[35].mxu0  ;;  %v5111_v23 = vpop.f32.mrb[35].mxu1 }
 0x32c   : > { %v7262_v28 = vld [vmem:[%s5782_s28 + $0xe0] ss:$0 sps:$4 sm:$0xff]  }
 0x32d   : > { %5331 = vmatmul.mubr.msk.bf16.gmra.mrb[140].mxu0 %vm494_vm2, %v6769_v53  ;;  %5217 = vmatmul.mubr.msk.bf16.gmra.mrb[140].mxu1 %vm494_vm2, %v6780_v0  ;;  %v8001_v53 = vld [vmem:[#allocation3_spill] sm:$0xff] }
 0x32e   : > { %5334 = vmatprep.mubr.msk.bf16.mxu0 %vm5714_vm1, %v7987_v13  ;;  %5220 = vmatprep.mubr.msk.bf16.mxu1 %vm5714_vm1, %v7987_v13 }
 0x330   : > { %v2632_v43 = vpop.f32.mrb[36].mxu0  ;;  %v2266_v41 = vpop.f32.mrb[36].mxu1 }
 0x331   : > { %v5228_v19 = vpop.f32.mrb[37].mxu0  ;;  %v5114_v11 = vpop.f32.mrb[37].mxu1 }
 0x332   : > { %v2634_v46 = vpop.f32.mrb[38].mxu0  ;;  %v2268_v39 = vpop.f32.mrb[38].mxu1 }
 0x333   : > { %v5229_v16 = vpop.f32.mrb[39].mxu0  ;;  %v5115_v30 = vpop.f32.mrb[39].mxu1  ;;  %v2481_v55 = vrot.slane %v2268_v39, 2 }
 0x335   : > { %5335 = vmatmul.mubr.msk.bf16.gmra.mrb[144].mxu0 %vm494_vm2, %v6780_v0  ;;  %5221 = vmatmul.mubr.msk.bf16.gmra.mrb[144].mxu1 %vm494_vm2, %v8001_v53 }
 0x336   : > { %5338 = vmatprep.mubr.msk.bf16.mxu0 %vm5714_vm1, %v7987_v13  ;;  %5344 = vmatprep.mubr.msk.bf16.mxu1 %vm5714_vm1, %v7987_v13 }
 0x338   : > { %v2638_v34 = vpop.f32.mrb[40].mxu0  ;;  %v2273_v63 = vpop.f32.mrb[40].mxu1 }
 0x339   : > { %v5232_v10 = vpop.f32.mrb[41].mxu0  ;;  %v2482_v50 = vrot.slane %v2273_v63, 2  ;;  %v5118_v47 = vpop.f32.mrb[41].mxu1  ;;  %v5678_v34 = vld [vmem:[%s5782_s28] sm:$0xff]   ;;  %v8002_v63 = vld [vmem:[#allocation4_spill] sm:$0xff] }
 0x33a   : > { %v2640_v3 = vpop.f32.mrb[42].mxu0  ;;  %v2276_v49 = vpop.f32.mrb[42].mxu1 }
 0x33b   : > { %v5233_v18 = vpop.f32.mrb[43].mxu0  ;;  %v2483_v0 = vrot.slane %v2276_v49, 2  ;;  %v5119_v57 = vpop.f32.mrb[43].mxu1  ;;  %v2560_v54 = vsel %vm1508_vm4, %v2481_v55, %v2482_v50 }
 0x33c   : > { %v2561_v35 = vadd.f32 %v2560_v54, %v6824_v33 }
 0x33d   : > { %5339 = vmatmul.mubr.msk.bf16.gmra.mrb[148].mxu0 %vm494_vm2, %v7262_v28  ;;  %5345 = vmatmul.mubr.msk.bf16.vlgmr.msra.gmra.mrb[148].mxu1 %vm494_vm2, %v6808_v22  ;;  %v2559_v23 = vsel %vm1508_vm4, %v2482_v50, %v2483_v0 }
 0x33e   : > { %5462 = vmatprep.mubr.msk.bf16.mxu0 %vm5714_vm1, %v7987_v13  ;;  %5348 = vmatprep.mubr.msk.bf16.mxu1 %vm5714_vm1, %v7987_v13  ;;  %v2562_v43 = vadd.f32 %v2559_v23, %v6835_v45 }
 0x340   : > { %v2644_v19 = vpop.f32.mrb[44].mxu0  ;;  %v2281_v41 = vpop.f32.mrb[44].mxu1 }
 0x341   : > { %v5236_v46 = vpop.f32.mrb[45].mxu0  ;;  %v2484_v11 = vrot.slane %v2281_v41, 2  ;;  %v5122_v33 = vpop.f32.mrb[45].mxu1 }
 0x342   : > { %v2646_v16 = vpop.f32.mrb[46].mxu0  ;;  %v2284_v39 = vpop.f32.mrb[46].mxu1 }
 0x343   : > { %v5237_v30 = vpop.f32.mrb[47].mxu0  ;;  %v2485_v22 = vrot.slane %v2284_v39, 2  ;;  %v5123_v53 = vpop.f32.mrb[47].mxu1 }
 0x345   : > { %5463 = vmatmul.mubr.msk.bf16.vlgmr.msra.gmra.mrb[152].mxu0 %vm494_vm2, %v5678_v34  ;;  %5349 = vmatmul.mubr.msk.bf16.gmra.mrb[152].mxu1 %vm494_vm2, %v8002_v63  ;;  %v2558_v45 = vsel %vm1508_vm4, %v2484_v11, %v2485_v22  ;;  %v8004_v11 = vld [vmem:[#allocation5_spill] sm:$0xff] }
 0x346   : > { %5466 = vmatprep.mubr.msk.bf16.mxu0 %vm5714_vm1, %v7987_v13  ;;  %5352 = vmatprep.mubr.msk.bf16.mxu1 %vm5714_vm1, %v7987_v13  ;;  %v2563_v10 = vadd.f32 %v2558_v45, %v6853_v24  ;;  %v8003_v24 = vld [vmem:[#allocation6_spill] sm:$0xff] }
 0x348   : > { %v2650_v55 = vpop.f32.mrb[48].mxu0  ;;  %v2289_v50 = vpop.f32.mrb[48].mxu1 }
 0x349   : > { %v7287_v47 = vadd.f32 %v2650_v55, %v2561_v35  ;;  %v5240_v3 = vpop.f32.mrb[49].mxu0  ;;  %v2486_v49 = vrot.slane %v2289_v50, 2  ;;  %v5126_v0 = vpop.f32.mrb[49].mxu1 }
 0x34a   : > { %v2653_v18 = vpop.f32.mrb[50].mxu0  ;;  %v2292_v23 = vpop.f32.mrb[50].mxu1 }
 0x34b   : > { %v7289_v57 = vadd.f32 %v2653_v18, %v2562_v43  ;;  %v5241_v54 = vpop.f32.mrb[51].mxu0  ;;  %v5127_v19 = vpop.f32.mrb[51].mxu1  ;;  %v2557_v41 = vsel %vm1508_vm4, %v2485_v22, %v2486_v49  ;;  %v2487_v16 = vrot.slane %v2292_v23, 2 }
 0x34c   : > { %v2564_v46 = vadd.f32 %v2557_v41, %v8003_v24 }
 0x34d   : > { %5467 = vmatmul.mubr.msk.bf16.gmra.mrb[156].mxu0 %vm494_vm2, %v8002_v63  ;;  %5353 = vmatmul.mubr.msk.bf16.gmra.mrb[156].mxu1 %vm494_vm2, %v8004_v11 }
 0x34e   : > { %5470 = vmatprep.mubr.msk.bf16.mxu0 %vm5714_vm1, %v7987_v13  ;;  %5356 = vmatprep.mubr.msk.bf16.mxu1 %vm5714_vm1, %v7987_v13 }
 0x350   : > { %v2658_v35 = vpop.f32.mrb[52].mxu0  ;;  %v2297_v43 = vpop.f32.mrb[52].mxu1 }
 0x351   : > { %v5244_v33 = vpop.f32.mrb[53].mxu0  ;;  %v2488_v39 = vrot.slane %v2297_v43, 2  ;;  %v5130_v30 = vpop.f32.mrb[53].mxu1 }
 0x352   : > { %v2660_v22 = vpop.f32.mrb[54].mxu0  ;;  %v2300_v53 = vpop.f32.mrb[54].mxu1  ;;  %v8005_v33 = vld [vmem:[#allocation7_spill] sm:$0xff] }
 0x353   : > { %v7302_v34 = vadd.f32 %v2660_v22, %v2563_v10  ;;  %v5245_v63 = vpop.f32.mrb[55].mxu0  ;;  %v2489_v45 = vrot.slane %v2300_v53, 2  ;;  %v5131_v55 = vpop.f32.mrb[55].mxu1  ;;  %v2556_v50 = vsel %vm1508_vm4, %v2487_v16, %v2488_v39 }
 0x354   : > { %v2565_v3 = vadd.f32 %v2556_v50, %v6877_v48 }
 0x355   : > { %5471 = vmatmul.mubr.msk.bf16.gmra.mrb[160].mxu0 %vm494_vm2, %v8004_v11  ;;  %5357 = vmatmul.mubr.msk.bf16.gmra.mrb[160].mxu1 %vm494_vm2, %v6865_v17  ;;  %v2555_v10 = vsel %vm1508_vm4, %v2488_v39, %v2489_v45 }
 0x356   : > { %5474 = vmatprep.mubr.msk.bf16.mxu0 %vm5714_vm1, %v7987_v13  ;;  %5360 = vmatprep.mubr.msk.bf16.mxu1 %vm5714_vm1, %v7987_v13  ;;  %v2566_v49 = vadd.f32 %v2555_v10, %v6890_v51 }
 0x358   : > { %v2665_v18 = vpop.f32.mrb[56].mxu0  ;;  %v2305_v0 = vpop.f32.mrb[56].mxu1 }
 0x359   : > { %v7318_v54 = vadd.f32 %v2665_v18, %v2564_v46  ;;  %v5248_v23 = vpop.f32.mrb[57].mxu0  ;;  %v2490_v48 = vrot.slane %v2305_v0, 2  ;;  %v5134_v19 = vpop.f32.mrb[57].mxu1 }
 0x35a   : > { %v2668_v41 = vpop.f32.mrb[58].mxu0  ;;  %v2308_v24 = vpop.f32.mrb[58].mxu1  ;;  %v8007_v23 = vld [vmem:[#allocation8_spill] sm:$0xff] }
 0x35b   : > { %v5249_v11 = vpop.f32.mrb[59].mxu0  ;;  %v2491_v35 = vrot.slane %v2308_v24, 2  ;;  %v5135_v43 = vpop.f32.mrb[59].mxu1 }
 0x35d   : > { %5475 = vmatmul.mubr.msk.bf16.gmra.mrb[164].mxu0 %vm494_vm2, %v6865_v17  ;;  %5361 = vmatmul.mubr.msk.bf16.gmra.mrb[164].mxu1 %vm494_vm2, %v8005_v33  ;;  %v2554_v51 = vsel %vm1508_vm4, %v2490_v48, %v2491_v35 }
 0x35e   : > { %5478 = vmatprep.mubr.msk.bf16.mxu0 %vm5714_vm1, %v7987_v13  ;;  %5364 = vmatprep.mubr.msk.bf16.mxu1 %vm5714_vm1, %v7987_v13  ;;  %v2567_v46 = vadd.f32 %v2554_v51, %v6906_v44  ;;  %v8006_v44 = vld [vmem:[#allocation9_spill] sm:$0xff] }
 0x360   : > { %v2672_v16 = vpop.f32.mrb[60].mxu0  ;;  %v2313_v39 = vpop.f32.mrb[60].mxu1 }
 0x361   : > { %v7331_v30 = vadd.f32 %v2672_v16, %v2565_v3  ;;  %v5252_v22 = vpop.f32.mrb[61].mxu0  ;;  %v2492_v17 = vrot.slane %v2313_v39, 2  ;;  %v5138_v63 = vpop.f32.mrb[61].mxu1 }
 0x362   : > { %v2675_v53 = vpop.f32.mrb[62].mxu0  ;;  %v2316_v50 = vpop.f32.mrb[62].mxu1 }
 0x363   : > { %v7333_v45 = vadd.f32 %v2675_v53, %v2566_v49  ;;  %v5253_v55 = vpop.f32.mrb[63].mxu0  ;;  %v5139_v10 = vpop.f32.mrb[63].mxu1  ;;  %v2553_v18 = vsel %vm1508_vm4, %v2491_v35, %v2492_v17  ;;  %v2493_v19 = vrot.slane %v2316_v50, 2 }
 0x364   : > { %v2568_v0 = vadd.f32 %v2553_v18, %v8006_v44 }
 0x365   : > { %5479 = vmatmul.mubr.msk.bf16.gmra.mrb[168].mxu0 %vm494_vm2, %v8005_v33  ;;  %5365 = vmatmul.mubr.msk.bf16.gmra.mrb[168].mxu1 %vm494_vm2, %v8007_v23 }
 0x366   : > { %5482 = vmatprep.mubr.msk.bf16.mxu0 %vm5714_vm1, %v7987_v13  ;;  %5368 = vmatprep.mubr.msk.bf16.mxu1 %vm5714_vm1, %v7987_v13 }
 0x368   : > { %v2680_v3 = vpop.f32.mrb[64].mxu0  ;;  %v2321_v49 = vpop.f32.mrb[64].mxu1 }
 0x369   : > { %v5256_v48 = vpop.f32.mrb[65].mxu0  ;;  %v2494_v41 = vrot.slane %v2321_v49, 2  ;;  %v5142_v24 = vpop.f32.mrb[65].mxu1 }
 0x36a   : > { %v2682_v11 = vpop.f32.mrb[66].mxu0  ;;  %v2324_v35 = vpop.f32.mrb[66].mxu1  ;;  %v8008_v48 = vld [vmem:[#allocation10_spill] sm:$0xff] }
 0x36b   : > { %v7346_v43 = vadd.f32 %v2682_v11, %v2567_v46  ;;  %v5257_v33 = vpop.f32.mrb[67].mxu0  ;;  %v2495_v51 = vrot.slane %v2324_v35, 2  ;;  %v5143_v16 = vpop.f32.mrb[67].mxu1  ;;  %v2552_v39 = vsel %vm1508_vm4, %v2493_v19, %v2494_v41 }
 0x36c   : > { %v2569_v22 = vadd.f32 %v2552_v39, %v6930_v8 }
 0x36d   : > { %5483 = vmatmul.mubr.msk.bf16.gmra.mrb[172].mxu0 %vm494_vm2, %v8007_v23  ;;  %5369 = vmatmul.mubr.msk.bf16.gmra.mrb[172].mxu1 %vm494_vm2, %v6918_v36  ;;  %v2551_v46 = vsel %vm1508_vm4, %v2494_v41, %v2495_v51 }
 0x36e   : > { %5486 = vmatprep.mubr.msk.bf16.mxu0 %vm5714_vm1, %v7987_v13  ;;  %5372 = vmatprep.mubr.msk.bf16.mxu1 %vm5714_vm1, %v7987_v13  ;;  %v2570_v17 = vadd.f32 %v2551_v46, %v6943_v40 }
 0x370   : > { %v2687_v53 = vpop.f32.mrb[68].mxu0  ;;  %v2329_v63 = vpop.f32.mrb[68].mxu1 }
 0x371   : > { %v7362_v55 = vadd.f32 %v2687_v53, %v2568_v0  ;;  %v5260_v50 = vpop.f32.mrb[69].mxu0  ;;  %v2496_v8 = vrot.slane %v2329_v63, 2  ;;  %v5146_v10 = vpop.f32.mrb[69].mxu1 }
 0x372   : > { %v2690_v18 = vpop.f32.mrb[70].mxu0  ;;  %v2332_v44 = vpop.f32.mrb[70].mxu1  ;;  %v8010_v50 = vld [vmem:[#allocation11_spill] sm:$0xff] }
 0x373   : > { %v5261_v23 = vpop.f32.mrb[71].mxu0  ;;  %v2497_v3 = vrot.slane %v2332_v44, 2  ;;  %v5147_v49 = vpop.f32.mrb[71].mxu1 }
 0x375   : > { %5487 = vmatmul.mubr.msk.bf16.gmra.mrb[176].mxu0 %vm494_vm2, %v6918_v36  ;;  %5373 = vmatmul.mubr.msk.bf16.gmra.mrb[176].mxu1 %vm494_vm2, %v8008_v48  ;;  %v2550_v40 = vsel %vm1508_vm4, %v2496_v8, %v2497_v3 }
 0x376   : > { %5490 = vmatprep.mubr.msk.bf16.mxu0 %vm5714_vm1, %v7987_v13  ;;  %5376 = vmatprep.mubr.msk.bf16.mxu1 %vm5714_vm1, %v7987_v13  ;;  %v2571_v0 = vadd.f32 %v2550_v40, %v6959_v38  ;;  %v8009_v38 = vld [vmem:[#allocation12_spill] sm:$0xff] }
 0x378   : > { %v2694_v19 = vpop.f32.mrb[72].mxu0  ;;  %v2337_v41 = vpop.f32.mrb[72].mxu1 }
 0x379   : > { %v7375_v24 = vadd.f32 %v2694_v19, %v2569_v22  ;;  %v5264_v11 = vpop.f32.mrb[73].mxu0  ;;  %v2498_v36 = vrot.slane %v2337_v41, 2  ;;  %v5150_v33 = vpop.f32.mrb[73].mxu1 }
 0x37a   : > { %v2697_v35 = vpop.f32.mrb[74].mxu0  ;;  %v2340_v39 = vpop.f32.mrb[74].mxu1 }
 0x37b   : > { %v7377_v51 = vadd.f32 %v2697_v35, %v2570_v17  ;;  %v5265_v16 = vpop.f32.mrb[75].mxu0  ;;  %v5151_v46 = vpop.f32.mrb[75].mxu1  ;;  %v2549_v53 = vsel %vm1508_vm4, %v2497_v3, %v2498_v36  ;;  %v2499_v10 = vrot.slane %v2340_v39, 2 }
 0x37c   : > { %v2572_v63 = vadd.f32 %v2549_v53, %v8009_v38 }
 0x37d   : > { %5491 = vmatmul.mubr.msk.bf16.gmra.mrb[180].mxu0 %vm494_vm2, %v8008_v48  ;;  %5377 = vmatmul.mubr.msk.bf16.gmra.mrb[180].mxu1 %vm494_vm2, %v8010_v50 }
 0x37e   : > { %5494 = vmatprep.mubr.msk.bf16.mxu0 %vm5714_vm1, %v7987_v13  ;;  %5380 = vmatprep.mubr.msk.bf16.mxu1 %vm5714_vm1, %v7987_v13 }
 0x380   : > { %v2702_v22 = vpop.f32.mrb[76].mxu0  ;;  %v2345_v17 = vpop.f32.mrb[76].mxu1 }
 0x381   : > { %v5268_v8 = vpop.f32.mrb[77].mxu0  ;;  %v2500_v18 = vrot.slane %v2345_v17, 2  ;;  %v5154_v44 = vpop.f32.mrb[77].mxu1 }
 0x382   : > { %v2704_v23 = vpop.f32.mrb[78].mxu0  ;;  %v2348_v3 = vpop.f32.mrb[78].mxu1  ;;  %v8011_v8 = vld [vmem:[#allocation13_spill] sm:$0xff] }
 0x383   : > { %v7390_v49 = vadd.f32 %v2704_v23, %v2571_v0  ;;  %v5269_v48 = vpop.f32.mrb[79].mxu0  ;;  %v2501_v40 = vrot.slane %v2348_v3, 2  ;;  %v5155_v19 = vpop.f32.mrb[79].mxu1  ;;  %v2548_v41 = vsel %vm1508_vm4, %v2499_v10, %v2500_v18 }
 0x384   : > { %v2573_v11 = vadd.f32 %v2548_v41, %v6983_v15 }
 0x385   : > { %5495 = vmatmul.mubr.msk.bf16.gmra.mrb[184].mxu0 %vm494_vm2, %v8010_v50  ;;  %5381 = vmatmul.mubr.msk.bf16.gmra.mrb[184].mxu1 %vm494_vm2, %v6971_v27  ;;  %v2547_v0 = vsel %vm1508_vm4, %v2500_v18, %v2501_v40 }
 0x386   : > { %5498 = vmatprep.mubr.msk.bf16.mxu0 %vm5714_vm1, %v7987_v13  ;;  %5384 = vmatprep.mubr.msk.bf16.mxu1 %vm5714_vm1, %v7987_v13  ;;  %v2574_v36 = vadd.f32 %v2547_v0, %v6996_v14 }
 0x388   : > { %v2709_v35 = vpop.f32.mrb[80].mxu0  ;;  %v2353_v33 = vpop.f32.mrb[80].mxu1 }
 0x389   : > { %v7406_v16 = vadd.f32 %v2709_v35, %v2572_v63  ;;  %v5272_v39 = vpop.f32.mrb[81].mxu0  ;;  %v2502_v15 = vrot.slane %v2353_v33, 2  ;;  %v5158_v46 = vpop.f32.mrb[81].mxu1 }
 0x38a   : > { %v2712_v53 = vpop.f32.mrb[82].mxu0  ;;  %v2356_v38 = vpop.f32.mrb[82].mxu1  ;;  %v8013_v39 = vld [vmem:[#allocation14_spill] sm:$0xff] }
 0x38b   : > { %v5273_v50 = vpop.f32.mrb[83].mxu0  ;;  %v2503_v22 = vrot.slane %v2356_v38, 2  ;;  %v5159_v17 = vpop.f32.mrb[83].mxu1 }
 0x38d   : > { %5499 = vmatmul.mubr.msk.bf16.gmra.mrb[188].mxu0 %vm494_vm2, %v6971_v27  ;;  %5385 = vmatmul.mubr.msk.bf16.gmra.mrb[188].mxu1 %vm494_vm2, %v8011_v8  ;;  %v2546_v14 = vsel %vm1508_vm4, %v2502_v15, %v2503_v22 }
 0x38e   : > { %5502 = vmatprep.mubr.msk.bf16.mxu0 %vm5714_vm1, %v7987_v13  ;;  %5388 = vmatprep.mubr.msk.bf16.mxu1 %vm5714_vm1, %v7987_v13  ;;  %v2575_v63 = vadd.f32 %v2546_v14, %v7012_v25  ;;  %v8012_v25 = vld [vmem:[#allocation15_spill] sm:$0xff] }
 0x390   : > { %v2716_v10 = vpop.f32.mrb[84].mxu0  ;;  %v2361_v18 = vpop.f32.mrb[84].mxu1 }
 0x391   : > { %v7419_v44 = vadd.f32 %v2716_v10, %v2573_v11  ;;  %v5276_v23 = vpop.f32.mrb[85].mxu0  ;;  %v2504_v27 = vrot.slane %v2361_v18, 2  ;;  %v5162_v48 = vpop.f32.mrb[85].mxu1 }
 0x392   : > { %v2719_v3 = vpop.f32.mrb[86].mxu0  ;;  %v2364_v41 = vpop.f32.mrb[86].mxu1 }
 0x393   : > { %v7421_v40 = vadd.f32 %v2719_v3, %v2574_v36  ;;  %v5277_v19 = vpop.f32.mrb[87].mxu0  ;;  %v5163_v0 = vpop.f32.mrb[87].mxu1  ;;  %v2545_v35 = vsel %vm1508_vm4, %v2503_v22, %v2504_v27  ;;  %v2505_v46 = vrot.slane %v2364_v41, 2 }
 0x394   : > { %v2576_v33 = vadd.f32 %v2545_v35, %v8012_v25 }
 0x395   : > { %5503 = vmatmul.mubr.msk.bf16.gmra.mrb[192].mxu0 %vm494_vm2, %v8011_v8  ;;  %5389 = vmatmul.mubr.msk.bf16.gmra.mrb[192].mxu1 %vm494_vm2, %v8013_v39 }
 0x396   : > { %5506 = vmatprep.mubr.msk.bf16.mxu0 %vm5714_vm1, %v7987_v13  ;;  %5392 = vmatprep.mubr.msk.bf16.mxu1 %vm5714_vm1, %v7987_v13 }
 0x398   : > { %v2724_v11 = vpop.f32.mrb[88].mxu0  ;;  %v2369_v36 = vpop.f32.mrb[88].mxu1 }
 0x399   : > { %v5280_v15 = vpop.f32.mrb[89].mxu0  ;;  %v2506_v53 = vrot.slane %v2369_v36, 2  ;;  %v5166_v38 = vpop.f32.mrb[89].mxu1 }
 0x39a   : > { %v2726_v50 = vpop.f32.mrb[90].mxu0  ;;  %v2372_v22 = vpop.f32.mrb[90].mxu1  ;;  %v8014_v15 = vld [vmem:[#allocation16_spill] sm:$0xff] }
 0x39b   : > { %v7434_v17 = vadd.f32 %v2726_v50, %v2575_v63  ;;  %v5281_v8 = vpop.f32.mrb[91].mxu0  ;;  %v2507_v14 = vrot.slane %v2372_v22, 2  ;;  %v5167_v10 = vpop.f32.mrb[91].mxu1  ;;  %v2544_v18 = vsel %vm1508_vm4, %v2505_v46, %v2506_v53 }
 0x39c   : > { %v2577_v23 = vadd.f32 %v2544_v18, %v7036_v21 }
 0x39d   : > { %5507 = vmatmul.mubr.msk.bf16.gmra.mrb[196].mxu0 %vm494_vm2, %v8013_v39  ;;  %5393 = vmatmul.mubr.msk.bf16.gmra.mrb[196].mxu1 %vm494_vm2, %v7024_v29  ;;  %v2543_v63 = vsel %vm1508_vm4, %v2506_v53, %v2507_v14 }
 0x39e   : > { %5510 = vmatprep.mubr.msk.bf16.mxu0 %vm5714_vm1, %v7987_v13  ;;  %5396 = vmatprep.mubr.msk.bf16.mxu1 %vm5714_vm1, %v7987_v13  ;;  %v2578_v27 = vadd.f32 %v2543_v63, %v7049_v12 }
 0x3a0   : > { %v2731_v3 = vpop.f32.mrb[92].mxu0  ;;  %v2377_v48 = vpop.f32.mrb[92].mxu1 }
 0x3a1   : > { %v7450_v19 = vadd.f32 %v2731_v3, %v2576_v33  ;;  %v5284_v41 = vpop.f32.mrb[93].mxu0  ;;  %v2508_v21 = vrot.slane %v2377_v48, 2  ;;  %v5170_v0 = vpop.f32.mrb[93].mxu1  ;;  %v8015_v48 = vld [vmem:[#allocation17_spill] sm:$0xff] }
 0x3a2   : > { %v2734_v35 = vpop.f32.mrb[94].mxu0  ;;  %v2380_v25 = vpop.f32.mrb[94].mxu1 }
 0x3a3   : > { %v5285_v39 = vpop.f32.mrb[95].mxu0  ;;  %v2509_v11 = vrot.slane %v2380_v25, 2  ;;  %v5171_v36 = vpop.f32.mrb[95].mxu1 }
 0x3a5   : > { %5511 = vmatmul.mubr.msk.bf16.gmra.mrb[200].mxu0 %vm494_vm2, %v7024_v29  ;;  %5397 = vmatmul.mubr.msk.bf16.gmra.mrb[200].mxu1 %vm494_vm2, %v8014_v15  ;;  %v2542_v12 = vsel %vm1508_vm4, %v2508_v21, %v2509_v11 }
 0x3a6   : > { %5514 = vmatprep.mubr.msk.bf16.mxu0 %vm5714_vm1, %v7987_v13  ;;  %5400 = vmatprep.mubr.msk.bf16.mxu1 %vm5714_vm1, %v7987_v13  ;;  %v2579_v33 = vadd.f32 %v2542_v12, %v7065_v7 }
 0x3a8   : > { %v2738_v46 = vpop.f32.mrb[96].mxu0  ;;  %v2385_v53 = vpop.f32.mrb[96].mxu1 }
 0x3a9   : > { %v7463_v38 = vadd.f32 %v2738_v46, %v2577_v23  ;;  %v5288_v50 = vpop.f32.mrb[97].mxu0  ;;  %v2510_v29 = vrot.slane %v2385_v53, 2  ;;  %v5174_v8 = vpop.f32.mrb[97].mxu1 }
 0x3aa   : > { %v2741_v22 = vpop.f32.mrb[98].mxu0  ;;  %v2388_v18 = vpop.f32.mrb[98].mxu1 }
 0x3ab   : > { %v7465_v14 = vadd.f32 %v2741_v22, %v2578_v27  ;;  %v5289_v10 = vpop.f32.mrb[99].mxu0  ;;  %v5175_v63 = vpop.f32.mrb[99].mxu1  ;;  %v2541_v3 = vsel %vm1508_vm4, %v2509_v11, %v2510_v29  ;;  %v2511_v21 = vrot.slane %v2388_v18, 2 }
 0x3ac   : > { %v2580_v7 = vadd.f32 %v2541_v3, %v7072_v62 }
 0x3ad   : > { %5515 = vmatmul.mubr.msk.bf16.gmra.mrb[204].mxu0 %vm494_vm2, %v8014_v15  ;;  %5401 = vmatmul.mubr.msk.bf16.gmra.mrb[204].mxu1 %vm494_vm2, %v8015_v48 }
 0x3ae   : > { %5518 = vmatprep.mubr.msk.bf16.mxu0 %vm5714_vm1, %v7987_v13  ;;  %5404 = vmatprep.mubr.msk.bf16.mxu1 %vm5714_vm1, %v7987_v13 }
 0x3b0   : > { %v2746_v23 = vpop.f32.mrb[100].mxu0  ;;  %v2393_v27 = vpop.f32.mrb[100].mxu1 }
 0x3b1   : > { %v5292_v41 = vpop.f32.mrb[101].mxu0  ;;  %v2512_v0 = vrot.slane %v2393_v27, 2  ;;  %v5178_v35 = vpop.f32.mrb[101].mxu1 }
 0x3b2   : > { %v2748_v25 = vpop.f32.mrb[102].mxu0  ;;  %v2396_v39 = vpop.f32.mrb[102].mxu1 }
 0x3b3   : > { %v7478_v11 = vadd.f32 %v2748_v25, %v2579_v33  ;;  %v5293_v62 = vpop.f32.mrb[103].mxu0  ;;  %v2513_v36 = vrot.slane %v2396_v39, 2  ;;  %v5179_v15 = vpop.f32.mrb[103].mxu1  ;;  %v2540_v12 = vsel %vm1508_vm4, %v2511_v21, %v2512_v0 }
 0x3b4   : > { %v2581_v46 = vadd.f32 %v2540_v12, %v7086_v59 }
 0x3b5   : > { %5519 = vmatmul.mubr.msk.bf16.gmra.mrb[208].mxu0 %vm494_vm2, %v8015_v48  ;;  %5405 = vmatmul.mubr.msk.bf16.gmra.mrb[208].mxu1 %vm494_vm2, %v7089_v37  ;;  %v2539_v33 = vsel %vm1508_vm4, %v2512_v0, %v2513_v36 }
 0x3b6   : > { %5522 = vmatprep.mubr.msk.bf16.mxu0 %vm5714_vm1, %v7987_v13  ;;  %5408 = vmatprep.mubr.msk.bf16.mxu1 %vm5714_vm1, %v7987_v13  ;;  %v2582_v53 = vadd.f32 %v2539_v33, %v7099_v20 }
 0x3b8   : > { %v2753_v50 = vpop.f32.mrb[104].mxu0  ;;  %v2401_v29 = vpop.f32.mrb[104].mxu1 }
 0x3b9   : > { %v7494_v22 = vadd.f32 %v2753_v50, %v2580_v7  ;;  %v5296_v8 = vpop.f32.mrb[105].mxu0  ;;  %v2514_v59 = vrot.slane %v2401_v29, 2  ;;  %v5182_v10 = vpop.f32.mrb[105].mxu1 }
 0x3ba   : > { %v2756_v18 = vpop.f32.mrb[106].mxu0  ;;  %v2404_v63 = vpop.f32.mrb[106].mxu1 }
 0x3bb   : > { %v5297_v3 = vpop.f32.mrb[107].mxu0  ;;  %v2515_v48 = vrot.slane %v2404_v63, 2  ;;  %v5183_v23 = vpop.f32.mrb[107].mxu1 }
 0x3bd   : > { %5523 = vmatmul.mubr.msk.bf16.gmra.mrb[212].mxu0 %vm494_vm2, %v7089_v37  ;;  %5409 = vmatmul.mubr.msk.bf16.gmra.mrb[212].mxu1 %vm494_vm2, %v7105_v56  ;;  %v2538_v20 = vsel %vm1508_vm4, %v2514_v59, %v2515_v48 }
 0x3be   : > { %5526 = vmatprep.mubr.msk.bf16.mxu0 %vm5714_vm1, %v7987_v13  ;;  %5412 = vmatprep.mubr.msk.bf16.mxu1 %vm5714_vm1, %v7987_v13  ;;  %v2583_v7 = vadd.f32 %v2538_v20, %v7115_v1 }
 0x3c0   : > { %v2760_v27 = vpop.f32.mrb[108].mxu0  ;;  %v2409_v41 = vpop.f32.mrb[108].mxu1 }
 0x3c1   : > { %v7507_v21 = vadd.f32 %v2760_v27, %v2581_v46  ;;  %v5300_v0 = vpop.f32.mrb[109].mxu0  ;;  %v2516_v37 = vrot.slane %v2409_v41, 2  ;;  %v5186_v25 = vpop.f32.mrb[109].mxu1 }
 0x3c2   : > { %v2763_v35 = vpop.f32.mrb[110].mxu0  ;;  %v2412_v36 = vpop.f32.mrb[110].mxu1 }
 0x3c3   : > { %v7509_v39 = vadd.f32 %v2763_v35, %v2582_v53  ;;  %v5301_v62 = vpop.f32.mrb[111].mxu0  ;;  %v5187_v15 = vpop.f32.mrb[111].mxu1  ;;  %v2537_v12 = vsel %vm1508_vm4, %v2515_v48, %v2516_v37  ;;  %v2517_v50 = vrot.slane %v2412_v36, 2 }
 0x3c4   : > { %v2584_v1 = vadd.f32 %v2537_v12, %v7122_v31 }
 0x3c5   : > { %5527 = vmatmul.mubr.msk.bf16.gmra.mrb[216].mxu0 %vm494_vm2, %v7105_v56  ;;  %5413 = vmatmul.mubr.msk.bf16.gmra.mrb[216].mxu1 %vm494_vm2, %v7125_v2 }
 0x3c6   : > { %5530 = vmatprep.mubr.msk.bf16.mxu0 %vm5714_vm1, %v7987_v13  ;;  %5416 = vmatprep.mubr.msk.bf16.mxu1 %vm5714_vm1, %v7987_v13 }
 0x3c8   : > { %v2768_v46 = vpop.f32.mrb[112].mxu0  ;;  %v2417_v33 = vpop.f32.mrb[112].mxu1 }
 0x3c9   : > { %v5304_v53 = vpop.f32.mrb[113].mxu0  ;;  %v2518_v29 = vrot.slane %v2417_v33, 2  ;;  %v5190_v8 = vpop.f32.mrb[113].mxu1 }
 0x3ca   : > { %v2770_v59 = vpop.f32.mrb[114].mxu0  ;;  %v2420_v10 = vpop.f32.mrb[114].mxu1 }
 0x3cb   : > { %v7522_v56 = vadd.f32 %v2770_v59, %v2583_v7  ;;  %v5305_v31 = vpop.f32.mrb[115].mxu0  ;;  %v2519_v18 = vrot.slane %v2420_v10, 2  ;;  %v5191_v63 = vpop.f32.mrb[115].mxu1  ;;  %v2536_v3 = vsel %vm1508_vm4, %v2517_v50, %v2518_v29 }
 0x3cc   : > { %v2585_v48 = vadd.f32 %v2536_v3, %v7139_v32 }
 0x3cd   : > { %5531 = vmatmul.mubr.msk.bf16.gmra.mrb[220].mxu0 %vm494_vm2, %v7125_v2  ;;  %5417 = vmatmul.mubr.msk.bf16.gmra.mrb[220].mxu1 %vm494_vm2, %v7142_v61  ;;  %v2535_v23 = vsel %vm1508_vm4, %v2518_v29, %v2519_v18  ;;  %v5679_v18 = vld [vmem:[%s5782_s28 + $0xa0] sm:$0xff]  }
 0x3ce   : > { %5534 = vmatprep.mubr.msk.bf16.mxu0 %vm5714_vm1, %v7987_v13  ;;  %5420 = vmatprep.mubr.msk.bf16.mxu1 %vm5714_vm1, %v7987_v13  ;;  %v2586_v20 = vadd.f32 %v2535_v23, %v7152_v4 }
 0x3d0   : > { %v2775_v7 = vpop.f32.mrb[116].mxu0  ;;  %v2425_v27 = vpop.f32.mrb[116].mxu1 }
 0x3d1   : > { %v7538_v41 = vadd.f32 %v2775_v7, %v2584_v1  ;;  %v5308_v2 = vpop.f32.mrb[117].mxu0  ;;  %v2520_v32 = vrot.slane %v2425_v27, 2  ;;  %v5194_v0 = vpop.f32.mrb[117].mxu1 }
 0x3d2   : > { %v2778_v37 = vpop.f32.mrb[118].mxu0  ;;  %v2428_v35 = vpop.f32.mrb[118].mxu1 }
 0x3d3   : > { %v5309_v25 = vpop.f32.mrb[119].mxu0  ;;  %v2521_v62 = vrot.slane %v2428_v35, 2  ;;  %v5195_v36 = vpop.f32.mrb[119].mxu1 }
 0x3d4   : > { %v5680_v25 = vld [vmem:[%s5782_s28 + $0xa8] sm:$0xff]  }
 0x3d5   : > { %5535 = vmatmul.mubr.msk.bf16.gmra.mrb[224].mxu0 %vm494_vm2, %v7142_v61  ;;  %5421 = vmatmul.mubr.msk.bf16.gmra.mrb[224].mxu1 %vm494_vm2, %v7158_v6  ;;  %v2534_v4 = vsel %vm1508_vm4, %v2520_v32, %v2521_v62 }
 0x3d6   : > { %5538 = vmatprep.mubr.msk.bf16.mxu0 %vm5714_vm1, %v7987_v13  ;;  %5424 = vmatprep.mubr.msk.bf16.mxu1 %vm5714_vm1, %v7987_v13  ;;  %v2587_v15 = vadd.f32 %v2534_v4, %v7168_v5 }
 0x3d8   : > { %v2782_v12 = vpop.f32.mrb[120].mxu0  ;;  %v2433_v1 = vpop.f32.mrb[120].mxu1 }
 0x3d9   : > { %v7551_v46 = vadd.f32 %v2782_v12, %v2585_v48  ;;  %v5312_v61 = vpop.f32.mrb[121].mxu0  ;;  %v2522_v33 = vrot.slane %v2433_v1, 2  ;;  %v5198_v50 = vpop.f32.mrb[121].mxu1 }
 0x3da   : > { %v2785_v53 = vpop.f32.mrb[122].mxu0  ;;  %v2436_v59 = vpop.f32.mrb[122].mxu1 }
 0x3db   : > { %v7553_v29 = vadd.f32 %v2785_v53, %v2586_v20  ;;  %v5313_v8 = vpop.f32.mrb[123].mxu0  ;;  %v5199_v10 = vpop.f32.mrb[123].mxu1  ;;  %v2533_v31 = vsel %vm1508_vm4, %v2521_v62, %v2522_v33  ;;  %v2523_v23 = vrot.slane %v2436_v59, 2 }
 0x3dc   : > { %v2588_v5 = vadd.f32 %v2533_v31, %v7175_v52  ;;  %v5681_v10 = vld [vmem:[%s5782_s28 + $0xb0] sm:$0xff]  }
 0x3dd   : > { %5539 = vmatmul.mubr.msk.bf16.gmra.mrb[228].mxu0 %vm494_vm2, %v7158_v6  ;;  %5425 = vmatmul.mubr.msk.bf16.gmra.mrb[228].mxu1 %vm494_vm2, %v5679_v18 }
 0x3de   : > { %5542 = vmatprep.mubr.msk.bf16.mxu0 %vm5714_vm1, %v7987_v13  ;;  %5428 = vmatprep.mubr.msk.bf16.mxu1 %vm5714_vm1, %v7987_v13 }
 0x3e0   : > { %v2790_v63 = vpop.f32.mrb[124].mxu0  ;;  %v2441_v3 = vpop.f32.mrb[124].mxu1 }
 0x3e1   : > { %v5316_v48 = vpop.f32.mrb[125].mxu0  ;;  %v2524_v20 = vrot.slane %v2441_v3, 2  ;;  %v5202_v7 = vpop.f32.mrb[125].mxu1 }
 0x3e2   : > { %v2792_v27 = vpop.f32.mrb[126].mxu0  ;;  %v2444_v6 = vpop.f32.mrb[126].mxu1 }
 0x3e3   : > { %v7566_v2 = vadd.f32 %v2792_v27, %v2587_v15  ;;  %v5317_v52 = vpop.f32.mrb[127].mxu0  ;;  %v2525_v32 = vrot.slane %v2444_v6, 2  ;;  %v5203_v0 = vpop.f32.mrb[127].mxu1  ;;  %v2532_v37 = vsel %vm1508_vm4, %v2523_v23, %v2524_v20 }
 0x3e4   : > { %v2589_v35 = vadd.f32 %v2532_v37, %v7189_v9  ;;  %v5682_v0 = vld [vmem:[%s5782_s28 + $0xb8] sm:$0xff]  }
 0x3e5   : > { %5543 = vmatmul.mubr.msk.bf16.gmra.mrb[232].mxu0 %vm494_vm2, %v5679_v18  ;;  %5429 = vmatmul.mubr.msk.bf16.gmra.mrb[232].mxu1 %vm494_vm2, %v5680_v25  ;;  %v2531_v62 = vsel %vm1508_vm4, %v2524_v20, %v2525_v32 }
 0x3e6   : > { %5546 = vmatprep.mubr.msk.bf16.mxu0 %vm5714_vm1, %v7987_v13  ;;  %5432 = vmatprep.mubr.msk.bf16.mxu1 %vm5714_vm1, %v7987_v13  ;;  %v2590_v36 = vadd.f32 %v2531_v62, %v7199_v60 }
 0x3e8   : > { %v2797_v4 = vpop.f32.mrb[128].mxu0  ;;  %v2449_v15 = vpop.f32.mrb[128].mxu1 }
 0x3e9   : > { %v7581_v12 = vadd.f32 %v2797_v4, %v2588_v5  ;;  %v5320_v9 = vpop.f32.mrb[129].mxu0  ;;  %v2526_v1 = vrot.slane %v2449_v15, 2  ;;  %v5206_v61 = vpop.f32.mrb[129].mxu1 }
 0x3ea   : > { %v2800_v33 = vpop.f32.mrb[130].mxu0  ;;  %v2452_v53 = vpop.f32.mrb[130].mxu1 }
 0x3eb   : > { %v5321_v50 = vpop.f32.mrb[131].mxu0  ;;  %v2527_v8 = vrot.slane %v2452_v53, 2  ;;  %v5207_v59 = vpop.f32.mrb[131].mxu1 }
 0x3ed   : > { %5547 = vmatmul.mubr.msk.bf16.gmra.mrb[236].mxu0 %vm494_vm2, %v5680_v25  ;;  %5433 = vmatmul.mubr.msk.bf16.gmra.mrb[236].mxu1 %vm494_vm2, %v5681_v10  ;;  %v2530_v60 = vsel %vm1508_vm4, %v2526_v1, %v2527_v8 }
 0x3ee   : > { %5550 = vmatprep.mubr.msk.bf16.mxu0 %vm5714_vm1, %v7987_v13  ;;  %5436 = vmatprep.mubr.msk.bf16.mxu1 %vm5714_vm1, %v7987_v13  ;;  %v2591_v31 = vadd.f32 %v2530_v60, %v7211_v42 }
 0x3f0   : > { %v2804_v5 = vpop.f32.mrb[132].mxu0  ;;  %v2457_v18 = vpop.f32.mrb[132].mxu1 }
 0x3f1   : > { %v7593_v63 = vadd.f32 %v2804_v5, %v2589_v35  ;;  %v5324_v3 = vpop.f32.mrb[133].mxu0  ;;  %v2528_v48 = vrot.slane %v2457_v18, 2  ;;  %v5210_v20 = vpop.f32.mrb[133].mxu1  ;;  %v5684_v5 = vld [vmem:[%s5782_s28 + $0xc8] sm:$0xff]  }
 0x3f2   : > { %v2807_v23 = vpop.f32.mrb[134].mxu0  ;;  %v2460_v6 = vpop.f32.mrb[134].mxu1 }
 0x3f3   : > { %v7595_v7 = vadd.f32 %v2807_v23, %v2590_v36  ;;  %v5325_v27 = vpop.f32.mrb[135].mxu0  ;;  %v5211_v52 = vpop.f32.mrb[135].mxu1  ;;  %v2529_v32 = vsel %vm1508_vm4, %v2527_v8, %v2528_v48 }
 0x3f4   : > { %v2592_v42 = vadd.f32 %v2529_v32, %v7217_v58  ;;  %v5683_v58 = vld [vmem:[%s5782_s28 + $0xc0] sm:$0xff]   ;;  %v5685_v32 = vld [vmem:[%s5782_s28 + $0xd0] sm:$0xff]  }
 0x3f5   : > { %5551 = vmatmul.mubr.msk.bf16.gmra.mrb[240].mxu0 %vm494_vm2, %v5681_v10  ;;  %5437 = vmatmul.mubr.msk.bf16.gmra.mrb[240].mxu1 %vm494_vm2, %v5682_v0 }
 0x3f6   : > { %5554 = vmatprep.mubr.msk.bf16.mxu0 %vm5714_vm1, %v7987_v13  ;;  %5440 = vmatprep.mubr.msk.bf16.mxu1 %vm5714_vm1, %v7987_v13 }
 0x3f8   : > { %v2812_v37 = vpop.f32.mrb[136].mxu0  ;;  %v2464_v25 = vpop.f32.mrb[136].mxu1 }
 0x3f9   : > { %v5328_v35 = vpop.f32.mrb[137].mxu0  ;;  %v5214_v36 = vpop.f32.mrb[137].mxu1 }
 0x3fa   : > { %v2814_v62 = vpop.f32.mrb[138].mxu0  ;;  %v2466_v9 = vpop.f32.mrb[138].mxu1 }
 0x3fb   : > { %v7607_v4 = vadd.f32 %v2814_v62, %v2591_v31  ;;  %v5329_v15 = vpop.f32.mrb[139].mxu0  ;;  %v5215_v1 = vpop.f32.mrb[139].mxu1  ;;  %v5686_v9 = vld [vmem:[%s5782_s28 + $0xd8] sm:$0xff]  }
 0x3fd   : > { %5555 = vmatmul.mubr.msk.bf16.gmra.mrb[244].mxu0 %vm494_vm2, %v5682_v0  ;;  %5441 = vmatmul.mubr.msk.bf16.gmra.mrb[244].mxu1 %vm494_vm2, %v5683_v58 }
 0x3fe   : > { %5558 = vmatprep.mubr.msk.bf16.mxu0 %vm5714_vm1, %v7987_v13  ;;  %5444 = vmatprep.mubr.msk.bf16.mxu1 %vm5714_vm1, %v7987_v13 }
 0x400   : > { %v2819_v61 = vpop.f32.mrb[140].mxu0  ;;  %v2470_v50 = vpop.f32.mrb[140].mxu1 }
 0x401   : > { %v7616_v33 = vadd.f32 %v2819_v61, %v2592_v42  ;;  %v5332_v53 = vpop.f32.mrb[141].mxu0  ;;  %v5218_v59 = vpop.f32.mrb[141].mxu1 }
 0x402   : > { %v2822_v8 = vpop.f32.mrb[142].mxu0  ;;  %v2472_v60 = vpop.f32.mrb[142].mxu1 }
 0x403   : > { %v5333_v10 = vpop.f32.mrb[143].mxu0  ;;  %v5219_v31 = vpop.f32.mrb[143].mxu1 }
 0x405   : > { %5559 = vmatmul.mubr.msk.bf16.gmra.mrb[248].mxu0 %vm494_vm2, %v5683_v58  ;;  %5445 = vmatmul.mubr.msk.bf16.gmra.mrb[248].mxu1 %vm494_vm2, %v5684_v5 }
 0x406   : > { %5562 = vmatprep.mubr.msk.bf16.mxu0 %vm5714_vm1, %v7987_v13  ;;  %5448 = vmatprep.mubr.msk.bf16.mxu1 %vm5714_vm1, %v7987_v13 }
 0x408   : > { %v2826_v18 = vpop.f32.mrb[144].mxu0  ;;  %v2476_v48 = vpop.f32.mrb[144].mxu1 }
 0x409   : > { %v5336_v3 = vpop.f32.mrb[145].mxu0  ;;  %v5222_v20 = vpop.f32.mrb[145].mxu1 }
 0x40a   : > { %v2828_v23 = vpop.f32.mrb[146].mxu0  ;;  %v2478_v6 = vpop.f32.mrb[146].mxu1 }
 0x40b   : > { %v5337_v27 = vpop.f32.mrb[147].mxu0  ;;  %v5223_v52 = vpop.f32.mrb[147].mxu1 }
 0x40d   : > { %5563 = vmatmul.mubr.msk.bf16.gmra.mrb[252].mxu0 %vm494_vm2, %v5684_v5  ;;  %5449 = vmatmul.mubr.msk.bf16.gmra.mrb[252].mxu1 %vm494_vm2, %v5685_v32 }
 0x40e   : > { %5566 = vmatprep.mubr.msk.bf16.mxu0 %vm5714_vm1, %v7987_v13  ;;  %5452 = vmatprep.mubr.msk.bf16.mxu1 %vm5714_vm1, %v7987_v13 }
 0x410   : > { %v2832_v42 = vpop.f32.mrb[148].mxu0  ;;  %v2908_v37 = vpop.f32.mrb[148].mxu1 }
 0x411   : > { %v5340_v0 = vpop.f32.mrb[149].mxu0  ;;  %v5346_v25 = vpop.f32.mrb[149].mxu1 }
 0x412   : > { %v2834_v35 = vpop.f32.mrb[150].mxu0  ;;  %v2910_v36 = vpop.f32.mrb[150].mxu1 }
 0x413   : > { %v5341_v62 = vpop.f32.mrb[151].mxu0  ;;  %v5347_v15 = vpop.f32.mrb[151].mxu1 }
 0x415   : > { %5567 = vmatmul.mubr.msk.bf16.gmra.mrb[0].mxu0 %vm494_vm2, %v5685_v32  ;;  %5453 = vmatmul.mubr.msk.bf16.gmra.mrb[0].mxu1 %vm494_vm2, %v5686_v9 }
 0x416   : > { %5570 = vmatprep.mubr.msk.bf16.mxu0 %vm5714_vm1, %v7987_v13  ;;  %5456 = vmatprep.mubr.msk.bf16.mxu1 %vm5714_vm1, %v7987_v13 }
 0x418   : > { %v3280_v1 = vpop.f32.mrb[152].mxu0  ;;  %v2914_v61 = vpop.f32.mrb[152].mxu1 }
 0x419   : > { %v5464_v58 = vpop.f32.mrb[153].mxu0  ;;  %v5350_v50 = vpop.f32.mrb[153].mxu1 }
 0x41a   : > { %v3282_v53 = vpop.f32.mrb[154].mxu0  ;;  %v2916_v59 = vpop.f32.mrb[154].mxu1 }
 0x41b   : > { %v5465_v8 = vpop.f32.mrb[155].mxu0  ;;  %v5351_v10 = vpop.f32.mrb[155].mxu1 }
 0x41d   : > { %5571 = vmatmul.mubr.msk.bf16.gmra.mrb[4].mxu0 %vm494_vm2, %v5686_v9  ;;  %5457 = vmatmul.mubr.msk.bf16.gmra.mrb[4].mxu1 %vm494_vm2, %v7262_v28 }
 0x41e   : > { %5574 = vmatprep.mubr.msk.bf16.mxu0 %vm5714_vm1, %v7987_v13 }
 0x420   : > { %v3286_v60 = vpop.f32.mrb[156].mxu0  ;;  %v2920_v5 = vpop.f32.mrb[156].mxu1 }
 0x421   : > { %v5468_v31 = vpop.f32.mrb[157].mxu0  ;;  %v5354_v3 = vpop.f32.mrb[157].mxu1 }
 0x422   : > { %v3288_v18 = vpop.f32.mrb[158].mxu0  ;;  %v2922_v23 = vpop.f32.mrb[158].mxu1 }
 0x423   : > { %v5469_v48 = vpop.f32.mrb[159].mxu0  ;;  %v5355_v20 = vpop.f32.mrb[159].mxu1 }
 0x425   : > { %5575 = vmatmul.mubr.msk.bf16.gmra.mrb[8].mxu0 %vm494_vm2, %v7262_v28 }
 0x428   : > { %v3292_v27 = vpop.f32.mrb[160].mxu0  ;;  %v2926_v6 = vpop.f32.mrb[160].mxu1 }
 0x429   : > { %v5472_v52 = vpop.f32.mrb[161].mxu0  ;;  %v3129_v32 = vrot.slane %v2926_v6, 1  ;;  %v5358_v42 = vpop.f32.mrb[161].mxu1 }
 0x42a   : > { %v3294_v0 = vpop.f32.mrb[162].mxu0  ;;  %v2929_v37 = vpop.f32.mrb[162].mxu1 }
 0x42b   : > { %v5473_v35 = vpop.f32.mrb[163].mxu0  ;;  %v3130_v13 = vrot.slane %v2929_v37, 1  ;;  %v5359_v25 = vpop.f32.mrb[163].mxu1 }
 0x42c   : > { %v7661_v25 = vld [vmem:[%s7959_s2] ss:$0 sm:$0xff] }
 0x42d   : > { %v3208_v62 = vsel %vm1135_vm3, %v3129_v32, %v3130_v13 }
 0x42e   : > { %v3209_v36 = vadd.f32 %v3208_v62, %v7287_v47 }
 0x430   : > { %v3298_v15 = vpop.f32.mrb[164].mxu0  ;;  %v2934_v9 = vpop.f32.mrb[164].mxu1 }
 0x431   : > { %v5476_v1 = vpop.f32.mrb[165].mxu0  ;;  %v3131_v58 = vrot.slane %v2934_v9, 1  ;;  %v5362_v61 = vpop.f32.mrb[165].mxu1  ;;  %v3501_v53 = vrot.slane %v3298_v15, 2 }
 0x432   : > { %v3301_v28 = vpop.f32.mrb[166].mxu0  ;;  %v2937_v59 = vpop.f32.mrb[166].mxu1 }
 0x433   : > { %v3502_v50 = vrot.slane %v3301_v28, 2  ;;  %v5477_v8 = vpop.f32.mrb[167].mxu0  ;;  %v3207_v10 = vsel %vm1135_vm3, %v3130_v13, %v3131_v58  ;;  %v5363_v60 = vpop.f32.mrb[167].mxu1  ;;  %v3132_v20 = vrot.slane %v2937_v59, 1  ;;  %v7671_v58 = vld [vmem:[%s7960_s3] ss:$0 sm:$0xff] }
 0x434   : > { %v3210_v31 = vadd.f32 %v3207_v10, %v7289_v57 }
 0x435   : > { %v3580_v5 = vsel %vm1508_vm4, %v3501_v53, %v3502_v50 }
 0x436   : > { %v3581_v47 = vadd.f32 %v3580_v5, %v3209_v36 }
 0x438   : > { %v3306_v18 = vpop.f32.mrb[168].mxu0  ;;  %v2942_v3 = vpop.f32.mrb[168].mxu1  ;;  %v3620_v9 = vmul.f32 %v7661_v25, %v3581_v47 }
 0x439   : > { %v3503_v48 = vrot.slane %v3306_v18, 2  ;;  %v5480_v23 = vpop.f32.mrb[169].mxu0  ;;  %v3133_v27 = vrot.slane %v2942_v3, 1  ;;  %v5366_v6 = vpop.f32.mrb[169].mxu1 }
 0x43a   : > { %v3309_v52 = vpop.f32.mrb[170].mxu0  ;;  %v2945_v42 = vpop.f32.mrb[170].mxu1  ;;  %v3659_v47 = vadd.f32 %v7671_v58, %v3620_v9 }
 0x43b   : > { %v3579_v32 = vsel %vm1508_vm4, %v3502_v50, %v3503_v48  ;;  %v5481_v0 = vpop.f32.mrb[171].mxu0  ;;  %v3206_v57 = vsel %vm1135_vm3, %v3132_v20, %v3133_v27  ;;  %v3134_v35 = vrot.slane %v2945_v42, 1  ;;  %v5367_v13 = vpop.f32.mrb[171].mxu1  ;;  %v3504_v28 = vrot.slane %v3309_v52, 2 }
 0x43c   : > { %v3582_v37 = vadd.f32 %v3579_v32, %v3210_v31  ;;  %v3211_v62 = vadd.f32 %v3206_v57, %v7302_v34  ;;  %v3691_v42 = vmax.f32 %v3659_v47, 0.0 }
 0x43d   : > { %v3205_v36 = vsel %vm1135_vm3, %v3133_v27, %v3134_v35 }
 0x43e   : > { %v3212_v15 = vadd.f32 %v3205_v36, %v7318_v54  ;;  %v3621_v8 = vmul.f32 %v7661_v25, %v3582_v37 }
 0x440   : > { %v3314_v1 = vpop.f32.mrb[172].mxu0  ;;  %v2950_v61 = vpop.f32.mrb[172].mxu1  ;;  %v3660_v20 = vadd.f32 %v7671_v58, %v3621_v8  ;;  %v3723_v8 = vsel %vm494_vm2, %v3691_v42, 0.0 }
 0x441   : > { %v3505_v53 = vrot.slane %v3314_v1, 2  ;;  %v5484_v50 = vpop.f32.mrb[173].mxu0  ;;  %v3135_v34 = vrot.slane %v2950_v61, 1  ;;  %v5370_v59 = vpop.f32.mrb[173].mxu1 }
 0x442   : > { %v3317_v10 = vpop.f32.mrb[174].mxu0  ;;  %v2953_v60 = vpop.f32.mrb[174].mxu1 }
 0x443   : > { %v3578_v54 = vsel %vm1508_vm4, %v3504_v28, %v3505_v53  ;;  %v3506_v31 = vrot.slane %v3317_v10, 2  ;;  %v5485_v5 = vpop.f32.mrb[175].mxu0  ;;  %v3136_v3 = vrot.slane %v2953_v60, 1  ;;  %v5371_v48 = vpop.f32.mrb[175].mxu1 }
 0x444   : > { %v3583_v18 = vadd.f32 %v3578_v54, %v3211_v62  ;;  %v3692_v62 = vmax.f32 %v3660_v20, 0.0 }
 0x445   : > { %v3577_v23 = vsel %vm1508_vm4, %v3505_v53, %v3506_v31  ;;  %v3204_v6 = vsel %vm1135_vm3, %v3135_v34, %v3136_v3 }
 0x446   : > { %v3622_v27 = vmul.f32 %v7661_v25, %v3583_v18  ;;  %v3584_v52 = vadd.f32 %v3577_v23, %v3212_v15  ;;  %v3213_v32 = vadd.f32 %v3204_v6, %v7331_v30  ;;  %v3726_v47 = vsel %vm494_vm2, %v3692_v62, 0.0 }
 0x448   : > { %v3661_v0 = vadd.f32 %v7671_v58, %v3622_v27  ;;  %v3623_v57 = vmul.f32 %v7661_v25, %v3584_v52  ;;  %v3322_v37 = vpop.f32.mrb[176].mxu0  ;;  %v2958_v35 = vpop.f32.mrb[176].mxu1 }
 0x449   : > { %v5488_v13 = vpop.f32.mrb[177].mxu0  ;;  %v3137_v1 = vrot.slane %v2958_v35, 1  ;;  %v5374_v61 = vpop.f32.mrb[177].mxu1  ;;  %v3507_v53 = vrot.slane %v3322_v37, 2 }
 0x44a   : > { %v3693_v36 = vmax.f32 %v3661_v0, 0.0  ;;  %v3662_v9 = vadd.f32 %v7671_v58, %v3623_v57  ;;  %v3325_v28 = vpop.f32.mrb[178].mxu0  ;;  %v2961_v30 = vpop.f32.mrb[178].mxu1 }
 0x44b   : > { %v3508_v15 = vrot.slane %v3325_v28, 2  ;;  %v5489_v50 = vpop.f32.mrb[179].mxu0  ;;  %v3203_v10 = vsel %vm1135_vm3, %v3136_v3, %v3137_v1  ;;  %v5375_v54 = vpop.f32.mrb[179].mxu1  ;;  %v3138_v42 = vrot.slane %v2961_v30, 1 }
 0x44c   : > { %v3724_v34 = vsel %vm494_vm2, %v3693_v36, 0.0  ;;  %v3694_v59 = vmax.f32 %v3662_v9, 0.0  ;;  %v3214_v31 = vadd.f32 %v3203_v10, %v7333_v45 }
 0x44d   : > { %v3725_v60 = vadd.f32 %v3724_v34, %v3723_v8  ;;  %v3576_v5 = vsel %vm1508_vm4, %v3507_v53, %v3508_v15 }
 0x44e   : > { %v3727_v18 = vsel %vm494_vm2, %v3694_v59, 0.0  ;;  %v3585_v48 = vadd.f32 %v3576_v5, %v3213_v32 }
 0x44f   : > { %v3771_v3 = vmul.f32 0.5, %v3725_v60  ;;  %v3728_v23 = vadd.f32 %v3727_v18, %v3726_v47 }
 0x450   : > { %v3330_v20 = vpop.f32.mrb[180].mxu0  ;;  %v2966_v27 = vpop.f32.mrb[180].mxu1  ;;  %v3624_v50 = vmul.f32 %v7661_v25, %v3585_v48 }
 0x451   : > { %3787 = vst.msk [vmem:[%s7699_s25] sm:$0xff] %vm494_vm2, %v3771_v3  ;;  %v3772_v45 = vmul.f32 0.5, %v3728_v23  ;;  %v3509_v6 = vrot.slane %v3330_v20, 2  ;;  %v5492_v52 = vpop.f32.mrb[181].mxu0  ;;  %v3139_v0 = vrot.slane %v2966_v27, 1  ;;  %v5378_v57 = vpop.f32.mrb[181].mxu1 }
 0x452   : > { %v3333_v37 = vpop.f32.mrb[182].mxu0  ;;  %v2969_v13 = vpop.f32.mrb[182].mxu1 }
 0x453   : > { %3788 = vst.msk [vmem:[%s7699_s25 + $0x8] sm:$0xff] %vm494_vm2, %v3772_v45  ;;  %v3575_v35 = vsel %vm1508_vm4, %v3508_v15, %v3509_v6  ;;  %v5493_v32 = vpop.f32.mrb[183].mxu0  ;;  %v3202_v62 = vsel %vm1135_vm3, %v3138_v42, %v3139_v0  ;;  %v3140_v9 = vrot.slane %v2969_v13, 1  ;;  %v5379_v1 = vpop.f32.mrb[183].mxu1  ;;  %v3510_v8 = vrot.slane %v3333_v37, 2 }
 0x454   : > { %v3586_v36 = vadd.f32 %v3575_v35, %v3214_v31  ;;  %v3215_v28 = vadd.f32 %v3202_v62, %v7346_v43 }
 0x455   : > { %v3201_v61 = vsel %vm1135_vm3, %v3139_v0, %v3140_v9 }
 0x456   : > { %v3216_v53 = vadd.f32 %v3201_v61, %v7362_v55  ;;  %v3625_v10 = vmul.f32 %v7661_v25, %v3586_v36  ;;  %v3663_v55 = vadd.f32 %v7671_v58, %v3624_v50 }
 0x458   : > { %v3338_v30 = vpop.f32.mrb[184].mxu0  ;;  %v2974_v15 = vpop.f32.mrb[184].mxu1  ;;  %v3664_v45 = vadd.f32 %v7671_v58, %v3625_v10  ;;  %v3695_v0 = vmax.f32 %v3663_v55, 0.0 }
 0x459   : > { %v3511_v34 = vrot.slane %v3338_v30, 2  ;;  %v5496_v59 = vpop.f32.mrb[185].mxu0  ;;  %v3141_v54 = vrot.slane %v2974_v15, 1  ;;  %v5382_v60 = vpop.f32.mrb[185].mxu1 }
 0x45a   : > { %v3341_v31 = vpop.f32.mrb[186].mxu0  ;;  %v2977_v5 = vpop.f32.mrb[186].mxu1  ;;  %v3696_v62 = vmax.f32 %v3664_v45, 0.0 }
 0x45b   : > { %v3574_v43 = vsel %vm1508_vm4, %v3510_v8, %v3511_v34  ;;  %v3512_v47 = vrot.slane %v3341_v31, 2  ;;  %v5497_v18 = vpop.f32.mrb[187].mxu0  ;;  %v3142_v48 = vrot.slane %v2977_v5, 1  ;;  %v5383_v23 = vpop.f32.mrb[187].mxu1  ;;  %v3729_v8 = vsel %vm494_vm2, %v3695_v0, 0.0 }
 0x45c   : > { %v3587_v3 = vadd.f32 %v3574_v43, %v3215_v28  ;;  %v3732_v43 = vsel %vm494_vm2, %v3696_v62, 0.0 }
 0x45d   : > { %v3573_v20 = vsel %vm1508_vm4, %v3511_v34, %v3512_v47  ;;  %v3200_v6 = vsel %vm1135_vm3, %v3141_v54, %v3142_v48 }
 0x45e   : > { %v3626_v27 = vmul.f32 %v7661_v25, %v3587_v3  ;;  %v3588_v52 = vadd.f32 %v3573_v20, %v3216_v53  ;;  %v3217_v42 = vadd.f32 %v3200_v6, %v7375_v24 }
 0x460   : > { %v3665_v57 = vadd.f32 %v7671_v58, %v3626_v27  ;;  %v3627_v37 = vmul.f32 %v7661_v25, %v3588_v52  ;;  %v3346_v35 = vpop.f32.mrb[188].mxu0  ;;  %v2982_v13 = vpop.f32.mrb[188].mxu1 }
 0x461   : > { %v5500_v32 = vpop.f32.mrb[189].mxu0  ;;  %v3143_v1 = vrot.slane %v2982_v13, 1  ;;  %v5386_v61 = vpop.f32.mrb[189].mxu1  ;;  %v3513_v50 = vrot.slane %v3346_v35, 2 }
 0x462   : > { %v3697_v36 = vmax.f32 %v3665_v57, 0.0  ;;  %v3666_v9 = vadd.f32 %v7671_v58, %v3627_v37  ;;  %v3349_v28 = vpop.f32.mrb[190].mxu0  ;;  %v2985_v24 = vpop.f32.mrb[190].mxu1 }
 0x463   : > { %v3514_v30 = vrot.slane %v3349_v28, 2  ;;  %v5501_v53 = vpop.f32.mrb[191].mxu0  ;;  %v3199_v59 = vsel %vm1135_vm3, %v3142_v48, %v3143_v1  ;;  %v5387_v10 = vpop.f32.mrb[191].mxu1  ;;  %v3144_v27 = vrot.slane %v2985_v24, 1 }
 0x464   : > { %v3730_v15 = vsel %vm494_vm2, %v3697_v36, 0.0  ;;  %v3698_v34 = vmax.f32 %v3666_v9, 0.0  ;;  %v3218_v60 = vadd.f32 %v3199_v59, %v7377_v51 }
 0x465   : > { %v3731_v54 = vadd.f32 %v3730_v15, %v3729_v8  ;;  %v3572_v31 = vsel %vm1508_vm4, %v3513_v50, %v3514_v30 }
 0x466   : > { %v3733_v5 = vsel %vm494_vm2, %v3698_v34, 0.0  ;;  %v3589_v47 = vadd.f32 %v3572_v31, %v3217_v42 }
 0x467   : > { %v3773_v18 = vmul.f32 0.5, %v3731_v54  ;;  %v3734_v55 = vadd.f32 %v3733_v5, %v3732_v43 }
 0x468   : > { %v3354_v3 = vpop.f32.mrb[192].mxu0  ;;  %v2990_v48 = vpop.f32.mrb[192].mxu1  ;;  %v3628_v1 = vmul.f32 %v7661_v25, %v3589_v47 }
 0x469   : > { %3789 = vst.msk [vmem:[%s7699_s25 + $0x10] sm:$0xff] %vm494_vm2, %v3773_v18  ;;  %v3774_v23 = vmul.f32 0.5, %v3734_v55  ;;  %v3515_v20 = vrot.slane %v3354_v3, 2  ;;  %v5504_v45 = vpop.f32.mrb[193].mxu0  ;;  %v3145_v51 = vrot.slane %v2990_v48, 1  ;;  %v5390_v6 = vpop.f32.mrb[193].mxu1 }
 0x46a   : > { %v3357_v52 = vpop.f32.mrb[194].mxu0  ;;  %v2993_v57 = vpop.f32.mrb[194].mxu1 }
 0x46b   : > { %3790 = vst.msk [vmem:[%s7699_s25 + $0x18] sm:$0xff] %vm494_vm2, %v3774_v23  ;;  %v3571_v0 = vsel %vm1508_vm4, %v3514_v30, %v3515_v20  ;;  %v5505_v42 = vpop.f32.mrb[195].mxu0  ;;  %v3198_v37 = vsel %vm1135_vm3, %v3144_v27, %v3145_v51  ;;  %v3146_v13 = vrot.slane %v2993_v57, 1  ;;  %v5391_v32 = vpop.f32.mrb[195].mxu1  ;;  %v3516_v61 = vrot.slane %v3357_v52, 2 }
 0x46c   : > { %v3590_v35 = vadd.f32 %v3571_v0, %v3218_v60  ;;  %v3219_v62 = vadd.f32 %v3198_v37, %v7390_v49 }
 0x46d   : > { %v3197_v36 = vsel %vm1135_vm3, %v3145_v51, %v3146_v13 }
 0x46e   : > { %v3220_v9 = vadd.f32 %v3197_v36, %v7406_v16  ;;  %v3629_v24 = vmul.f32 %v7661_v25, %v3590_v35  ;;  %v3667_v16 = vadd.f32 %v7671_v58, %v3628_v1 }
 0x470   : > { %v3362_v28 = vpop.f32.mrb[196].mxu0  ;;  %v2998_v50 = vpop.f32.mrb[196].mxu1  ;;  %v3668_v47 = vadd.f32 %v7671_v58, %v3629_v24  ;;  %v3699_v48 = vmax.f32 %v3667_v16, 0.0 }
 0x471   : > { %v3517_v30 = vrot.slane %v3362_v28, 2  ;;  %v5508_v53 = vpop.f32.mrb[197].mxu0  ;;  %v3147_v8 = vrot.slane %v2998_v50, 1  ;;  %v5394_v15 = vpop.f32.mrb[197].mxu1 }
 0x472   : > { %v3365_v34 = vpop.f32.mrb[198].mxu0  ;;  %v3001_v59 = vpop.f32.mrb[198].mxu1  ;;  %v3700_v52 = vmax.f32 %v3668_v47, 0.0  ;;  %v3735_v36 = vsel %vm494_vm2, %v3699_v48, 0.0 }
 0x473   : > { %v3570_v49 = vsel %vm1508_vm4, %v3516_v61, %v3517_v30  ;;  %v3518_v10 = vrot.slane %v3365_v34, 2  ;;  %v5509_v54 = vpop.f32.mrb[199].mxu0  ;;  %v3148_v31 = vrot.slane %v3001_v59, 1  ;;  %v5395_v43 = vpop.f32.mrb[199].mxu1 }
 0x474   : > { %v3591_v60 = vadd.f32 %v3570_v49, %v3219_v62  ;;  %v3738_v24 = vsel %vm494_vm2, %v3700_v52, 0.0 }
 0x475   : > { %v3569_v5 = vsel %vm1508_vm4, %v3517_v30, %v3518_v10  ;;  %v3196_v55 = vsel %vm1135_vm3, %v3147_v8, %v3148_v31 }
 0x476   : > { %v3630_v18 = vmul.f32 %v7661_v25, %v3591_v60  ;;  %v3592_v3 = vadd.f32 %v3569_v5, %v3220_v9  ;;  %v3221_v23 = vadd.f32 %v3196_v55, %v7419_v44 }
 0x478   : > { %v3669_v20 = vadd.f32 %v7671_v58, %v3630_v18  ;;  %v3631_v45 = vmul.f32 %v7661_v25, %v3592_v3  ;;  %v3370_v27 = vpop.f32.mrb[200].mxu0  ;;  %v3006_v51 = vpop.f32.mrb[200].mxu1 }
 0x479   : > { %v5512_v6 = vpop.f32.mrb[201].mxu0  ;;  %v3149_v42 = vrot.slane %v3006_v51, 1  ;;  %v5398_v35 = vpop.f32.mrb[201].mxu1  ;;  %v3519_v13 = vrot.slane %v3370_v27, 2 }
 0x47a   : > { %v3701_v0 = vmax.f32 %v3669_v20, 0.0  ;;  %v3670_v57 = vadd.f32 %v7671_v58, %v3631_v45  ;;  %v3373_v37 = vpop.f32.mrb[202].mxu0  ;;  %v3009_v44 = vpop.f32.mrb[202].mxu1 }
 0x47b   : > { %v3520_v32 = vrot.slane %v3373_v37, 2  ;;  %v5513_v62 = vpop.f32.mrb[203].mxu0  ;;  %v3195_v28 = vsel %vm1135_vm3, %v3148_v31, %v3149_v42  ;;  %v5399_v61 = vpop.f32.mrb[203].mxu1  ;;  %v3150_v31 = vrot.slane %v3009_v44, 1 }
 0x47c   : > { %v3736_v9 = vsel %vm494_vm2, %v3701_v0, 0.0  ;;  %v3702_v1 = vmax.f32 %v3670_v57, 0.0  ;;  %v3222_v30 = vadd.f32 %v3195_v28, %v7421_v40 }
 0x47d   : > { %v3737_v50 = vadd.f32 %v3736_v9, %v3735_v36  ;;  %v3568_v53 = vsel %vm1508_vm4, %v3519_v13, %v3520_v32 }
 0x47e   : > { %v3739_v8 = vsel %vm494_vm2, %v3702_v1, 0.0  ;;  %v3593_v15 = vadd.f32 %v3568_v53, %v3221_v23 }
 0x47f   : > { %v3775_v34 = vmul.f32 0.5, %v3737_v50  ;;  %v3740_v49 = vadd.f32 %v3739_v8, %v3738_v24 }
 0x480   : > { %v3378_v59 = vpop.f32.mrb[204].mxu0  ;;  %v3014_v54 = vpop.f32.mrb[204].mxu1  ;;  %v3632_v6 = vmul.f32 %v7661_v25, %v3593_v15 }
 0x481   : > { %3791 = vst.msk [vmem:[%s7699_s25 + $0x20] sm:$0xff] %vm494_vm2, %v3775_v34  ;;  %v3776_v10 = vmul.f32 0.5, %v3740_v49  ;;  %v3521_v16 = vrot.slane %v3378_v59, 2  ;;  %v5516_v60 = vpop.f32.mrb[205].mxu0  ;;  %v3151_v40 = vrot.slane %v3014_v54, 1  ;;  %v5402_v43 = vpop.f32.mrb[205].mxu1 }
 0x482   : > { %v3381_v5 = vpop.f32.mrb[206].mxu0  ;;  %v3017_v18 = vpop.f32.mrb[206].mxu1 }
 0x483   : > { %3792 = vst.msk [vmem:[%s7699_s25 + $0x28] sm:$0xff] %vm494_vm2, %v3776_v10  ;;  %v3567_v47 = vsel %vm1508_vm4, %v3520_v32, %v3521_v16  ;;  %v5517_v55 = vpop.f32.mrb[207].mxu0  ;;  %v3194_v3 = vsel %vm1135_vm3, %v3150_v31, %v3151_v40  ;;  %v3152_v48 = vrot.slane %v3017_v18, 1  ;;  %v5403_v20 = vpop.f32.mrb[207].mxu1  ;;  %v3522_v0 = vrot.slane %v3381_v5, 2 }
 0x484   : > { %v3594_v23 = vadd.f32 %v3567_v47, %v3222_v30  ;;  %v3223_v45 = vadd.f32 %v3194_v3, %v7434_v17 }
 0x485   : > { %v3193_v27 = vsel %vm1135_vm3, %v3151_v40, %v3152_v48 }
 0x486   : > { %v3224_v51 = vadd.f32 %v3193_v27, %v7450_v19  ;;  %v3633_v35 = vmul.f32 %v7661_v25, %v3594_v23  ;;  %v3671_v19 = vadd.f32 %v7671_v58, %v3632_v6 }
 0x488   : > { %v3386_v52 = vpop.f32.mrb[208].mxu0  ;;  %v3022_v57 = vpop.f32.mrb[208].mxu1  ;;  %v3672_v30 = vadd.f32 %v7671_v58, %v3633_v35  ;;  %v3703_v34 = vmax.f32 %v3671_v19, 0.0 }
 0x489   : > { %v3523_v42 = vrot.slane %v3386_v52, 2  ;;  %v5520_v37 = vpop.f32.mrb[209].mxu0  ;;  %v3153_v13 = vrot.slane %v3022_v57, 1  ;;  %v5406_v32 = vpop.f32.mrb[209].mxu1 }
 0x48a   : > { %v3389_v62 = vpop.f32.mrb[210].mxu0  ;;  %v3025_v44 = vpop.f32.mrb[210].mxu1  ;;  %v3704_v60 = vmax.f32 %v3672_v30, 0.0  ;;  %v3741_v23 = vsel %vm494_vm2, %v3703_v34, 0.0 }
 0x48b   : > { %v3566_v17 = vsel %vm1508_vm4, %v3522_v0, %v3523_v42  ;;  %v3524_v36 = vrot.slane %v3389_v62, 2  ;;  %v5521_v9 = vpop.f32.mrb[211].mxu0  ;;  %v3154_v28 = vrot.slane %v3025_v44, 1  ;;  %v5407_v61 = vpop.f32.mrb[211].mxu1 }
 0x48c   : > { %v3595_v1 = vadd.f32 %v3566_v17, %v3223_v45  ;;  %v3744_v0 = vsel %vm494_vm2, %v3704_v60, 0.0 }
 0x48d   : > { %v3565_v50 = vsel %vm1508_vm4, %v3523_v42, %v3524_v36  ;;  %v3192_v24 = vsel %vm1135_vm3, %v3153_v13, %v3154_v28 }
 0x48e   : > { %v3634_v53 = vmul.f32 %v7661_v25, %v3595_v1  ;;  %v3596_v8 = vadd.f32 %v3565_v50, %v3224_v51  ;;  %v3225_v15 = vadd.f32 %v3192_v24, %v7463_v38 }
 0x490   : > { %v3673_v49 = vadd.f32 %v7671_v58, %v3634_v53  ;;  %v3635_v59 = vmul.f32 %v7661_v25, %v3596_v8  ;;  %v3394_v10 = vpop.f32.mrb[212].mxu0  ;;  %v3030_v54 = vpop.f32.mrb[212].mxu1 }
 0x491   : > { %v5524_v16 = vpop.f32.mrb[213].mxu0  ;;  %v3155_v43 = vrot.slane %v3030_v54, 1  ;;  %v5410_v47 = vpop.f32.mrb[213].mxu1  ;;  %v3525_v18 = vrot.slane %v3394_v10, 2 }
 0x492   : > { %v3705_v31 = vmax.f32 %v3673_v49, 0.0  ;;  %v3674_v40 = vadd.f32 %v7671_v58, %v3635_v59  ;;  %v3397_v5 = vpop.f32.mrb[214].mxu0  ;;  %v3033_v38 = vpop.f32.mrb[214].mxu1 }
 0x493   : > { %v3526_v55 = vrot.slane %v3397_v5, 2  ;;  %v5525_v3 = vpop.f32.mrb[215].mxu0  ;;  %v3191_v45 = vsel %vm1135_vm3, %v3154_v28, %v3155_v43  ;;  %v5411_v27 = vpop.f32.mrb[215].mxu1  ;;  %v3156_v36 = vrot.slane %v3033_v38, 1 }
 0x494   : > { %v3742_v48 = vsel %vm494_vm2, %v3705_v31, 0.0  ;;  %v3706_v20 = vmax.f32 %v3674_v40, 0.0  ;;  %v3226_v6 = vadd.f32 %v3191_v45, %v7465_v14 }
 0x495   : > { %v3743_v51 = vadd.f32 %v3742_v48, %v3741_v23  ;;  %v3564_v52 = vsel %vm1508_vm4, %v3525_v18, %v3526_v55 }
 0x496   : > { %v3745_v57 = vsel %vm494_vm2, %v3706_v20, 0.0  ;;  %v3597_v42 = vadd.f32 %v3564_v52, %v3225_v15 }
 0x497   : > { %v3777_v37 = vmul.f32 0.5, %v3743_v51  ;;  %v3746_v35 = vadd.f32 %v3745_v57, %v3744_v0 }
 0x498   : > { %v3402_v13 = vpop.f32.mrb[216].mxu0  ;;  %v3038_v62 = vpop.f32.mrb[216].mxu1  ;;  %v3636_v49 = vmul.f32 %v7661_v25, %v3597_v42 }
 0x499   : > { %3793 = vst.msk [vmem:[%s7699_s25 + $0x30] sm:$0xff] %vm494_vm2, %v3777_v37  ;;  %v3778_v32 = vmul.f32 0.5, %v3746_v35  ;;  %v3527_v17 = vrot.slane %v3402_v13, 2  ;;  %v5528_v44 = vpop.f32.mrb[217].mxu0  ;;  %v3157_v14 = vrot.slane %v3038_v62, 1  ;;  %v5414_v9 = vpop.f32.mrb[217].mxu1 }
 0x49a   : > { %v3405_v19 = vpop.f32.mrb[218].mxu0  ;;  %v3041_v28 = vpop.f32.mrb[218].mxu1 }
 0x49b   : > { %3794 = vst.msk [vmem:[%s7699_s25 + $0x38] sm:$0xff] %vm494_vm2, %v3778_v32  ;;  %v3563_v1 = vsel %vm1508_vm4, %v3526_v55, %v3527_v17  ;;  %v5529_v61 = vpop.f32.mrb[219].mxu0  ;;  %v3190_v50 = vsel %vm1135_vm3, %v3156_v36, %v3157_v14  ;;  %v3158_v53 = vrot.slane %v3041_v28, 1  ;;  %v5415_v24 = vpop.f32.mrb[219].mxu1  ;;  %v3528_v10 = vrot.slane %v3405_v19, 2 }
 0x49c   : > { %v3598_v30 = vadd.f32 %v3563_v1, %v3226_v6  ;;  %v3227_v8 = vadd.f32 %v3190_v50, %v7478_v11 }
 0x49d   : > { %v3189_v15 = vsel %vm1135_vm3, %v3157_v14, %v3158_v53 }
 0x49e   : > { %v3228_v34 = vadd.f32 %v3189_v15, %v7494_v22  ;;  %v3637_v31 = vmul.f32 %v7661_v25, %v3598_v30  ;;  %v3675_v22 = vadd.f32 %v7671_v58, %v3636_v49 }
 0x4a0   : > { %v3410_v59 = vpop.f32.mrb[220].mxu0  ;;  %v3046_v54 = vpop.f32.mrb[220].mxu1  ;;  %v3676_v20 = vadd.f32 %v7671_v58, %v3637_v31  ;;  %v3707_v52 = vmax.f32 %v3675_v22, 0.0 }
 0x4a1   : > { %v3529_v16 = vrot.slane %v3410_v59, 2  ;;  %v5532_v60 = vpop.f32.mrb[221].mxu0  ;;  %v3159_v40 = vrot.slane %v3046_v54, 1  ;;  %v5418_v43 = vpop.f32.mrb[221].mxu1 }
 0x4a2   : > { %v3413_v5 = vpop.f32.mrb[222].mxu0  ;;  %v3049_v47 = vpop.f32.mrb[222].mxu1  ;;  %v3708_v13 = vmax.f32 %v3676_v20, 0.0  ;;  %v3747_v1 = vsel %vm494_vm2, %v3707_v52, 0.0 }
 0x4a3   : > { %v3562_v11 = vsel %vm1508_vm4, %v3528_v10, %v3529_v16  ;;  %v3530_v18 = vrot.slane %v3413_v5, 2  ;;  %v5533_v55 = vpop.f32.mrb[223].mxu0  ;;  %v3160_v38 = vrot.slane %v3049_v47, 1  ;;  %v5419_v23 = vpop.f32.mrb[223].mxu1 }
 0x4a4   : > { %v3599_v3 = vadd.f32 %v3562_v11, %v3227_v8  ;;  %v3750_v15 = vsel %vm494_vm2, %v3708_v13, 0.0 }
 0x4a5   : > { %v3561_v48 = vsel %vm1508_vm4, %v3529_v16, %v3530_v18  ;;  %v3188_v27 = vsel %vm1135_vm3, %v3159_v40, %v3160_v38 }
 0x4a6   : > { %v3638_v45 = vmul.f32 %v7661_v25, %v3599_v3  ;;  %v3600_v51 = vadd.f32 %v3561_v48, %v3228_v34  ;;  %v3229_v6 = vadd.f32 %v3188_v27, %v7507_v21 }
 0x4a8   : > { %v3677_v0 = vadd.f32 %v7671_v58, %v3638_v45  ;;  %v3639_v57 = vmul.f32 %v7661_v25, %v3600_v51  ;;  %v3418_v42 = vpop.f32.mrb[224].mxu0  ;;  %v3054_v37 = vpop.f32.mrb[224].mxu1 }
 0x4a9   : > { %v5536_v35 = vpop.f32.mrb[225].mxu0  ;;  %v3161_v17 = vrot.slane %v3054_v37, 1  ;;  %v5422_v36 = vpop.f32.mrb[225].mxu1  ;;  %v3531_v14 = vrot.slane %v3418_v42, 2 }
 0x4aa   : > { %v3709_v32 = vmax.f32 %v3677_v0, 0.0  ;;  %v3678_v62 = vadd.f32 %v7671_v58, %v3639_v57  ;;  %v3421_v44 = vpop.f32.mrb[226].mxu0  ;;  %v3057_v21 = vpop.f32.mrb[226].mxu1 }
 0x4ab   : > { %v3532_v9 = vrot.slane %v3421_v44, 2  ;;  %v5537_v19 = vpop.f32.mrb[227].mxu0  ;;  %v3187_v50 = vsel %vm1135_vm3, %v3160_v38, %v3161_v17  ;;  %v5423_v30 = vpop.f32.mrb[227].mxu1  ;;  %v3162_v43 = vrot.slane %v3057_v21, 1 }
 0x4ac   : > { %v3748_v28 = vsel %vm494_vm2, %v3709_v32, 0.0  ;;  %v3710_v61 = vmax.f32 %v3678_v62, 0.0  ;;  %v3230_v24 = vadd.f32 %v3187_v50, %v7509_v39 }
 0x4ad   : > { %v3749_v53 = vadd.f32 %v3748_v28, %v3747_v1  ;;  %v3560_v8 = vsel %vm1508_vm4, %v3531_v14, %v3532_v9 }
 0x4ae   : > { %v3751_v34 = vsel %vm494_vm2, %v3710_v61, 0.0  ;;  %v3601_v49 = vadd.f32 %v3560_v8, %v3229_v6 }
 0x4af   : > { %v3779_v59 = vmul.f32 0.5, %v3749_v53  ;;  %v3752_v10 = vadd.f32 %v3751_v34, %v3750_v15 }
 0x4b0   : > { %v3426_v54 = vpop.f32.mrb[228].mxu0  ;;  %v3062_v60 = vpop.f32.mrb[228].mxu1  ;;  %v3640_v27 = vmul.f32 %v7661_v25, %v3601_v49 }
 0x4b1   : > { %3795 = vst.msk [vmem:[%s7699_s25 + $0x40] sm:$0xff] %vm494_vm2, %v3779_v59  ;;  %v3780_v16 = vmul.f32 0.5, %v3752_v10  ;;  %v3533_v31 = vrot.slane %v3426_v54, 2  ;;  %v5540_v40 = vpop.f32.mrb[229].mxu0  ;;  %v3163_v39 = vrot.slane %v3062_v60, 1  ;;  %v5426_v5 = vpop.f32.mrb[229].mxu1 }
 0x4b2   : > { %v3429_v11 = vpop.f32.mrb[230].mxu0  ;;  %v3065_v18 = vpop.f32.mrb[230].mxu1 }
 0x4b3   : > { %3796 = vst.msk [vmem:[%s7699_s25 + $0x48] sm:$0xff] %vm494_vm2, %v3780_v16  ;;  %v3559_v47 = vsel %vm1508_vm4, %v3532_v9, %v3533_v31  ;;  %v5541_v55 = vpop.f32.mrb[231].mxu0  ;;  %v3186_v22 = vsel %vm1135_vm3, %v3162_v43, %v3163_v39  ;;  %v3164_v38 = vrot.slane %v3065_v18, 1  ;;  %v5427_v23 = vpop.f32.mrb[231].mxu1  ;;  %v3534_v6 = vrot.slane %v3429_v11, 2 }
 0x4b4   : > { %v3602_v3 = vadd.f32 %v3559_v47, %v3230_v24  ;;  %v3231_v48 = vadd.f32 %v3186_v22, %v7522_v56 }
 0x4b5   : > { %v3185_v20 = vsel %vm1135_vm3, %v3163_v39, %v3164_v38 }
 0x4b6   : > { %v3232_v45 = vadd.f32 %v3185_v20, %v7538_v41  ;;  %v3641_v42 = vmul.f32 %v7661_v25, %v3602_v3  ;;  %v3679_v41 = vadd.f32 %v7671_v58, %v3640_v27 }
 0x4b8   : > { %v3434_v51 = vpop.f32.mrb[232].mxu0  ;;  %v3070_v52 = vpop.f32.mrb[232].mxu1  ;;  %v3680_v19 = vadd.f32 %v7671_v58, %v3641_v42  ;;  %v3711_v50 = vmax.f32 %v3679_v41, 0.0 }
 0x4b9   : > { %v3535_v0 = vrot.slane %v3434_v51, 2  ;;  %v5544_v57 = vpop.f32.mrb[233].mxu0  ;;  %v3165_v37 = vrot.slane %v3070_v52, 1  ;;  %v5430_v35 = vpop.f32.mrb[233].mxu1 }
 0x4ba   : > { %v3437_v13 = vpop.f32.mrb[234].mxu0  ;;  %v3073_v32 = vpop.f32.mrb[234].mxu1  ;;  %v3712_v34 = vmax.f32 %v3680_v19, 0.0  ;;  %v3753_v43 = vsel %vm494_vm2, %v3711_v50, 0.0 }
 0x4bb   : > { %v3558_v56 = vsel %vm1508_vm4, %v3534_v6, %v3535_v0  ;;  %v3536_v62 = vrot.slane %v3437_v13, 2  ;;  %v5545_v17 = vpop.f32.mrb[235].mxu0  ;;  %v3166_v36 = vrot.slane %v3073_v32, 1  ;;  %v5431_v14 = vpop.f32.mrb[235].mxu1 }
 0x4bc   : > { %v3603_v44 = vadd.f32 %v3558_v56, %v3231_v48  ;;  %v3756_v3 = vsel %vm494_vm2, %v3712_v34, 0.0 }
 0x4bd   : > { %v3557_v9 = vsel %vm1508_vm4, %v3535_v0, %v3536_v62  ;;  %v3184_v1 = vsel %vm1135_vm3, %v3165_v37, %v3166_v36 }
 0x4be   : > { %v3642_v21 = vmul.f32 %v7661_v25, %v3603_v44  ;;  %v3604_v28 = vadd.f32 %v3557_v9, %v3232_v45  ;;  %v3233_v61 = vadd.f32 %v3184_v1, %v7551_v46 }
 0x4c0   : > { %v3681_v30 = vadd.f32 %v7671_v58, %v3642_v21  ;;  %v3643_v53 = vmul.f32 %v7661_v25, %v3604_v28  ;;  %v3442_v24 = vpop.f32.mrb[236].mxu0  ;;  %v3078_v8 = vpop.f32.mrb[236].mxu1 }
 0x4c1   : > { %v5548_v15 = vpop.f32.mrb[237].mxu0  ;;  %v3167_v10 = vrot.slane %v3078_v8, 1  ;;  %v5434_v16 = vpop.f32.mrb[237].mxu1  ;;  %v3537_v60 = vrot.slane %v3442_v24, 2 }
 0x4c2   : > { %v3713_v49 = vmax.f32 %v3681_v30, 0.0  ;;  %v3682_v59 = vadd.f32 %v7671_v58, %v3643_v53  ;;  %v3445_v54 = vpop.f32.mrb[238].mxu0  ;;  %v3081_v46 = vpop.f32.mrb[238].mxu1 }
 0x4c3   : > { %v3538_v31 = vrot.slane %v3445_v54, 2  ;;  %v5549_v40 = vpop.f32.mrb[239].mxu0  ;;  %v3183_v11 = vsel %vm1135_vm3, %v3166_v36, %v3167_v10  ;;  %v5435_v47 = vpop.f32.mrb[239].mxu1  ;;  %v3168_v0 = vrot.slane %v3081_v46, 1 }
 0x4c4   : > { %v3754_v39 = vsel %vm494_vm2, %v3713_v49, 0.0  ;;  %v3714_v5 = vmax.f32 %v3682_v59, 0.0  ;;  %v3234_v55 = vadd.f32 %v3183_v11, %v7553_v29 }
 0x4c5   : > { %v3755_v18 = vadd.f32 %v3754_v39, %v3753_v43  ;;  %v3556_v22 = vsel %vm1508_vm4, %v3537_v60, %v3538_v31 }
 0x4c6   : > { %v3757_v38 = vsel %vm494_vm2, %v3714_v5, 0.0  ;;  %v3605_v23 = vadd.f32 %v3556_v22, %v3233_v61 }
 0x4c7   : > { %v3781_v48 = vmul.f32 0.5, %v3755_v18  ;;  %v3758_v20 = vadd.f32 %v3757_v38, %v3756_v3 }
 0x4c8   : > { %v3450_v45 = vpop.f32.mrb[240].mxu0  ;;  %v3086_v51 = vpop.f32.mrb[240].mxu1  ;;  %v3644_v14 = vmul.f32 %v7661_v25, %v3605_v23 }
 0x4c9   : > { %3797 = vst.msk [vmem:[%s7699_s25 + $0x50] sm:$0xff] %vm494_vm2, %v3781_v48  ;;  %v3782_v27 = vmul.f32 0.5, %v3758_v20  ;;  %v3539_v6 = vrot.slane %v3450_v45, 2  ;;  %v5552_v52 = vpop.f32.mrb[241].mxu0  ;;  %v3169_v29 = vrot.slane %v3086_v51, 1  ;;  %v5438_v57 = vpop.f32.mrb[241].mxu1 }
 0x4ca   : > { %v3453_v42 = vpop.f32.mrb[242].mxu0  ;;  %v3089_v35 = vpop.f32.mrb[242].mxu1 }
 0x4cb   : > { %3798 = vst.msk [vmem:[%s7699_s25 + $0x58] sm:$0xff] %vm494_vm2, %v3782_v27  ;;  %v3555_v37 = vsel %vm1508_vm4, %v3538_v31, %v3539_v6  ;;  %v5553_v13 = vpop.f32.mrb[243].mxu0  ;;  %v3182_v56 = vsel %vm1135_vm3, %v3168_v0, %v3169_v29  ;;  %v3170_v62 = vrot.slane %v3089_v35, 1  ;;  %v5439_v17 = vpop.f32.mrb[243].mxu1  ;;  %v3540_v19 = vrot.slane %v3453_v42, 2 }
 0x4cc   : > { %v3606_v32 = vadd.f32 %v3555_v37, %v3234_v55  ;;  %v3235_v41 = vadd.f32 %v3182_v56, %v7566_v2 }
 0x4cd   : > { %v3181_v44 = vsel %vm1135_vm3, %v3169_v29, %v3170_v62 }
 0x4ce   : > { %v3236_v36 = vadd.f32 %v3181_v44, %v7581_v12  ;;  %v3645_v61 = vmul.f32 %v7661_v25, %v3606_v32  ;;  %v3683_v12 = vadd.f32 %v7671_v58, %v3644_v14 }
 0x4d0   : > { %v3458_v9 = vpop.f32.mrb[244].mxu0  ;;  %v3094_v21 = vpop.f32.mrb[244].mxu1  ;;  %v3684_v54 = vadd.f32 %v7671_v58, %v3645_v61  ;;  %v3715_v46 = vmax.f32 %v3683_v12, 0.0 }
 0x4d1   : > { %v3541_v1 = vrot.slane %v3458_v9, 2  ;;  %v5556_v28 = vpop.f32.mrb[245].mxu0  ;;  %v3171_v50 = vrot.slane %v3094_v21, 1  ;;  %v5442_v30 = vpop.f32.mrb[245].mxu1 }
 0x4d2   : > { %v3461_v53 = vpop.f32.mrb[246].mxu0  ;;  %v3097_v24 = vpop.f32.mrb[246].mxu1  ;;  %v3716_v18 = vmax.f32 %v3684_v54, 0.0  ;;  %v3759_v27 = vsel %vm494_vm2, %v3715_v46, 0.0 }
 0x4d3   : > { %v3554_v2 = vsel %vm1508_vm4, %v3540_v19, %v3541_v1  ;;  %v3542_v8 = vrot.slane %v3461_v53, 2  ;;  %v5557_v15 = vpop.f32.mrb[247].mxu0  ;;  %v3172_v49 = vrot.slane %v3097_v24, 1  ;;  %v5443_v59 = vpop.f32.mrb[247].mxu1  ;;  %v5687_v24 = vld [vmem:[%s7959_s2] ss:$0 sm:$0xff] }
 0x4d4   : > { %v3607_v34 = vadd.f32 %v3554_v2, %v3235_v41  ;;  %v3762_v57 = vsel %vm494_vm2, %v3716_v18, 0.0 }
 0x4d5   : > { %v3553_v10 = vsel %vm1508_vm4, %v3541_v1, %v3542_v8  ;;  %v3180_v60 = vsel %vm1135_vm3, %v3171_v50, %v3172_v49 }
 0x4d6   : > { %v3646_v16 = vmul.f32 %v7661_v25, %v3607_v34  ;;  %v3608_v31 = vadd.f32 %v3553_v10, %v3236_v36  ;;  %v3237_v40 = vadd.f32 %v3180_v60, %v7593_v63 }
 0x4d8   : > { %v3685_v43 = vadd.f32 %v7671_v58, %v3646_v16  ;;  %v3647_v39 = vmul.f32 %v7661_v25, %v3608_v31  ;;  %v3466_v5 = vpop.f32.mrb[248].mxu0  ;;  %v3102_v11 = vpop.f32.mrb[248].mxu1 }
 0x4d9   : > { %v5560_v47 = vpop.f32.mrb[249].mxu0  ;;  %v3173_v3 = vrot.slane %v3102_v11, 1  ;;  %v5446_v23 = vpop.f32.mrb[249].mxu1  ;;  %v3543_v48 = vrot.slane %v3466_v5, 2 }
 0x4da   : > { %v3717_v55 = vmax.f32 %v3685_v43, 0.0  ;;  %v3686_v22 = vadd.f32 %v7671_v58, %v3647_v39  ;;  %v3469_v38 = vpop.f32.mrb[250].mxu0  ;;  %v3105_v63 = vpop.f32.mrb[250].mxu1 }
 0x4db   : > { %v3544_v20 = vrot.slane %v3469_v38, 2  ;;  %v5561_v45 = vpop.f32.mrb[251].mxu0  ;;  %v3179_v6 = vsel %vm1135_vm3, %v3172_v49, %v3173_v3  ;;  %v5447_v52 = vpop.f32.mrb[251].mxu1  ;;  %v3174_v44 = vrot.slane %v3105_v63, 1 }
 0x4dc   : > { %v3760_v51 = vsel %vm494_vm2, %v3717_v55, 0.0  ;;  %v3718_v25 = vmax.f32 %v3686_v22, 0.0  ;;  %v3238_v58 = vadd.f32 %v3179_v6, %v7595_v7 }
 0x4dd   : > { %v3761_v0 = vadd.f32 %v3760_v51, %v3759_v27  ;;  %v3552_v29 = vsel %vm1508_vm4, %v3543_v48, %v3544_v20 }
 0x4de   : > { %v3763_v42 = vsel %vm494_vm2, %v3718_v25, 0.0  ;;  %v3609_v37 = vadd.f32 %v3552_v29, %v3237_v40 }
 0x4df   : > { %v3783_v35 = vmul.f32 0.5, %v3761_v0  ;;  %v3764_v13 = vadd.f32 %v3763_v42, %v3762_v57 }
 0x4e0   : > { %v3474_v56 = vpop.f32.mrb[252].mxu0  ;;  %v3110_v62 = vpop.f32.mrb[252].mxu1  ;;  %v3648_v8 = vmul.f32 %v5687_v24, %v3609_v37 }
 0x4e1   : > { %3799 = vst.msk [vmem:[%s7699_s25 + $0x60] sm:$0xff] %vm494_vm2, %v3783_v35  ;;  %v3784_v32 = vmul.f32 0.5, %v3764_v13  ;;  %v3545_v17 = vrot.slane %v3474_v56, 2  ;;  %v5564_v41 = vpop.f32.mrb[253].mxu0  ;;  %v3175_v7 = vrot.slane %v3110_v62, 1  ;;  %v5450_v36 = vpop.f32.mrb[253].mxu1 }
 0x4e2   : > { %v3477_v14 = vpop.f32.mrb[254].mxu0  ;;  %v3113_v19 = vpop.f32.mrb[254].mxu1 }
 0x4e3   : > { %3800 = vst.msk [vmem:[%s7699_s25 + $0x68] sm:$0xff] %vm494_vm2, %v3784_v32  ;;  %v3551_v9 = vsel %vm1508_vm4, %v3544_v20, %v3545_v17  ;;  %v5565_v21 = vpop.f32.mrb[255].mxu0  ;;  %v3178_v1 = vsel %vm1135_vm3, %v3174_v44, %v3175_v7  ;;  %v3176_v61 = vrot.slane %v3113_v19, 1  ;;  %v5451_v50 = vpop.f32.mrb[255].mxu1  ;;  %v3546_v12 = vrot.slane %v3477_v14, 2 }
 0x4e4   : > { %v3610_v28 = vadd.f32 %v3551_v9, %v3238_v58  ;;  %v3239_v30 = vadd.f32 %v3178_v1, %v7607_v4 }
 0x4e5   : > { %v3177_v53 = vsel %vm1135_vm3, %v3175_v7, %v3176_v61 }
 0x4e6   : > { %v3240_v2 = vadd.f32 %v3177_v53, %v7616_v33  ;;  %v3649_v10 = vmul.f32 %v5687_v24, %v3610_v28  ;;  %v5688_v33 = vld [vmem:[%s7960_s3] ss:$0 sm:$0xff] }
 0x4e7   : > { %v3687_v46 = vadd.f32 %v5688_v33, %v3648_v8 }
 0x4e8   : > { %v3482_v15 = vpop.f32.mrb[0].mxu0  ;;  %v3118_v59 = vpop.f32.mrb[0].mxu1  ;;  %v3688_v11 = vadd.f32 %v5688_v33, %v3649_v10 }
 0x4e9   : > { %v3547_v34 = vrot.slane %v3482_v15, 2  ;;  %v5568_v49 = vpop.f32.mrb[1].mxu0  ;;  %v5454_v16 = vpop.f32.mrb[1].mxu1  ;;  %v3719_v55 = vmax.f32 %v3687_v46, 0.0 }
 0x4ea   : > { %v3485_v54 = vpop.f32.mrb[2].mxu0  ;;  %v3120_v40 = vpop.f32.mrb[2].mxu1  ;;  %v3720_v20 = vmax.f32 %v3688_v11, 0.0 }
 0x4eb   : > { %v3550_v4 = vsel %vm1508_vm4, %v3546_v12, %v3547_v34  ;;  %v3548_v60 = vrot.slane %v3485_v54, 2  ;;  %v5569_v31 = vpop.f32.mrb[3].mxu0  ;;  %v5455_v39 = vpop.f32.mrb[3].mxu1  ;;  %v3765_v26 = vsel %vm494_vm2, %v3719_v55, 0.0 }
 0x4ec   : > { %v3611_v43 = vadd.f32 %v3550_v4, %v3239_v30  ;;  %v3768_v57 = vsel %vm494_vm2, %v3720_v20, 0.0 }
 0x4ed   : > { %v3549_v5 = vsel %vm1508_vm4, %v3547_v34, %v3548_v60 }
 0x4ee   : > { %v3650_v47 = vmul.f32 %v5687_v24, %v3611_v43  ;;  %v3612_v18 = vadd.f32 %v3549_v5, %v3240_v2 }
 0x4f0   : > { %v3689_v22 = vadd.f32 %v5688_v33, %v3650_v47  ;;  %v3651_v3 = vmul.f32 %v5687_v24, %v3612_v18  ;;  %v3490_v38 = vpop.f32.mrb[4].mxu0  ;;  %v3124_v48 = vpop.f32.mrb[4].mxu1 }
 0x4f1   : > { %v5572_v23 = vpop.f32.mrb[5].mxu0  ;;  %v5458_v51 = vpop.f32.mrb[5].mxu1 }
 0x4f2   : > { %v3721_v45 = vmax.f32 %v3689_v22, 0.0  ;;  %v3690_v63 = vadd.f32 %v5688_v33, %v3651_v3  ;;  %v3492_v27 = vpop.f32.mrb[6].mxu0  ;;  %v3126_v6 = vpop.f32.mrb[6].mxu1 }
 0x4f3   : > { %v5573_v25 = vpop.f32.mrb[7].mxu0  ;;  %v5459_v58 = vpop.f32.mrb[7].mxu1 }
 0x4f4   : > { %v3766_v52 = vsel %vm494_vm2, %v3721_v45, 0.0  ;;  %v3722_v0 = vmax.f32 %v3690_v63, 0.0 }
 0x4f5   : > { %v3767_v29 = vadd.f32 %v3766_v52, %v3765_v26 }
 0x4f6   : > { %v3769_v42 = vsel %vm494_vm2, %v3722_v0, 0.0 }
 0x4f7   : > { %v3785_v37 = vmul.f32 0.5, %v3767_v29  ;;  %v3770_v35 = vadd.f32 %v3769_v42, %v3768_v57 }
 0x4f8   : > { %v3496_v13 = vpop.f32.mrb[8].mxu0 }
 0x4f9   : > { %3801 = vst.msk [vmem:[%s7699_s25 + $0x70] sm:$0xff] %vm494_vm2, %v3785_v37  ;;  %v3786_v56 = vmul.f32 0.5, %v3770_v35  ;;  %v5576_v32 = vpop.f32.mrb[9].mxu0 }
 0x4fa   : > { %v3498_v62 = vpop.f32.mrb[10].mxu0 }
 0x4fb   : > { %3802 = vst.msk [vmem:[%s7699_s25 + $0x78] sm:$0xff] %vm494_vm2, %v3786_v56  ;;  %v5577_v17 = vpop.f32.mrb[11].mxu0 }
 0x4fc PF: > { %s14_s17 = sadd.s32 1, %s5711_s17   ;;  %s8016_s15 = smov %s5707_s16 }
 0x4fd   : > { %p11_p5 = scmp.ge.s32.totalorder %s14_s17, 4   ;;  %s8017_s16 = smov %s8019_s18 }
 0x4ff   :  { %13 = sbr.rel (!%p11_p5) target bundleno = 2 (0x2), region = 83 }

</bundles_post_ra>
